<compile_context>
chip_gen: v7x
topology: tpu7x:2x2x1
jax: 0.10.0
libtpu: 0.0.40
codegen_flags: <defaults>
</compile_context>

<pallas_src>
import math

import numpy as np

import jax
import jax.numpy as jnp
from jax.experimental import pallas as pl
from jax.experimental.pallas import tpu as pltpu


# --------------------------------------------------------------------------- #
# Configuration (matches the PyTorch module's config usage)
# --------------------------------------------------------------------------- #
CFG = dict(
    hidden_state_size=16,
    random_noise_size=8,
    state_resolution=(16, 16),
    state_features=4,
    actions_count=3,
    action_space_dimension=2,
)

HS = CFG["hidden_state_size"]
SF = CFG["state_features"]
AUX = CFG["actions_count"] + CFG["action_space_dimension"]      # 5
H, W = CFG["state_resolution"]                                  # 16, 16
HW = H * W                                                      # 256
H2, W2 = H // 2, W // 2                                         # 8, 8
HW2 = H2 * W2                                                   # 64

# Row / column masks and the per-sample lane decomposition use power-of-two
# shifts & masks (cheap VPU bit ops).
assert (H & (H - 1)) == 0 and (W & (W - 1)) == 0, "state_resolution must be power of two"

SF_PAD = SF + ((-SF) % 8)                                       # 8
AUX_PAD = AUX + ((-AUX) % 8)                                    # 8

BN_EPS = 1e-5
LEAKY_SLOPE = 0.2

# Packed per-layer BatchNorm channel offsets, order [r0, n0, r1, n1, r2, n2].
BN_SIZES = (HS, 2 * HS, 2 * HS, HS, HS, HS)
BN_OFFSETS = tuple(sum(BN_SIZES[:i]) for i in range(len(BN_SIZES)))
BN_TOTAL = sum(BN_SIZES)                                        # 128


def _log2(n: int) -> int:
    return n.bit_length() - 1


# --------------------------------------------------------------------------- #
# In-kernel building blocks
# --------------------------------------------------------------------------- #
def _conv3x3(x, w_ref, b_ref, hs, ws):
    """3x3 / stride-1 / zero-pad-1 conv in batched flat-spatial layout.

    x:     (Cin, B*hs*ws) f32, per-sample spatial flattened row-major,
           samples concatenated along lanes, channels on sublanes.
    w_ref: (Cout, 9*Cin) bf16, columns tap-major (tap k = kh*3 + kw, then Cin).
    b_ref: (Cout, 1) f32.
    Returns (Cout, B*hs*ws) f32.

    The 9 shifted taps are built in-register with pltpu.roll along the lane
    axis; the row/column border masks both implement the zero padding and
    prevent any bleed across sample boundaries / lane wraparound.
    """
    cin, lanes = x.shape
    pos = jax.lax.broadcasted_iota(jnp.int32, (1, lanes), 1)
    col = pos & (ws - 1)                      # column within the sample image
    row = (pos >> _log2(ws)) & (hs - 1)       # row within the sample image
    not_left = col > 0
    not_right = col < ws - 1
    not_top = row > 0
    not_bot = row < hs - 1

    taps = []
    for kh in range(3):
        for kw in range(3):
            d = (kh - 1) * ws + (kw - 1)      # tap reads x[p + d]
            t = x if d == 0 else pltpu.roll(x, (-d) % lanes, 1)
            mask = None
            if kh == 0:
                mask = not_top
            elif kh == 2:
                mask = not_bot
            if kw == 0:
                mask = not_left if mask is None else jnp.logical_and(mask, not_left)
            elif kw == 2:
                mask = not_right if mask is None else jnp.logical_and(mask, not_right)
            if mask is not None:
                t = jnp.where(mask, t, 0.0)
            taps.append(t)

    # im2col matrix, sublane-aligned concat (every Cin is a multiple of 8),
    # cast once to bf16 for the MXU.
    m = jnp.concatenate(taps, axis=0).astype(jnp.bfloat16)        # (9*Cin, lanes)
    out = jnp.dot(w_ref[...], m, preferred_element_type=jnp.float32)
    return out + b_ref[...]


def _conv_lstm(x, w_ref, b_ref, hs, ws, csize):
    """ConvLSTM single step with zero initial (h, c).

    Gate conv weights have the h-input columns and the forget-gate rows
    removed (exactly zero contribution for this step); gate rows are [i, o, g]:
        c_new = sigmoid(i) * tanh(g)            (f * c_prev == 0)
        h_new = sigmoid(o) * tanh(c_new)
    """
    gates = _conv3x3(x, w_ref, b_ref, hs, ws)                     # (3*csize, lanes)
    i = jax.nn.sigmoid(gates[0:csize])
    o = jax.nn.sigmoid(gates[csize:2 * csize])
    g = jnp.tanh(gates[2 * csize:3 * csize])
    return o * jnp.tanh(i * g)


def _batchnorm(x, gamma_ref, beta_ref, layer, slope=None):
    """Training-mode BatchNorm2d over (batch * spatial) + optional LeakyReLU.

    x: (C, B*hw) f32 with batch on lanes, so the stats are one lane reduction.
    """
    off, size = BN_OFFSETS[layer], BN_SIZES[layer]
    gamma = gamma_ref[off:off + size, :]                           # (C, 1)
    beta = beta_ref[off:off + size, :]
    inv_n = 1.0 / float(x.shape[1])
    mean = x.sum(axis=1, keepdims=True) * inv_n
    var = (x * x).sum(axis=1, keepdims=True) * inv_n - mean * mean  # biased (PyTorch)
    scale = gamma * jax.lax.rsqrt(var + BN_EPS)
    shift = beta - mean * scale
    y = x * scale + shift
    if slope is not None:
        y = jnp.where(y >= 0, y, slope * y)
    return y


def _bcast_aux(aux_ref, bsz, hw):
    """Broadcast (AUX_PAD, B) per-sample constants to (AUX_PAD, B*hw) lanes."""
    lanes = bsz * hw
    pos = jax.lax.broadcasted_iota(jnp.int32, (1, lanes), 1)
    sample = pos >> _log2(hw)                    # sample index per lane
    out = jnp.broadcast_to(aux_ref[:, 0:1], (AUX_PAD, lanes))
    for b in range(1, bsz):
        out = jnp.where(sample == b, aux_ref[:, b:b + 1], out)
    return out


# --------------------------------------------------------------------------- #
# Fused forward kernel (whole network, single invocation)
# --------------------------------------------------------------------------- #
def _fused_forward_kernel(states_ref, aux_ref,
                          w_r0, b_r0, w_n0, b_n0,
                          w_r1, b_r1, w_n1, b_n1,
                          w_r2, b_r2, w_n2, b_n2,
                          gamma_ref, beta_ref, sub_ref, up_ref,
                          out_ref):
    bsz = states_ref.shape[1] // HW

    # Broadcast (actions, variations) to per-lane constants at both resolutions.
    aux16 = _bcast_aux(aux_ref, bsz, HW)                           # (8, B*256)
    aux8 = _bcast_aux(aux_ref, bsz, HW2)                           # (8, B*64)

    # --- recurrent block 0: ConvLSTM + BN                  (16x16,  HS) ------
    h = _conv_lstm(jnp.concatenate([states_ref[...], aux16], axis=0),
                   w_r0, b_r0, H, W, HS)
    x = _batchnorm(h, gamma_ref, beta_ref, 0)

    # --- non-recurrent block 0: SameBlock, stride 2        (-> 8x8, 2*HS) ----
    y = _conv3x3(jnp.concatenate([x, aux16], axis=0), w_n0, b_n0, H, W)
    y = jnp.dot(y.astype(jnp.bfloat16), sub_ref[...],
                preferred_element_type=jnp.float32)                # lane subsample
    x = _batchnorm(y, gamma_ref, beta_ref, 1, LEAKY_SLOPE)

    # --- recurrent block 1: ConvLSTM + BN                  (8x8,   2*HS) -----
    h = _conv_lstm(jnp.concatenate([x, aux8], axis=0), w_r1, b_r1, H2, W2, 2 * HS)
    x = _batchnorm(h, gamma_ref, beta_ref, 2)

    # --- non-recurrent block 1: UpBlock (conv + BN + LeakyReLU, 2x bilinear) -
    y = _conv3x3(jnp.concatenate([x, aux8], axis=0), w_n1, b_n1, H2, W2)
    y = _batchnorm(y, gamma_ref, beta_ref, 3, LEAKY_SLOPE)
    x = jnp.dot(y.astype(jnp.bfloat16), up_ref[...],
                preferred_element_type=jnp.float32)                # 2x bilinear

    # --- recurrent block 2: ConvLSTM + BN                  (16x16,  HS) ------
    h = _conv_lstm(jnp.concatenate([x, aux16], axis=0), w_r2, b_r2, H, W, HS)
    x = _batchnorm(h, gamma_ref, beta_ref, 4)

    # --- non-recurrent block 2: SameBlock, stride 1        (16x16,  HS) ------
    y = _conv3x3(jnp.concatenate([x, aux16], axis=0), w_n2, b_n2, H, W)
    x = _batchnorm(y, gamma_ref, beta_ref, 5, LEAKY_SLOPE)

    out_ref[...] = x


# --------------------------------------------------------------------------- #
# Wrapper-side parameter packing and constant matrices
# --------------------------------------------------------------------------- #
def _pack_conv(w, b):
    """(3,3,Cin,Cout), (Cout,) -> ((Cout, 9*Cin) bf16, (Cout, 1) f32).

    Columns are tap-major (kh*3+kw) then input channel: must match the im2col
    row order built by _conv3x3."""
    cin, cout = w.shape[2], w.shape[3]
    wk = jnp.transpose(w.reshape(9, cin, cout), (2, 0, 1)).reshape(cout, 9 * cin)
    return wk.astype(jnp.bfloat16), b.reshape(cout, 1).astype(jnp.float32)


def _pad_in_channels(w, cin_x):
    """Zero-pad conv input channels so the spatial block and the aux block each
    become a multiple of 8 (matching the sublane-aligned in-kernel layout)."""
    w_x, w_a = w[:, :, :cin_x, :], w[:, :, cin_x:, :]
    w_x = jnp.pad(w_x, ((0, 0), (0, 0), (0, (-cin_x) % 8), (0, 0)))
    w_a = jnp.pad(w_a, ((0, 0), (0, 0), (0, AUX_PAD - w_a.shape[2]), (0, 0)))
    return jnp.concatenate([w_x, w_a], axis=2)


def _pack_plain_conv(params, cin_x):
    w, b = params
    return _pack_conv(_pad_in_channels(w, cin_x), b)


def _pack_lstm_conv(params, cin_x, hidden):
    """ConvLSTM gate conv over [x, aux, h] -> [i, f, o, g].  For the single
    step after reinit_memory (h == c == 0), drop the h input columns and the
    forget-gate rows (exactly zero contribution).  Remaining rows: [i, o, g]."""
    w, b = params
    w = w[:, :, :cin_x + AUX, :]                                   # drop h cols
    w = jnp.concatenate([w[..., :hidden], w[..., 2 * hidden:]], axis=-1)
    b = jnp.concatenate([b[:hidden], b[2 * hidden:]], axis=0)
    return _pack_conv(_pad_in_channels(w, cin_x), b)


def pack_params(params):
    """One-time packing of all conv weights (hoisted out of the per-step forward)."""
    w_r0, b_r0 = _pack_lstm_conv(params["lstm0"], SF, HS)
    w_n0, b_n0 = _pack_plain_conv(params["same0"], HS)
    w_r1, b_r1 = _pack_lstm_conv(params["lstm1"], 2 * HS, 2 * HS)
    w_n1, b_n1 = _pack_plain_conv(params["up1"], 2 * HS)
    w_r2, b_r2 = _pack_lstm_conv(params["lstm2"], HS, HS)
    w_n2, b_n2 = _pack_plain_conv(params["same2"], HS)
    return dict(w_r0=w_r0, b_r0=b_r0, w_n0=w_n0, b_n0=b_n0,
                w_r1=w_r1, b_r1=b_r1, w_n1=w_n1, b_n1=b_n1,
                w_r2=w_r2, b_r2=b_r2, w_n2=w_n2, b_n2=b_n2,
                bn_gamma=params["bn_gamma"], bn_beta=params["bn_beta"])


def _subsample_matrix_np(hs, ws):
    """(hs*ws, hs*ws//4) 0/1 matrix selecting even rows / even columns:
    stride-2 conv output == (stride-1 conv output) @ this matrix."""
    hw, hw2 = hs * ws, (hs // 2) * (ws // 2)
    m = np.zeros((hw, hw2), np.float32)
    q = np.arange(hw2)
    sel = (q // (ws // 2)) * (2 * ws) + (q % (ws // 2)) * 2
    m[sel, q] = 1.0
    return m


def _upsample1d_np(n):
    """(2n, n) 1-D 2x bilinear (align_corners=False) interpolation weights."""
    u = np.zeros((2 * n, n), np.float32)
    i = np.arange(n)
    u[2 * i, i] += 0.75
    u[2 * i, np.clip(i - 1, 0, n - 1)] += 0.25
    u[2 * i + 1, i] += 0.75
    u[2 * i + 1, np.clip(i + 1, 0, n - 1)] += 0.25
    return u


def _upsample_matrix_np(hs, ws):
    """(hs*ws, 4*hs*ws): x_flat @ M == flat(2x bilinear upsample of x)."""
    uh, uw = _upsample1d_np(hs), _upsample1d_np(ws)
    m = np.einsum("oh,pw->hwop", uh, uw)           # [h_in, w_in, h_out, w_out]
    return m.reshape(hs * ws, 4 * hs * ws)


# --------------------------------------------------------------------------- #
# Parameter init (deterministic, synthetic; PyTorch-style conv init)
# --------------------------------------------------------------------------- #
def init_conv(key, cin, cout, k=3):
    kw, kb = jax.random.split(key)
    bound = 1.0 / math.sqrt(cin * k * k)
    w = jax.random.uniform(kw, (k, k, cin, cout), jnp.float32, -bound, bound)
    b = jax.random.uniform(kb, (cout,), jnp.float32, -bound, bound)
    return w, b


def init_params(key):
    keys = jax.random.split(key, 6)
    p = {}
    # ConvLSTM gate convs: in = (layer_in + layer_out), out = 4 * layer_out
    p["lstm0"] = init_conv(keys[0], (SF + AUX) + HS, 4 * HS)
    p["lstm1"] = init_conv(keys[1], (2 * HS + AUX) + 2 * HS, 4 * 2 * HS)
    p["lstm2"] = init_conv(keys[2], (HS + AUX) + HS, 4 * HS)
    # Non-recurrent conv blocks
    p["same0"] = init_conv(keys[3], HS + AUX, 2 * HS)
    p["up1"] = init_conv(keys[4], 2 * HS + AUX, HS)
    p["same2"] = init_conv(keys[5], HS + AUX, HS)
    # BatchNorm affine params, packed [r0, n0, r1, n1, r2, n2]
    # (PyTorch default init: weight = 1, bias = 0)
    p["bn_gamma"] = jnp.ones((BN_TOTAL, 1), jnp.float32)
    p["bn_beta"] = jnp.zeros((BN_TOTAL, 1), jnp.float32)
    return p


# --------------------------------------------------------------------------- #
# Forward pass (matches ConvDynamicsNetwork.forward after reinit_memory)
# --------------------------------------------------------------------------- #
@jax.jit
def forward(packed, states_nchw, actions, variations, random_noise_nchw):
    del random_noise_nchw        # unused by the reference forward (see TODO above)
    bsz = states_nchw.shape[0]
    lanes = bsz * HW

    # NCHW -> (C, B*H*W): channels on sublanes, batch+flat-spatial on lanes.
    states = states_nchw.astype(jnp.float32).reshape(bsz, SF, HW)
    states = jnp.transpose(states, (1, 0, 2)).reshape(SF, lanes)
    states = jnp.pad(states, ((0, SF_PAD - SF), (0, 0)))

    aux = jnp.concatenate([actions, variations], axis=1).astype(jnp.float32)
    aux = jnp.pad(aux, ((0, 0), (0, AUX_PAD - AUX)))
    aux = jnp.transpose(aux, (1, 0))                               # (AUX_PAD, B)

    # Block-diagonal (per-sample) subsample / upsample maps, exact in bf16.
    # Built from numpy constants at trace time -> baked into the program.
    eye = np.eye(bsz, dtype=np.float32)
    sub_bd = jnp.asarray(np.kron(eye, _subsample_matrix_np(H, W)),
                         dtype=jnp.bfloat16)                       # (B*256, B*64)
    up_bd = jnp.asarray(np.kron(eye, _upsample_matrix_np(H2, W2)),
                        dtype=jnp.bfloat16)                        # (B*64, B*256)

    args = (states, aux,
            packed["w_r0"], packed["b_r0"], packed["w_n0"], packed["b_n0"],
            packed["w_r1"], packed["b_r1"], packed["w_n1"], packed["b_n1"],
            packed["w_r2"], packed["b_r2"], packed["w_n2"], packed["b_n2"],
            packed["bn_gamma"], packed["bn_beta"], sub_bd, up_bd)

    out_bytes = HS * lanes * 4
    in_bytes = sum(int(np.prod(a.shape)) * a.dtype.itemsize for a in args)
    cost = pl.CostEstimate(
        flops=int(21e6 * bsz + 3.2e6 * bsz * bsz),
        transcendentals=int(41e3 * bsz),
        bytes_accessed=int(in_bytes + out_bytes))

    vmem = lambda: pl.BlockSpec(memory_space=pltpu.MemorySpace.VMEM)

    out_flat = pl.pallas_call(
        _fused_forward_kernel,
        out_shape=jax.ShapeDtypeStruct((HS, lanes), jnp.float32),
        in_specs=[vmem() for _ in args],
        out_specs=vmem(),
        cost_estimate=cost,
    )(*args)

    # (HS, B*H*W) -> NCHW
    out = out_flat.reshape(HS, bsz, H, W)
    return jnp.transpose(out, (1, 0, 2, 3))


# --------------------------------------------------------------------------- #
if __name__ == "__main__":
    key = jax.random.PRNGKey(0)
    k_params, k_s, k_a, k_v, k_n = jax.random.split(key, 5)

    B = 2
    states = jax.random.normal(k_s, (B, SF, H, W), jnp.float32)
    actions = jax.nn.softmax(
        jax.random.normal(k_a, (B, CFG["actions_count"]), jnp.float32), axis=-1)
    variations = jax.random.normal(
        k_v, (B, CFG["action_space_dimension"]), jnp.float32)
    random_noise = jax.random.normal(
        k_n, (B, CFG["random_noise_size"], H, W), jnp.float32)

    params = init_params(k_params)
    packed = pack_params(params)           # one-time packing, outside the step

    out = forward(packed, states, actions, variations, random_noise)
    out = jax.block_until_ready(out)

    assert out.shape == (B, HS, H, W), out.shape
    assert bool(jnp.all(jnp.isfinite(out)))
    print("KERNEL_OK")
</pallas_src>

<mosaic_0001>
module attributes {stable_mosaic.version = 11 : i64} {
  func.func @_fused_forward_kernel(%arg0: memref<8x512xf32, #tpu.memory_space<vmem>>, %arg1: memref<8x2xf32, #tpu.memory_space<vmem>>, %arg2: memref<48x144xbf16, #tpu.memory_space<vmem>>, %arg3: memref<48x1xf32, #tpu.memory_space<vmem>>, %arg4: memref<32x216xbf16, #tpu.memory_space<vmem>>, %arg5: memref<32x1xf32, #tpu.memory_space<vmem>>, %arg6: memref<96x360xbf16, #tpu.memory_space<vmem>>, %arg7: memref<96x1xf32, #tpu.memory_space<vmem>>, %arg8: memref<16x360xbf16, #tpu.memory_space<vmem>>, %arg9: memref<16x1xf32, #tpu.memory_space<vmem>>, %arg10: memref<48x216xbf16, #tpu.memory_space<vmem>>, %arg11: memref<48x1xf32, #tpu.memory_space<vmem>>, %arg12: memref<16x216xbf16, #tpu.memory_space<vmem>>, %arg13: memref<16x1xf32, #tpu.memory_space<vmem>>, %arg14: memref<128x1xf32, #tpu.memory_space<vmem>>, %arg15: memref<128x1xf32, #tpu.memory_space<vmem>>, %arg16: memref<512x128xbf16, #tpu.memory_space<vmem>>, %arg17: memref<128x512xbf16, #tpu.memory_space<vmem>>, %arg18: memref<16x512xf32, #tpu.memory_space<vmem>>) attributes {dimension_semantics = [], scalar_prefetch = 0 : i64, scratch_operands = 0 : i64, tpu.core_type = #tpu.core_type<tc>} {
    %0 = tpu.iota {dimensions = array<i32: 1>} : vector<1x512xi32>
    %c8_i32 = arith.constant 8 : i32
    %1 = vector.broadcast %c8_i32 : i32 to vector<1x512xi32>
    %2 = arith.shrsi %0, %1 : vector<1x512xi32>
    %c0 = arith.constant 0 : index
    %c0_0 = arith.constant 0 : index
    %3 = vector.load %arg1[%c0, %c0_0] : memref<8x2xf32, #tpu.memory_space<vmem>>, vector<8x1xf32>
    %4 = vector.shape_cast %3 : vector<8x1xf32> to vector<8x1xf32>
    %5 = vector.broadcast %4 : vector<8x1xf32> to vector<8x512xf32>
    %c1_i32 = arith.constant 1 : i32
    %6 = vector.broadcast %c1_i32 : i32 to vector<1x512xi32>
    %7 = arith.cmpi eq, %2, %6 : vector<1x512xi32>
    %c0_1 = arith.constant 0 : index
    %c1 = arith.constant 1 : index
    %8 = vector.load %arg1[%c0_1, %c1] : memref<8x2xf32, #tpu.memory_space<vmem>>, vector<8x1xf32>
    %9 = vector.shape_cast %7 : vector<1x512xi1> to vector<1x512xi1>
    %10 = vector.broadcast %9 : vector<1x512xi1> to vector<8x512xi1>
    %11 = vector.shape_cast %8 : vector<8x1xf32> to vector<8x1xf32>
    %12 = vector.broadcast %11 : vector<8x1xf32> to vector<8x512xf32>
    %13 = arith.select %10, %12, %5 : vector<8x512xi1>, vector<8x512xf32>
    %14 = tpu.iota {dimensions = array<i32: 1>} : vector<1x128xi32>
    %c6_i32 = arith.constant 6 : i32
    %15 = vector.broadcast %c6_i32 : i32 to vector<1x128xi32>
    %16 = arith.shrsi %14, %15 : vector<1x128xi32>
    %c0_2 = arith.constant 0 : index
    %c0_3 = arith.constant 0 : index
    %17 = vector.load %arg1[%c0_2, %c0_3] : memref<8x2xf32, #tpu.memory_space<vmem>>, vector<8x1xf32>
    %18 = vector.shape_cast %17 : vector<8x1xf32> to vector<8x1xf32>
    %19 = vector.broadcast %18 : vector<8x1xf32> to vector<8x128xf32>
    %c1_i32_4 = arith.constant 1 : i32
    %20 = vector.broadcast %c1_i32_4 : i32 to vector<1x128xi32>
    %21 = arith.cmpi eq, %16, %20 : vector<1x128xi32>
    %c0_5 = arith.constant 0 : index
    %c1_6 = arith.constant 1 : index
    %22 = vector.load %arg1[%c0_5, %c1_6] : memref<8x2xf32, #tpu.memory_space<vmem>>, vector<8x1xf32>
    %23 = vector.shape_cast %21 : vector<1x128xi1> to vector<1x128xi1>
    %24 = vector.broadcast %23 : vector<1x128xi1> to vector<8x128xi1>
    %25 = vector.shape_cast %22 : vector<8x1xf32> to vector<8x1xf32>
    %26 = vector.broadcast %25 : vector<8x1xf32> to vector<8x128xf32>
    %27 = arith.select %24, %26, %19 : vector<8x128xi1>, vector<8x128xf32>
    %c0_7 = arith.constant 0 : index
    %c0_8 = arith.constant 0 : index
    %28 = vector.load %arg0[%c0_7, %c0_8] : memref<8x512xf32, #tpu.memory_space<vmem>>, vector<8x512xf32>
    %29 = tpu.concatenate %28, %13 in 0 : vector<8x512xf32>, vector<8x512xf32> -> vector<16x512xf32>
    %30 = tpu.iota {dimensions = array<i32: 1>} : vector<1x512xi32>
    %c15_i32 = arith.constant 15 : i32
    %31 = vector.broadcast %c15_i32 : i32 to vector<1x512xi32>
    %32 = arith.andi %30, %31 : vector<1x512xi32>
    %c4_i32 = arith.constant 4 : i32
    %33 = vector.broadcast %c4_i32 : i32 to vector<1x512xi32>
    %34 = arith.shrsi %30, %33 : vector<1x512xi32>
    %c15_i32_9 = arith.constant 15 : i32
    %35 = vector.broadcast %c15_i32_9 : i32 to vector<1x512xi32>
    %36 = arith.andi %34, %35 : vector<1x512xi32>
    %c0_i32 = arith.constant 0 : i32
    %37 = vector.broadcast %c0_i32 : i32 to vector<1x512xi32>
    %38 = arith.cmpi sgt, %32, %37 : vector<1x512xi32>
    %c15_i32_10 = arith.constant 15 : i32
    %39 = vector.broadcast %c15_i32_10 : i32 to vector<1x512xi32>
    %40 = arith.cmpi slt, %32, %39 : vector<1x512xi32>
    %c0_i32_11 = arith.constant 0 : i32
    %41 = vector.broadcast %c0_i32_11 : i32 to vector<1x512xi32>
    %42 = arith.cmpi sgt, %36, %41 : vector<1x512xi32>
    %c15_i32_12 = arith.constant 15 : i32
    %43 = vector.broadcast %c15_i32_12 : i32 to vector<1x512xi32>
    %44 = arith.cmpi slt, %36, %43 : vector<1x512xi32>
    %c17_i32 = arith.constant 17 : i32
    %45 = tpu.dynamic_rotate %29 by %c17_i32 dim 1 : vector<16x512xf32>, i32 -> vector<16x512xf32>
    %46 = arith.andi %42, %38 : vector<1x512xi1>
    %cst = arith.constant 0.000000e+00 : f32
    %47 = vector.shape_cast %46 : vector<1x512xi1> to vector<1x512xi1>
    %48 = vector.broadcast %47 : vector<1x512xi1> to vector<16x512xi1>
    %49 = vector.broadcast %cst : f32 to vector<16x512xf32>
    %50 = arith.select %48, %45, %49 : vector<16x512xi1>, vector<16x512xf32>
    %c16_i32 = arith.constant 16 : i32
    %51 = tpu.dynamic_rotate %29 by %c16_i32 dim 1 : vector<16x512xf32>, i32 -> vector<16x512xf32>
    %cst_13 = arith.constant 0.000000e+00 : f32
    %52 = vector.shape_cast %42 : vector<1x512xi1> to vector<1x512xi1>
    %53 = vector.broadcast %52 : vector<1x512xi1> to vector<16x512xi1>
    %54 = vector.broadcast %cst_13 : f32 to vector<16x512xf32>
    %55 = arith.select %53, %51, %54 : vector<16x512xi1>, vector<16x512xf32>
    %c15_i32_14 = arith.constant 15 : i32
    %56 = tpu.dynamic_rotate %29 by %c15_i32_14 dim 1 : vector<16x512xf32>, i32 -> vector<16x512xf32>
    %57 = arith.andi %42, %40 : vector<1x512xi1>
    %cst_15 = arith.constant 0.000000e+00 : f32
    %58 = vector.shape_cast %57 : vector<1x512xi1> to vector<1x512xi1>
    %59 = vector.broadcast %58 : vector<1x512xi1> to vector<16x512xi1>
    %60 = vector.broadcast %cst_15 : f32 to vector<16x512xf32>
    %61 = arith.select %59, %56, %60 : vector<16x512xi1>, vector<16x512xf32>
    %c1_i32_16 = arith.constant 1 : i32
    %62 = tpu.dynamic_rotate %29 by %c1_i32_16 dim 1 : vector<16x512xf32>, i32 -> vector<16x512xf32>
    %cst_17 = arith.constant 0.000000e+00 : f32
    %63 = vector.shape_cast %38 : vector<1x512xi1> to vector<1x512xi1>
    %64 = vector.broadcast %63 : vector<1x512xi1> to vector<16x512xi1>
    %65 = vector.broadcast %cst_17 : f32 to vector<16x512xf32>
    %66 = arith.select %64, %62, %65 : vector<16x512xi1>, vector<16x512xf32>
    %c511_i32 = arith.constant 511 : i32
    %67 = tpu.dynamic_rotate %29 by %c511_i32 dim 1 : vector<16x512xf32>, i32 -> vector<16x512xf32>
    %cst_18 = arith.constant 0.000000e+00 : f32
    %68 = vector.shape_cast %40 : vector<1x512xi1> to vector<1x512xi1>
    %69 = vector.broadcast %68 : vector<1x512xi1> to vector<16x512xi1>
    %70 = vector.broadcast %cst_18 : f32 to vector<16x512xf32>
    %71 = arith.select %69, %67, %70 : vector<16x512xi1>, vector<16x512xf32>
    %c497_i32 = arith.constant 497 : i32
    %72 = tpu.dynamic_rotate %29 by %c497_i32 dim 1 : vector<16x512xf32>, i32 -> vector<16x512xf32>
    %73 = arith.andi %44, %38 : vector<1x512xi1>
    %cst_19 = arith.constant 0.000000e+00 : f32
    %74 = vector.shape_cast %73 : vector<1x512xi1> to vector<1x512xi1>
    %75 = vector.broadcast %74 : vector<1x512xi1> to vector<16x512xi1>
    %76 = vector.broadcast %cst_19 : f32 to vector<16x512xf32>
    %77 = arith.select %75, %72, %76 : vector<16x512xi1>, vector<16x512xf32>
    %c496_i32 = arith.constant 496 : i32
    %78 = tpu.dynamic_rotate %29 by %c496_i32 dim 1 : vector<16x512xf32>, i32 -> vector<16x512xf32>
    %cst_20 = arith.constant 0.000000e+00 : f32
    %79 = vector.shape_cast %44 : vector<1x512xi1> to vector<1x512xi1>
    %80 = vector.broadcast %79 : vector<1x512xi1> to vector<16x512xi1>
    %81 = vector.broadcast %cst_20 : f32 to vector<16x512xf32>
    %82 = arith.select %80, %78, %81 : vector<16x512xi1>, vector<16x512xf32>
    %c495_i32 = arith.constant 495 : i32
    %83 = tpu.dynamic_rotate %29 by %c495_i32 dim 1 : vector<16x512xf32>, i32 -> vector<16x512xf32>
    %84 = arith.andi %44, %40 : vector<1x512xi1>
    %cst_21 = arith.constant 0.000000e+00 : f32
    %85 = vector.shape_cast %84 : vector<1x512xi1> to vector<1x512xi1>
    %86 = vector.broadcast %85 : vector<1x512xi1> to vector<16x512xi1>
    %87 = vector.broadcast %cst_21 : f32 to vector<16x512xf32>
    %88 = arith.select %86, %83, %87 : vector<16x512xi1>, vector<16x512xf32>
    %89 = tpu.concatenate %50, %55, %61, %66, %29, %71, %77, %82, %88 in 0 : vector<16x512xf32>, vector<16x512xf32>, vector<16x512xf32>, vector<16x512xf32>, vector<16x512xf32>, vector<16x512xf32>, vector<16x512xf32>, vector<16x512xf32>, vector<16x512xf32> -> vector<144x512xf32>
    %90 = arith.truncf %89 : vector<144x512xf32> to vector<144x512xbf16>
    %c0_22 = arith.constant 0 : index
    %c0_23 = arith.constant 0 : index
    %91 = vector.load %arg2[%c0_22, %c0_23] : memref<48x144xbf16, #tpu.memory_space<vmem>>, vector<48x144xbf16>
    %cst_24 = arith.constant dense<0.000000e+00> : vector<48x512xf32>
    %92 = tpu.matmul %91, %90, %cst_24 {dimension_numbers = #tpu.dot_dimension_numbers<[1], [0], [0], [1], [0, 0, 1, 1], [], []>} : vector<48x144xbf16>, vector<144x512xbf16>, vector<48x512xf32> -> vector<48x512xf32>
    %c0_25 = arith.constant 0 : index
    %c0_26 = arith.constant 0 : index
    %93 = vector.load %arg3[%c0_25, %c0_26] : memref<48x1xf32, #tpu.memory_space<vmem>>, vector<48x1xf32>
    %94 = vector.broadcast %93 : vector<48x1xf32> to vector<48x512xf32>
    %95 = arith.addf %92, %94 : vector<48x512xf32>
    %96 = vector.extract_strided_slice %95 {offsets = [0, 0], sizes = [16, 512], strides = [1, 1]} : vector<48x512xf32> to vector<16x512xf32>
    %97 = arith.negf %96 : vector<16x512xf32>
    %98 = math.exp %97 : vector<16x512xf32>
    %cst_27 = arith.constant 1.000000e+00 : f32
    %99 = vector.broadcast %cst_27 : f32 to vector<16x512xf32>
    %100 = arith.addf %99, %98 : vector<16x512xf32>
    %101 = arith.divf %99, %100 : vector<16x512xf32>
    %102 = vector.extract_strided_slice %95 {offsets = [16, 0], sizes = [16, 512], strides = [1, 1]} : vector<48x512xf32> to vector<16x512xf32>
    %103 = arith.negf %102 : vector<16x512xf32>
    %104 = math.exp %103 : vector<16x512xf32>
    %cst_28 = arith.constant 1.000000e+00 : f32
    %105 = vector.broadcast %cst_28 : f32 to vector<16x512xf32>
    %106 = arith.addf %105, %104 : vector<16x512xf32>
    %107 = arith.divf %105, %106 : vector<16x512xf32>
    %108 = vector.extract_strided_slice %95 {offsets = [32, 0], sizes = [16, 512], strides = [1, 1]} : vector<48x512xf32> to vector<16x512xf32>
    %109 = math.tanh %108 : vector<16x512xf32>
    %110 = arith.mulf %101, %109 : vector<16x512xf32>
    %111 = math.tanh %110 : vector<16x512xf32>
    %112 = arith.mulf %107, %111 : vector<16x512xf32>
    %c0_29 = arith.constant 0 : index
    %c0_30 = arith.constant 0 : index
    %113 = vector.load %arg14[%c0_29, %c0_30] : memref<128x1xf32, #tpu.memory_space<vmem>>, vector<16x1xf32>
    %c0_31 = arith.constant 0 : index
    %c0_32 = arith.constant 0 : index
    %114 = vector.load %arg15[%c0_31, %c0_32] : memref<128x1xf32, #tpu.memory_space<vmem>>, vector<16x1xf32>
    %cst_33 = arith.constant dense<0.000000e+00> : vector<16xf32>
    %115 = vector.multi_reduction <add>, %112, %cst_33 [1] : vector<16x512xf32> to vector<16xf32>
    %116 = vector.shape_cast %115 : vector<16xf32> to vector<16x1xf32>
    %cst_34 = arith.constant 0.001953125 : f32
    %117 = vector.broadcast %cst_34 : f32 to vector<16x1xf32>
    %118 = arith.mulf %116, %117 : vector<16x1xf32>
    %119 = arith.mulf %112, %112 : vector<16x512xf32>
    %cst_35 = arith.constant dense<0.000000e+00> : vector<16xf32>
    %120 = vector.multi_reduction <add>, %119, %cst_35 [1] : vector<16x512xf32> to vector<16xf32>
    %121 = vector.shape_cast %120 : vector<16xf32> to vector<16x1xf32>
    %cst_36 = arith.constant 0.001953125 : f32
    %122 = vector.broadcast %cst_36 : f32 to vector<16x1xf32>
    %123 = arith.mulf %121, %122 : vector<16x1xf32>
    %124 = arith.mulf %118, %118 : vector<16x1xf32>
    %125 = arith.subf %123, %124 : vector<16x1xf32>
    %cst_37 = arith.constant 9.99999974E-6 : f32
    %126 = vector.broadcast %cst_37 : f32 to vector<16x1xf32>
    %127 = arith.addf %125, %126 : vector<16x1xf32>
    %128 = math.rsqrt %127 : vector<16x1xf32>
    %129 = arith.mulf %113, %128 : vector<16x1xf32>
    %130 = arith.mulf %118, %129 : vector<16x1xf32>
    %131 = arith.subf %114, %130 : vector<16x1xf32>
    %132 = vector.broadcast %129 : vector<16x1xf32> to vector<16x512xf32>
    %133 = arith.mulf %112, %132 : vector<16x512xf32>
    %134 = vector.broadcast %131 : vector<16x1xf32> to vector<16x512xf32>
    %135 = arith.addf %133, %134 : vector<16x512xf32>
    %136 = tpu.concatenate %135, %13 in 0 : vector<16x512xf32>, vector<8x512xf32> -> vector<24x512xf32>
    %137 = tpu.iota {dimensions = array<i32: 1>} : vector<1x512xi32>
    %c15_i32_38 = arith.constant 15 : i32
    %138 = vector.broadcast %c15_i32_38 : i32 to vector<1x512xi32>
    %139 = arith.andi %137, %138 : vector<1x512xi32>
    %c4_i32_39 = arith.constant 4 : i32
    %140 = vector.broadcast %c4_i32_39 : i32 to vector<1x512xi32>
    %141 = arith.shrsi %137, %140 : vector<1x512xi32>
    %c15_i32_40 = arith.constant 15 : i32
    %142 = vector.broadcast %c15_i32_40 : i32 to vector<1x512xi32>
    %143 = arith.andi %141, %142 : vector<1x512xi32>
    %c0_i32_41 = arith.constant 0 : i32
    %144 = vector.broadcast %c0_i32_41 : i32 to vector<1x512xi32>
    %145 = arith.cmpi sgt, %139, %144 : vector<1x512xi32>
    %c15_i32_42 = arith.constant 15 : i32
    %146 = vector.broadcast %c15_i32_42 : i32 to vector<1x512xi32>
    %147 = arith.cmpi slt, %139, %146 : vector<1x512xi32>
    %c0_i32_43 = arith.constant 0 : i32
    %148 = vector.broadcast %c0_i32_43 : i32 to vector<1x512xi32>
    %149 = arith.cmpi sgt, %143, %148 : vector<1x512xi32>
    %c15_i32_44 = arith.constant 15 : i32
    %150 = vector.broadcast %c15_i32_44 : i32 to vector<1x512xi32>
    %151 = arith.cmpi slt, %143, %150 : vector<1x512xi32>
    %c17_i32_45 = arith.constant 17 : i32
    %152 = tpu.dynamic_rotate %136 by %c17_i32_45 dim 1 : vector<24x512xf32>, i32 -> vector<24x512xf32>
    %153 = arith.andi %149, %145 : vector<1x512xi1>
    %cst_46 = arith.constant 0.000000e+00 : f32
    %154 = vector.shape_cast %153 : vector<1x512xi1> to vector<1x512xi1>
    %155 = vector.broadcast %154 : vector<1x512xi1> to vector<24x512xi1>
    %156 = vector.broadcast %cst_46 : f32 to vector<24x512xf32>
    %157 = arith.select %155, %152, %156 : vector<24x512xi1>, vector<24x512xf32>
    %c16_i32_47 = arith.constant 16 : i32
    %158 = tpu.dynamic_rotate %136 by %c16_i32_47 dim 1 : vector<24x512xf32>, i32 -> vector<24x512xf32>
    %cst_48 = arith.constant 0.000000e+00 : f32
    %159 = vector.shape_cast %149 : vector<1x512xi1> to vector<1x512xi1>
    %160 = vector.broadcast %159 : vector<1x512xi1> to vector<24x512xi1>
    %161 = vector.broadcast %cst_48 : f32 to vector<24x512xf32>
    %162 = arith.select %160, %158, %161 : vector<24x512xi1>, vector<24x512xf32>
    %c15_i32_49 = arith.constant 15 : i32
    %163 = tpu.dynamic_rotate %136 by %c15_i32_49 dim 1 : vector<24x512xf32>, i32 -> vector<24x512xf32>
    %164 = arith.andi %149, %147 : vector<1x512xi1>
    %cst_50 = arith.constant 0.000000e+00 : f32
    %165 = vector.shape_cast %164 : vector<1x512xi1> to vector<1x512xi1>
    %166 = vector.broadcast %165 : vector<1x512xi1> to vector<24x512xi1>
    %167 = vector.broadcast %cst_50 : f32 to vector<24x512xf32>
    %168 = arith.select %166, %163, %167 : vector<24x512xi1>, vector<24x512xf32>
    %c1_i32_51 = arith.constant 1 : i32
    %169 = tpu.dynamic_rotate %136 by %c1_i32_51 dim 1 : vector<24x512xf32>, i32 -> vector<24x512xf32>
    %cst_52 = arith.constant 0.000000e+00 : f32
    %170 = vector.shape_cast %145 : vector<1x512xi1> to vector<1x512xi1>
    %171 = vector.broadcast %170 : vector<1x512xi1> to vector<24x512xi1>
    %172 = vector.broadcast %cst_52 : f32 to vector<24x512xf32>
    %173 = arith.select %171, %169, %172 : vector<24x512xi1>, vector<24x512xf32>
    %c511_i32_53 = arith.constant 511 : i32
    %174 = tpu.dynamic_rotate %136 by %c511_i32_53 dim 1 : vector<24x512xf32>, i32 -> vector<24x512xf32>
    %cst_54 = arith.constant 0.000000e+00 : f32
    %175 = vector.shape_cast %147 : vector<1x512xi1> to vector<1x512xi1>
    %176 = vector.broadcast %175 : vector<1x512xi1> to vector<24x512xi1>
    %177 = vector.broadcast %cst_54 : f32 to vector<24x512xf32>
    %178 = arith.select %176, %174, %177 : vector<24x512xi1>, vector<24x512xf32>
    %c497_i32_55 = arith.constant 497 : i32
    %179 = tpu.dynamic_rotate %136 by %c497_i32_55 dim 1 : vector<24x512xf32>, i32 -> vector<24x512xf32>
    %180 = arith.andi %151, %145 : vector<1x512xi1>
    %cst_56 = arith.constant 0.000000e+00 : f32
    %181 = vector.shape_cast %180 : vector<1x512xi1> to vector<1x512xi1>
    %182 = vector.broadcast %181 : vector<1x512xi1> to vector<24x512xi1>
    %183 = vector.broadcast %cst_56 : f32 to vector<24x512xf32>
    %184 = arith.select %182, %179, %183 : vector<24x512xi1>, vector<24x512xf32>
    %c496_i32_57 = arith.constant 496 : i32
    %185 = tpu.dynamic_rotate %136 by %c496_i32_57 dim 1 : vector<24x512xf32>, i32 -> vector<24x512xf32>
    %cst_58 = arith.constant 0.000000e+00 : f32
    %186 = vector.shape_cast %151 : vector<1x512xi1> to vector<1x512xi1>
    %187 = vector.broadcast %186 : vector<1x512xi1> to vector<24x512xi1>
    %188 = vector.broadcast %cst_58 : f32 to vector<24x512xf32>
    %189 = arith.select %187, %185, %188 : vector<24x512xi1>, vector<24x512xf32>
    %c495_i32_59 = arith.constant 495 : i32
    %190 = tpu.dynamic_rotate %136 by %c495_i32_59 dim 1 : vector<24x512xf32>, i32 -> vector<24x512xf32>
    %191 = arith.andi %151, %147 : vector<1x512xi1>
    %cst_60 = arith.constant 0.000000e+00 : f32
    %192 = vector.shape_cast %191 : vector<1x512xi1> to vector<1x512xi1>
    %193 = vector.broadcast %192 : vector<1x512xi1> to vector<24x512xi1>
    %194 = vector.broadcast %cst_60 : f32 to vector<24x512xf32>
    %195 = arith.select %193, %190, %194 : vector<24x512xi1>, vector<24x512xf32>
    %196 = tpu.concatenate %157, %162, %168, %173, %136, %178, %184, %189, %195 in 0 : vector<24x512xf32>, vector<24x512xf32>, vector<24x512xf32>, vector<24x512xf32>, vector<24x512xf32>, vector<24x512xf32>, vector<24x512xf32>, vector<24x512xf32>, vector<24x512xf32> -> vector<216x512xf32>
    %197 = arith.truncf %196 : vector<216x512xf32> to vector<216x512xbf16>
    %c0_61 = arith.constant 0 : index
    %c0_62 = arith.constant 0 : index
    %198 = vector.load %arg4[%c0_61, %c0_62] : memref<32x216xbf16, #tpu.memory_space<vmem>>, vector<32x216xbf16>
    %cst_63 = arith.constant dense<0.000000e+00> : vector<32x512xf32>
    %199 = tpu.matmul %198, %197, %cst_63 {dimension_numbers = #tpu.dot_dimension_numbers<[1], [0], [0], [1], [0, 0, 1, 1], [], []>} : vector<32x216xbf16>, vector<216x512xbf16>, vector<32x512xf32> -> vector<32x512xf32>
    %c0_64 = arith.constant 0 : index
    %c0_65 = arith.constant 0 : index
    %200 = vector.load %arg5[%c0_64, %c0_65] : memref<32x1xf32, #tpu.memory_space<vmem>>, vector<32x1xf32>
    %201 = vector.broadcast %200 : vector<32x1xf32> to vector<32x512xf32>
    %202 = arith.addf %199, %201 : vector<32x512xf32>
    %203 = arith.truncf %202 : vector<32x512xf32> to vector<32x512xbf16>
    %c0_66 = arith.constant 0 : index
    %c0_67 = arith.constant 0 : index
    %204 = vector.load %arg16[%c0_66, %c0_67] : memref<512x128xbf16, #tpu.memory_space<vmem>>, vector<512x128xbf16>
    %cst_68 = arith.constant dense<0.000000e+00> : vector<32x128xf32>
    %205 = tpu.matmul %203, %204, %cst_68 {dimension_numbers = #tpu.dot_dimension_numbers<[1], [0], [0], [1], [0, 0, 1, 1], [], []>} : vector<32x512xbf16>, vector<512x128xbf16>, vector<32x128xf32> -> vector<32x128xf32>
    %c16 = arith.constant 16 : index
    %c0_69 = arith.constant 0 : index
    %206 = vector.load %arg14[%c16, %c0_69] : memref<128x1xf32, #tpu.memory_space<vmem>>, vector<32x1xf32>
    %c16_70 = arith.constant 16 : index
    %c0_71 = arith.constant 0 : index
    %207 = vector.load %arg15[%c16_70, %c0_71] : memref<128x1xf32, #tpu.memory_space<vmem>>, vector<32x1xf32>
    %cst_72 = arith.constant dense<0.000000e+00> : vector<32xf32>
    %208 = vector.multi_reduction <add>, %205, %cst_72 [1] : vector<32x128xf32> to vector<32xf32>
    %209 = vector.shape_cast %208 : vector<32xf32> to vector<32x1xf32>
    %cst_73 = arith.constant 7.812500e-03 : f32
    %210 = vector.broadcast %cst_73 : f32 to vector<32x1xf32>
    %211 = arith.mulf %209, %210 : vector<32x1xf32>
    %212 = arith.mulf %205, %205 : vector<32x128xf32>
    %cst_74 = arith.constant dense<0.000000e+00> : vector<32xf32>
    %213 = vector.multi_reduction <add>, %212, %cst_74 [1] : vector<32x128xf32> to vector<32xf32>
    %214 = vector.shape_cast %213 : vector<32xf32> to vector<32x1xf32>
    %cst_75 = arith.constant 7.812500e-03 : f32
    %215 = vector.broadcast %cst_75 : f32 to vector<32x1xf32>
    %216 = arith.mulf %214, %215 : vector<32x1xf32>
    %217 = arith.mulf %211, %211 : vector<32x1xf32>
    %218 = arith.subf %216, %217 : vector<32x1xf32>
    %cst_76 = arith.constant 9.99999974E-6 : f32
    %219 = vector.broadcast %cst_76 : f32 to vector<32x1xf32>
    %220 = arith.addf %218, %219 : vector<32x1xf32>
    %221 = math.rsqrt %220 : vector<32x1xf32>
    %222 = arith.mulf %206, %221 : vector<32x1xf32>
    %223 = arith.mulf %211, %222 : vector<32x1xf32>
    %224 = arith.subf %207, %223 : vector<32x1xf32>
    %225 = vector.broadcast %222 : vector<32x1xf32> to vector<32x128xf32>
    %226 = arith.mulf %205, %225 : vector<32x128xf32>
    %227 = vector.broadcast %224 : vector<32x1xf32> to vector<32x128xf32>
    %228 = arith.addf %226, %227 : vector<32x128xf32>
    %cst_77 = arith.constant 0.000000e+00 : f32
    %229 = vector.broadcast %cst_77 : f32 to vector<32x128xf32>
    %230 = arith.cmpf oge, %228, %229 : vector<32x128xf32>
    %cst_78 = arith.constant 2.000000e-01 : f32
    %231 = vector.broadcast %cst_78 : f32 to vector<32x128xf32>
    %232 = arith.mulf %231, %228 : vector<32x128xf32>
    %233 = arith.select %230, %228, %232 : vector<32x128xi1>, vector<32x128xf32>
    %234 = tpu.concatenate %233, %27 in 0 : vector<32x128xf32>, vector<8x128xf32> -> vector<40x128xf32>
    %235 = tpu.iota {dimensions = array<i32: 1>} : vector<1x128xi32>
    %c7_i32 = arith.constant 7 : i32
    %236 = vector.broadcast %c7_i32 : i32 to vector<1x128xi32>
    %237 = arith.andi %235, %236 : vector<1x128xi32>
    %c3_i32 = arith.constant 3 : i32
    %238 = vector.broadcast %c3_i32 : i32 to vector<1x128xi32>
    %239 = arith.shrsi %235, %238 : vector<1x128xi32>
    %c7_i32_79 = arith.constant 7 : i32
    %240 = vector.broadcast %c7_i32_79 : i32 to vector<1x128xi32>
    %241 = arith.andi %239, %240 : vector<1x128xi32>
    %c0_i32_80 = arith.constant 0 : i32
    %242 = vector.broadcast %c0_i32_80 : i32 to vector<1x128xi32>
    %243 = arith.cmpi sgt, %237, %242 : vector<1x128xi32>
    %c7_i32_81 = arith.constant 7 : i32
    %244 = vector.broadcast %c7_i32_81 : i32 to vector<1x128xi32>
    %245 = arith.cmpi slt, %237, %244 : vector<1x128xi32>
    %c0_i32_82 = arith.constant 0 : i32
    %246 = vector.broadcast %c0_i32_82 : i32 to vector<1x128xi32>
    %247 = arith.cmpi sgt, %241, %246 : vector<1x128xi32>
    %c7_i32_83 = arith.constant 7 : i32
    %248 = vector.broadcast %c7_i32_83 : i32 to vector<1x128xi32>
    %249 = arith.cmpi slt, %241, %248 : vector<1x128xi32>
    %c9_i32 = arith.constant 9 : i32
    %250 = tpu.dynamic_rotate %234 by %c9_i32 dim 1 : vector<40x128xf32>, i32 -> vector<40x128xf32>
    %251 = arith.andi %247, %243 : vector<1x128xi1>
    %cst_84 = arith.constant 0.000000e+00 : f32
    %252 = vector.shape_cast %251 : vector<1x128xi1> to vector<1x128xi1>
    %253 = vector.broadcast %252 : vector<1x128xi1> to vector<40x128xi1>
    %254 = vector.broadcast %cst_84 : f32 to vector<40x128xf32>
    %255 = arith.select %253, %250, %254 : vector<40x128xi1>, vector<40x128xf32>
    %c8_i32_85 = arith.constant 8 : i32
    %256 = tpu.dynamic_rotate %234 by %c8_i32_85 dim 1 : vector<40x128xf32>, i32 -> vector<40x128xf32>
    %cst_86 = arith.constant 0.000000e+00 : f32
    %257 = vector.shape_cast %247 : vector<1x128xi1> to vector<1x128xi1>
    %258 = vector.broadcast %257 : vector<1x128xi1> to vector<40x128xi1>
    %259 = vector.broadcast %cst_86 : f32 to vector<40x128xf32>
    %260 = arith.select %258, %256, %259 : vector<40x128xi1>, vector<40x128xf32>
    %c7_i32_87 = arith.constant 7 : i32
    %261 = tpu.dynamic_rotate %234 by %c7_i32_87 dim 1 : vector<40x128xf32>, i32 -> vector<40x128xf32>
    %262 = arith.andi %247, %245 : vector<1x128xi1>
    %cst_88 = arith.constant 0.000000e+00 : f32
    %263 = vector.shape_cast %262 : vector<1x128xi1> to vector<1x128xi1>
    %264 = vector.broadcast %263 : vector<1x128xi1> to vector<40x128xi1>
    %265 = vector.broadcast %cst_88 : f32 to vector<40x128xf32>
    %266 = arith.select %264, %261, %265 : vector<40x128xi1>, vector<40x128xf32>
    %c1_i32_89 = arith.constant 1 : i32
    %267 = tpu.dynamic_rotate %234 by %c1_i32_89 dim 1 : vector<40x128xf32>, i32 -> vector<40x128xf32>
    %cst_90 = arith.constant 0.000000e+00 : f32
    %268 = vector.shape_cast %243 : vector<1x128xi1> to vector<1x128xi1>
    %269 = vector.broadcast %268 : vector<1x128xi1> to vector<40x128xi1>
    %270 = vector.broadcast %cst_90 : f32 to vector<40x128xf32>
    %271 = arith.select %269, %267, %270 : vector<40x128xi1>, vector<40x128xf32>
    %c127_i32 = arith.constant 127 : i32
    %272 = tpu.dynamic_rotate %234 by %c127_i32 dim 1 : vector<40x128xf32>, i32 -> vector<40x128xf32>
    %cst_91 = arith.constant 0.000000e+00 : f32
    %273 = vector.shape_cast %245 : vector<1x128xi1> to vector<1x128xi1>
    %274 = vector.broadcast %273 : vector<1x128xi1> to vector<40x128xi1>
    %275 = vector.broadcast %cst_91 : f32 to vector<40x128xf32>
    %276 = arith.select %274, %272, %275 : vector<40x128xi1>, vector<40x128xf32>
    %c121_i32 = arith.constant 121 : i32
    %277 = tpu.dynamic_rotate %234 by %c121_i32 dim 1 : vector<40x128xf32>, i32 -> vector<40x128xf32>
    %278 = arith.andi %249, %243 : vector<1x128xi1>
    %cst_92 = arith.constant 0.000000e+00 : f32
    %279 = vector.shape_cast %278 : vector<1x128xi1> to vector<1x128xi1>
    %280 = vector.broadcast %279 : vector<1x128xi1> to vector<40x128xi1>
    %281 = vector.broadcast %cst_92 : f32 to vector<40x128xf32>
    %282 = arith.select %280, %277, %281 : vector<40x128xi1>, vector<40x128xf32>
    %c120_i32 = arith.constant 120 : i32
    %283 = tpu.dynamic_rotate %234 by %c120_i32 dim 1 : vector<40x128xf32>, i32 -> vector<40x128xf32>
    %cst_93 = arith.constant 0.000000e+00 : f32
    %284 = vector.shape_cast %249 : vector<1x128xi1> to vector<1x128xi1>
    %285 = vector.broadcast %284 : vector<1x128xi1> to vector<40x128xi1>
    %286 = vector.broadcast %cst_93 : f32 to vector<40x128xf32>
    %287 = arith.select %285, %283, %286 : vector<40x128xi1>, vector<40x128xf32>
    %c119_i32 = arith.constant 119 : i32
    %288 = tpu.dynamic_rotate %234 by %c119_i32 dim 1 : vector<40x128xf32>, i32 -> vector<40x128xf32>
    %289 = arith.andi %249, %245 : vector<1x128xi1>
    %cst_94 = arith.constant 0.000000e+00 : f32
    %290 = vector.shape_cast %289 : vector<1x128xi1> to vector<1x128xi1>
    %291 = vector.broadcast %290 : vector<1x128xi1> to vector<40x128xi1>
    %292 = vector.broadcast %cst_94 : f32 to vector<40x128xf32>
    %293 = arith.select %291, %288, %292 : vector<40x128xi1>, vector<40x128xf32>
    %294 = tpu.concatenate %255, %260, %266, %271, %234, %276, %282, %287, %293 in 0 : vector<40x128xf32>, vector<40x128xf32>, vector<40x128xf32>, vector<40x128xf32>, vector<40x128xf32>, vector<40x128xf32>, vector<40x128xf32>, vector<40x128xf32>, vector<40x128xf32> -> vector<360x128xf32>
    %295 = arith.truncf %294 : vector<360x128xf32> to vector<360x128xbf16>
    %c0_95 = arith.constant 0 : index
    %c0_96 = arith.constant 0 : index
    %296 = vector.load %arg6[%c0_95, %c0_96] : memref<96x360xbf16, #tpu.memory_space<vmem>>, vector<96x360xbf16>
    %cst_97 = arith.constant dense<0.000000e+00> : vector<96x128xf32>
    %297 = tpu.matmul %296, %295, %cst_97 {dimension_numbers = #tpu.dot_dimension_numbers<[1], [0], [0], [1], [0, 0, 1, 1], [], []>} : vector<96x360xbf16>, vector<360x128xbf16>, vector<96x128xf32> -> vector<96x128xf32>
    %c0_98 = arith.constant 0 : index
    %c0_99 = arith.constant 0 : index
    %298 = vector.load %arg7[%c0_98, %c0_99] : memref<96x1xf32, #tpu.memory_space<vmem>>, vector<96x1xf32>
    %299 = vector.broadcast %298 : vector<96x1xf32> to vector<96x128xf32>
    %300 = arith.addf %297, %299 : vector<96x128xf32>
    %301 = vector.extract_strided_slice %300 {offsets = [0, 0], sizes = [32, 128], strides = [1, 1]} : vector<96x128xf32> to vector<32x128xf32>
    %302 = arith.negf %301 : vector<32x128xf32>
    %303 = math.exp %302 : vector<32x128xf32>
    %cst_100 = arith.constant 1.000000e+00 : f32
    %304 = vector.broadcast %cst_100 : f32 to vector<32x128xf32>
    %305 = arith.addf %304, %303 : vector<32x128xf32>
    %306 = arith.divf %304, %305 : vector<32x128xf32>
    %307 = vector.extract_strided_slice %300 {offsets = [32, 0], sizes = [32, 128], strides = [1, 1]} : vector<96x128xf32> to vector<32x128xf32>
    %308 = arith.negf %307 : vector<32x128xf32>
    %309 = math.exp %308 : vector<32x128xf32>
    %cst_101 = arith.constant 1.000000e+00 : f32
    %310 = vector.broadcast %cst_101 : f32 to vector<32x128xf32>
    %311 = arith.addf %310, %309 : vector<32x128xf32>
    %312 = arith.divf %310, %311 : vector<32x128xf32>
    %313 = vector.extract_strided_slice %300 {offsets = [64, 0], sizes = [32, 128], strides = [1, 1]} : vector<96x128xf32> to vector<32x128xf32>
    %314 = math.tanh %313 : vector<32x128xf32>
    %315 = arith.mulf %306, %314 : vector<32x128xf32>
    %316 = math.tanh %315 : vector<32x128xf32>
    %317 = arith.mulf %312, %316 : vector<32x128xf32>
    %c48 = arith.constant 48 : index
    %c0_102 = arith.constant 0 : index
    %318 = vector.load %arg14[%c48, %c0_102] : memref<128x1xf32, #tpu.memory_space<vmem>>, vector<32x1xf32>
    %c48_103 = arith.constant 48 : index
    %c0_104 = arith.constant 0 : index
    %319 = vector.load %arg15[%c48_103, %c0_104] : memref<128x1xf32, #tpu.memory_space<vmem>>, vector<32x1xf32>
    %cst_105 = arith.constant dense<0.000000e+00> : vector<32xf32>
    %320 = vector.multi_reduction <add>, %317, %cst_105 [1] : vector<32x128xf32> to vector<32xf32>
    %321 = vector.shape_cast %320 : vector<32xf32> to vector<32x1xf32>
    %cst_106 = arith.constant 7.812500e-03 : f32
    %322 = vector.broadcast %cst_106 : f32 to vector<32x1xf32>
    %323 = arith.mulf %321, %322 : vector<32x1xf32>
    %324 = arith.mulf %317, %317 : vector<32x128xf32>
    %cst_107 = arith.constant dense<0.000000e+00> : vector<32xf32>
    %325 = vector.multi_reduction <add>, %324, %cst_107 [1] : vector<32x128xf32> to vector<32xf32>
    %326 = vector.shape_cast %325 : vector<32xf32> to vector<32x1xf32>
    %cst_108 = arith.constant 7.812500e-03 : f32
    %327 = vector.broadcast %cst_108 : f32 to vector<32x1xf32>
    %328 = arith.mulf %326, %327 : vector<32x1xf32>
    %329 = arith.mulf %323, %323 : vector<32x1xf32>
    %330 = arith.subf %328, %329 : vector<32x1xf32>
    %cst_109 = arith.constant 9.99999974E-6 : f32
    %331 = vector.broadcast %cst_109 : f32 to vector<32x1xf32>
    %332 = arith.addf %330, %331 : vector<32x1xf32>
    %333 = math.rsqrt %332 : vector<32x1xf32>
    %334 = arith.mulf %318, %333 : vector<32x1xf32>
    %335 = arith.mulf %323, %334 : vector<32x1xf32>
    %336 = arith.subf %319, %335 : vector<32x1xf32>
    %337 = vector.broadcast %334 : vector<32x1xf32> to vector<32x128xf32>
    %338 = arith.mulf %317, %337 : vector<32x128xf32>
    %339 = vector.broadcast %336 : vector<32x1xf32> to vector<32x128xf32>
    %340 = arith.addf %338, %339 : vector<32x128xf32>
    %341 = tpu.concatenate %340, %27 in 0 : vector<32x128xf32>, vector<8x128xf32> -> vector<40x128xf32>
    %342 = tpu.iota {dimensions = array<i32: 1>} : vector<1x128xi32>
    %c7_i32_110 = arith.constant 7 : i32
    %343 = vector.broadcast %c7_i32_110 : i32 to vector<1x128xi32>
    %344 = arith.andi %342, %343 : vector<1x128xi32>
    %c3_i32_111 = arith.constant 3 : i32
    %345 = vector.broadcast %c3_i32_111 : i32 to vector<1x128xi32>
    %346 = arith.shrsi %342, %345 : vector<1x128xi32>
    %c7_i32_112 = arith.constant 7 : i32
    %347 = vector.broadcast %c7_i32_112 : i32 to vector<1x128xi32>
    %348 = arith.andi %346, %347 : vector<1x128xi32>
    %c0_i32_113 = arith.constant 0 : i32
    %349 = vector.broadcast %c0_i32_113 : i32 to vector<1x128xi32>
    %350 = arith.cmpi sgt, %344, %349 : vector<1x128xi32>
    %c7_i32_114 = arith.constant 7 : i32
    %351 = vector.broadcast %c7_i32_114 : i32 to vector<1x128xi32>
    %352 = arith.cmpi slt, %344, %351 : vector<1x128xi32>
    %c0_i32_115 = arith.constant 0 : i32
    %353 = vector.broadcast %c0_i32_115 : i32 to vector<1x128xi32>
    %354 = arith.cmpi sgt, %348, %353 : vector<1x128xi32>
    %c7_i32_116 = arith.constant 7 : i32
    %355 = vector.broadcast %c7_i32_116 : i32 to vector<1x128xi32>
    %356 = arith.cmpi slt, %348, %355 : vector<1x128xi32>
    %c9_i32_117 = arith.constant 9 : i32
    %357 = tpu.dynamic_rotate %341 by %c9_i32_117 dim 1 : vector<40x128xf32>, i32 -> vector<40x128xf32>
    %358 = arith.andi %354, %350 : vector<1x128xi1>
    %cst_118 = arith.constant 0.000000e+00 : f32
    %359 = vector.shape_cast %358 : vector<1x128xi1> to vector<1x128xi1>
    %360 = vector.broadcast %359 : vector<1x128xi1> to vector<40x128xi1>
    %361 = vector.broadcast %cst_118 : f32 to vector<40x128xf32>
    %362 = arith.select %360, %357, %361 : vector<40x128xi1>, vector<40x128xf32>
    %c8_i32_119 = arith.constant 8 : i32
    %363 = tpu.dynamic_rotate %341 by %c8_i32_119 dim 1 : vector<40x128xf32>, i32 -> vector<40x128xf32>
    %cst_120 = arith.constant 0.000000e+00 : f32
    %364 = vector.shape_cast %354 : vector<1x128xi1> to vector<1x128xi1>
    %365 = vector.broadcast %364 : vector<1x128xi1> to vector<40x128xi1>
    %366 = vector.broadcast %cst_120 : f32 to vector<40x128xf32>
    %367 = arith.select %365, %363, %366 : vector<40x128xi1>, vector<40x128xf32>
    %c7_i32_121 = arith.constant 7 : i32
    %368 = tpu.dynamic_rotate %341 by %c7_i32_121 dim 1 : vector<40x128xf32>, i32 -> vector<40x128xf32>
    %369 = arith.andi %354, %352 : vector<1x128xi1>
    %cst_122 = arith.constant 0.000000e+00 : f32
    %370 = vector.shape_cast %369 : vector<1x128xi1> to vector<1x128xi1>
    %371 = vector.broadcast %370 : vector<1x128xi1> to vector<40x128xi1>
    %372 = vector.broadcast %cst_122 : f32 to vector<40x128xf32>
    %373 = arith.select %371, %368, %372 : vector<40x128xi1>, vector<40x128xf32>
    %c1_i32_123 = arith.constant 1 : i32
    %374 = tpu.dynamic_rotate %341 by %c1_i32_123 dim 1 : vector<40x128xf32>, i32 -> vector<40x128xf32>
    %cst_124 = arith.constant 0.000000e+00 : f32
    %375 = vector.shape_cast %350 : vector<1x128xi1> to vector<1x128xi1>
    %376 = vector.broadcast %375 : vector<1x128xi1> to vector<40x128xi1>
    %377 = vector.broadcast %cst_124 : f32 to vector<40x128xf32>
    %378 = arith.select %376, %374, %377 : vector<40x128xi1>, vector<40x128xf32>
    %c127_i32_125 = arith.constant 127 : i32
    %379 = tpu.dynamic_rotate %341 by %c127_i32_125 dim 1 : vector<40x128xf32>, i32 -> vector<40x128xf32>
    %cst_126 = arith.constant 0.000000e+00 : f32
    %380 = vector.shape_cast %352 : vector<1x128xi1> to vector<1x128xi1>
    %381 = vector.broadcast %380 : vector<1x128xi1> to vector<40x128xi1>
    %382 = vector.broadcast %cst_126 : f32 to vector<40x128xf32>
    %383 = arith.select %381, %379, %382 : vector<40x128xi1>, vector<40x128xf32>
    %c121_i32_127 = arith.constant 121 : i32
    %384 = tpu.dynamic_rotate %341 by %c121_i32_127 dim 1 : vector<40x128xf32>, i32 -> vector<40x128xf32>
    %385 = arith.andi %356, %350 : vector<1x128xi1>
    %cst_128 = arith.constant 0.000000e+00 : f32
    %386 = vector.shape_cast %385 : vector<1x128xi1> to vector<1x128xi1>
    %387 = vector.broadcast %386 : vector<1x128xi1> to vector<40x128xi1>
    %388 = vector.broadcast %cst_128 : f32 to vector<40x128xf32>
    %389 = arith.select %387, %384, %388 : vector<40x128xi1>, vector<40x128xf32>
    %c120_i32_129 = arith.constant 120 : i32
    %390 = tpu.dynamic_rotate %341 by %c120_i32_129 dim 1 : vector<40x128xf32>, i32 -> vector<40x128xf32>
    %cst_130 = arith.constant 0.000000e+00 : f32
    %391 = vector.shape_cast %356 : vector<1x128xi1> to vector<1x128xi1>
    %392 = vector.broadcast %391 : vector<1x128xi1> to vector<40x128xi1>
    %393 = vector.broadcast %cst_130 : f32 to vector<40x128xf32>
    %394 = arith.select %392, %390, %393 : vector<40x128xi1>, vector<40x128xf32>
    %c119_i32_131 = arith.constant 119 : i32
    %395 = tpu.dynamic_rotate %341 by %c119_i32_131 dim 1 : vector<40x128xf32>, i32 -> vector<40x128xf32>
    %396 = arith.andi %356, %352 : vector<1x128xi1>
    %cst_132 = arith.constant 0.000000e+00 : f32
    %397 = vector.shape_cast %396 : vector<1x128xi1> to vector<1x128xi1>
    %398 = vector.broadcast %397 : vector<1x128xi1> to vector<40x128xi1>
    %399 = vector.broadcast %cst_132 : f32 to vector<40x128xf32>
    %400 = arith.select %398, %395, %399 : vector<40x128xi1>, vector<40x128xf32>
    %401 = tpu.concatenate %362, %367, %373, %378, %341, %383, %389, %394, %400 in 0 : vector<40x128xf32>, vector<40x128xf32>, vector<40x128xf32>, vector<40x128xf32>, vector<40x128xf32>, vector<40x128xf32>, vector<40x128xf32>, vector<40x128xf32>, vector<40x128xf32> -> vector<360x128xf32>
    %402 = arith.truncf %401 : vector<360x128xf32> to vector<360x128xbf16>
    %c0_133 = arith.constant 0 : index
    %c0_134 = arith.constant 0 : index
    %403 = vector.load %arg8[%c0_133, %c0_134] : memref<16x360xbf16, #tpu.memory_space<vmem>>, vector<16x360xbf16>
    %cst_135 = arith.constant dense<0.000000e+00> : vector<16x128xf32>
    %404 = tpu.matmul %403, %402, %cst_135 {dimension_numbers = #tpu.dot_dimension_numbers<[1], [0], [0], [1], [0, 0, 1, 1], [], []>} : vector<16x360xbf16>, vector<360x128xbf16>, vector<16x128xf32> -> vector<16x128xf32>
    %c0_136 = arith.constant 0 : index
    %c0_137 = arith.constant 0 : index
    %405 = vector.load %arg9[%c0_136, %c0_137] : memref<16x1xf32, #tpu.memory_space<vmem>>, vector<16x1xf32>
    %406 = vector.broadcast %405 : vector<16x1xf32> to vector<16x128xf32>
    %407 = arith.addf %404, %406 : vector<16x128xf32>
    %c80 = arith.constant 80 : index
    %c0_138 = arith.constant 0 : index
    %408 = vector.load %arg14[%c80, %c0_138] : memref<128x1xf32, #tpu.memory_space<vmem>>, vector<16x1xf32>
    %c80_139 = arith.constant 80 : index
    %c0_140 = arith.constant 0 : index
    %409 = vector.load %arg15[%c80_139, %c0_140] : memref<128x1xf32, #tpu.memory_space<vmem>>, vector<16x1xf32>
    %cst_141 = arith.constant dense<0.000000e+00> : vector<16xf32>
    %410 = vector.multi_reduction <add>, %407, %cst_141 [1] : vector<16x128xf32> to vector<16xf32>
    %411 = vector.shape_cast %410 : vector<16xf32> to vector<16x1xf32>
    %cst_142 = arith.constant 7.812500e-03 : f32
    %412 = vector.broadcast %cst_142 : f32 to vector<16x1xf32>
    %413 = arith.mulf %411, %412 : vector<16x1xf32>
    %414 = arith.mulf %407, %407 : vector<16x128xf32>
    %cst_143 = arith.constant dense<0.000000e+00> : vector<16xf32>
    %415 = vector.multi_reduction <add>, %414, %cst_143 [1] : vector<16x128xf32> to vector<16xf32>
    %416 = vector.shape_cast %415 : vector<16xf32> to vector<16x1xf32>
    %cst_144 = arith.constant 7.812500e-03 : f32
    %417 = vector.broadcast %cst_144 : f32 to vector<16x1xf32>
    %418 = arith.mulf %416, %417 : vector<16x1xf32>
    %419 = arith.mulf %413, %413 : vector<16x1xf32>
    %420 = arith.subf %418, %419 : vector<16x1xf32>
    %cst_145 = arith.constant 9.99999974E-6 : f32
    %421 = vector.broadcast %cst_145 : f32 to vector<16x1xf32>
    %422 = arith.addf %420, %421 : vector<16x1xf32>
    %423 = math.rsqrt %422 : vector<16x1xf32>
    %424 = arith.mulf %408, %423 : vector<16x1xf32>
    %425 = arith.mulf %413, %424 : vector<16x1xf32>
    %426 = arith.subf %409, %425 : vector<16x1xf32>
    %427 = vector.broadcast %424 : vector<16x1xf32> to vector<16x128xf32>
    %428 = arith.mulf %407, %427 : vector<16x128xf32>
    %429 = vector.broadcast %426 : vector<16x1xf32> to vector<16x128xf32>
    %430 = arith.addf %428, %429 : vector<16x128xf32>
    %cst_146 = arith.constant 0.000000e+00 : f32
    %431 = vector.broadcast %cst_146 : f32 to vector<16x128xf32>
    %432 = arith.cmpf oge, %430, %431 : vector<16x128xf32>
    %cst_147 = arith.constant 2.000000e-01 : f32
    %433 = vector.broadcast %cst_147 : f32 to vector<16x128xf32>
    %434 = arith.mulf %433, %430 : vector<16x128xf32>
    %435 = arith.select %432, %430, %434 : vector<16x128xi1>, vector<16x128xf32>
    %436 = arith.truncf %435 : vector<16x128xf32> to vector<16x128xbf16>
    %c0_148 = arith.constant 0 : index
    %c0_149 = arith.constant 0 : index
    %437 = vector.load %arg17[%c0_148, %c0_149] : memref<128x512xbf16, #tpu.memory_space<vmem>>, vector<128x512xbf16>
    %cst_150 = arith.constant dense<0.000000e+00> : vector<16x512xf32>
    %438 = tpu.matmul %436, %437, %cst_150 {dimension_numbers = #tpu.dot_dimension_numbers<[1], [0], [0], [1], [0, 0, 1, 1], [], []>} : vector<16x128xbf16>, vector<128x512xbf16>, vector<16x512xf32> -> vector<16x512xf32>
    %439 = tpu.concatenate %438, %13 in 0 : vector<16x512xf32>, vector<8x512xf32> -> vector<24x512xf32>
    %440 = tpu.iota {dimensions = array<i32: 1>} : vector<1x512xi32>
    %c15_i32_151 = arith.constant 15 : i32
    %441 = vector.broadcast %c15_i32_151 : i32 to vector<1x512xi32>
    %442 = arith.andi %440, %441 : vector<1x512xi32>
    %c4_i32_152 = arith.constant 4 : i32
    %443 = vector.broadcast %c4_i32_152 : i32 to vector<1x512xi32>
    %444 = arith.shrsi %440, %443 : vector<1x512xi32>
    %c15_i32_153 = arith.constant 15 : i32
    %445 = vector.broadcast %c15_i32_153 : i32 to vector<1x512xi32>
    %446 = arith.andi %444, %445 : vector<1x512xi32>
    %c0_i32_154 = arith.constant 0 : i32
    %447 = vector.broadcast %c0_i32_154 : i32 to vector<1x512xi32>
    %448 = arith.cmpi sgt, %442, %447 : vector<1x512xi32>
    %c15_i32_155 = arith.constant 15 : i32
    %449 = vector.broadcast %c15_i32_155 : i32 to vector<1x512xi32>
    %450 = arith.cmpi slt, %442, %449 : vector<1x512xi32>
    %c0_i32_156 = arith.constant 0 : i32
    %451 = vector.broadcast %c0_i32_156 : i32 to vector<1x512xi32>
    %452 = arith.cmpi sgt, %446, %451 : vector<1x512xi32>
    %c15_i32_157 = arith.constant 15 : i32
    %453 = vector.broadcast %c15_i32_157 : i32 to vector<1x512xi32>
    %454 = arith.cmpi slt, %446, %453 : vector<1x512xi32>
    %c17_i32_158 = arith.constant 17 : i32
    %455 = tpu.dynamic_rotate %439 by %c17_i32_158 dim 1 : vector<24x512xf32>, i32 -> vector<24x512xf32>
    %456 = arith.andi %452, %448 : vector<1x512xi1>
    %cst_159 = arith.constant 0.000000e+00 : f32
    %457 = vector.shape_cast %456 : vector<1x512xi1> to vector<1x512xi1>
    %458 = vector.broadcast %457 : vector<1x512xi1> to vector<24x512xi1>
    %459 = vector.broadcast %cst_159 : f32 to vector<24x512xf32>
    %460 = arith.select %458, %455, %459 : vector<24x512xi1>, vector<24x512xf32>
    %c16_i32_160 = arith.constant 16 : i32
    %461 = tpu.dynamic_rotate %439 by %c16_i32_160 dim 1 : vector<24x512xf32>, i32 -> vector<24x512xf32>
    %cst_161 = arith.constant 0.000000e+00 : f32
    %462 = vector.shape_cast %452 : vector<1x512xi1> to vector<1x512xi1>
    %463 = vector.broadcast %462 : vector<1x512xi1> to vector<24x512xi1>
    %464 = vector.broadcast %cst_161 : f32 to vector<24x512xf32>
    %465 = arith.select %463, %461, %464 : vector<24x512xi1>, vector<24x512xf32>
    %c15_i32_162 = arith.constant 15 : i32
    %466 = tpu.dynamic_rotate %439 by %c15_i32_162 dim 1 : vector<24x512xf32>, i32 -> vector<24x512xf32>
    %467 = arith.andi %452, %450 : vector<1x512xi1>
    %cst_163 = arith.constant 0.000000e+00 : f32
    %468 = vector.shape_cast %467 : vector<1x512xi1> to vector<1x512xi1>
    %469 = vector.broadcast %468 : vector<1x512xi1> to vector<24x512xi1>
    %470 = vector.broadcast %cst_163 : f32 to vector<24x512xf32>
    %471 = arith.select %469, %466, %470 : vector<24x512xi1>, vector<24x512xf32>
    %c1_i32_164 = arith.constant 1 : i32
    %472 = tpu.dynamic_rotate %439 by %c1_i32_164 dim 1 : vector<24x512xf32>, i32 -> vector<24x512xf32>
    %cst_165 = arith.constant 0.000000e+00 : f32
    %473 = vector.shape_cast %448 : vector<1x512xi1> to vector<1x512xi1>
    %474 = vector.broadcast %473 : vector<1x512xi1> to vector<24x512xi1>
    %475 = vector.broadcast %cst_165 : f32 to vector<24x512xf32>
    %476 = arith.select %474, %472, %475 : vector<24x512xi1>, vector<24x512xf32>
    %c511_i32_166 = arith.constant 511 : i32
    %477 = tpu.dynamic_rotate %439 by %c511_i32_166 dim 1 : vector<24x512xf32>, i32 -> vector<24x512xf32>
    %cst_167 = arith.constant 0.000000e+00 : f32
    %478 = vector.shape_cast %450 : vector<1x512xi1> to vector<1x512xi1>
    %479 = vector.broadcast %478 : vector<1x512xi1> to vector<24x512xi1>
    %480 = vector.broadcast %cst_167 : f32 to vector<24x512xf32>
    %481 = arith.select %479, %477, %480 : vector<24x512xi1>, vector<24x512xf32>
    %c497_i32_168 = arith.constant 497 : i32
    %482 = tpu.dynamic_rotate %439 by %c497_i32_168 dim 1 : vector<24x512xf32>, i32 -> vector<24x512xf32>
    %483 = arith.andi %454, %448 : vector<1x512xi1>
    %cst_169 = arith.constant 0.000000e+00 : f32
    %484 = vector.shape_cast %483 : vector<1x512xi1> to vector<1x512xi1>
    %485 = vector.broadcast %484 : vector<1x512xi1> to vector<24x512xi1>
    %486 = vector.broadcast %cst_169 : f32 to vector<24x512xf32>
    %487 = arith.select %485, %482, %486 : vector<24x512xi1>, vector<24x512xf32>
    %c496_i32_170 = arith.constant 496 : i32
    %488 = tpu.dynamic_rotate %439 by %c496_i32_170 dim 1 : vector<24x512xf32>, i32 -> vector<24x512xf32>
    %cst_171 = arith.constant 0.000000e+00 : f32
    %489 = vector.shape_cast %454 : vector<1x512xi1> to vector<1x512xi1>
    %490 = vector.broadcast %489 : vector<1x512xi1> to vector<24x512xi1>
    %491 = vector.broadcast %cst_171 : f32 to vector<24x512xf32>
    %492 = arith.select %490, %488, %491 : vector<24x512xi1>, vector<24x512xf32>
    %c495_i32_172 = arith.constant 495 : i32
    %493 = tpu.dynamic_rotate %439 by %c495_i32_172 dim 1 : vector<24x512xf32>, i32 -> vector<24x512xf32>
    %494 = arith.andi %454, %450 : vector<1x512xi1>
    %cst_173 = arith.constant 0.000000e+00 : f32
    %495 = vector.shape_cast %494 : vector<1x512xi1> to vector<1x512xi1>
    %496 = vector.broadcast %495 : vector<1x512xi1> to vector<24x512xi1>
    %497 = vector.broadcast %cst_173 : f32 to vector<24x512xf32>
    %498 = arith.select %496, %493, %497 : vector<24x512xi1>, vector<24x512xf32>
    %499 = tpu.concatenate %460, %465, %471, %476, %439, %481, %487, %492, %498 in 0 : vector<24x512xf32>, vector<24x512xf32>, vector<24x512xf32>, vector<24x512xf32>, vector<24x512xf32>, vector<24x512xf32>, vector<24x512xf32>, vector<24x512xf32>, vector<24x512xf32> -> vector<216x512xf32>
    %500 = arith.truncf %499 : vector<216x512xf32> to vector<216x512xbf16>
    %c0_174 = arith.constant 0 : index
    %c0_175 = arith.constant 0 : index
    %501 = vector.load %arg10[%c0_174, %c0_175] : memref<48x216xbf16, #tpu.memory_space<vmem>>, vector<48x216xbf16>
    %cst_176 = arith.constant dense<0.000000e+00> : vector<48x512xf32>
    %502 = tpu.matmul %501, %500, %cst_176 {dimension_numbers = #tpu.dot_dimension_numbers<[1], [0], [0], [1], [0, 0, 1, 1], [], []>} : vector<48x216xbf16>, vector<216x512xbf16>, vector<48x512xf32> -> vector<48x512xf32>
    %c0_177 = arith.constant 0 : index
    %c0_178 = arith.constant 0 : index
    %503 = vector.load %arg11[%c0_177, %c0_178] : memref<48x1xf32, #tpu.memory_space<vmem>>, vector<48x1xf32>
    %504 = vector.broadcast %503 : vector<48x1xf32> to vector<48x512xf32>
    %505 = arith.addf %502, %504 : vector<48x512xf32>
    %506 = vector.extract_strided_slice %505 {offsets = [0, 0], sizes = [16, 512], strides = [1, 1]} : vector<48x512xf32> to vector<16x512xf32>
    %507 = arith.negf %506 : vector<16x512xf32>
    %508 = math.exp %507 : vector<16x512xf32>
    %cst_179 = arith.constant 1.000000e+00 : f32
    %509 = vector.broadcast %cst_179 : f32 to vector<16x512xf32>
    %510 = arith.addf %509, %508 : vector<16x512xf32>
    %511 = arith.divf %509, %510 : vector<16x512xf32>
    %512 = vector.extract_strided_slice %505 {offsets = [16, 0], sizes = [16, 512], strides = [1, 1]} : vector<48x512xf32> to vector<16x512xf32>
    %513 = arith.negf %512 : vector<16x512xf32>
    %514 = math.exp %513 : vector<16x512xf32>
    %cst_180 = arith.constant 1.000000e+00 : f32
    %515 = vector.broadcast %cst_180 : f32 to vector<16x512xf32>
    %516 = arith.addf %515, %514 : vector<16x512xf32>
    %517 = arith.divf %515, %516 : vector<16x512xf32>
    %518 = vector.extract_strided_slice %505 {offsets = [32, 0], sizes = [16, 512], strides = [1, 1]} : vector<48x512xf32> to vector<16x512xf32>
    %519 = math.tanh %518 : vector<16x512xf32>
    %520 = arith.mulf %511, %519 : vector<16x512xf32>
    %521 = math.tanh %520 : vector<16x512xf32>
    %522 = arith.mulf %517, %521 : vector<16x512xf32>
    %c96 = arith.constant 96 : index
    %c0_181 = arith.constant 0 : index
    %523 = vector.load %arg14[%c96, %c0_181] : memref<128x1xf32, #tpu.memory_space<vmem>>, vector<16x1xf32>
    %c96_182 = arith.constant 96 : index
    %c0_183 = arith.constant 0 : index
    %524 = vector.load %arg15[%c96_182, %c0_183] : memref<128x1xf32, #tpu.memory_space<vmem>>, vector<16x1xf32>
    %cst_184 = arith.constant dense<0.000000e+00> : vector<16xf32>
    %525 = vector.multi_reduction <add>, %522, %cst_184 [1] : vector<16x512xf32> to vector<16xf32>
    %526 = vector.shape_cast %525 : vector<16xf32> to vector<16x1xf32>
    %cst_185 = arith.constant 0.001953125 : f32
    %527 = vector.broadcast %cst_185 : f32 to vector<16x1xf32>
    %528 = arith.mulf %526, %527 : vector<16x1xf32>
    %529 = arith.mulf %522, %522 : vector<16x512xf32>
    %cst_186 = arith.constant dense<0.000000e+00> : vector<16xf32>
    %530 = vector.multi_reduction <add>, %529, %cst_186 [1] : vector<16x512xf32> to vector<16xf32>
    %531 = vector.shape_cast %530 : vector<16xf32> to vector<16x1xf32>
    %cst_187 = arith.constant 0.001953125 : f32
    %532 = vector.broadcast %cst_187 : f32 to vector<16x1xf32>
    %533 = arith.mulf %531, %532 : vector<16x1xf32>
    %534 = arith.mulf %528, %528 : vector<16x1xf32>
    %535 = arith.subf %533, %534 : vector<16x1xf32>
    %cst_188 = arith.constant 9.99999974E-6 : f32
    %536 = vector.broadcast %cst_188 : f32 to vector<16x1xf32>
    %537 = arith.addf %535, %536 : vector<16x1xf32>
    %538 = math.rsqrt %537 : vector<16x1xf32>
    %539 = arith.mulf %523, %538 : vector<16x1xf32>
    %540 = arith.mulf %528, %539 : vector<16x1xf32>
    %541 = arith.subf %524, %540 : vector<16x1xf32>
    %542 = vector.broadcast %539 : vector<16x1xf32> to vector<16x512xf32>
    %543 = arith.mulf %522, %542 : vector<16x512xf32>
    %544 = vector.broadcast %541 : vector<16x1xf32> to vector<16x512xf32>
    %545 = arith.addf %543, %544 : vector<16x512xf32>
    %546 = tpu.concatenate %545, %13 in 0 : vector<16x512xf32>, vector<8x512xf32> -> vector<24x512xf32>
    %547 = tpu.iota {dimensions = array<i32: 1>} : vector<1x512xi32>
    %c15_i32_189 = arith.constant 15 : i32
    %548 = vector.broadcast %c15_i32_189 : i32 to vector<1x512xi32>
    %549 = arith.andi %547, %548 : vector<1x512xi32>
    %c4_i32_190 = arith.constant 4 : i32
    %550 = vector.broadcast %c4_i32_190 : i32 to vector<1x512xi32>
    %551 = arith.shrsi %547, %550 : vector<1x512xi32>
    %c15_i32_191 = arith.constant 15 : i32
    %552 = vector.broadcast %c15_i32_191 : i32 to vector<1x512xi32>
    %553 = arith.andi %551, %552 : vector<1x512xi32>
    %c0_i32_192 = arith.constant 0 : i32
    %554 = vector.broadcast %c0_i32_192 : i32 to vector<1x512xi32>
    %555 = arith.cmpi sgt, %549, %554 : vector<1x512xi32>
    %c15_i32_193 = arith.constant 15 : i32
    %556 = vector.broadcast %c15_i32_193 : i32 to vector<1x512xi32>
    %557 = arith.cmpi slt, %549, %556 : vector<1x512xi32>
    %c0_i32_194 = arith.constant 0 : i32
    %558 = vector.broadcast %c0_i32_194 : i32 to vector<1x512xi32>
    %559 = arith.cmpi sgt, %553, %558 : vector<1x512xi32>
    %c15_i32_195 = arith.constant 15 : i32
    %560 = vector.broadcast %c15_i32_195 : i32 to vector<1x512xi32>
    %561 = arith.cmpi slt, %553, %560 : vector<1x512xi32>
    %c17_i32_196 = arith.constant 17 : i32
    %562 = tpu.dynamic_rotate %546 by %c17_i32_196 dim 1 : vector<24x512xf32>, i32 -> vector<24x512xf32>
    %563 = arith.andi %559, %555 : vector<1x512xi1>
    %cst_197 = arith.constant 0.000000e+00 : f32
    %564 = vector.shape_cast %563 : vector<1x512xi1> to vector<1x512xi1>
    %565 = vector.broadcast %564 : vector<1x512xi1> to vector<24x512xi1>
    %566 = vector.broadcast %cst_197 : f32 to vector<24x512xf32>
    %567 = arith.select %565, %562, %566 : vector<24x512xi1>, vector<24x512xf32>
    %c16_i32_198 = arith.constant 16 : i32
    %568 = tpu.dynamic_rotate %546 by %c16_i32_198 dim 1 : vector<24x512xf32>, i32 -> vector<24x512xf32>
    %cst_199 = arith.constant 0.000000e+00 : f32
    %569 = vector.shape_cast %559 : vector<1x512xi1> to vector<1x512xi1>
    %570 = vector.broadcast %569 : vector<1x512xi1> to vector<24x512xi1>
    %571 = vector.broadcast %cst_199 : f32 to vector<24x512xf32>
    %572 = arith.select %570, %568, %571 : vector<24x512xi1>, vector<24x512xf32>
    %c15_i32_200 = arith.constant 15 : i32
    %573 = tpu.dynamic_rotate %546 by %c15_i32_200 dim 1 : vector<24x512xf32>, i32 -> vector<24x512xf32>
    %574 = arith.andi %559, %557 : vector<1x512xi1>
    %cst_201 = arith.constant 0.000000e+00 : f32
    %575 = vector.shape_cast %574 : vector<1x512xi1> to vector<1x512xi1>
    %576 = vector.broadcast %575 : vector<1x512xi1> to vector<24x512xi1>
    %577 = vector.broadcast %cst_201 : f32 to vector<24x512xf32>
    %578 = arith.select %576, %573, %577 : vector<24x512xi1>, vector<24x512xf32>
    %c1_i32_202 = arith.constant 1 : i32
    %579 = tpu.dynamic_rotate %546 by %c1_i32_202 dim 1 : vector<24x512xf32>, i32 -> vector<24x512xf32>
    %cst_203 = arith.constant 0.000000e+00 : f32
    %580 = vector.shape_cast %555 : vector<1x512xi1> to vector<1x512xi1>
    %581 = vector.broadcast %580 : vector<1x512xi1> to vector<24x512xi1>
    %582 = vector.broadcast %cst_203 : f32 to vector<24x512xf32>
    %583 = arith.select %581, %579, %582 : vector<24x512xi1>, vector<24x512xf32>
    %c511_i32_204 = arith.constant 511 : i32
    %584 = tpu.dynamic_rotate %546 by %c511_i32_204 dim 1 : vector<24x512xf32>, i32 -> vector<24x512xf32>
    %cst_205 = arith.constant 0.000000e+00 : f32
    %585 = vector.shape_cast %557 : vector<1x512xi1> to vector<1x512xi1>
    %586 = vector.broadcast %585 : vector<1x512xi1> to vector<24x512xi1>
    %587 = vector.broadcast %cst_205 : f32 to vector<24x512xf32>
    %588 = arith.select %586, %584, %587 : vector<24x512xi1>, vector<24x512xf32>
    %c497_i32_206 = arith.constant 497 : i32
    %589 = tpu.dynamic_rotate %546 by %c497_i32_206 dim 1 : vector<24x512xf32>, i32 -> vector<24x512xf32>
    %590 = arith.andi %561, %555 : vector<1x512xi1>
    %cst_207 = arith.constant 0.000000e+00 : f32
    %591 = vector.shape_cast %590 : vector<1x512xi1> to vector<1x512xi1>
    %592 = vector.broadcast %591 : vector<1x512xi1> to vector<24x512xi1>
    %593 = vector.broadcast %cst_207 : f32 to vector<24x512xf32>
    %594 = arith.select %592, %589, %593 : vector<24x512xi1>, vector<24x512xf32>
    %c496_i32_208 = arith.constant 496 : i32
    %595 = tpu.dynamic_rotate %546 by %c496_i32_208 dim 1 : vector<24x512xf32>, i32 -> vector<24x512xf32>
    %cst_209 = arith.constant 0.000000e+00 : f32
    %596 = vector.shape_cast %561 : vector<1x512xi1> to vector<1x512xi1>
    %597 = vector.broadcast %596 : vector<1x512xi1> to vector<24x512xi1>
    %598 = vector.broadcast %cst_209 : f32 to vector<24x512xf32>
    %599 = arith.select %597, %595, %598 : vector<24x512xi1>, vector<24x512xf32>
    %c495_i32_210 = arith.constant 495 : i32
    %600 = tpu.dynamic_rotate %546 by %c495_i32_210 dim 1 : vector<24x512xf32>, i32 -> vector<24x512xf32>
    %601 = arith.andi %561, %557 : vector<1x512xi1>
    %cst_211 = arith.constant 0.000000e+00 : f32
    %602 = vector.shape_cast %601 : vector<1x512xi1> to vector<1x512xi1>
    %603 = vector.broadcast %602 : vector<1x512xi1> to vector<24x512xi1>
    %604 = vector.broadcast %cst_211 : f32 to vector<24x512xf32>
    %605 = arith.select %603, %600, %604 : vector<24x512xi1>, vector<24x512xf32>
    %606 = tpu.concatenate %567, %572, %578, %583, %546, %588, %594, %599, %605 in 0 : vector<24x512xf32>, vector<24x512xf32>, vector<24x512xf32>, vector<24x512xf32>, vector<24x512xf32>, vector<24x512xf32>, vector<24x512xf32>, vector<24x512xf32>, vector<24x512xf32> -> vector<216x512xf32>
    %607 = arith.truncf %606 : vector<216x512xf32> to vector<216x512xbf16>
    %c0_212 = arith.constant 0 : index
    %c0_213 = arith.constant 0 : index
    %608 = vector.load %arg12[%c0_212, %c0_213] : memref<16x216xbf16, #tpu.memory_space<vmem>>, vector<16x216xbf16>
    %cst_214 = arith.constant dense<0.000000e+00> : vector<16x512xf32>
    %609 = tpu.matmul %608, %607, %cst_214 {dimension_numbers = #tpu.dot_dimension_numbers<[1], [0], [0], [1], [0, 0, 1, 1], [], []>} : vector<16x216xbf16>, vector<216x512xbf16>, vector<16x512xf32> -> vector<16x512xf32>
    %c0_215 = arith.constant 0 : index
    %c0_216 = arith.constant 0 : index
    %610 = vector.load %arg13[%c0_215, %c0_216] : memref<16x1xf32, #tpu.memory_space<vmem>>, vector<16x1xf32>
    %611 = vector.broadcast %610 : vector<16x1xf32> to vector<16x512xf32>
    %612 = arith.addf %609, %611 : vector<16x512xf32>
    %c112 = arith.constant 112 : index
    %c0_217 = arith.constant 0 : index
    %613 = vector.load %arg14[%c112, %c0_217] : memref<128x1xf32, #tpu.memory_space<vmem>>, vector<16x1xf32>
    %c112_218 = arith.constant 112 : index
    %c0_219 = arith.constant 0 : index
    %614 = vector.load %arg15[%c112_218, %c0_219] : memref<128x1xf32, #tpu.memory_space<vmem>>, vector<16x1xf32>
    %cst_220 = arith.constant dense<0.000000e+00> : vector<16xf32>
    %615 = vector.multi_reduction <add>, %612, %cst_220 [1] : vector<16x512xf32> to vector<16xf32>
    %616 = vector.shape_cast %615 : vector<16xf32> to vector<16x1xf32>
    %cst_221 = arith.constant 0.001953125 : f32
    %617 = vector.broadcast %cst_221 : f32 to vector<16x1xf32>
    %618 = arith.mulf %616, %617 : vector<16x1xf32>
    %619 = arith.mulf %612, %612 : vector<16x512xf32>
    %cst_222 = arith.constant dense<0.000000e+00> : vector<16xf32>
    %620 = vector.multi_reduction <add>, %619, %cst_222 [1] : vector<16x512xf32> to vector<16xf32>
    %621 = vector.shape_cast %620 : vector<16xf32> to vector<16x1xf32>
    %cst_223 = arith.constant 0.001953125 : f32
    %622 = vector.broadcast %cst_223 : f32 to vector<16x1xf32>
    %623 = arith.mulf %621, %622 : vector<16x1xf32>
    %624 = arith.mulf %618, %618 : vector<16x1xf32>
    %625 = arith.subf %623, %624 : vector<16x1xf32>
    %cst_224 = arith.constant 9.99999974E-6 : f32
    %626 = vector.broadcast %cst_224 : f32 to vector<16x1xf32>
    %627 = arith.addf %625, %626 : vector<16x1xf32>
    %628 = math.rsqrt %627 : vector<16x1xf32>
    %629 = arith.mulf %613, %628 : vector<16x1xf32>
    %630 = arith.mulf %618, %629 : vector<16x1xf32>
    %631 = arith.subf %614, %630 : vector<16x1xf32>
    %632 = vector.broadcast %629 : vector<16x1xf32> to vector<16x512xf32>
    %633 = arith.mulf %612, %632 : vector<16x512xf32>
    %634 = vector.broadcast %631 : vector<16x1xf32> to vector<16x512xf32>
    %635 = arith.addf %633, %634 : vector<16x512xf32>
    %cst_225 = arith.constant 0.000000e+00 : f32
    %636 = vector.broadcast %cst_225 : f32 to vector<16x512xf32>
    %637 = arith.cmpf oge, %635, %636 : vector<16x512xf32>
    %cst_226 = arith.constant 2.000000e-01 : f32
    %638 = vector.broadcast %cst_226 : f32 to vector<16x512xf32>
    %639 = arith.mulf %638, %635 : vector<16x512xf32>
    %640 = arith.select %637, %635, %639 : vector<16x512xi1>, vector<16x512xf32>
    %c0_227 = arith.constant 0 : index
    %c0_228 = arith.constant 0 : index
    %641 = vector.load %arg18[%c0_227, %c0_228] : memref<16x512xf32, #tpu.memory_space<vmem>>, vector<16x512xf32>
    tpu.vector_store %arg18[%c0_227, %c0_228], %640 {strides = array<i32>} : memref<16x512xf32, #tpu.memory_space<vmem>>, vector<16x512xf32>,
    return
  }
}

</mosaic_0001>

<bundles_post_ra>
// kernel: forward.1
= control target key start
LH: loop header
LB: loop body
LE: loop exit
PB: predicated region body
PF: predicated region fallthrough
CT: control target
= control target key end

     0   :  { %v10108_v0 = vmov 0   ;;  %v6704_v2 = vmov 1   ;;  %v60_v3 = vlaneseq  ;;  %s10341_s25 = smov 16   ;;  %s10328_s26 = smov 15   ;;  %v10409_v34 = vmov 0  ;;  %s10049_s1 = inlined_call_operand.vmem [shape: f32[8,2], index: 1, kind: input, shape index: {}]   ;;  %s10050_s0 = inlined_call_operand.vmem [shape: f32[8,512], index: 0, kind: input, shape index: {}]   ;;  %s10051_s2 = inlined_call_operand.vmem [shape: bf16[48,144], index: 2, kind: input, shape index: {}]   ;;  %s10052_s3 = inlined_call_operand.vmem [shape: f32[48,1], index: 3, kind: input, shape index: {}]   ;;  %s10053_s14 = inlined_call_operand.vmem [shape: f32[128,1], index: 14, kind: input, shape index: {}]   ;;  %s10054_s15 = inlined_call_operand.vmem [shape: f32[128,1], index: 15, kind: input, shape index: {}]   ;;  %s10055_s5 = inlined_call_operand.vmem [shape: f32[32,1], index: 5, kind: input, shape index: {}]   ;;  %s10056_s4 = inlined_call_operand.vmem [shape: bf16[32,216], index: 4, kind: input, shape index: {}]   ;;  %s10057_s16 = inlined_call_operand.vmem [shape: bf16[512,128], index: 16, kind: input, shape index: {}]   ;;  %s10058_s6 = inlined_call_operand.vmem [shape: bf16[96,360], index: 6, kind: input, shape index: {}]   ;;  %s10059_s7 = inlined_call_operand.vmem [shape: f32[96,1], index: 7, kind: input, shape index: {}]   ;;  %s10060_s8 = inlined_call_operand.vmem [shape: bf16[16,360], index: 8, kind: input, shape index: {}]   ;;  %s10061_s9 = inlined_call_operand.vmem [shape: f32[16,1], index: 9, kind: input, shape index: {}]   ;;  %s10062_s17 = inlined_call_operand.vmem [shape: bf16[128,512], index: 17, kind: input, shape index: {}]   ;;  %s10063_s11 = inlined_call_operand.vmem [shape: f32[48,1], index: 11, kind: input, shape index: {}]   ;;  %s10064_s10 = inlined_call_operand.vmem [shape: bf16[48,216], index: 10, kind: input, shape index: {}]   ;;  %s10065_s13 = inlined_call_operand.vmem [shape: f32[16,1], index: 13, kind: input, shape index: {}]   ;;  %s10066_s12 = inlined_call_operand.vmem [shape: bf16[16,216], index: 12, kind: input, shape index: {}]   ;;  %s10067_s18 = inlined_call_operand.vmem [shape: f32[16,512], index: 18, kind: output, shape index: {}]  }
   0x1   :  { %10394 = sst [smem:[#allocation88_spill]] %s10049_s1  ;;  %5497 = vset.pattern.permute.xlu0 %v10108_v0  ;;  %5659 = vset.pattern.permute.xlu1 %v10108_v0  ;;  %v10416_v37 = vmov 0  ;;  %s6708_s27 = smov 1   ;;  %v10419_v38 = vmov 0  ;;  %v10424_v40 = vmov 0  ;;  %v10427_v41 = vmov 0 }
   0x2   :  { %10395 = sst [smem:[#allocation89_spill]] %s10050_s0  ;;  %s10397_s29 = sld [smem:[#allocation88_spill]]  ;;  %v6823_v4 = vand.u32 127, %v60_v3  ;;  %v10432_v43 = vmov 0  ;;  %v10435_v44 = vmov 0  ;;  %v10437_v45 = vmov 0 }
   0x3   :  { %10396 = sst [smem:[#allocation90_spill]] %s10051_s2  ;;  %s10399_s19 = sld [smem:[#allocation89_spill]]  ;;  %v10440_v46 = vmov 0  ;;  %v10442_v47 = vmov 0  ;;  %v518_v49 = vld [vmem:[%s10052_s3] sm:$0xff]  ;;  %v519_v50 = vld [vmem:[%s10052_s3 + $0x8] sm:$0xff] }
   0x4   :  { %v6826_v5 = vadd.s32 256, %v6823_v4  ;;  %v6829_v6 = vadd.s32 128, %v6823_v4  ;;  %v65_v7 = vshra.s32 %v6823_v4, 8  ;;  %v6836_v10 = vadd.s32 384, %v6823_v4  ;;  %s10339_s2 = smov 17   ;;  %s10081_s28 = smov 127  }
   0x5   :  { %v104_v26 = vand.u32 15, %v6823_v4  ;;  %v108_v27 = vshra.s32 %v6823_v4, 4  ;;  %s10077_s30 = smov 112   ;;  %s10079_s1 = smov 111   ;;  %v520_v51 = vld [vmem:[%s10052_s3 + $0x10] sm:$0xff]  ;;  %v522_v52 = vld [vmem:[%s10052_s3 + $0x20] sm:$0xff] }
   0x6   :  { %v67_v8 = vshra.s32 %v6826_v5, 8  ;;  %v66_v11 = vshra.s32 %v6829_v6, 8  ;;  %vm75_vm0 = vcmp.eq.s32.totalorder %v65_v7, 1  ;;  %v68_v14 = vshra.s32 %v6836_v10, 8  ;;  %s10445_s20 = sld [smem:[#allocation90_spill]]  ;;  %v521_v53 = vld [vmem:[%s10052_s3 + $0x18] sm:$0xff] }
   0x7   :  { %v6905_v28 = vand.u32 15, %v108_v27  ;;  %v110_v29 = vshra.s32 %v6826_v5, 4  ;;  %vm6908_vm4 = vcmp.gt.s32.totalorder %v104_v26, 0  ;;  %v106_v31 = vand.u32 15, %v6826_v5  ;;  %v523_v54 = vld [vmem:[%s10052_s3 + $0x28] sm:$0xff]  ;;  %s10661_s24 = smov 127  }
   0x8   :  { %v69_v1 = vld [vmem:[%s10397_s29] sm:$0xff]  ;;  %vm77_vm1 = vcmp.eq.s32.totalorder %v67_v8, 1  ;;  %vm76_vm2 = vcmp.eq.s32.totalorder %v66_v11, 1  ;;  %vm78_vm3 = vcmp.eq.s32.totalorder %v68_v14, 1  ;;  %vm6964_vm12 = vcmp.lt.s32.totalorder %v104_v26, 15  ;;  %s10075_s29 = smov 113  }
   0x9   :  { %72 = vperm.xlu0 %5497, %v69_v1   ;;  %v6842_v12 = vld [vmem:[%s10399_s19 + $0x10] sm:$0xff]  ;;  %v6847_v13 = vld [vmem:[%s10399_s19] sm:$0xff]  ;;  %v6875_v21 = vld [vmem:[%s10399_s19 + $0x8] sm:$0xff]  ;;  %vm10070_vm5 = vcmp.gt.s32.totalorder %v6905_v28, 0  ;;  %v6914_v32 = vand.u32 15, %v110_v29  ;;  %vm6936_vm8 = vcmp.gt.s32.totalorder %v106_v31, 0 }
   0xa   :  { %v6892_v24 = vld [vmem:[%s10399_s19 + $0x18] sm:$0xff]  ;;  %vm6924_vm6 = vmand %vm10070_vm5, %vm6908_vm4  ;;  %v10420_v38 = vsel %vm6964_vm12, 4294967295, %v10419_v38  ;;  %vm6991_vm15 = vcmp.lt.s32.totalorder %v106_v31, 15  ;;  %v109_v55 = vshra.s32 %v6829_v6, 4  ;;  %v105_v56 = vand.u32 15, %v6829_v6  ;;  %s10662_s19 = smov 112  }
   0xb   :  { %vm6932_vm7 = vmpackc.low %vm10070_vm5, %vm6924_vm6  ;;  %vm10071_vm9 = vcmp.gt.s32.totalorder %v6914_v32, 0  ;;  %10421 = vst [vmem:[#allocation10_spill] sm:$0xff] %v10420_v38  ;;  %v10428_v41 = vsel %vm6991_vm15, 4294967295, %v10427_v41  ;;  %v111_v58 = vshra.s32 %v6836_v10, 4  ;;  %v107_v62 = vand.u32 15, %v6836_v10  ;;  %s10663_s0 = smov 113  }
   0xc   :  { %v10410_v34 = vsel %vm6932_vm7, 4294967295, %v10409_v34  ;;  %vm6948_vm10 = vmand %vm10071_vm9, %vm6936_vm8  ;;  %10429 = vst [vmem:[#allocation12_spill] sm:$0xff] %v10428_v41  ;;  %v6298_v48 = vld [vmem:[%s10445_s20 + $0x4] ss:$8 sps:$4 sm:$0xff]   ;;  %v7097_v57 = vand.u32 15, %v109_v55  ;;  %v10448_v3 = vmov 0 }
   0xd   :  { %5498 = vset.pattern.permute.xlu0 %v6704_v2  ;;  %10411 = vst [vmem:[#allocation8_spill] sm:$0xff] %v10410_v34  ;;  %vm6956_vm11 = vmpackc.low %vm10071_vm9, %vm6948_vm10  ;;  %v7108_v63 = vand.u32 15, %v111_v58  ;;  %v10533_v39 = vmov 0  ;;  %s10664_s21 = smov 111   ;;  %s10345_s3 = smov 7  }
   0xe   :  { %88 = vperm.xlu0 %5498, %v69_v1   ;;  %v10417_v37 = vsel %vm6956_vm11, 4294967295, %v10416_v37  ;;  %vm6975_vm13 = vmand %vm10070_vm5, %vm6964_vm12 }
   0xf   :  { %10418 = vst [vmem:[#allocation9_spill] sm:$0xff] %v10417_v37  ;;  %vm6983_vm14 = vmpackc.low %vm6908_vm4, %vm6975_vm13  ;;  %vm10096_vm7 = vcmp.gt.s32.totalorder %v7108_v63, 0 }
  0x10   :  { %v10425_v40 = vsel %vm6983_vm14, 4294967295, %v10424_v40 }
  0x11   :  { %10426 = vst [vmem:[#allocation11_spill] sm:$0xff] %v10425_v40 }
  0x12   :  { %5660 = vset.pattern.permute.xlu0 %v10108_v0 }
  0x88   :  { %v6833_v9 = vpop.permute.xlu0 %72 }
  0x89   :  { %10398 = vst [vmem:[#allocation2_spill] sm:$0xff] %v6833_v9 }
  0x8d   :  { %v6850_v15 = vpop.permute.xlu0 %88 }
  0x8e   :  { %10400 = vst [vmem:[#allocation3_spill] sm:$0xff] %v6850_v15  ;;  %v6854_v16 = vsel %vm75_vm0, %v6850_v15, %v6833_v9  ;;  %v6858_v17 = vsel %vm77_vm1, %v6850_v15, %v6833_v9  ;;  %v6870_v20 = vsel %vm76_vm2, %v6850_v15, %v6833_v9  ;;  %v6887_v23 = vsel %vm78_vm3, %v6850_v15, %v6833_v9  ;;  %vm6999_vm0 = vmand %vm10071_vm9, %vm6991_vm15 }
  0x8f   :  { %10401 = vst [vmem:[#allocation4_spill] sm:$0xff] %v6854_v16  ;;  %10402 = vst [vmem:[#allocation5_spill] sm:$0xff] %v6858_v17  ;;  %v6862_v18 = vpack.i.bf16 %v6858_v17, %v6842_v12  ;;  %v6866_v19 = vpack.i.bf16 %v6854_v16, %v6847_v13  ;;  %v6883_v22 = vpack.i.bf16 %v6870_v20, %v6875_v21  ;;  %vm10073_vm2 = vcmp.lt.s32.totalorder %v6905_v28, 15 }
  0x90   :  { %10403 = vst [vmem:[#allocation6_spill] sm:$0xff] %v6870_v20  ;;  %10404 = vst [vmem:[#allocation7_spill] sm:$0xff] %v6887_v23  ;;  %v5509_v25 = vpack.i.bf16 %v6887_v23, %v6892_v24  ;;  %vm10084_vm9 = vcmp.lt.s32.totalorder %v6914_v32, 15  ;;  %v10498_v9 = vmov 0 }
  0x91   :  { %5515 = vrot.lane.b32.xlu0 %v6862_v18, %s10339_s2  ;;  %5500 = vrot.lane.b32.xlu1 %v6866_v19, %s10339_s2  ;;  %vm7009_vm1 = vmpackc.low %vm6936_vm8, %vm6999_vm0 }
  0x92   :  { %v10433_v43 = vsel %vm7009_vm1, 4294967295, %v10432_v43  ;;  %vm7029_vm3 = vmand %vm10073_vm2, %vm6908_vm4 }
  0x93   :  { %10434 = vst [vmem:[#allocation13_spill] sm:$0xff] %v10433_v43  ;;  %v10436_v44 = vsel %vm7029_vm3, 4294967295, %v10435_v44  ;;  %vm7037_vm5 = vmpackc.low %vm10073_vm2, %vm7029_vm3  ;;  %v10515_v43 = vmov 0 }
  0x94   :  { %v10438_v45 = vsel %vm7037_vm5, 4294967295, %v10437_v45  ;;  %vm7049_vm1 = vmand %vm10084_vm9, %vm6936_vm8  ;;  %vm10083_vm5 = vcmask 130048  }
  0x95   :  { %5525 = vrot.lane.b32.xlu0 %v6883_v22, %s10341_s25  ;;  %5505 = vrot.lane.b32.xlu1 %v6883_v22, %s10339_s2  ;;  %10439 = vst [vmem:[#allocation14_spill] sm:$0xff] %v10438_v45  ;;  %v10441_v46 = vsel %vm7049_vm1, 4294967295, %v10440_v46  ;;  %vm7057_vm2 = vmpackc.low %vm10084_vm9, %vm7049_vm1  ;;  %vm10088_vm9 = vcmp.gt.s32.totalorder %v7097_v57, 0  ;;  %vm10456_vm1 = vcmp.lt.s32.totalorder %v6823_v4, 17 }
  0x96   :  { %v10443_v47 = vsel %vm7057_vm2, 4294967295, %v10442_v47  ;;  %4514 = vmatprep.mubr.msk.bf16.mxu0 %vm10083_vm5, %v6298_v48  ;;  %4565 = vmatprep.mubr.msk.bf16.mxu1 %vm10083_vm5, %v6298_v48  ;;  %vm7102_vm5 = vcmp.gt.s32.totalorder %v105_v56, 0  ;;  %vm10090_vm2 = vcmp.lt.s32.totalorder %v6823_v4, 17  ;;  %vm10457_vm3 = vmmov %vm10456_vm1 }
  0x97   :  { %10444 = vst [vmem:[#allocation15_spill] sm:$0xff] %v10443_v47  ;;  %vm7115_vm14 = vmand %vm10088_vm9, %vm7102_vm5  ;;  %vm7132_vm9 = vcmp.gt.s32.totalorder %v107_v62, 0 }
  0x98   :  { %v10449_v3 = vsel %vm7115_vm14, 4294967295, %v10448_v3  ;;  %vm7128_vm11 = vmpackc.low %vm7115_vm14, %vm7115_vm14 }
  0x99   :  { %5535 = vrot.lane.b32.xlu0 %v6862_v18, %s10341_s25  ;;  %5510 = vrot.lane.b32.xlu1 %v5509_v25, %s10339_s2  ;;  %vm7145_vm14 = vmand %vm10096_vm7, %vm7132_vm9 }
  0x9a   :  { %vm10461_vm7 = vmmov %vm10456_vm1 }
  0x9d   :  { %5545 = vrot.lane.b32.xlu0 %v6883_v22, %s10328_s26  ;;  %5520 = vrot.lane.b32.xlu1 %v6866_v19, %s10341_s25 }
  0xa1   :  { %5555 = vrot.lane.b32.xlu0 %v6862_v18, %s10328_s26  ;;  %5530 = vrot.lane.b32.xlu1 %v5509_v25, %s10341_s25 }
  0xa5   :  { %5565 = vrot.lane.b32.xlu0 %v6883_v22, %s6708_s27  ;;  %5540 = vrot.lane.b32.xlu1 %v6866_v19, %s10328_s26 }
  0xa9   :  { %5575 = vrot.lane.b32.xlu0 %v6862_v18, %s6708_s27  ;;  %5550 = vrot.lane.b32.xlu1 %v5509_v25, %s10328_s26 }
  0xad   :  { %5585 = vrot.lane.b32.xlu0 %v6862_v18, %s10081_s28  ;;  %5560 = vrot.lane.b32.xlu1 %v6866_v19, %s6708_s27 }
  0xb1   :  { %5595 = vrot.lane.b32.xlu0 %v5509_v25, %s10081_s28  ;;  %5570 = vrot.lane.b32.xlu1 %v5509_v25, %s6708_s27 }
  0xb5   :  { %5605 = vrot.lane.b32.xlu0 %v6862_v18, %s10075_s29  ;;  %5580 = vrot.lane.b32.xlu1 %v6883_v22, %s10081_s28 }
  0xb9   :  { %5615 = vrot.lane.b32.xlu0 %v5509_v25, %s10075_s29  ;;  %5590 = vrot.lane.b32.xlu1 %v6866_v19, %s10081_s28 }
  0xbd   :  { %5625 = vrot.lane.b32.xlu0 %v6862_v18, %s10077_s30  ;;  %5600 = vrot.lane.b32.xlu1 %v6883_v22, %s10075_s29 }
  0xc1   :  { %5635 = vrot.lane.b32.xlu0 %v5509_v25, %s10077_s30  ;;  %5610 = vrot.lane.b32.xlu1 %v6866_v19, %s10075_s29  ;;  %s10918_s29 = smov 119  }
  0xc5   :  { %5645 = vrot.lane.b32.xlu0 %v6862_v18, %s10079_s1  ;;  %5620 = vrot.lane.b32.xlu1 %v6883_v22, %s10077_s30  ;;  %v10450_v18 = vmov 0 }
  0xc6   :  { %v10451_v18 = vsel %vm7128_vm11, 4294967295, %v10450_v18 }
  0xc9   :  { %5655 = vrot.lane.b32.xlu0 %v5509_v25, %s10079_s1  ;;  %5630 = vrot.lane.b32.xlu1 %v6866_v19, %s10077_s30  ;;  %s6718_s30 = smov 120  }
  0xcd   :  { %5640 = vrot.lane.b32.xlu1 %v6883_v22, %s10079_s1  ;;  %531 = vperm.xlu0 %5660, %v519_v50  }
  0xd1   :  { %5650 = vrot.lane.b32.xlu1 %v6866_v19, %s10079_s1  ;;  %546 = vperm.xlu0 %5660, %v522_v52   ;;  %v10452_v19 = vmov 0  ;;  %s10343_s1 = smov 119  }
  0xd2   :  { %v10453_v19 = vsel %vm7132_vm9, 4294967295, %v10452_v19 }
  0xd5   :  { %526 = vperm.xlu1 %5659, %v518_v49   ;;  %v10454_v49 = vmov 0 }
  0xd6   :  { %v10455_v49 = vsel %vm7145_vm14, 4294967295, %v10454_v49 }
  0xd9   :  { %536 = vperm.xlu1 %5659, %v520_v51  }
  0xdd   :  { %541 = vperm.xlu1 %5659, %v521_v53  }
  0xe1   :  { %551 = vperm.xlu1 %5659, %v523_v54   ;;  %v10459_v54 = vmov 0 }
 0x103   :  { %v5516_v59 = vpop.permute.xlu0 %5515  ;;  %v5501_v60 = vpop.permute.xlu1 %5500 }
 0x104   :  { %v5503_v5 = vunpack.i.h.bf16 %v5501_v60  ;;  %v5502_v7 = vunpack.i.l.bf16 %v5501_v60  ;;  %v5517_v22 = vunpack.i.l.bf16 %v5516_v59  ;;  %v5518_v29 = vunpack.i.h.bf16 %v5516_v59 }
 0x107   :  { %v5526_v1 = vpop.permute.xlu0 %5525  ;;  %v5506_v2 = vpop.permute.xlu1 %5505 }
 0x108   :  { %v5508_v8 = vunpack.i.h.bf16 %v5506_v2  ;;  %v5507_v11 = vunpack.i.l.bf16 %v5506_v2 }
 0x10a   :  { %v153_v10 = vsel %vm10090_vm2, %v5502_v7, %v5507_v11  ;;  %v7123_v14 = vsel %vm10090_vm2, %v5503_v5, %v5508_v8  ;;  %v151_v50 = vsel %vm10456_vm1, %v5507_v11, %v5517_v22  ;;  %vm10458_vm2 = vmmov %vm10456_vm1  ;;  %v7166_v55 = vsel %vm10461_vm7, %v5508_v8, %v5518_v29 }
 0x10b   :  { %v5536_v25 = vpop.permute.xlu0 %5535  ;;  %v5511_v26 = vpop.permute.xlu1 %5510  ;;  %v4467_v27 = vpack.c.bf16 %v7123_v14, %v153_v10  ;;  %10462 = vst [vmem:[#allocation16_spill] sm:$0xff] %v7166_v55  ;;  %v5527_v11 = vunpack.i.l.bf16 %v5526_v1  ;;  %v10464_v8 = vmov 0  ;;  %vm7188_vm7 = vmpackc.low %vm6948_vm10, %vm6948_vm10 }
 0x10c   :  { %v5513_v31 = vunpack.i.h.bf16 %v5511_v26  ;;  %v5512_v48 = vunpack.i.l.bf16 %v5511_v26  ;;  %v5538_v51 = vunpack.i.h.bf16 %v5536_v25  ;;  %v5537_v58 = vunpack.i.l.bf16 %v5536_v25 }
 0x10d   :  { %4468 = vmatprep.subr.msk.bf16.mxu0 %vm7128_vm11, %v4467_v27  ;;  %vm7160_vm11 = vmpackc.low %vm6924_vm6, %vm6924_vm6  ;;  %v10466_v25 = vmov 0 }
 0x10e   :  { %v155_v52 = vsel %vm10457_vm3, %v5512_v48, %v5502_v7  ;;  %v7155_v53 = vsel %vm10458_vm2, %v5513_v31, %v5503_v5  ;;  %v10460_v54 = vsel %vm7160_vm11, 4294967295, %v10459_v54  ;;  %v149_v5 = vsel %vm10456_vm1, %v5517_v22, %v5512_v48  ;;  %vm10463_vm2 = vmmov %vm10456_vm1 }
 0x10f   :  { %v5546_v59 = vpop.permute.xlu0 %5545  ;;  %v5521_v60 = vpop.permute.xlu1 %5520  ;;  %v4470_v2 = vpack.c.bf16 %v7155_v53, %v155_v52  ;;  %v7173_v33 = vsel %vm10463_vm2, %v5518_v29, %v5513_v31  ;;  %v5528_v7 = vunpack.i.h.bf16 %v5526_v1  ;;  %vm7178_vm6 = vmpackc.low %vm7145_vm14, %vm7145_vm14  ;;  %v10467_v25 = vsel %vm7188_vm7, 4294967295, %v10466_v25 }
 0x110   :  { %v5523_v10 = vunpack.i.h.bf16 %v5521_v60  ;;  %v5522_v26 = vunpack.i.l.bf16 %v5521_v60  ;;  %v10465_v8 = vsel %vm7178_vm6, 4294967295, %v10464_v8  ;;  %v4518_v22 = vpack.c.bf16 %v7173_v33, %v149_v5  ;;  %10468 = vst [vmem:[#allocation17_spill] sm:$0xff] %v10467_v25 }
 0x111   :  { %4471 = vmatpush1.bf16.msk.msra.mxu0 %vm7160_vm11, %v4470_v2  ;;  %vm10469_vm3 = vcmp.lt.s32.totalorder %v6823_v4, 16  ;;  %v4521_v29 = vpack.c.bf16 %v7166_v55, %v151_v50  ;;  %vm10472_vm2 = vcmp.gt.s32.totalorder %v7097_v57, 0  ;;  %v10473_v31 = vmov 0 }
 0x112   :  { %v7194_v1 = vsel %vm10469_vm3, %v5523_v10, %v5528_v7  ;;  %vm10471_vm1 = vmmov %vm10469_vm3  ;;  %4519 = vmatprep.subr.msk.bf16.mxu1 %vm7178_vm6, %v4518_v22  ;;  %vm7219_vm3 = vcmp.lt.s32.totalorder %v105_v56, 15 }
 0x113   :  { %10470 = vst [vmem:[#allocation18_spill] sm:$0xff] %v7194_v1  ;;  %v198_v27 = vsel %vm10471_vm1, %v5522_v26, %v5527_v11  ;;  %vm7202_vm11 = vmpackc.low %vm10472_vm2, %vm10472_vm2  ;;  %v5556_v52 = vpop.permute.xlu0 %5555  ;;  %v5531_v60 = vpop.permute.xlu1 %5530  ;;  %4522 = vmatpush1.bf16.msk.msra.mxu1 %vm7188_vm7, %v4521_v29  ;;  %v10491_v29 = vmov 0 }
 0x114   :  { %v10474_v31 = vsel %vm7202_vm11, 4294967295, %v10473_v31  ;;  %vm10476_vm10 = vmmov %vm10471_vm1  ;;  %v4473_v50 = vpack.c.bf16 %v7194_v1, %v198_v27  ;;  %v5533_v2 = vunpack.i.h.bf16 %v5531_v60  ;;  %v5532_v5 = vunpack.i.l.bf16 %v5531_v60 }
 0x115   :  { %10475 = vst [vmem:[#allocation19_spill] sm:$0xff] %v10474_v31  ;;  %v196_v36 = vsel %vm10476_vm10, %v5527_v11, %v5537_v58  ;;  %vm10477_vm14 = vmmov %vm10471_vm1  ;;  %vm10481_vm1 = vcmp.gt.s32.totalorder %v7108_v63, 0  ;;  %vm7233_vm10 = vcmp.lt.s32.totalorder %v107_v62, 15  ;;  %v5558_v6 = vunpack.i.h.bf16 %v5556_v52 }
 0x116   :  { %v7210_v48 = vsel %vm10477_vm14, %v5528_v7, %v5538_v51  ;;  %4474 = vmatprep.subr.msk.bf16.mxu0 %vm7202_vm11, %v4473_v50  ;;  %vm7229_vm2 = vmpackc.low %vm10481_vm1, %vm10481_vm1  ;;  %v10482_v7 = vmov 0  ;;  %vm10490_vm11 = vcmp.gt.s32.totalorder %v6914_v32, 0  ;;  %v5557_v60 = vunpack.i.l.bf16 %v5556_v52 }
 0x117   :  { %10478 = vst [vmem:[#allocation20_spill] sm:$0xff] %v7210_v48  ;;  %v10483_v7 = vsel %vm7229_vm2, 4294967295, %v10482_v7  ;;  %vm10487_vm7 = vmmov %vm10477_vm14  ;;  %v4527_v62 = vpack.c.bf16 %v7210_v48, %v196_v36  ;;  %v5566_v0 = vpop.permute.xlu0 %5565  ;;  %v5541_v15 = vpop.permute.xlu1 %5540  ;;  %v5548_v36 = vunpack.i.h.bf16 %v5546_v59  ;;  %v5547_v52 = vunpack.i.l.bf16 %v5546_v59 }
 0x118   :  { %10484 = vst [vmem:[#allocation21_spill] sm:$0xff] %v10483_v7  ;;  %v7239_v56 = vsel %vm10487_vm7, %v5538_v51, %v5533_v2  ;;  %vm10489_vm14 = vmmov %vm10487_vm7  ;;  %v5543_v47 = vunpack.i.h.bf16 %v5541_v15 }
 0x119   :  { %10488 = vst [vmem:[#allocation22_spill] sm:$0xff] %v7239_v56  ;;  %v194_v27 = vsel %vm10489_vm14, %v5537_v58, %v5532_v5  ;;  %vm7246_vm6 = vmpackc.low %vm10490_vm11, %vm10490_vm11  ;;  %vm10497_vm11 = vcmp.gt.s32.totalorder %v7097_v57, 0  ;;  %vm10501_vm14 = vcmp.gt.s32.totalorder %v6905_v28, 0 }
 0x11a   :  { %v10492_v29 = vsel %vm7246_vm6, 4294967295, %v10491_v29  ;;  %vm10494_vm1 = vmmov %vm10487_vm7  ;;  %v4524_v58 = vpack.c.bf16 %v7239_v56, %v194_v27 }
 0x11b   :  { %10493 = vst [vmem:[#allocation23_spill] sm:$0xff] %v10492_v29  ;;  %v200_v50 = vsel %vm10494_vm1, %v5532_v5, %v5522_v26  ;;  %vm10495_vm15 = vmmov %vm10494_vm1  ;;  %v5542_v26 = vunpack.i.l.bf16 %v5541_v15  ;;  %vm10505_vm1 = vcmp.lt.s32.totalorder %v6823_v4, 15  ;;  %v10508_v15 = vmov 0  ;;  %v5551_v45 = vpop.permute.xlu1 %5550 }
 0x11c   :  { %v7255_v51 = vsel %vm10495_vm15, %v5533_v2, %v5523_v10  ;;  %vm7262_vm7 = vmand %vm10497_vm11, %vm7219_vm3  ;;  %v10502_v10 = vmov 0  ;;  %4525 = vmatprep.subr.msk.bf16.mxu1 %vm7229_vm2, %v4524_v58  ;;  %v7278_v5 = vsel %vm10505_vm1, %v5543_v47, %v5548_v36  ;;  %v5576_v58 = vpop.permute.xlu0 %5575  ;;  %v5552_v40 = vunpack.i.l.bf16 %v5551_v45 }
 0x11d   :  { %10496 = vst [vmem:[#allocation24_spill] sm:$0xff] %v7255_v51  ;;  %v10499_v9 = vsel %vm7262_vm7, 4294967295, %v10498_v9  ;;  %vm7269_vm15 = vmpackc.low %vm10501_vm14, %vm10501_vm14  ;;  %v4476_v2 = vpack.c.bf16 %v7255_v51, %v200_v50  ;;  %4528 = vmatpush1.bf16.msk.msra.mxu1 %vm7246_vm6, %v4527_v62 }
 0x11e   :  { %10500 = vst [vmem:[#allocation25_spill] sm:$0xff] %v10499_v9  ;;  %v10503_v10 = vsel %vm7269_vm15, 4294967295, %v10502_v10  ;;  %10506 = vst [vmem:[#allocation27_spill] sm:$0xff] %v7278_v5  ;;  %v5567_v9 = vunpack.i.l.bf16 %v5566_v0 }
 0x11f   :  { %10504 = vst [vmem:[#allocation26_spill] sm:$0xff] %v10503_v10  ;;  %vm10507_vm11 = vmmov %vm10505_vm1  ;;  %4477 = vmatpush1.bf16.msk.msra.mxu0 %vm7269_vm15, %v4476_v2 }
 0x120   :  { %v239_v59 = vsel %vm10507_vm11, %v5542_v26, %v5547_v52  ;;  %vm7287_vm14 = vmpackc.low %vm7262_vm7, %vm7262_vm7  ;;  %v7330_v29 = vpop.permute.xlu0 %5585 }
 0x121   :  { %v10509_v15 = vsel %vm7287_vm14, 4294967295, %v10508_v15  ;;  %vm10511_vm12 = vmmov %vm10505_vm1  ;;  %v4479_v62 = vpack.c.bf16 %v7278_v5, %v239_v59  ;;  %v10520_v5 = vmov 0 }
 0x122   :  { %10510 = vst [vmem:[#allocation28_spill] sm:$0xff] %v10509_v15  ;;  %v237_v27 = vsel %vm10511_vm12, %v5547_v52, %v5557_v60  ;;  %vm10512_vm2 = vmmov %vm10505_vm1  ;;  %vm10514_vm1 = vcmp.gt.s32.totalorder %v7108_v63, 0  ;;  %v5553_v52 = vunpack.i.h.bf16 %v5551_v45  ;;  %v10526_v15 = vmov 0 }
 0x123   :  { %v7295_v50 = vsel %vm10512_vm2, %v5548_v36, %v5558_v6  ;;  %vm7304_vm11 = vmand %vm10514_vm1, %vm7233_vm10  ;;  %4480 = vmatprep.subr.msk.bf16.mxu0 %vm7287_vm14, %v4479_v62  ;;  %v5568_v36 = vunpack.i.h.bf16 %v5566_v0  ;;  %v235_v59 = vsel %vm10512_vm2, %v5557_v60, %v5552_v40  ;;  %v5561_v60 = vpop.permute.xlu1 %5560  ;;  %v5578_v0 = vunpack.i.h.bf16 %v5576_v58 }
 0x124   :  { %10513 = vst [vmem:[#allocation29_spill] sm:$0xff] %v7295_v50  ;;  %v10516_v43 = vsel %vm7304_vm11, 4294967295, %v10515_v43  ;;  %vm10518_vm12 = vmmov %vm10512_vm2  ;;  %v4533_v45 = vpack.c.bf16 %v7295_v50, %v237_v27  ;;  %v5577_v27 = vunpack.i.l.bf16 %v5576_v58  ;;  %v5563_v50 = vunpack.i.h.bf16 %v5561_v60 }
 0x125   :  { %10517 = vst [vmem:[#allocation30_spill] sm:$0xff] %v10516_v43  ;;  %v7312_v2 = vsel %vm10518_vm12, %v5558_v6, %v5553_v52  ;;  %vm7319_vm1 = vmpackc.low %vm7304_vm11, %vm7304_vm11  ;;  %vm10189_vm11 = vcmp.lt.s32.totalorder %v7108_v63, 15 }
 0x126   :  { %10519 = vst [vmem:[#allocation31_spill] sm:$0xff] %v7312_v2  ;;  %v10521_v5 = vsel %vm7319_vm1, 4294967295, %v10520_v5  ;;  %vm10523_vm7 = vmmov %vm10512_vm2  ;;  %v4530_v43 = vpack.c.bf16 %v7312_v2, %v235_v59 }
 0x127   :  { %10522 = vst [vmem:[#allocation32_spill] sm:$0xff] %v10521_v5  ;;  %v241_v62 = vsel %vm10523_vm7, %v5552_v40, %v5542_v26  ;;  %vm10524_vm6 = vmmov %vm10512_vm2  ;;  %v5562_v40 = vunpack.i.l.bf16 %v5561_v60  ;;  %vm10143_vm7 = vcmp.lt.s32.totalorder %v6823_v4, 1 }
 0x128   :  { %v7328_v6 = vsel %vm10524_vm6, %v5553_v52, %v5543_v47  ;;  %vm7336_vm12 = vmpackc.low %vm6999_vm0, %vm6999_vm0  ;;  %v10529_v47 = vmov 0  ;;  %4531 = vmatprep.subr.msk.bf16.mxu1 %vm7319_vm1, %v4530_v43  ;;  %v7353_v26 = vsel %vm10143_vm7, %v5563_v50, %v5568_v36  ;;  %v5596_v43 = vpop.permute.xlu0 %5595  ;;  %v5571_v52 = vpop.permute.xlu1 %5570 }
 0x129   :  { %10525 = vst [vmem:[#allocation33_spill] sm:$0xff] %v7328_v6  ;;  %v10527_v15 = vsel %vm7336_vm12, 4294967295, %v10526_v15  ;;  %vm7343_vm6 = vmpackc.low %vm6975_vm13, %vm6975_vm13  ;;  %v4482_v42 = vpack.c.bf16 %v7328_v6, %v241_v62  ;;  %v284_v58 = vsel %vm10143_vm7, %v5562_v40, %v5567_v9  ;;  %4534 = vmatpush1.bf16.msk.msra.mxu1 %vm7336_vm12, %v4533_v45  ;;  %v282_v62 = vsel %vm10143_vm7, %v5567_v9, %v5577_v27 }
 0x12a   :  { %10528 = vst [vmem:[#allocation34_spill] sm:$0xff] %v10527_v15  ;;  %v10530_v47 = vsel %vm7343_vm6, 4294967295, %v10529_v47  ;;  %10532 = vst [vmem:[#allocation36_spill] sm:$0xff] %v7353_v26  ;;  %v4485_v59 = vpack.c.bf16 %v7353_v26, %v284_v58  ;;  %v7373_v45 = vsel %vm10143_vm7, %v5568_v36, %v5578_v0  ;;  %v5573_v60 = vunpack.i.h.bf16 %v5571_v52 }
 0x12b   :  { %10531 = vst [vmem:[#allocation35_spill] sm:$0xff] %v10530_v47  ;;  %vm7362_vm13 = vmpackc.low %vm7102_vm5, %vm7102_vm5  ;;  %4483 = vmatpush1.bf16.msk.msra.mxu0 %vm7343_vm6, %v4482_v42  ;;  %v5572_v6 = vunpack.i.l.bf16 %v5571_v52  ;;  %v10538_v9 = vmov 0  ;;  %vm10564_vm6 = vcmp.lt.s32.totalorder %v7097_v57, 15 }
 0x12c   :  { %v10534_v39 = vsel %vm7362_vm13, 4294967295, %v10533_v39  ;;  %10536 = vst [vmem:[#allocation38_spill] sm:$0xff] %v7373_v45  ;;  %4486 = vmatprep.subr.msk.bf16.mxu0 %vm7362_vm13, %v4485_v59  ;;  %v7379_v15 = vsel %vm10143_vm7, %v5578_v0, %v5573_v60  ;;  %vm7386_vm0 = vmpackc.low %vm7132_vm9, %vm7132_vm9  ;;  %v7394_v58 = vsel %vm10143_vm7, %v5573_v60, %v5563_v50  ;;  %v7396_v52 = vpop.permute.xlu0 %5605  ;;  %v5581_v0 = vpop.permute.xlu1 %5580 }
 0x12d   :  { %10535 = vst [vmem:[#allocation37_spill] sm:$0xff] %v10534_v39  ;;  %10537 = vst [vmem:[#allocation39_spill] sm:$0xff] %v7379_v15  ;;  %v280_v42 = vsel %vm10143_vm7, %v5577_v27, %v5572_v6  ;;  %v10539_v9 = vsel %vm7386_vm0, 4294967295, %v10538_v9  ;;  %v286_v36 = vsel %vm10143_vm7, %v5572_v6, %v5562_v40  ;;  %v10542_v27 = vmov 0 }
 0x12e   :  { %10540 = vst [vmem:[#allocation40_spill] sm:$0xff] %v10539_v9  ;;  %10541 = vst [vmem:[#allocation41_spill] sm:$0xff] %v7394_v58  ;;  %v4536_v59 = vpack.c.bf16 %v7379_v15, %v280_v42  ;;  %v4539_v39 = vpack.c.bf16 %v7373_v45, %v282_v62  ;;  %v5588_v6 = vunpack.i.h.bf16 %v7330_v29  ;;  %v5587_v40 = vunpack.i.l.bf16 %v7330_v29 }
 0x12f   :  { %vm7402_vm2 = vmpackc.low %vm6936_vm8, %vm6936_vm8  ;;  %v5583_v50 = vunpack.i.h.bf16 %v5581_v0  ;;  %v5582_v60 = vunpack.i.l.bf16 %v5581_v0  ;;  %v10545_v42 = vmov 0  ;;  %vm10154_vm8 = vcmp.lt.s32.totalorder %v6823_v4, 127 }
 0x130   :  { %v10543_v27 = vsel %vm7402_vm2, 4294967295, %v10542_v27  ;;  %vm7412_vm7 = vmpackc.low %vm6908_vm4, %vm6908_vm4  ;;  %v4488_v35 = vpack.c.bf16 %v7394_v58, %v286_v36  ;;  %4537 = vmatprep.subr.msk.bf16.mxu1 %vm7386_vm0, %v4536_v59  ;;  %v495_v62 = vpack.c.bf16 %v6887_v23, %v6892_v24  ;;  %v493_v0 = vpack.c.bf16 %v6870_v20, %v6875_v21  ;;  %v5616_v59 = vpop.permute.xlu0 %5615  ;;  %v5591_v24 = vpop.permute.xlu1 %5590 }
 0x131   :  { %10544 = vst [vmem:[#allocation42_spill] sm:$0xff] %v10543_v27  ;;  %v10546_v42 = vsel %vm7412_vm7, 4294967295, %v10545_v42  ;;  %v7424_v29 = vsel %vm10154_vm8, %v5583_v50, %v5588_v6  ;;  %v323_v30 = vsel %vm10154_vm8, %v5582_v60, %v5587_v40  ;;  %4540 = vmatpush1.bf16.msk.msra.mxu1 %vm7402_vm2, %v4539_v39  ;;  %v5598_v36 = vunpack.i.h.bf16 %v5596_v43  ;;  %vm7443_vm8 = vmpackc.low %vm7219_vm3, %vm7219_vm3 }
 0x132   :  { %10547 = vst [vmem:[#allocation43_spill] sm:$0xff] %v10546_v42  ;;  %10548 = vst [vmem:[#allocation44_spill] sm:$0xff] %v7424_v29  ;;  %v5597_v15 = vunpack.i.l.bf16 %v5596_v43  ;;  %4489 = vmatpush1.bf16.msk.msra.mxu0 %vm7412_vm7, %v4488_v35  ;;  %662 = vmatprep.subr.bf16.mxu1 %v495_v62  ;;  %v494_v23 = vpack.c.bf16 %v6858_v17, %v6842_v12  ;;  %v5593_v9 = vunpack.i.h.bf16 %v5591_v24  ;;  %v5592_v45 = vunpack.i.l.bf16 %v5591_v24 }
 0x133   :  { %599 = vmatprep.subr.bf16.mxu0 %v493_v0  ;;  %v4491_v58 = vpack.c.bf16 %v7424_v29, %v323_v30  ;;  %v492_v21 = vpack.c.bf16 %v6854_v16, %v6847_v13  ;;  %v10549_v39 = vmov 0  ;;  %vm10552_vm2 = vcmp.lt.s32.totalorder %v6823_v4, 127 }
 0x134   :  { %v10550_v39 = vsel %vm7443_vm8, 4294967295, %v10549_v39  ;;  %v7449_v12 = vsel %vm10552_vm2, %v5598_v36, %v5593_v9  ;;  %vm10554_vm7 = vmmov %vm10552_vm2  ;;  %vm10555_vm4 = vnez %v10420_v38  ;;  %v10556_v13 = vmov 0  ;;  %v5601_v0 = vpop.permute.xlu1 %5600 }
 0x135   :  { %10551 = vst [vmem:[#allocation45_spill] sm:$0xff] %v10550_v39  ;;  %10553 = vst [vmem:[#allocation46_spill] sm:$0xff] %v7449_v12  ;;  %v325_v43 = vsel %vm10554_vm7, %v5592_v45, %v5582_v60  ;;  %663 = vmatpush1.bf16.msra.mxu1 %v494_v23  ;;  %v7468_v30 = vsel %vm10552_vm2, %v5593_v9, %v5583_v50  ;;  %v7472_v60 = vpop.permute.xlu0 %5625  ;;  %v5607_v9 = vunpack.i.l.bf16 %v7396_v52  ;;  %v10568_v50 = vmov 0 }
 0x136   :  { %vm7456_vm0 = vmpackc.low %vm10555_vm4, %vm10555_vm4  ;;  %10562 = vst [vmem:[#allocation49_spill] sm:$0xff] %v7468_v30  ;;  %600 = vmatpush1.bf16.msra.mxu0 %v492_v21  ;;  %v5617_v39 = vunpack.i.l.bf16 %v5616_v59 }
 0x137   :  { %v10557_v13 = vsel %vm7456_vm0, 4294967295, %v10556_v13  ;;  %vm10559_vm13 = vmmov %vm10552_vm2  ;;  %4492 = vmatprep.subr.msk.bf16.mxu0 %vm7443_vm8, %v4491_v58  ;;  %v10572_v58 = vmov 0 }
 0x138   :  { %10558 = vst [vmem:[#allocation47_spill] sm:$0xff] %v10557_v13  ;;  %v321_v35 = vsel %vm10559_vm13, %v5587_v40, %v5597_v15  ;;  %vm10560_vm12 = vmmov %vm10552_vm2  ;;  %v10565_v40 = vmov 0 }
 0x139   :  { %v7464_v62 = vsel %vm10560_vm12, %v5588_v6, %v5598_v36  ;;  %vm10563_vm7 = vmmov %vm10552_vm2  ;;  %v5608_v6 = vunpack.i.h.bf16 %v7396_v52  ;;  %v4494_v36 = vpack.c.bf16 %v7468_v30, %v325_v43  ;;  %vm10571_vm2 = vnez %v10428_v41  ;;  %v5636_v30 = vpop.permute.xlu0 %5635 }
 0x13a   :  { %10561 = vst [vmem:[#allocation48_spill] sm:$0xff] %v7464_v62  ;;  %v327_v23 = vsel %vm10563_vm7, %v5597_v15, %v5592_v45  ;;  %vm7478_vm13 = vmand %vm10564_vm6, %vm7102_vm5  ;;  %v5603_v15 = vunpack.i.h.bf16 %v5601_v0  ;;  %v5602_v45 = vunpack.i.l.bf16 %v5601_v0  ;;  %vm10179_vm6 = vcmp.lt.s32.totalorder %v6823_v4, 113 }
 0x13b   :  { %v10566_v40 = vsel %vm7478_vm13, 4294967295, %v10565_v40  ;;  %vm7489_vm12 = vmpackc.low %vm7233_vm10, %vm7233_vm10  ;;  %v4542_v24 = vpack.c.bf16 %v7449_v12, %v327_v23  ;;  %v4545_v0 = vpack.c.bf16 %v7464_v62, %v321_v35  ;;  %v10576_v43 = vmov 0  ;;  %4495 = vmatpush1.bf16.msk.msra.mxu0 %vm7456_vm0, %v4494_v36  ;;  %v5611_v12 = vpop.permute.xlu1 %5610 }
 0x13c   :  { %10567 = vst [vmem:[#allocation50_spill] sm:$0xff] %v10566_v40  ;;  %v10569_v50 = vsel %vm7489_vm12, 4294967295, %v10568_v50  ;;  %vm7499_vm7 = vmpackc.low %vm10571_vm2, %vm10571_vm2  ;;  %v7505_v52 = vsel %vm10179_vm6, %v5603_v15, %v5608_v6  ;;  %v364_v21 = vsel %vm10179_vm6, %v5602_v45, %v5607_v9  ;;  %v5618_v23 = vunpack.i.h.bf16 %v5616_v59 }
 0x13d   :  { %10570 = vst [vmem:[#allocation51_spill] sm:$0xff] %v10569_v50  ;;  %v10573_v58 = vsel %vm7499_vm7, 4294967295, %v10572_v58  ;;  %10575 = vst [vmem:[#allocation53_spill] sm:$0xff] %v7505_v52  ;;  %4543 = vmatprep.subr.msk.bf16.mxu1 %vm7489_vm12, %v4542_v24  ;;  %v4497_v35 = vpack.c.bf16 %v7505_v52, %v364_v21  ;;  %v5613_v40 = vunpack.i.h.bf16 %v5611_v12  ;;  %v5612_v62 = vunpack.i.l.bf16 %v5611_v12 }
 0x13e   :  { %10574 = vst [vmem:[#allocation52_spill] sm:$0xff] %v10573_v58  ;;  %vm7513_vm8 = vmpackc.low %vm7478_vm13, %vm7478_vm13  ;;  %4546 = vmatpush1.bf16.msk.msra.mxu1 %vm7499_vm7, %v4545_v0  ;;  %v10579_v59 = vmov 0  ;;  %vm10582_vm13 = vcmp.lt.s32.totalorder %v6823_v4, 113 }
 0x13f   :  { %v10577_v43 = vsel %vm7513_vm8, 4294967295, %v10576_v43  ;;  %4498 = vmatprep.subr.msk.bf16.mxu0 %vm7513_vm8, %v4497_v35  ;;  %vm7531_vm6 = vmand %vm10189_vm11, %vm7132_vm9  ;;  %v7537_v36 = vsel %vm10582_vm13, %v5618_v23, %v5613_v40  ;;  %v5621_v52 = vpop.permute.xlu1 %5620 }
 0x140   :  { %10578 = vst [vmem:[#allocation54_spill] sm:$0xff] %v10577_v43  ;;  %v10580_v59 = vsel %vm7531_vm6, 4294967295, %v10579_v59  ;;  %10583 = vst [vmem:[#allocation56_spill] sm:$0xff] %v7537_v36  ;;  %v5623_v43 = vunpack.i.h.bf16 %v5621_v52  ;;  %v5622_v58 = vunpack.i.l.bf16 %v5621_v52 }
 0x141   :  { %10581 = vst [vmem:[#allocation55_spill] sm:$0xff] %v10580_v59  ;;  %vm10584_vm0 = vmmov %vm10582_vm13  ;;  %vm10591_vm13 = vnez %v10436_v44  ;;  %v5637_v44 = vunpack.i.l.bf16 %v5636_v30 }
 0x142   :  { %v366_v24 = vsel %vm10584_vm0, %v5612_v62, %v5602_v45  ;;  %vm10585_vm7 = vmmov %vm10584_vm0  ;;  %v10592_v45 = vmov 0 }
 0x143   :  { %v362_v12 = vsel %vm10585_vm7, %v5607_v9, %v5617_v39  ;;  %vm10586_vm8 = vmmov %vm10584_vm0  ;;  %v5628_v9 = vunpack.i.h.bf16 %v7472_v60  ;;  %vm10603_vm7 = vcmp.lt.s32.totalorder %v7097_v57, 15 }
 0x144   :  { %v7545_v21 = vsel %vm10586_vm8, %v5608_v6, %v5618_v23  ;;  %vm10588_vm12 = vmmov %vm10584_vm0  ;;  %v5627_v6 = vunpack.i.l.bf16 %v7472_v60  ;;  %v5646_v23 = vpop.permute.xlu0 %5645  ;;  %vm10598_vm8 = vnez %v10441_v46  ;;  %v10599_v60 = vmov 0 }
 0x145   :  { %10587 = vst [vmem:[#allocation57_spill] sm:$0xff] %v7545_v21  ;;  %v7549_v0 = vsel %vm10588_vm12, %v5613_v40, %v5603_v15  ;;  %vm10590_vm11 = vmmov %vm10584_vm0  ;;  %v5638_v15 = vunpack.i.h.bf16 %v5636_v30  ;;  %v4551_v13 = vpack.c.bf16 %v7545_v21, %v362_v12  ;;  %v10604_v46 = vmov 0  ;;  %v5631_v30 = vpop.permute.xlu1 %5630 }
 0x146   :  { %10589 = vst [vmem:[#allocation58_spill] sm:$0xff] %v7549_v0  ;;  %v368_v35 = vsel %vm10590_vm11, %v5617_v39, %v5612_v62  ;;  %vm7556_vm9 = vmpackc.low %vm10591_vm13, %vm10591_vm13  ;;  %v10595_v39 = vmov 0  ;;  %vm10220_vm11 = vcmp.lt.s32.totalorder %v6823_v4, 112  ;;  %v4500_v62 = vpack.c.bf16 %v7549_v0, %v366_v24 }
 0x147   :  { %v10593_v45 = vsel %vm7556_vm9, 4294967295, %v10592_v45  ;;  %vm7565_vm0 = vmpackc.low %vm7531_vm6, %vm7531_vm6  ;;  %v4548_v40 = vpack.c.bf16 %v7537_v36, %v368_v35  ;;  %v7581_v52 = vsel %vm10220_vm11, %v5623_v43, %v5628_v9  ;;  %v409_v59 = vsel %vm10220_vm11, %v5622_v58, %v5627_v6 }
 0x148   :  { %10594 = vst [vmem:[#allocation59_spill] sm:$0xff] %v10593_v45  ;;  %v10596_v39 = vsel %vm7565_vm0, 4294967295, %v10595_v39  ;;  %vm7575_vm12 = vmpackc.low %vm10598_vm8, %vm10598_vm8  ;;  %4501 = vmatpush1.bf16.msk.msra.mxu0 %vm7556_vm9, %v4500_v62  ;;  %v4503_v24 = vpack.c.bf16 %v7581_v52, %v409_v59  ;;  %v5633_v12 = vunpack.i.h.bf16 %v5631_v30  ;;  %v5632_v35 = vunpack.i.l.bf16 %v5631_v30 }
 0x149   :  { %10597 = vst [vmem:[#allocation60_spill] sm:$0xff] %v10596_v39  ;;  %v10600_v60 = vsel %vm7575_vm12, 4294967295, %v10599_v60  ;;  %10602 = vst [vmem:[#allocation62_spill] sm:$0xff] %v7581_v52  ;;  %4549 = vmatprep.subr.msk.bf16.mxu1 %vm7565_vm0, %v4548_v40  ;;  %vm10607_vm8 = vcmp.lt.s32.totalorder %v6905_v28, 15  ;;  %v10608_v21 = vmov 0  ;;  %v407_v62 = vsel %vm10220_vm11, %v5627_v6, %v5637_v44  ;;  %v5656_v40 = vpop.permute.xlu0 %5655 }
 0x14a   :  { %10601 = vst [vmem:[#allocation61_spill] sm:$0xff] %v10600_v60  ;;  %vm7589_vm13 = vmpackc.low %vm10603_vm7, %vm10603_vm7  ;;  %4552 = vmatpush1.bf16.msk.msra.mxu1 %vm7575_vm12, %v4551_v13  ;;  %vm10611_vm9 = vcmp.lt.s32.totalorder %v7097_v57, 15  ;;  %v10612_v13 = vmov 0  ;;  %v7621_v59 = vsel %vm10220_vm11, %v5628_v9, %v5638_v15  ;;  %v7625_v30 = vsel %vm10220_vm11, %v5638_v15, %v5633_v12  ;;  %v5641_v15 = vpop.permute.xlu1 %5640 }
 0x14b   :  { %v10605_v46 = vsel %vm7589_vm13, 4294967295, %v10604_v46  ;;  %vm7603_vm7 = vmpackc.low %vm10607_vm8, %vm10607_vm8  ;;  %4504 = vmatprep.subr.msk.bf16.mxu0 %vm7589_vm13, %v4503_v24  ;;  %10615 = vst [vmem:[#allocation66_spill] sm:$0xff] %v7621_v59  ;;  %v411_v6 = vsel %vm10220_vm11, %v5632_v35, %v5622_v58  ;;  %v7631_v24 = vsel %vm10220_vm11, %v5633_v12, %v5623_v43  ;;  %v5648_v9 = vunpack.i.h.bf16 %v5646_v23 }
 0x14c   :  { %10606 = vst [vmem:[#allocation63_spill] sm:$0xff] %v10605_v46  ;;  %v10609_v21 = vsel %vm7603_vm7, 4294967295, %v10608_v21  ;;  %vm7615_vm12 = vmand %vm10611_vm9, %vm7219_vm3  ;;  %vm10618_vm9 = vcmp.lt.s32.totalorder %v7108_v63, 15  ;;  %v10619_v46 = vmov 0  ;;  %v413_v52 = vsel %vm10220_vm11, %v5637_v44, %v5632_v35 }
 0x14d   :  { %10610 = vst [vmem:[#allocation64_spill] sm:$0xff] %v10609_v21  ;;  %v10613_v13 = vsel %vm7615_vm12, 4294967295, %v10612_v13  ;;  %10616 = vst [vmem:[#allocation67_spill] sm:$0xff] %v7625_v30  ;;  %v4506_v60 = vpack.c.bf16 %v7631_v24, %v411_v6  ;;  %vm10622_vm13 = vcmp.lt.s32.totalorder %v6914_v32, 15  ;;  %v10623_v58 = vmov 0 }
 0x14e   :  { %10614 = vst [vmem:[#allocation65_spill] sm:$0xff] %v10613_v13  ;;  %10617 = vst [vmem:[#allocation68_spill] sm:$0xff] %v7631_v24  ;;  %v5647_v43 = vunpack.i.l.bf16 %v5646_v23  ;;  %v5643_v12 = vunpack.i.h.bf16 %v5641_v15  ;;  %v5642_v45 = vunpack.i.l.bf16 %v5641_v15  ;;  %v4554_v0 = vpack.c.bf16 %v7625_v30, %v413_v52 }
 0x14f   :  { %vm7636_vm8 = vmpackc.low %vm10618_vm9, %vm10618_vm9  ;;  %v10626_v44 = vmov 0  ;;  %vm10238_vm11 = vcmp.lt.s32.totalorder %v6823_v4, 111  ;;  %v5658_v35 = vunpack.i.h.bf16 %v5656_v40  ;;  %v5657_v6 = vunpack.i.l.bf16 %v5656_v40  ;;  %4507 = vmatpush1.bf16.msk.msra.mxu0 %vm7603_vm7, %v4506_v60  ;;  %v5651_v60 = vpop.permute.xlu1 %5650 }
 0x150   :  { %v10620_v46 = vsel %vm7636_vm8, 4294967295, %v10619_v46  ;;  %vm7646_vm0 = vmpackc.low %vm10622_vm13, %vm10622_vm13  ;;  %v4557_v23 = vpack.c.bf16 %v7621_v59, %v407_v62  ;;  %vm10629_vm13 = vcmp.lt.s32.totalorder %v6905_v28, 15  ;;  %v10630_v52 = vmov 0  ;;  %4555 = vmatprep.subr.msk.bf16.mxu1 %vm7636_vm8, %v4554_v0 }
 0x151   :  { %10621 = vst [vmem:[#allocation69_spill] sm:$0xff] %v10620_v46  ;;  %v10624_v58 = vsel %vm7646_vm0, 4294967295, %v10623_v58  ;;  %vm7654_vm9 = vmpackc.low %vm7615_vm12, %vm7615_vm12  ;;  %v450_v15 = vsel %vm10238_vm11, %v5642_v45, %v5647_v43  ;;  %v7676_v40 = vsel %vm10238_vm11, %v5643_v12, %v5648_v9  ;;  %vm10634_vm7 = vcmp.lt.s32.totalorder %v7108_v63, 15 }
 0x152   :  { %10625 = vst [vmem:[#allocation70_spill] sm:$0xff] %v10624_v58  ;;  %v10627_v44 = vsel %vm7654_vm9, 4294967295, %v10626_v44  ;;  %vm7666_vm6 = vmand %vm10629_vm13, %vm10555_vm4  ;;  %v10635_v28 = vmov 0  ;;  %4558 = vmatpush1.bf16.msk.msra.mxu1 %vm7646_vm0, %v4557_v23  ;;  %v4509_v62 = vpack.c.bf16 %v7676_v40, %v450_v15  ;;  %v5653_v21 = vunpack.i.h.bf16 %v5651_v60 }
 0x153   :  { %10628 = vst [vmem:[#allocation71_spill] sm:$0xff] %v10627_v44  ;;  %v10631_v52 = vsel %vm7666_vm6, 4294967295, %v10630_v52  ;;  %10633 = vst [vmem:[#allocation73_spill] sm:$0xff] %v7676_v40  ;;  %v5652_v0 = vunpack.i.l.bf16 %v5651_v60  ;;  %v10638_v46 = vmov 0  ;;  %v448_v59 = vsel %vm10238_vm11, %v5647_v43, %v5657_v6 }
 0x154   :  { %10632 = vst [vmem:[#allocation72_spill] sm:$0xff] %v10631_v52  ;;  %vm7682_vm12 = vmand %vm10634_vm7, %vm7233_vm10  ;;  %4510 = vmatprep.subr.msk.bf16.mxu0 %vm7654_vm9, %v4509_v62  ;;  %v10641_v23 = vmov 0  ;;  %v7709_v15 = vsel %vm10238_vm11, %v5648_v9, %v5658_v35  ;;  %v7717_v62 = vsel %vm10238_vm11, %v5653_v21, %v5643_v12  ;;  %v7721_v44 = vsel %vm10238_vm11, %v5658_v35, %v5653_v21  ;;  %v6299_v35 = vld [vmem:[%s10445_s20 + $0x14] ss:$8 sps:$4 sm:$0xff]  }
 0x155   :  { %v10636_v28 = vsel %vm7682_vm12, 4294967295, %v10635_v28  ;;  %vm7692_vm13 = vmpackc.low %vm7666_vm6, %vm7666_vm6  ;;  %10644 = vst [vmem:[#allocation77_spill] sm:$0xff] %v7709_v15  ;;  %v452_v60 = vsel %vm10238_vm11, %v5652_v0, %v5642_v45  ;;  %v454_v43 = vsel %vm10238_vm11, %v5657_v6, %v5652_v0  ;;  %vm10647_vm9 = vcmp.lt.s32.totalorder %v6914_v32, 15  ;;  %v6296_v32 = vld [vmem:[%s10445_s20] ss:$8 sps:$4 sm:$0xff]  }
 0x156   :  { %10637 = vst [vmem:[#allocation74_spill] sm:$0xff] %v10636_v28  ;;  %v10639_v46 = vsel %vm7692_vm13, 4294967295, %v10638_v46  ;;  %vm7703_vm7 = vmpackc.low %vm7682_vm12, %vm7682_vm12  ;;  %v10648_v9 = vmov 0  ;;  %v4512_v45 = vpack.c.bf16 %v7717_v62, %v452_v60  ;;  %v4560_v6 = vpack.c.bf16 %v7721_v44, %v454_v43  ;;  %v6302_v0 = vld [vmem:[%s10445_s20 + $0x24] ss:$8 sps:$4 sm:$0xff]   ;;  %v527_v43 = vpop.permute.xlu1 %526 }
 0x157   :  { %10640 = vst [vmem:[#allocation75_spill] sm:$0xff] %v10639_v46  ;;  %v10642_v23 = vsel %vm7703_vm7, 4294967295, %v10641_v23  ;;  %10645 = vst [vmem:[#allocation78_spill] sm:$0xff] %v7717_v62  ;;  %v10651_v12 = vmov 0  ;;  %v4563_v21 = vpack.c.bf16 %v7709_v15, %v448_v59  ;;  %v6301_v59 = vld [vmem:[%s10445_s20 + $0x10] ss:$8 sps:$4 sm:$0xff]   ;;  %vm10671_vm8 = vnez %v10451_v18 }
 0x158   :  { %10643 = vst [vmem:[#allocation76_spill] sm:$0xff] %v10642_v23  ;;  %10646 = vst [vmem:[#allocation79_spill] sm:$0xff] %v7721_v44  ;;  %4513 = vmatpush1.bf16.msk.msra.mxu0 %vm7692_vm13, %v4512_v45  ;;  %4561 = vmatprep.subr.msk.bf16.mxu1 %vm7703_vm7, %v4560_v6  ;;  %v6304_v60 = vld [vmem:[%s10445_s20 + $0x20] ss:$8 sps:$4 sm:$0xff]  }
 0x159   :  { %vm7727_vm0 = vmand %vm10647_vm9, %vm10571_vm2  ;;  %vm10654_vm9 = vcmask 130048  }
 0x15a   :  { %v10649_v9 = vsel %vm7727_vm0, 4294967295, %v10648_v9  ;;  %vm7736_vm12 = vmpackc.low %vm7727_vm0, %vm7727_vm0  ;;  %v537_v45 = vpop.permute.xlu1 %536 }
 0x15b   :  { %10650 = vst [vmem:[#allocation80_spill] sm:$0xff] %v10649_v9  ;;  %v10652_v12 = vsel %vm7736_vm12, 4294967295, %v10651_v12  ;;  %4564 = vmatpush1.bf16.msk.msra.mxu1 %vm7736_vm12, %v4563_v21  ;;  %624 = vmatmul.mubr.bf16.vlgmr.msra.gmra.mrb[0].mxu0 %v6296_v32  ;;  %vm10655_vm11 = vmmov %vm10654_vm9  ;;  %v532_v21 = vpop.permute.xlu0 %531 }
 0x15c   :  { %10653 = vst [vmem:[#allocation81_spill] sm:$0xff] %v10652_v12  ;;  %4515 = vmatprep.mubr.msk.bf16.mxu0 %vm10654_vm9, %v6299_v35  ;;  %vm10656_vm13 = vmmov %vm10654_vm9 }
 0x15d   :  { %vm10657_vm7 = vmmov %vm10654_vm9  ;;  %vm10667_vm9 = vcmp.lt.s32.totalorder %v6823_v4, 16 }
 0x15e   :  { %687 = vmatmul.mubr.bf16.vlgmr.msra.gmra.mrb[0].mxu1 %v6296_v32  ;;  %vm10669_vm12 = vmmov %vm10667_vm9 }
 0x15f   :  { %4566 = vmatprep.mubr.msk.bf16.mxu1 %vm10655_vm11, %v6299_v35  ;;  %vm10277_vm11 = vcmask 719872  }
 0x163   :  { %634 = vmatmul.mubr.bf16.gmra.mrb[4].mxu0 %v6301_v59 }
 0x164   :  { %4516 = vmatprep.mubr.msk.bf16.mxu0 %vm10656_vm13, %v6302_v0  ;;  %vm10665_vm13 = vcmp.lt.s32.totalorder %v6823_v4, 17 }
 0x166   :  { %697 = vmatmul.mubr.bf16.gmra.mrb[4].mxu1 %v6301_v59 }
 0x167   :  { %4567 = vmatprep.mubr.msk.bf16.mxu1 %vm10657_vm7, %v6302_v0  ;;  %vm10666_vm7 = vmmov %vm10665_vm13 }
 0x168   :  { %vm10673_vm6 = vmmov %vm10666_vm7 }
 0x16b   :  { %644 = vmatmul.mubr.bf16.gmra.mrb[8].mxu0 %v6304_v60 }
 0x16e   :  { %707 = vmatmul.mubr.bf16.gmra.mrb[8].mxu1 %v6304_v60 }
 0x22e   :  { %v625_v6 = vpop.f32.mrb[0].mxu0 }
 0x22f   :  { %v626_v32 = vadd.f32 %v625_v6, %v527_v43  ;;  %v627_v35 = vpop.f32.mrb[1].mxu0 }
 0x230   :  { %v628_v46 = vadd.f32 %v627_v35, %v527_v43  ;;  %v629_v59 = vpop.f32.mrb[2].mxu0  ;;  %v7766_v35 = vpop.permute.xlu1 %541 }
 0x231   :  { %v688_v12 = vpop.f32.mrb[0].mxu1  ;;  %v4568_v28 = vmul.f32 -1.442695, %v626_v32  ;;  %v630_v44 = vadd.f32 %v629_v59, %v532_v21  ;;  %v631_v24 = vpop.f32.mrb[3].mxu0 }
 0x232   :  { %v689_v23 = vadd.f32 %v688_v12, %v527_v43  ;;  %v690_v58 = vpop.f32.mrb[1].mxu1  ;;  %v4569_v62 = vmul.f32 -1.442695, %v628_v46  ;;  %v632_v40 = vadd.f32 %v631_v24, %v532_v21 }
 0x233   :  { %v691_v0 = vadd.f32 %v690_v58, %v527_v43  ;;  %v692_v52 = vpop.f32.mrb[2].mxu1  ;;  %6431 = vpow2.f32 %v4568_v28  ;;  %v4572_v9 = vmul.f32 -1.442695, %v630_v44 }
 0x234   :  { %v4570_v13 = vmul.f32 -1.442695, %v689_v23  ;;  %v693_v60 = vadd.f32 %v692_v52, %v532_v21  ;;  %v694_v30 = vpop.f32.mrb[3].mxu1  ;;  %6433 = vpow2.f32 %v4569_v62  ;;  %v4573_v36 = vmul.f32 -1.442695, %v632_v40  ;;  %v552_v20 = vpop.permute.xlu1 %551 }
 0x235   :  { %v4571_v15 = vmul.f32 -1.442695, %v691_v0  ;;  %v695_v6 = vadd.f32 %v694_v30, %v532_v21 }
 0x236   :  { %6435 = vpow2.f32 %v4570_v13  ;;  %v4574_v12 = vmul.f32 -1.442695, %v693_v60  ;;  %v635_v58 = vpop.f32.mrb[4].mxu0 }
 0x237   :  { %6437 = vpow2.f32 %v4572_v9  ;;  %v4575_v32 = vmul.f32 -1.442695, %v695_v6  ;;  %v636_v43 = vadd.f32 %v635_v58, %v537_v45  ;;  %v637_v46 = vpop.f32.mrb[5].mxu0 }
 0x238   :  { %6439 = vpow2.f32 %v4571_v15  ;;  %v638_v24 = vadd.f32 %v637_v46, %v537_v45  ;;  %v639_v28 = vpop.f32.mrb[6].mxu0 }
 0x239   :  { %v698_v23 = vpop.f32.mrb[4].mxu1  ;;  %6441 = vpow2.f32 %v4573_v36  ;;  %v4576_v30 = vmul.f32 -1.442695, %v636_v43  ;;  %v640_v40 = vadd.f32 %v639_v28, %v7766_v35  ;;  %v641_v62 = vpop.f32.mrb[7].mxu0 }
 0x23a   :  { %v699_v52 = vadd.f32 %v698_v23, %v537_v45  ;;  %v700_v44 = vpop.f32.mrb[5].mxu1  ;;  %6443 = vpow2.f32 %v4574_v12  ;;  %v4577_v9 = vmul.f32 -1.442695, %v638_v24 }
 0x23b   :  { %v701_v13 = vadd.f32 %v700_v44, %v537_v45  ;;  %v702_v21 = vpop.f32.mrb[6].mxu1  ;;  %6445 = vpow2.f32 %v4575_v32  ;;  %v4580_v15 = vmul.f32 -1.442695, %v640_v40 }
 0x23c   :  { %v4578_v59 = vmul.f32 -1.442695, %v699_v52  ;;  %v704_v0 = vpop.f32.mrb[7].mxu1  ;;  %6447 = vpow2.f32 %v4576_v30 }
 0x23d   :  { %6449 = vpow2.f32 %v4577_v9  ;;  %v6432_v60 = vpop.eup %6431  ;;  %v4579_v36 = vmul.f32 -1.442695, %v701_v13 }
 0x23e   :  { %6451 = vpow2.f32 %v4578_v59  ;;  %v6434_v6 = vpop.eup %6433  ;;  %v741_v58 = vadd.f32 1.0, %v6432_v60  ;;  %v645_v46 = vpop.f32.mrb[8].mxu0 }
 0x23f   :  { %v742_v43 = vadd.f32 1.0, %v6434_v6  ;;  %v647_v23 = vpop.f32.mrb[9].mxu0  ;;  %6453 = vpow2.f32 %v4580_v15 }
 0x240   :  { %v6436_v12 = vpop.eup %6435  ;;  %v649_v32 = vpop.f32.mrb[10].mxu0  ;;  %6455 = vpow2.f32 %v4579_v36 }
 0x241   :  { %v708_v28 = vpop.f32.mrb[8].mxu1  ;;  %v6438_v45 = vpop.eup %6437  ;;  %v743_v44 = vadd.f32 1.0, %v6436_v12  ;;  %6457 = vrcp.f32 %v741_v58  ;;  %v642_v12 = vadd.f32 %v641_v62, %v7766_v35 }
 0x242   :  { %v710_v24 = vpop.f32.mrb[9].mxu1  ;;  %v6440_v52 = vpop.eup %6439  ;;  %v745_v39 = vadd.f32 1.0, %v6438_v45  ;;  %6459 = vrcp.f32 %v742_v43  ;;  %v703_v45 = vadd.f32 %v702_v21, %v7766_v35 }
 0x243   :  { %v651_v30 = vpop.f32.mrb[11].mxu0  ;;  %v712_v40 = vpop.f32.mrb[10].mxu1  ;;  %v744_v13 = vadd.f32 1.0, %v6440_v52  ;;  %6461 = vrcp.f32 %v743_v44  ;;  %v705_v52 = vadd.f32 %v704_v0, %v7766_v35  ;;  %v4581_v44 = vmul.f32 -1.442695, %v642_v12 }
 0x244   :  { %v6442_v9 = vpop.eup %6441  ;;  %v714_v59 = vpop.f32.mrb[11].mxu1  ;;  %6463 = vrcp.f32 %v745_v39  ;;  %v4582_v39 = vmul.f32 -1.442695, %v703_v45  ;;  %v650_v35 = vadd.f32 %v649_v32, %v552_v20 }
 0x245   :  { %v6444_v60 = vpop.eup %6443  ;;  %v746_v50 = vadd.f32 1.0, %v6442_v9  ;;  %6465 = vrcp.f32 %v744_v13  ;;  %v547_v62 = vpop.permute.xlu0 %546 }
 0x246   :  { %v6446_v6 = vpop.eup %6445  ;;  %v747_v29 = vadd.f32 1.0, %v6444_v60 }
 0x247   :  { %v6448_v41 = vpop.eup %6447  ;;  %v748_v15 = vadd.f32 1.0, %v6446_v6  ;;  %6467 = vrcp.f32 %v746_v50  ;;  %v4583_v6 = vmul.f32 -1.442695, %v705_v52  ;;  %v648_v50 = vadd.f32 %v647_v23, %v547_v62 }
 0x248   :  { %v6450_v17 = vpop.eup %6449  ;;  %v789_v36 = vadd.f32 1.0, %v6448_v41  ;;  %6469 = vrcp.f32 %v747_v29  ;;  %v646_v41 = vadd.f32 %v645_v46, %v547_v62  ;;  %v709_v29 = vadd.f32 %v708_v28, %v547_v62 }
 0x249   :  { %v6452_v38 = vpop.eup %6451  ;;  %v790_v58 = vadd.f32 1.0, %v6450_v17  ;;  %6471 = vrcp.f32 %v748_v15  ;;  %v711_v15 = vadd.f32 %v710_v24, %v547_v62  ;;  %v715_v52 = vadd.f32 %v714_v59, %v552_v20 }
 0x24a   :  { %v791_v43 = vadd.f32 1.0, %v6452_v38  ;;  %v6454_v9 = vpop.eup %6453  ;;  %6473 = vrcp.f32 %v789_v36  ;;  %v652_v36 = vadd.f32 %v651_v30, %v552_v20 }
 0x24b   :  { %v6456_v60 = vpop.eup %6455  ;;  %6475 = vrcp.f32 %v790_v58  ;;  %v713_v58 = vadd.f32 %v712_v40, %v552_v20 }
 0x24c   :  { %v6458_v13 = vpop.eup %6457  ;;  %6477 = vrcp.f32 %v791_v43  ;;  %v793_v43 = vadd.f32 1.0, %v6454_v9  ;;  %v792_v28 = vadd.f32 1.0, %v6456_v60 }
 0x24d   :  { %v6460_v21 = vpop.eup %6459  ;;  %6479 = vpow2.f32 %v4581_v44 }
 0x24e   :  { %v6462_v17 = vpop.eup %6461  ;;  %6481 = vpow2.f32 %v4582_v39 }
 0x24f   :  { %v6464_v38 = vpop.eup %6463  ;;  %6483 = vpow2.f32 %v4583_v6 }
 0x250   :  { %v6466_v0 = vpop.eup %6465  ;;  %6485 = vtanh.f32 %v646_v41 }
 0x251   :  { %v6468_v12 = vpop.eup %6467  ;;  %6487 = vtanh.f32 %v648_v50 }
 0x252   :  { %v6470_v45 = vpop.eup %6469  ;;  %6489 = vtanh.f32 %v709_v29 }
 0x253   :  { %v6472_v46 = vpop.eup %6471  ;;  %6491 = vtanh.f32 %v650_v35 }
 0x254   :  { %v6474_v23 = vpop.eup %6473  ;;  %6493 = vtanh.f32 %v711_v15 }
 0x255   :  { %v6476_v44 = vpop.eup %6475  ;;  %6495 = vtanh.f32 %v652_v36 }
 0x256   :  { %v6478_v39 = vpop.eup %6477  ;;  %6497 = vtanh.f32 %v713_v58 }
 0x257   :  { %v6480_v32 = vpop.eup %6479  ;;  %6499 = vtanh.f32 %v715_v52 }
 0x258   :  { %v6482_v24 = vpop.eup %6481  ;;  %6501 = vrcp.f32 %v793_v43  ;;  %v794_v62 = vadd.f32 1.0, %v6480_v32 }
 0x259   :  { %v6484_v30 = vpop.eup %6483  ;;  %6503 = vrcp.f32 %v792_v28  ;;  %v795_v6 = vadd.f32 1.0, %v6482_v24 }
 0x25a   :  { %v6486_v40 = vpop.eup %6485  ;;  %6505 = vrcp.f32 %v794_v62  ;;  %v796_v41 = vadd.f32 1.0, %v6484_v30 }
 0x25b   :  { %v6488_v20 = vpop.eup %6487  ;;  %6507 = vrcp.f32 %v795_v6  ;;  %v821_v59 = vmul.f32 %v6486_v40, %v6458_v13 }
 0x25c   :  { %v6490_v9 = vpop.eup %6489  ;;  %6509 = vrcp.f32 %v796_v41  ;;  %v822_v60 = vmul.f32 %v6488_v20, %v6460_v21 }
 0x25d   :  { %v6492_v50 = vpop.eup %6491  ;;  %6511 = vtanh.f32 %v821_v59  ;;  %v823_v29 = vmul.f32 %v6490_v9, %v6462_v17 }
 0x25e   :  { %v6494_v35 = vpop.eup %6493  ;;  %6513 = vtanh.f32 %v822_v60  ;;  %v825_v15 = vmul.f32 %v6492_v50, %v6464_v38 }
 0x25f   :  { %v6496_v36 = vpop.eup %6495  ;;  %6515 = vtanh.f32 %v823_v29  ;;  %v824_v58 = vmul.f32 %v6494_v35, %v6466_v0 }
 0x260   :  { %v6498_v52 = vpop.eup %6497  ;;  %6517 = vtanh.f32 %v825_v15  ;;  %v826_v43 = vmul.f32 %v6496_v36, %v6468_v12 }
 0x261   :  { %v6500_v28 = vpop.eup %6499  ;;  %6519 = vtanh.f32 %v824_v58  ;;  %v827_v32 = vmul.f32 %v6498_v52, %v6470_v45 }
 0x262   :  { %v6502_v24 = vpop.eup %6501  ;;  %6521 = vtanh.f32 %v826_v43  ;;  %v828_v13 = vmul.f32 %v6500_v28, %v6472_v46 }
 0x263   :  { %v6504_v62 = vpop.eup %6503  ;;  %6523 = vtanh.f32 %v827_v32 }
 0x264   :  { %v6506_v21 = vpop.eup %6505  ;;  %6525 = vtanh.f32 %v828_v13 }
 0x265   :  { %v6508_v17 = vpop.eup %6507 }
 0x266   :  { %v6510_v30 = vpop.eup %6509 }
 0x267   :  { %v6512_v6 = vpop.eup %6511 }
 0x268   :  { %v6514_v38 = vpop.eup %6513  ;;  %v7772_v40 = vmul.f32 %v6512_v6, %v6474_v23 }
 0x269   :  { %v6516_v0 = vpop.eup %6515  ;;  %v7774_v41 = vmul.f32 %v6514_v38, %v6476_v44 }
 0x26a   :  { %v6518_v12 = vpop.eup %6517  ;;  %v7776_v20 = vmul.f32 %v6516_v0, %v6478_v39  ;;  %v861_v45 = vmul.f32 %v7772_v40, %v7772_v40 }
 0x26b   :  { %v6520_v46 = vpop.eup %6519  ;;  %v849_v59 = vadd.f32 %v7774_v41, %v7772_v40  ;;  %v7782_v9 = vmul.f32 %v6518_v12, %v6502_v24  ;;  %v862_v60 = vmul.f32 %v7774_v41, %v7774_v41 }
 0x26c   :  { %v6522_v23 = vpop.eup %6521  ;;  %v7786_v50 = vmul.f32 %v6520_v46, %v6504_v62  ;;  %v863_v35 = vmul.f32 %v7776_v20, %v7776_v20 }
 0x26d   :  { %v6524_v44 = vpop.eup %6523  ;;  %v850_v29 = vadd.f32 %v849_v59, %v7776_v20  ;;  %v7789_v39 = vmul.f32 %v6522_v23, %v6506_v21  ;;  %v869_v15 = vadd.f32 %v862_v60, %v861_v45  ;;  %v865_v52 = vmul.f32 %v7782_v9, %v7782_v9 }
 0x26e   :  { %v6526_v36 = vpop.eup %6525  ;;  %v7793_v58 = vmul.f32 %v6524_v44, %v6508_v17  ;;  %v864_v21 = vmul.f32 %v7786_v50, %v7786_v50 }
 0x26f   :  { %v851_v43 = vadd.f32 %v850_v29, %v7786_v50  ;;  %v7798_v28 = vmul.f32 %v6526_v36, %v6510_v30  ;;  %v854_v32 = vadd.f32 %v7789_v39, %v7782_v9  ;;  %v870_v24 = vadd.f32 %v869_v15, %v863_v35 }
 0x270   :  { %v866_v13 = vmul.f32 %v7789_v39, %v7789_v39  ;;  %v867_v17 = vmul.f32 %v7793_v58, %v7793_v58 }
 0x271   :  { %852 = vadd.xlane.f32.xlu0 %v851_v43  ;;  %v855_v62 = vadd.f32 %v854_v32, %v7793_v58  ;;  %v871_v38 = vadd.f32 %v870_v24, %v864_v21  ;;  %v868_v12 = vmul.f32 %v7798_v28, %v7798_v28 }
 0x272   :  { %v874_v6 = vadd.f32 %v866_v13, %v865_v52 }
 0x273   :  { %v856_v30 = vadd.f32 %v855_v62, %v7798_v28  ;;  %v845_v62 = vld [vmem:[%s10053_s14] sm:$0xff] }
 0x274   :  { %v875_v0 = vadd.f32 %v874_v6, %v867_v17  ;;  %v847_v6 = vld [vmem:[%s10054_s15] sm:$0xff] }
 0x275   :  { %857 = vadd.xlane.f32.xlu1 %v856_v30  ;;  %872 = vadd.xlane.f32.xlu0 %v871_v38  ;;  %v846_v30 = vld [vmem:[%s10053_s14 + $0x8] sm:$0xff] }
 0x276   :  { %v876_v45 = vadd.f32 %v875_v0, %v868_v12 }
 0x279   :  { %877 = vadd.xlane.f32.xlu0 %v876_v45 }
 0x2fe   :  { %v853_v46 = vpop.xlane.xlu0 %852 }
 0x2ff   :  { %v859_v59 = vmul.f32 0.001953125, %v853_v46  ;;  %v848_v46 = vld [vmem:[%s10054_s15 + $0x8] sm:$0xff] }
 0x301   :  { %v881_v44 = vmul.f32 %v859_v59, %v859_v59 }
 0x302   :  { %v858_v60 = vpop.xlane.xlu1 %857  ;;  %v873_v23 = vpop.xlane.xlu0 %872 }
 0x303   :  { %v860_v29 = vmul.f32 0.001953125, %v858_v60  ;;  %v879_v35 = vmul.f32 0.001953125, %v873_v23 }
 0x305   :  { %v883_v15 = vsub.f32 %v879_v35, %v881_v44  ;;  %v882_v52 = vmul.f32 %v860_v29, %v860_v29 }
 0x306   :  { %v878_v36 = vpop.xlane.xlu0 %877 }
 0x307   :  { %v885_v43 = vadd.f32 1e-05, %v883_v15  ;;  %v880_v32 = vmul.f32 0.001953125, %v878_v36 }
 0x309   :  { %6527 = vrsqrt.f32 %v885_v43  ;;  %v884_v24 = vsub.f32 %v880_v32, %v882_v52 }
 0x30b   :  { %v886_v13 = vadd.f32 1e-05, %v884_v24 }
 0x30d   :  { %6529 = vrsqrt.f32 %v886_v13 }
 0x313   :  { %v6528_v21 = vpop.eup %6527 }
 0x314   :  { %v889_v17 = vmul.f32 %v6528_v21, %v845_v62 }
 0x316   :  { %897 = vperm.xlu1 %5659, %v889_v17   ;;  %v891_v38 = vmul.f32 %v889_v17, %v859_v59 }
 0x317   :  { %v6530_v0 = vpop.eup %6529 }
 0x318   :  { %v893_v12 = vsub.f32 %v847_v6, %v891_v38  ;;  %v890_v45 = vmul.f32 %v6530_v0, %v846_v30 }
 0x31a   :  { %915 = vperm.xlu1 %5659, %v893_v12   ;;  %902 = vperm.xlu0 %5660, %v890_v45   ;;  %v892_v60 = vmul.f32 %v890_v45, %v860_v29 }
 0x31c   :  { %v894_v23 = vsub.f32 %v848_v46, %v892_v60 }
 0x31e   :  { %920 = vperm.xlu1 %5659, %v894_v23  }
 0x395   :  { %v898_v44 = vpop.permute.xlu1 %897 }
 0x396   :  { %v905_v35 = vmul.f32 %v898_v44, %v7772_v40  ;;  %v906_v15 = vmul.f32 %v898_v44, %v7774_v41  ;;  %v907_v36 = vmul.f32 %v898_v44, %v7776_v20  ;;  %v908_v59 = vmul.f32 %v898_v44, %v7786_v50 }
 0x399   :  { %v916_v52 = vpop.permute.xlu1 %915  ;;  %v903_v29 = vpop.permute.xlu0 %902 }
 0x39a   :  { %v7828_v43 = vadd.f32 %v916_v52, %v905_v35  ;;  %v7830_v32 = vadd.f32 %v916_v52, %v906_v15  ;;  %v7832_v24 = vadd.f32 %v916_v52, %v907_v36  ;;  %v7834_v13 = vadd.f32 %v916_v52, %v908_v59  ;;  %v1247_v35 = vld [vmem:[%s10055_s5] sm:$0xff]  ;;  %v1248_v36 = vld [vmem:[%s10055_s5 + $0x8] sm:$0xff]  ;;  %v1249_v59 = vld [vmem:[%s10055_s5 + $0x10] sm:$0xff] }
 0x39b   :  { %v909_v20 = vmul.f32 %v903_v29, %v7782_v9  ;;  %v910_v50 = vmul.f32 %v903_v29, %v7789_v39  ;;  %v911_v21 = vmul.f32 %v903_v29, %v7793_v58  ;;  %v912_v17 = vmul.f32 %v903_v29, %v7798_v28  ;;  %v6307_v15 = vld [vmem:[%s10056_s4 + $0x4] ss:$8 sps:$4 sm:$0xff]   ;;  %v1250_v52 = vld [vmem:[%s10055_s5 + $0x18] sm:$0xff]  ;;  %s6714_s5 = smov 9  }
 0x39c   :  { %10658 = vst [vmem:[#allocation82_spill] sm:$0xff] %v7828_v43  ;;  %10659 = vst [vmem:[#allocation83_spill] sm:$0xff] %v7832_v24  ;;  %v5661_v62 = vpack.i.bf16 %v7830_v32, %v7828_v43  ;;  %v5666_v40 = vpack.i.bf16 %v7834_v13, %v7832_v24  ;;  %4661 = vmatprep.mubr.msk.bf16.mxu0 %vm10277_vm11, %v6307_v15  ;;  %4736 = vmatprep.mubr.msk.bf16.mxu1 %vm10277_vm11, %v6307_v15 }
 0x39d   :  { %v921_v41 = vpop.permute.xlu1 %920  ;;  %vm10668_vm11 = vmmov %vm10667_vm9 }
 0x39e   :  { %5662 = vrot.lane.b32.xlu0 %v5661_v62, %s10341_s25  ;;  %5667 = vrot.lane.b32.xlu1 %v5666_v40, %s10341_s25  ;;  %v7846_v6 = vadd.f32 %v921_v41, %v909_v20  ;;  %v7848_v30 = vadd.f32 %v921_v41, %v910_v50  ;;  %v7850_v38 = vadd.f32 %v921_v41, %v911_v21 }
 0x39f   :  { %v7852_v0 = vadd.f32 %v921_v41, %v912_v17 }
 0x3a0   :  { %10660 = vst [vmem:[#allocation84_spill] sm:$0xff] %v7850_v38  ;;  %v5681_v9 = vpack.i.bf16 %v7846_v6, %v7828_v43  ;;  %v5686_v39 = vpack.i.bf16 %v7848_v30, %v7830_v32  ;;  %v5691_v46 = vpack.i.bf16 %v7850_v38, %v7832_v24  ;;  %v5701_v23 = vpack.i.bf16 %v7848_v30, %v7846_v6 }
 0x3a1   :  { %v5696_v60 = vpack.i.bf16 %v7852_v0, %v7834_v13  ;;  %v5706_v44 = vpack.i.bf16 %v7852_v0, %v7850_v38 }
 0x3a2   :  { %5672 = vrot.lane.b32.xlu0 %v5661_v62, %s6708_s27  ;;  %5677 = vrot.lane.b32.xlu1 %v5666_v40, %s6708_s27 }
 0x3a6   :  { %5682 = vrot.lane.b32.xlu0 %v5681_v9, %s10339_s2  ;;  %5687 = vrot.lane.b32.xlu1 %v5686_v39, %s10339_s2 }
 0x3aa   :  { %5692 = vrot.lane.b32.xlu0 %v5691_v46, %s10339_s2  ;;  %5697 = vrot.lane.b32.xlu1 %v5696_v60, %s10339_s2  ;;  %s10926_s2 = smov 15  }
 0x3ae   :  { %5702 = vrot.lane.b32.xlu0 %v5701_v23, %s10341_s25  ;;  %5707 = vrot.lane.b32.xlu1 %v5706_v44, %s10341_s25 }
 0x3b2   :  { %5712 = vrot.lane.b32.xlu0 %v5681_v9, %s10328_s26  ;;  %5717 = vrot.lane.b32.xlu1 %v5686_v39, %s10328_s26 }
 0x3b6   :  { %5722 = vrot.lane.b32.xlu0 %v5691_v46, %s10328_s26  ;;  %5732 = vrot.lane.b32.xlu1 %v5696_v60, %s10328_s26  ;;  %s6715_s26 = smov 8  }
 0x3ba   :  { %5727 = vrot.lane.b32.xlu0 %v5661_v62, %s10661_s24  ;;  %5737 = vrot.lane.b32.xlu1 %v5666_v40, %s10661_s24 }
 0x3be   :  { %5742 = vrot.lane.b32.xlu0 %v5701_v23, %s6708_s27  ;;  %5752 = vrot.lane.b32.xlu1 %v5706_v44, %s6708_s27 }
 0x3c2   :  { %5747 = vrot.lane.b32.xlu0 %v5661_v62, %s10662_s19  ;;  %5757 = vrot.lane.b32.xlu1 %v5666_v40, %s10662_s19 }
 0x3c6   :  { %5762 = vrot.lane.b32.xlu0 %v5701_v23, %s10661_s24  ;;  %5767 = vrot.lane.b32.xlu1 %v5706_v44, %s10661_s24 }
 0x3ca   :  { %5772 = vrot.lane.b32.xlu0 %v5681_v9, %s10663_s0  ;;  %5777 = vrot.lane.b32.xlu1 %v5686_v39, %s10663_s0 }
 0x3ce   :  { %5782 = vrot.lane.b32.xlu0 %v5691_v46, %s10663_s0  ;;  %5787 = vrot.lane.b32.xlu1 %v5696_v60, %s10663_s0 }
 0x3d2   :  { %5792 = vrot.lane.b32.xlu0 %v5701_v23, %s10662_s19  ;;  %5797 = vrot.lane.b32.xlu1 %v5706_v44, %s10662_s19 }
 0x3d6   :  { %5802 = vrot.lane.b32.xlu0 %v5681_v9, %s10664_s21  ;;  %5807 = vrot.lane.b32.xlu1 %v5686_v39, %s10664_s21 }
 0x3da   :  { %5812 = vrot.lane.b32.xlu0 %v5691_v46, %s10664_s21  ;;  %5817 = vrot.lane.b32.xlu1 %v5696_v60, %s10664_s21 }
 0x3de   :  { %1253 = vperm.xlu0 %5660, %v1247_v35   ;;  %1258 = vperm.xlu1 %5659, %v1248_v36  }
 0x3e2   :  { %1263 = vperm.xlu0 %5660, %v1249_v59   ;;  %1268 = vperm.xlu1 %5659, %v1250_v52  }
 0x410   :  { %v5663_v29 = vpop.permute.xlu0 %5662  ;;  %v5668_v62 = vpop.permute.xlu1 %5667 }
 0x411   :  { %v5665_v9 = vunpack.i.h.bf16 %v5663_v29  ;;  %v5664_v39 = vunpack.i.l.bf16 %v5663_v29  ;;  %v5670_v23 = vunpack.i.h.bf16 %v5668_v62  ;;  %v5669_v44 = vunpack.i.l.bf16 %v5668_v62 }
 0x413   :  { %v979_v62 = vsel %vm10669_vm12, %v5669_v44, %v5670_v23  ;;  %vm10675_vm12 = vmmov %vm10673_vm6 }
 0x414   :  { %v7921_v40 = vpop.permute.xlu0 %5672  ;;  %v7923_v41 = vpop.permute.xlu1 %5677 }
 0x418   :  { %v5683_v20 = vpop.permute.xlu0 %5682  ;;  %v5688_v17 = vpop.permute.xlu1 %5687 }
 0x419   :  { %v5685_v50 = vunpack.i.h.bf16 %v5683_v20  ;;  %v5684_v21 = vunpack.i.l.bf16 %v5683_v20  ;;  %v5690_v46 = vunpack.i.h.bf16 %v5688_v17  ;;  %v5689_v60 = vunpack.i.l.bf16 %v5688_v17 }
 0x41a   :  { %v983_v20 = vsel %vm10667_vm9, %v5664_v39, %v5665_v9  ;;  %v985_v17 = vsel %vm10668_vm11, %v5670_v23, %v5664_v39  ;;  %vm10672_vm9 = vmmov %vm10666_vm7 }
 0x41b   :  { %v952_v35 = vsel %vm10665_vm13, %v5685_v50, %v5690_v46  ;;  %v951_v15 = vsel %vm10666_vm7, %v5684_v21, %v5689_v60  ;;  %vm10670_vm13 = vmmov %vm10666_vm7 }
 0x41c   :  { %v5693_v36 = vpop.permute.xlu0 %5692  ;;  %v5698_v45 = vpop.permute.xlu1 %5697  ;;  %v4589_v12 = vpack.c.bf16 %v952_v35, %v951_v15  ;;  %vm10674_vm11 = vmmov %vm10673_vm6 }
 0x41d   :  { %v5695_v59 = vunpack.i.h.bf16 %v5693_v36  ;;  %v5694_v52 = vunpack.i.l.bf16 %v5693_v36  ;;  %v5700_v28 = vunpack.i.h.bf16 %v5698_v45  ;;  %v5699_v29 = vunpack.i.l.bf16 %v5698_v45 }
 0x41e   :  { %4590 = vmatprep.subr.msk.bf16.mxu0 %vm10671_vm8, %v4589_v12 }
 0x41f   :  { %v949_v58 = vsel %vm10670_vm13, %v5689_v60, %v5694_v52  ;;  %v950_v24 = vsel %vm10666_vm7, %v5690_v46, %v5695_v59  ;;  %v948_v15 = vsel %vm10672_vm9, %v5695_v59, %v5700_v28  ;;  %v954_v45 = vsel %vm10673_vm6, %v5700_v28, %v5685_v50 }
 0x420   :  { %v4667_v35 = vpack.c.bf16 %v950_v24, %v949_v58  ;;  %v947_v39 = vsel %vm10674_vm11, %v5694_v52, %v5699_v29  ;;  %v5703_v23 = vpop.permute.xlu0 %5702  ;;  %v953_v60 = vsel %vm10675_vm12, %v5699_v29, %v5684_v21  ;;  %v5708_v46 = vpop.permute.xlu1 %5707  ;;  %vm10676_vm13 = vnez %v10449_v3 }
 0x421   :  { %v5705_v36 = vunpack.i.h.bf16 %v5703_v23  ;;  %v5704_v38 = vunpack.i.l.bf16 %v5703_v23  ;;  %v4664_v43 = vpack.c.bf16 %v948_v15, %v947_v39  ;;  %vm10677_vm7 = vcmp.gt.s32.totalorder %v7097_v57, 0 }
 0x422   :  { %vm7953_vm8 = vmpackc.low %vm10677_vm7, %vm10676_vm13  ;;  %v10678_v24 = vmov 0  ;;  %vm10680_vm6 = vcmp.lt.s32.totalorder %v6823_v4, 16  ;;  %v4592_v28 = vpack.c.bf16 %v954_v45, %v953_v60  ;;  %v5710_v12 = vunpack.i.h.bf16 %v5708_v46 }
 0x423   :  { %v10679_v24 = vsel %vm7953_vm8, 4294967295, %v10678_v24  ;;  %v981_v58 = vsel %vm10680_vm6, %v5665_v9, %v5669_v44  ;;  %v5709_v50 = vunpack.i.l.bf16 %v5708_v46  ;;  %vm10681_vm9 = vnez %v10455_v49  ;;  %vm10686_vm0 = vmmov %vm10680_vm6 }
 0x424   :  { %vm10682_vm11 = vcmp.gt.s32.totalorder %v7108_v63, 0  ;;  %v10683_v21 = vmov 0  ;;  %v984_v3 = vsel %vm10686_vm0, %v5704_v38, %v5705_v36  ;;  %vm10687_vm13 = vnez %v10465_v8  ;;  %vm10688_vm7 = vmmov %vm10686_vm0  ;;  %v5713_v49 = vpop.permute.xlu0 %5712 }
 0x425   :  { %vm7963_vm12 = vmpackc.low %vm10682_vm11, %vm10681_vm9  ;;  %4665 = vmatprep.subr.msk.bf16.mxu1 %vm10687_vm13, %v4664_v43  ;;  %v4595_v59 = vpack.c.bf16 %v983_v20, %v7123_v14  ;;  %v4670_v9 = vpack.c.bf16 %v979_v62, %v7173_v33  ;;  %v980_v44 = vsel %vm10688_vm7, %v5709_v50, %v5710_v12  ;;  %vm10689_vm6 = vnez %v10460_v54  ;;  %v5718_v62 = vpop.permute.xlu1 %5717 }
 0x426   :  { %v10684_v21 = vsel %vm7963_vm12, 4294967295, %v10683_v21  ;;  %4593 = vmatpush1.bf16.msk.msra.mxu0 %vm10689_vm6, %v4592_v28  ;;  %vm10690_vm9 = vnez %v10467_v25  ;;  %v4598_v52 = vpack.c.bf16 %v985_v17, %v7155_v53  ;;  %v4673_v29 = vpack.c.bf16 %v981_v58, %v7166_v55  ;;  %vm10691_vm11 = vmmov %vm10686_vm0 }
 0x427   :  { %10685 = vst [vmem:[#allocation85_spill] sm:$0xff] %v10684_v21  ;;  %4668 = vmatpush1.bf16.msk.msra.mxu1 %vm10690_vm9, %v4667_v35  ;;  %4596 = vmatprep.subr.msk.bf16.mxu0 %vm7953_vm8, %v4595_v59  ;;  %v5715_v43 = vunpack.i.h.bf16 %v5713_v49  ;;  %v5714_v20 = vunpack.i.l.bf16 %v5713_v49  ;;  %v5675_v15 = vunpack.i.h.bf16 %v7921_v40  ;;  %v5720_v45 = vunpack.i.h.bf16 %v5718_v62 }
 0x428   :  { %4671 = vmatprep.subr.msk.bf16.mxu1 %vm7963_vm12, %v4670_v9  ;;  %v5719_v39 = vunpack.i.l.bf16 %v5718_v62  ;;  %v4601_v35 = vpack.c.bf16 %v7194_v1, %v984_v3  ;;  %v5674_v23 = vunpack.i.l.bf16 %v7921_v40  ;;  %v5680_v17 = vunpack.i.h.bf16 %v7923_v41 }
 0x429   :  { %v986_v60 = vsel %vm10686_vm0, %v5710_v12, %v5704_v38  ;;  %v4676_v46 = vpack.c.bf16 %v7239_v56, %v980_v44  ;;  %v5679_v58 = vunpack.i.l.bf16 %v7923_v41  ;;  %v982_v28 = vsel %vm10691_vm11, %v5705_v36, %v5709_v50  ;;  %v5723_v38 = vpop.permute.xlu0 %5722  ;;  %v5733_v12 = vpop.permute.xlu1 %5732 }
 0x42a   :  { %vm10692_vm7 = vcmp.lt.s32.totalorder %v6823_v4, 15  ;;  %vm10694_vm9 = vnez %v10410_v34  ;;  %vm10695_vm8 = vnez %v10417_v37  ;;  %vm10696_vm0 = vnez %v10474_v31 }
 0x42b   :  { %v1016_v59 = vsel %vm10692_vm7, %v5715_v43, %v5720_v45  ;;  %vm10693_vm12 = vmmov %vm10692_vm7  ;;  %4599 = vmatpush1.bf16.msk.msra.mxu0 %vm10694_vm9, %v4598_v52  ;;  %4674 = vmatpush1.bf16.msk.msra.mxu1 %vm10695_vm8, %v4673_v29  ;;  %v5725_v40 = vunpack.i.h.bf16 %v5723_v38  ;;  %v5724_v41 = vunpack.i.l.bf16 %v5723_v38  ;;  %vm10697_vm11 = vnez %v10483_v7  ;;  %v10706_v38 = vld [vmem:[#allocation23_spill] sm:$0xff] }
 0x42c   :  { %v1015_v3 = vsel %vm10693_vm12, %v5714_v20, %v5719_v39  ;;  %4602 = vmatprep.subr.msk.bf16.mxu0 %vm10696_vm0, %v4601_v35  ;;  %4677 = vmatprep.subr.msk.bf16.mxu1 %vm10697_vm11, %v4676_v46  ;;  %v4604_v50 = vpack.c.bf16 %v7255_v51, %v986_v60  ;;  %v5735_v9 = vunpack.i.h.bf16 %v5733_v12  ;;  %v5734_v44 = vunpack.i.l.bf16 %v5733_v12  ;;  %vm10699_vm8 = vmmov %vm10692_vm7 }
 0x42d   :  { %v4607_v36 = vpack.c.bf16 %v1016_v59, %v1015_v3  ;;  %vm10698_vm12 = vcmp.lt.s32.totalorder %v6823_v4, 1  ;;  %v4679_v52 = vpack.c.bf16 %v7210_v48, %v982_v28  ;;  %v1013_v29 = vsel %vm10692_vm7, %v5719_v39, %v5724_v41  ;;  %vm10701_vm11 = vmmov %vm10692_vm7  ;;  %v5728_v28 = vpop.permute.xlu0 %5727 }
 0x42e   :  { %v1047_v49 = vsel %vm10698_vm12, %v5674_v23, %v5675_v15  ;;  %v1014_v62 = vsel %vm10699_vm8, %v5720_v45, %v5725_v40  ;;  %vm10700_vm0 = vmmov %vm10698_vm12  ;;  %v1012_v46 = vsel %vm10701_vm11, %v5725_v40, %v5735_v9  ;;  %vm10707_vm8 = vnez %v10706_v38  ;;  %v5738_v40 = vpop.permute.xlu1 %5737 }
 0x42f   :  { %v1043_v35 = vsel %vm10700_vm0, %v5679_v58, %v5680_v17  ;;  %vm10702_vm9 = vmmov %vm10692_vm7  ;;  %4605 = vmatpush1.bf16.msk.msra.mxu0 %vm7269_vm15, %v4604_v50  ;;  %v4685_v39 = vpack.c.bf16 %v1014_v62, %v1013_v29  ;;  %4680 = vmatpush1.bf16.msk.msra.mxu1 %vm10707_vm8, %v4679_v52  ;;  %v10717_v52 = vmov 0 }
 0x430   :  { %v1018_v60 = vsel %vm10702_vm9, %v5735_v9, %v5715_v43  ;;  %vm10703_vm13 = vmmov %vm10692_vm7  ;;  %4608 = vmatprep.subr.msk.bf16.mxu0 %vm7287_vm14, %v4607_v36  ;;  %v10708_v9 = vld [vmem:[#allocation25_spill] sm:$0xff]  ;;  %v10713_v36 = vld [vmem:[#allocation27_spill] sm:$0xff] }
 0x431   :  { %v1011_v59 = vsel %vm10703_vm13, %v5724_v41, %v5734_v44  ;;  %vm10704_vm12 = vmmov %vm10692_vm7  ;;  %vm10709_vm9 = vnez %v10708_v9  ;;  %v10710_v41 = vmov 0  ;;  %v4613_v50 = vpack.c.bf16 %v1047_v49, %v10713_v36  ;;  %v10722_v49 = vld [vmem:[#allocation34_spill] sm:$0xff] }
 0x432   :  { %v1017_v45 = vsel %vm10704_vm12, %v5734_v44, %v5714_v20  ;;  %v4682_v12 = vpack.c.bf16 %v1012_v46, %v1011_v59  ;;  %vm8035_vm13 = vmpackc.low %vm7102_vm5, %vm10709_vm9  ;;  %v1049_v20 = vsel %vm10700_vm0, %v5680_v17, %v5674_v23  ;;  %v10714_v44 = vld [vmem:[#allocation30_spill] sm:$0xff]  ;;  %vm10716_vm7 = vnez %v10453_v19  ;;  %v5743_v23 = vpop.permute.xlu0 %5742  ;;  %v5753_v62 = vpop.permute.xlu1 %5752  ;;  %v10724_v46 = vld [vmem:[#allocation33_spill] sm:$0xff] }
 0x433   :  { %v4610_v43 = vpack.c.bf16 %v1018_v60, %v1017_v45  ;;  %v10711_v41 = vsel %vm8035_vm13, 4294967295, %v10710_v41  ;;  %vm10715_vm11 = vnez %v10714_v44  ;;  %vm10720_vm5 = vmmov %vm10700_vm0  ;;  %vm10721_vm9 = vnez %v10530_v47 }
 0x434   :  { %10712 = vst [vmem:[#allocation25_spill] sm:$0xff] %v10711_v41  ;;  %4683 = vmatprep.subr.msk.bf16.mxu1 %vm7319_vm1, %v4682_v12  ;;  %vm8048_vm12 = vmpackc.low %vm10716_vm7, %vm10715_vm11  ;;  %v1045_v61 = vsel %vm10720_vm5, %v5675_v15, %v5679_v58  ;;  %v4688_v17 = vpack.c.bf16 %v1043_v35, %v7312_v2  ;;  %vm10723_vm0 = vnez %v10722_v49  ;;  %v5745_v19 = vunpack.i.h.bf16 %v5743_v23  ;;  %v10725_v15 = vld [vmem:[#allocation29_spill] sm:$0xff] }
 0x435   :  { %v10718_v52 = vsel %vm8048_vm12, 4294967295, %v10717_v52  ;;  %4611 = vmatpush1.bf16.msk.msra.mxu0 %vm10721_vm9, %v4610_v43  ;;  %4686 = vmatpush1.bf16.msk.msra.mxu1 %vm10723_vm0, %v4685_v39  ;;  %v5744_v29 = vunpack.i.l.bf16 %v5743_v23  ;;  %v4616_v60 = vpack.c.bf16 %v1049_v20, %v10724_v46  ;;  %v5755_v59 = vunpack.i.h.bf16 %v5753_v62  ;;  %vm10726_vm11 = vmmov %vm10720_vm5  ;;  %v10735_v49 = vld [vmem:[#allocation37_spill] sm:$0xff] }
 0x436   :  { %10719 = vst [vmem:[#allocation30_spill] sm:$0xff] %v10718_v52  ;;  %4614 = vmatprep.subr.msk.bf16.mxu0 %vm8035_vm13, %v4613_v50  ;;  %v5754_v45 = vunpack.i.l.bf16 %v5753_v62  ;;  %4689 = vmatprep.subr.msk.bf16.mxu1 %vm8048_vm12, %v4688_v17  ;;  %v4691_v58 = vpack.c.bf16 %v1045_v61, %v10725_v15  ;;  %v5730_v12 = vunpack.i.h.bf16 %v5728_v28  ;;  %v5729_v35 = vunpack.i.l.bf16 %v5728_v28  ;;  %vm10727_vm7 = vmmov %vm10720_vm5  ;;  %v10729_v50 = vld [vmem:[#allocation11_spill] sm:$0xff]  ;;  %v8075_v44 = vpop.permute.xlu0 %5747  ;;  %v10731_v17 = vld [vmem:[#allocation41_spill] sm:$0xff] }
 0x437   :  { %v1048_v43 = vsel %vm10726_vm11, %v5744_v29, %v5745_v19  ;;  %v1050_v39 = vsel %vm10727_vm7, %v5755_v59, %v5744_v29  ;;  %vm10728_vm0 = vmmov %vm10720_vm5  ;;  %vm10730_vm13 = vnez %v10729_v50  ;;  %v5740_v28 = vunpack.i.h.bf16 %v5738_v40  ;;  %v10732_v15 = vld [vmem:[#allocation38_spill] sm:$0xff]  ;;  %v10733_v29 = vld [vmem:[#allocation13_spill] sm:$0xff] }
 0x438   :  { %v1044_v9 = vsel %vm10720_vm5, %v5754_v45, %v5755_v59  ;;  %v1046_v20 = vsel %vm10728_vm0, %v5745_v19, %v5754_v45  ;;  %v4619_v61 = vpack.c.bf16 %v7353_v26, %v1048_v43  ;;  %v5739_v23 = vunpack.i.l.bf16 %v5738_v40  ;;  %v8082_v59 = vpop.permute.xlu1 %5757  ;;  %v10737_v19 = vld [vmem:[#allocation39_spill] sm:$0xff]  ;;  %v10739_v43 = vld [vmem:[#allocation40_spill] sm:$0xff] }
 0x439   :  { %4617 = vmatpush1.bf16.msk.msra.mxu0 %vm10730_vm13, %v4616_v60  ;;  %v4622_v62 = vpack.c.bf16 %v10731_v17, %v1050_v39  ;;  %v4697_v52 = vpack.c.bf16 %v10732_v15, %v1046_v20  ;;  %vm10734_vm11 = vnez %v10733_v29  ;;  %vm10736_vm0 = vnez %v10735_v49  ;;  %v10780_v17 = vld [vmem:[#allocation51_spill] sm:$0xff]  ;;  %v10795_v49 = vld [vmem:[#allocation50_spill] sm:$0xff] }
 0x43a   :  { %4692 = vmatpush1.bf16.msk.msra.mxu1 %vm10734_vm11, %v4691_v58  ;;  %4620 = vmatprep.subr.msk.bf16.mxu0 %vm10736_vm0, %v4619_v61  ;;  %v4694_v60 = vpack.c.bf16 %v10737_v19, %v1044_v9  ;;  %vm10738_vm7 = vcmp.lt.s32.totalorder %v6823_v4, 127  ;;  %vm10740_vm5 = vnez %v10739_v43  ;;  %v5763_v40 = vpop.permute.xlu0 %5762  ;;  %vm10743_vm11 = vnez %v10546_v42 }
 0x43b   :  { %v1079_v45 = vsel %vm10738_vm7, %v5729_v35, %v5730_v12  ;;  %vm10741_vm13 = vmmov %vm10738_vm7  ;;  %vm10744_vm0 = vnez %v10543_v27  ;;  %v5765_v9 = vunpack.i.h.bf16 %v5763_v40  ;;  %v5764_v20 = vunpack.i.l.bf16 %v5763_v40  ;;  %v10760_v27 = vld [vmem:[#allocation83_spill] sm:$0xff] }
 0x43c   :  { %4695 = vmatprep.subr.msk.bf16.mxu1 %vm10740_vm5, %v4694_v60  ;;  %v1081_v39 = vsel %vm10741_vm13, %v5740_v28, %v5729_v35  ;;  %vm10742_vm12 = vmmov %vm10738_vm7  ;;  %v5768_v61 = vpop.permute.xlu1 %5767  ;;  %v10745_v60 = vpack.c.bf16 %v7848_v30, %v7830_v32  ;;  %v10746_v35 = vpack.c.bf16 %v7852_v0, %v7834_v13  ;;  %vm10307_vm13 = vmmov 1   ;;  %v10753_v0 = vld [vmem:[#allocation6_spill] sm:$0xff] }
 0x43d   :  { %v1077_v58 = vsel %vm10742_vm12, %v5730_v12, %v5739_v23  ;;  %4623 = vmatpush1.bf16.msk.msra.mxu0 %vm10743_vm11, %v4622_v62  ;;  %v5770_v15 = vunpack.i.h.bf16 %v5768_v61  ;;  %v5769_v29 = vunpack.i.l.bf16 %v5768_v61  ;;  %vm8108_vm12 = vmpackc.low %vm7219_vm3, %vm10307_vm13  ;;  %v10747_v12 = vmov 0  ;;  %v10754_v61 = vld [vmem:[#allocation7_spill] sm:$0xff] }
 0x43e   :  { %4698 = vmatpush1.bf16.msk.msra.mxu1 %vm10744_vm0, %v4697_v52  ;;  %1321 = vmatprep.subr.bf16.mxu0 %v10745_v60  ;;  %v10748_v12 = vsel %vm8108_vm12, 4294967295, %v10747_v12  ;;  %v4628_v52 = vpack.c.bf16 %v1079_v45, %v6854_v16  ;;  %v1075_v62 = vsel %vm10738_vm7, %v5739_v23, %v5740_v28  ;;  %vm8118_vm0 = vmpackc.low %vm7233_vm10, %vm10307_vm13  ;;  %v10750_v32 = vmov 0  ;;  %v5773_v30 = vpop.permute.xlu0 %5772 }
 0x43f   :  { %1374 = vmatprep.subr.bf16.mxu1 %v10746_v35  ;;  %10749 = vst [vmem:[#allocation86_spill] sm:$0xff] %v10748_v12  ;;  %v10751_v32 = vsel %vm8118_vm0, 4294967295, %v10750_v32  ;;  %v5750_v13 = vunpack.i.h.bf16 %v8075_v44  ;;  %v5749_v11 = vunpack.i.l.bf16 %v8075_v44  ;;  %v4625_v40 = vpack.c.bf16 %v1077_v58, %v10753_v0  ;;  %vm10755_vm3 = vmmov %vm10738_vm7  ;;  %v10757_v35 = vld [vmem:[#allocation82_spill] sm:$0xff]  ;;  %v10759_v44 = vld [vmem:[#allocation84_spill] sm:$0xff] }
 0x440   :  { %10752 = vst [vmem:[#allocation87_spill] sm:$0xff] %v10751_v32  ;;  %v4700_v60 = vpack.c.bf16 %v1081_v39, %v10754_v61  ;;  %v5760_v45 = vunpack.i.h.bf16 %v8082_v59  ;;  %v5759_v28 = vunpack.i.l.bf16 %v8082_v59  ;;  %v1082_v22 = vsel %vm10755_vm3, %v5770_v15, %v5764_v20  ;;  %vm10756_vm10 = vmmov %vm10755_vm3  ;;  %v5778_v58 = vpop.permute.xlu1 %5777  ;;  %v10766_v61 = vld [vmem:[#allocation5_spill] sm:$0xff] }
 0x441   :  { %v1078_v23 = vsel %vm10756_vm10, %v5765_v9, %v5769_v29  ;;  %v10758_v16 = vpack.c.bf16 %v7846_v6, %v10757_v35  ;;  %v10761_v42 = vpack.c.bf16 %v10759_v44, %v10760_v27  ;;  %vm8141_vm7 = vmpackc.low %vm10555_vm4, %vm10307_vm13  ;;  %v10763_v59 = vmov 0  ;;  %v10772_v44 = vld [vmem:[#allocation44_spill] sm:$0xff]  ;;  %v10776_v32 = vld [vmem:[#allocation49_spill] sm:$0xff] }
 0x442   :  { %v10764_v59 = vsel %vm8141_vm7, 4294967295, %v10763_v59  ;;  %v4703_v0 = vpack.c.bf16 %v1075_v62, %v10766_v61  ;;  %v1080_v43 = vsel %vm10755_vm3, %v5764_v20, %v5765_v9  ;;  %vm10767_vm10 = vmmov %vm10755_vm3  ;;  %v5775_v6 = vunpack.i.h.bf16 %v5773_v30  ;;  %v5783_v20 = vpop.permute.xlu0 %5782  ;;  %v10778_v12 = vld [vmem:[#allocation45_spill] sm:$0xff] }
 0x443   :  { %1322 = vmatpush1.bf16.msra.mxu0 %v10758_v16  ;;  %1375 = vmatpush1.bf16.msra.mxu1 %v10761_v42  ;;  %10765 = vst [vmem:[#allocation82_spill] sm:$0xff] %v10764_v59  ;;  %v1076_v16 = vsel %vm10767_vm10, %v5769_v29, %v5770_v15  ;;  %vm8157_vm4 = vmpackc.low %vm10571_vm2, %vm10307_vm13  ;;  %v10769_v42 = vmov 0  ;;  %v5774_v62 = vunpack.i.l.bf16 %v5773_v30  ;;  %v5780_v35 = vunpack.i.h.bf16 %v5778_v58  ;;  %v10773_v29 = vld [vmem:[#allocation46_spill] sm:$0xff] }
 0x444   :  { %4626 = vmatprep.subr.msk.bf16.mxu0 %vm8108_vm12, %v4625_v40  ;;  %4701 = vmatprep.subr.msk.bf16.mxu1 %vm8118_vm0, %v4700_v60  ;;  %v10770_v42 = vsel %vm8157_vm4, 4294967295, %v10769_v42  ;;  %v5779_v9 = vunpack.i.l.bf16 %v5778_v58  ;;  %v4631_v15 = vpack.c.bf16 %v10772_v44, %v1078_v23  ;;  %v4706_v39 = vpack.c.bf16 %v10773_v29, %v1082_v22  ;;  %v5788_v58 = vpop.permute.xlu1 %5787  ;;  %v10777_v23 = vld [vmem:[#allocation48_spill] sm:$0xff] }
 0x445   :  { %10771 = vst [vmem:[#allocation84_spill] sm:$0xff] %v10770_v42  ;;  %vm10774_vm3 = vcmp.lt.s32.totalorder %v6823_v4, 112  ;;  %v5785_v30 = vunpack.i.h.bf16 %v5783_v20  ;;  %v5784_v27 = vunpack.i.l.bf16 %v5783_v20  ;;  %v4634_v61 = vpack.c.bf16 %v10776_v32, %v1080_v43  ;;  %v10790_v42 = vld [vmem:[#allocation47_spill] sm:$0xff] }
 0x446   :  { %v1145_v40 = vsel %vm10774_vm3, %v5760_v45, %v5749_v11  ;;  %vm10775_vm10 = vmmov %vm10774_vm3  ;;  %v4709_v44 = vpack.c.bf16 %v10777_v23, %v1076_v16  ;;  %v5790_v22 = vunpack.i.h.bf16 %v5788_v58  ;;  %v5789_v29 = vunpack.i.l.bf16 %v5788_v58  ;;  %v5793_v23 = vpop.permute.xlu0 %5792 }
 0x447   :  { %v1141_v60 = vsel %vm10775_vm10, %v5750_v13, %v5759_v28  ;;  %4629 = vmatpush1.bf16.msk.msra.mxu0 %vm8141_vm7, %v4628_v52  ;;  %4704 = vmatpush1.bf16.msk.msra.mxu1 %vm8157_vm4, %v4703_v0  ;;  %vm10779_vm2 = vnez %v10778_v12  ;;  %vm10781_vm3 = vnez %v10780_v17  ;;  %vm10782_vm10 = vcmp.lt.s32.totalorder %v6823_v4, 113 }
 0x448   :  { %4632 = vmatprep.subr.msk.bf16.mxu0 %vm10779_vm2, %v4631_v15  ;;  %4707 = vmatprep.subr.msk.bf16.mxu1 %vm10781_vm3, %v4706_v39  ;;  %v1112_v52 = vsel %vm10782_vm10, %v5775_v6, %v5780_v35  ;;  %vm10783_vm13 = vmmov %vm10782_vm10  ;;  %v5794_v12 = vunpack.i.l.bf16 %v5793_v23 }
 0x449   :  { %v1111_v0 = vsel %vm10783_vm13, %v5774_v62, %v5779_v9  ;;  %vm10784_vm4 = vmmov %vm10782_vm10  ;;  %vm10791_vm13 = vnez %v10790_v42 }
 0x44a   :  { %v1109_v20 = vsel %vm10784_vm4, %v5779_v9, %v5784_v27  ;;  %vm10785_vm7 = vmmov %vm10784_vm4  ;;  %v10792_v9 = vld [vmem:[#allocation52_spill] sm:$0xff] }
 0x44b   :  { %v1110_v43 = vsel %vm10785_vm7, %v5780_v35, %v5785_v30  ;;  %vm10786_vm0 = vmmov %vm10784_vm4  ;;  %4635 = vmatpush1.bf16.msk.msra.mxu0 %vm10791_vm13, %v4634_v61  ;;  %vm10793_vm4 = vnez %v10792_v9  ;;  %v5795_v35 = vunpack.i.h.bf16 %v5793_v23  ;;  %vm10796_vm7 = vnez %v10795_v49  ;;  %v10804_v23 = vld [vmem:[#allocation55_spill] sm:$0xff]  ;;  %v5803_v49 = vpop.permute.xlu0 %5802 }
 0x44c   :  { %v1108_v16 = vsel %vm10786_vm0, %v5785_v30, %v5790_v22  ;;  %vm10787_vm2 = vmmov %vm10786_vm0  ;;  %4710 = vmatpush1.bf16.msk.msra.mxu1 %vm10793_vm4, %v4709_v44  ;;  %v5798_v30 = vpop.permute.xlu1 %5797  ;;  %v4637_v59 = vpack.c.bf16 %v1110_v43, %v1109_v20  ;;  %v4640_v44 = vpack.c.bf16 %v1112_v52, %v1111_v0  ;;  %vm10806_vm13 = vcmp.lt.s32.totalorder %v7108_v63, 15  ;;  %v10813_v43 = vld [vmem:[#allocation56_spill] sm:$0xff]  ;;  %v10817_v0 = vld [vmem:[#allocation59_spill] sm:$0xff] }
 0x44d   :  { %v1114_v15 = vsel %vm10787_vm2, %v5790_v22, %v5775_v6  ;;  %vm10788_vm3 = vmmov %vm10786_vm0  ;;  %v5800_v22 = vunpack.i.h.bf16 %v5798_v30  ;;  %vm10797_vm2 = vcmp.lt.s32.totalorder %v7097_v57, 15  ;;  %v10810_v57 = vld [vmem:[#allocation60_spill] sm:$0xff] }
 0x44e   :  { %v1107_v39 = vsel %vm10788_vm3, %v5784_v27, %v5789_v29  ;;  %vm10789_vm10 = vmmov %vm10786_vm0  ;;  %vm10794_vm0 = vcmp.lt.s32.totalorder %v6823_v4, 112  ;;  %v5799_v27 = vunpack.i.l.bf16 %v5798_v30  ;;  %v5804_v30 = vunpack.i.l.bf16 %v5803_v49 }
 0x44f   :  { %v1113_v58 = vsel %vm10789_vm10, %v5789_v29, %v5774_v62  ;;  %v4715_v17 = vpack.c.bf16 %v1108_v16, %v1107_v39  ;;  %v1143_v6 = vsel %vm10794_vm0, %v5749_v11, %v5750_v13  ;;  %vm8203_vm3 = vmpackc.low %vm10797_vm2, %vm10796_vm7  ;;  %v10798_v62 = vmov 0  ;;  %v10802_v29 = vld [vmem:[#allocation54_spill] sm:$0xff]  ;;  %v10812_v11 = vld [vmem:[#allocation53_spill] sm:$0xff] }
 0x450   :  { %v4712_v32 = vpack.c.bf16 %v1114_v15, %v1113_v58  ;;  %v10799_v62 = vsel %vm8203_vm3, 4294967295, %v10798_v62  ;;  %vm10801_vm10 = vmmov %vm10794_vm0  ;;  %vm10803_vm4 = vnez %v10802_v29  ;;  %vm10805_vm0 = vnez %v10804_v23  ;;  %v10819_v16 = vld [vmem:[#allocation61_spill] sm:$0xff]  ;;  %v10825_v23 = vld [vmem:[#allocation80_spill] sm:$0xff] }
 0x451   :  { %10800 = vst [vmem:[#allocation83_spill] sm:$0xff] %v10799_v62  ;;  %v1139_v61 = vsel %vm10801_vm10, %v5759_v28, %v5760_v45  ;;  %4638 = vmatprep.subr.msk.bf16.mxu0 %vm10803_vm4, %v4637_v59  ;;  %vm8215_vm12 = vmpackc.low %vm10806_vm13, %vm10805_vm0  ;;  %v10807_v13 = vmov 0  ;;  %vm10811_vm7 = vnez %v10810_v57  ;;  %v4643_v20 = vpack.c.bf16 %v1141_v60, %v10812_v11  ;;  %v10814_v28 = vld [vmem:[#allocation58_spill] sm:$0xff]  ;;  %v10821_v15 = vld [vmem:[#allocation57_spill] sm:$0xff] }
 0x452   :  { %v10808_v13 = vsel %vm8215_vm12, 4294967295, %v10807_v13  ;;  %4713 = vmatprep.subr.msk.bf16.mxu1 %vm10811_vm7, %v4712_v32  ;;  %v4718_v45 = vpack.c.bf16 %v1145_v40, %v10813_v43  ;;  %v4646_v52 = vpack.c.bf16 %v1143_v6, %v10814_v28  ;;  %vm10815_vm2 = vmmov %vm10801_vm10  ;;  %vm10818_vm13 = vnez %v10817_v0  ;;  %v5808_v32 = vpop.permute.xlu1 %5807  ;;  %v10832_v28 = vld [vmem:[#allocation78_spill] sm:$0xff] }
 0x453   :  { %10809 = vst [vmem:[#allocation10_spill] sm:$0xff] %v10808_v13  ;;  %v1146_v59 = vsel %vm10815_vm2, %v5800_v22, %v5794_v12  ;;  %vm10816_vm10 = vmmov %vm10815_vm2  ;;  %4641 = vmatpush1.bf16.msk.msra.mxu0 %vm10818_vm13, %v4640_v44  ;;  %vm10820_vm0 = vnez %v10819_v16  ;;  %v4721_v39 = vpack.c.bf16 %v1139_v61, %v10821_v15  ;;  %v5805_v58 = vunpack.i.h.bf16 %v5803_v49  ;;  %v5813_v15 = vpop.permute.xlu0 %5812  ;;  %v10827_v16 = vld [vmem:[#allocation62_spill] sm:$0xff]  ;;  %v10833_v13 = vld [vmem:[#allocation72_spill] sm:$0xff] }
 0x454   :  { %v1142_v63 = vsel %vm10816_vm10, %v5795_v35, %v5799_v27  ;;  %4716 = vmatpush1.bf16.msk.msra.mxu1 %vm10820_vm0, %v4715_v17  ;;  %vm10822_vm7 = vmmov %vm10815_vm2  ;;  %4644 = vmatprep.subr.msk.bf16.mxu0 %vm8203_vm3, %v4643_v20  ;;  %v5810_v6 = vunpack.i.h.bf16 %v5808_v32  ;;  %v5809_v44 = vunpack.i.l.bf16 %v5808_v32  ;;  %v10824_v17 = vld [vmem:[#allocation77_spill] sm:$0xff]  ;;  %v10835_v49 = vld [vmem:[#allocation14_spill] sm:$0xff]  ;;  %vm10890_vm13 = vmmov 1  }
 0x455   :  { %v1144_v40 = vsel %vm10822_vm7, %v5794_v12, %v5795_v35  ;;  %vm10823_vm4 = vmmov %vm10815_vm2  ;;  %4719 = vmatprep.subr.msk.bf16.mxu1 %vm8215_vm12, %v4718_v45  ;;  %vm10826_vm2 = vnez %v10825_v23  ;;  %v4649_v12 = vpack.c.bf16 %v10827_v16, %v1142_v63  ;;  %v10828_v35 = vld [vmem:[#allocation67_spill] sm:$0xff]  ;;  %vm10834_vm7 = vnez %v10833_v13  ;;  %v10839_v63 = vld [vmem:[#allocation68_spill] sm:$0xff] }
 0x456   :  { %v1140_v60 = vsel %vm10823_vm4, %v5799_v27, %v5800_v22  ;;  %v474_v61 = vsel %vm10826_vm2, %v10824_v17, 0.0  ;;  %v4724_v57 = vpack.c.bf16 %v10828_v35, %v1146_v59  ;;  %v10829_v22 = vld [vmem:[#allocation73_spill] sm:$0xff]  ;;  %v472_v45 = vsel %vm10834_vm7, %v10832_v28, 0.0  ;;  %v10837_v32 = vld [vmem:[#allocation15_spill] sm:$0xff]  ;;  %v5818_v43 = vpop.permute.xlu1 %5817  ;;  %v10840_v59 = vld [vmem:[#allocation66_spill] sm:$0xff] }
 0x457   :  { %v10830_v27 = vld [vmem:[#allocation65_spill] sm:$0xff]  ;;  %vm10836_vm10 = vnez %v10835_v49  ;;  %vm10838_vm12 = vnez %v10837_v32  ;;  %v5815_v17 = vunpack.i.h.bf16 %v5813_v15  ;;  %v5814_v23 = vunpack.i.l.bf16 %v5813_v15  ;;  %v10856_v32 = vld [vmem:[#allocation64_spill] sm:$0xff] }
 0x458   :  { %vm10831_vm4 = vnez %v10830_v27  ;;  %4647 = vmatpush1.bf16.msk.msra.mxu0 %vm10836_vm10, %v4646_v52  ;;  %4722 = vmatpush1.bf16.msk.msra.mxu1 %vm10838_vm12, %v4721_v39  ;;  %v4652_v16 = vpack.c.bf16 %v10839_v63, %v1144_v40  ;;  %v4727_v35 = vpack.c.bf16 %v10840_v59, %v1140_v60  ;;  %v5820_v62 = vunpack.i.h.bf16 %v5818_v43  ;;  %v10843_v13 = vld [vmem:[#allocation69_spill] sm:$0xff] }
 0x459   :  { %v473_v20 = vsel %vm10831_vm4, %v10829_v22, 0.0  ;;  %v5819_v27 = vunpack.i.l.bf16 %v5818_v43  ;;  %v10841_v22 = vld [vmem:[#allocation63_spill] sm:$0xff]  ;;  %vm10844_vm4 = vnez %v10843_v13  ;;  %vm10845_vm7 = vcmp.lt.s32.totalorder %v6823_v4, 111  ;;  %v10854_v13 = vld [vmem:[#allocation74_spill] sm:$0xff] }
 0x45a   :  { %vm10842_vm2 = vnez %v10841_v22  ;;  %4725 = vmatprep.subr.msk.bf16.mxu1 %vm10844_vm4, %v4724_v57  ;;  %v1176_v28 = vsel %vm10845_vm7, %v5805_v58, %v5810_v6  ;;  %vm10846_vm12 = vmmov %vm10845_vm7 }
 0x45b   :  { %4650 = vmatprep.subr.msk.bf16.mxu0 %vm10842_vm2, %v4649_v12  ;;  %v1175_v52 = vsel %vm10846_vm12, %v5804_v30, %v5809_v44  ;;  %vm10847_vm10 = vmmov %vm10845_vm7  ;;  %v10853_v12 = vld [vmem:[#allocation79_spill] sm:$0xff]  ;;  %vm10855_vm12 = vnez %v10854_v13  ;;  %v1239_v13 = vpack.c.bf16 %v472_v45, %v472_v45 }
 0x45c   :  { %v1173_v15 = vsel %vm10847_vm10, %v5809_v44, %v5814_v23  ;;  %vm10848_vm0 = vmmov %vm10845_vm7  ;;  %v475_v59 = vsel %vm10855_vm12, %v10853_v12, 0.0  ;;  %vm10857_vm10 = vnez %v10856_v32  ;;  %vm10330_vm12 = vcmask 1043456   ;;  %v6319_v12 = vld [vmem:[%s10057_s16 + $0x50] sm:$0xff]  }
 0x45d   :  { %v1174_v39 = vsel %vm10848_vm0, %v5810_v6, %v5815_v17  ;;  %vm10849_vm3 = vmmov %vm10848_vm0  ;;  %4653 = vmatpush1.bf16.msk.msra.mxu0 %vm10857_vm10, %v4652_v16  ;;  %v10858_v6 = vld [vmem:[#allocation70_spill] sm:$0xff]  ;;  %v10868_v16 = vld [vmem:[#allocation81_spill] sm:$0xff] }
 0x45e   :  { %v1172_v43 = vsel %vm10849_vm3, %v5815_v17, %v5820_v62  ;;  %vm10850_vm2 = vmmov %vm10848_vm0  ;;  %v4655_v17 = vpack.c.bf16 %v1174_v39, %v1173_v15  ;;  %v6315_v15 = vld [vmem:[%s10057_s16 + $0x48] sm:$0xff]  }
 0x45f   :  { %v1178_v40 = vsel %vm10850_vm2, %v5820_v62, %v5805_v58  ;;  %vm10851_vm4 = vmmov %vm10848_vm0  ;;  %v4658_v62 = vpack.c.bf16 %v1176_v28, %v1175_v52  ;;  %v10860_v58 = vld [vmem:[#allocation71_spill] sm:$0xff]  ;;  %v6313_v28 = vld [vmem:[%s10057_s16] sm:$0xff]  }
 0x460   :  { %v1171_v57 = vsel %vm10851_vm4, %v5814_v23, %v5819_v27  ;;  %vm10852_vm7 = vmmov %vm10848_vm0  ;;  %vm10859_vm0 = vnez %v10858_v6  ;;  %vm10861_vm3 = vnez %v10860_v58  ;;  %v10862_v23 = vld [vmem:[#allocation76_spill] sm:$0xff]  ;;  %v6314_v52 = vld [vmem:[%s10057_s16 + $0x80] sm:$0xff]  }
 0x461   :  { %v1177_v60 = vsel %vm10852_vm7, %v5819_v27, %v5804_v30  ;;  %v4733_v44 = vpack.c.bf16 %v1172_v43, %v1171_v57  ;;  %4728 = vmatpush1.bf16.msk.msra.mxu1 %vm10859_vm0, %v4727_v35  ;;  %4656 = vmatprep.subr.msk.bf16.mxu0 %vm10861_vm3, %v4655_v17  ;;  %vm10863_vm2 = vnez %v10862_v23  ;;  %v8289_v30 = vpack.c.bf16 %v473_v20, %v473_v20  ;;  %v10866_v57 = vld [vmem:[#allocation75_spill] sm:$0xff]  ;;  %v6311_v35 = vld [vmem:[%s10057_s16 + $0x40] sm:$0xff]   ;;  %v6310_v17 = vld [vmem:[%s10056_s4 + $0x10] ss:$8 sps:$4 sm:$0xff]  }
 0x462   :  { %v4730_v63 = vpack.c.bf16 %v1178_v40, %v1177_v60  ;;  %v8291_v27 = vpack.c.bf16 %v475_v59, %v475_v59  ;;  %v1241_v43 = vpack.c.bf16 %v474_v61, %v474_v61  ;;  %vm10867_vm4 = vnez %v10866_v57  ;;  %v6312_v61 = vld [vmem:[%s10057_s16 + $0xc0] sm:$0xff]   ;;  %v6308_v59 = vld [vmem:[%s10056_s4 + $0x14] ss:$8 sps:$4 sm:$0xff]   ;;  %v6316_v39 = vld [vmem:[%s10057_s16 + $0xc8] sm:$0xff]  }
 0x463   :  { %10864 = vst [vmem:[#allocation12_spill] sm:$0xff] %v8289_v30  ;;  %4659 = vmatpush1.bf16.msk.msra.mxu0 %vm10867_vm4, %v4658_v62  ;;  %vm10869_vm7 = vnez %v10868_v16  ;;  %v8308_v20 = vsel %vm10330_vm12, %v1239_v13, 0  ;;  %v6317_v40 = vld [vmem:[%s10057_s16 + $0x8] sm:$0xff]   ;;  %v6321_v62 = vld [vmem:[%s10057_s16 + $0x10] sm:$0xff]  }
 0x464   :  { %4731 = vmatprep.subr.msk.bf16.mxu1 %vm10863_vm2, %v4730_v63  ;;  %10865 = vst [vmem:[#allocation50_spill] sm:$0xff] %v8291_v27  ;;  %4660 = vmatprep.subr.msk.bf16.mxu0 %vm10330_vm12, %v8289_v30  ;;  %10870 = vst [vmem:[#allocation55_spill] sm:$0xff] %v8308_v20  ;;  %v8311_v45 = vsel %vm10330_vm12, %v1241_v43, 0  ;;  %v6305_v63 = vld [vmem:[%s10056_s4] ss:$8 sps:$4 sm:$0xff]   ;;  %v6322_v13 = vld [vmem:[%s10057_s16 + $0x90] sm:$0xff]  }
 0x465   :  { %4734 = vmatpush1.bf16.msk.msra.mxu1 %vm10869_vm7, %v4733_v44  ;;  %10871 = vst [vmem:[#allocation77_spill] sm:$0xff] %v8311_v45  ;;  %v6318_v60 = vld [vmem:[%s10057_s16 + $0x88] sm:$0xff]   ;;  %v6320_v44 = vld [vmem:[%s10057_s16 + $0xd0] sm:$0xff]   ;;  %v6323_v43 = vld [vmem:[%s10057_s16 + $0x58] sm:$0xff]   ;;  %s6717_s4 = smov 121  }
 0x466   :  { %4735 = vmatprep.subr.msk.bf16.mxu1 %vm10330_vm12, %v8291_v27  ;;  %vm10872_vm12 = vcmask 719872  }
 0x467   :  { %1336 = vmatpush1.bf16.msra.mxu0 %v8308_v20  ;;  %vm10873_vm7 = vmmov %vm10872_vm12 }
 0x468   :  { %5282 = vmatprep.subr.bf16.mxu0 %v6311_v35  ;;  %v6324_v35 = vld [vmem:[%s10057_s16 + $0xd8] sm:$0xff]  }
 0x469   :  { %1389 = vmatpush1.bf16.msra.mxu1 %v8311_v45 }
 0x46a   :  { %5310 = vmatprep.subr.bf16.mxu1 %v6312_v61  ;;  %1342 = vmatmul.mubr.bf16.vlgmr.msra.gmra.mrb[12].mxu0 %v6305_v63  ;;  %v6325_v61 = vld [vmem:[%s10057_s16 + $0x18] sm:$0xff]  }
 0x46b   :  { %4662 = vmatprep.mubr.msk.bf16.mxu0 %vm10872_vm12, %v6308_v59  ;;  %5283 = vmatpush3.bf16.msra.mxu0 %v6313_v28  ;;  %v6328_v28 = vld [vmem:[%s10057_s16 + $0xe0] sm:$0xff]  }
 0x46c   :  { %1395 = vmatmul.mubr.bf16.vlgmr.msra.gmra.mrb[12].mxu1 %v6305_v63  ;;  %5284 = vmatprep.subr.bf16.mxu0 %v6315_v15  ;;  %v6326_v63 = vld [vmem:[%s10057_s16 + $0x98] sm:$0xff]   ;;  %v6330_v15 = vld [vmem:[%s10057_s16 + $0xa0] sm:$0xff]  }
 0x46d   :  { %4737 = vmatprep.mubr.msk.bf16.mxu1 %vm10873_vm7, %v6308_v59  ;;  %5311 = vmatpush3.bf16.msra.mxu1 %v6314_v52  ;;  %v6327_v59 = vld [vmem:[%s10057_s16 + $0x60] sm:$0xff]  }
 0x46e   :  { %5312 = vmatprep.subr.bf16.mxu1 %v6316_v39  ;;  %v6329_v52 = vld [vmem:[%s10057_s16 + $0x20] sm:$0xff]   ;;  %v6331_v39 = vld [vmem:[%s10057_s16 + $0x68] sm:$0xff]  }
 0x46f   :  { %5285 = vmatpush3.bf16.msra.mxu0 %v6317_v40  ;;  %v6332_v40 = vld [vmem:[%s10057_s16 + $0xe8] sm:$0xff]  }
 0x470   :  { %5286 = vmatprep.subr.bf16.mxu0 %v6319_v12  ;;  %v6334_v12 = vld [vmem:[%s10057_s16 + $0xa8] sm:$0xff]  }
 0x471   :  { %5313 = vmatpush3.bf16.msra.mxu1 %v6318_v60  ;;  %v6333_v60 = vld [vmem:[%s10057_s16 + $0x28] sm:$0xff]  }
 0x472   :  { %5314 = vmatprep.subr.bf16.mxu1 %v6320_v44  ;;  %1352 = vmatmul.mubr.bf16.gmra.mrb[16].mxu0 %v6310_v17  ;;  %v6335_v44 = vld [vmem:[%s10057_s16 + $0x70] sm:$0xff]  }
 0x473   :  { %5287 = vmatpush3.bf16.msra.mxu0 %v6321_v62  ;;  %v6337_v62 = vld [vmem:[%s10057_s16 + $0x30] sm:$0xff]  }
 0x474   :  { %1405 = vmatmul.mubr.bf16.gmra.mrb[16].mxu1 %v6310_v17  ;;  %5288 = vmatprep.subr.bf16.mxu0 %v6323_v43  ;;  %v6336_v17 = vld [vmem:[%s10057_s16 + $0xf0] sm:$0xff]   ;;  %v6339_v43 = vld [vmem:[%s10057_s16 + $0x78] sm:$0xff]  }
 0x475   :  { %5315 = vmatpush3.bf16.msra.mxu1 %v6322_v13  ;;  %v6338_v13 = vld [vmem:[%s10057_s16 + $0xb0] sm:$0xff]  }
 0x476   :  { %5316 = vmatprep.subr.bf16.mxu1 %v6324_v35  ;;  %v6340_v35 = vld [vmem:[%s10057_s16 + $0xf8] sm:$0xff]  }
 0x477   :  { %5289 = vmatpush3.bf16.msra.mxu0 %v6325_v61  ;;  %v6341_v61 = vld [vmem:[%s10057_s16 + $0x38] sm:$0xff]  }
 0x478   :  { %5290 = vmatprep.subr.bf16.mxu0 %v6327_v59  ;;  %v1254_v59 = vpop.permute.xlu0 %1253 }
 0x479   :  { %5317 = vmatpush3.bf16.msra.mxu1 %v6326_v63  ;;  %v6342_v63 = vld [vmem:[%s10057_s16 + $0xb8] sm:$0xff]  }
 0x47a   :  { %5318 = vmatprep.subr.bf16.mxu1 %v6328_v28  ;;  %v1259_v28 = vpop.permute.xlu1 %1258 }
 0x47b   :  { %5291 = vmatpush3.bf16.msra.mxu0 %v6329_v52 }
 0x47c   :  { %5292 = vmatprep.subr.bf16.mxu0 %v6331_v39  ;;  %v1264_v57 = vpop.permute.xlu0 %1263 }
 0x47d   :  { %5319 = vmatpush3.bf16.msra.mxu1 %v6330_v15 }
 0x47e   :  { %5320 = vmatprep.subr.bf16.mxu1 %v6332_v40  ;;  %v1269_v6 = vpop.permute.xlu1 %1268 }
 0x47f   :  { %5293 = vmatpush3.bf16.msra.mxu0 %v6333_v60 }
 0x480   :  { %5294 = vmatprep.subr.bf16.mxu0 %v6335_v44 }
 0x481   :  { %5321 = vmatpush3.bf16.msra.mxu1 %v6334_v12 }
 0x482   :  { %5322 = vmatprep.subr.bf16.mxu1 %v6336_v17 }
 0x483   :  { %5295 = vmatpush3.bf16.msra.mxu0 %v6337_v62 }
 0x484   :  { %5296 = vmatprep.subr.bf16.mxu0 %v6339_v43 }
 0x485   :  { %5323 = vmatpush3.bf16.msra.mxu1 %v6338_v13 }
 0x486   :  { %5324 = vmatprep.subr.bf16.mxu1 %v6340_v35 }
 0x487   :  { %5297 = vmatpush3.bf16.msra.mxu0 %v6341_v61 }
 0x489   :  { %5325 = vmatpush3.bf16.msra.mxu1 %v6342_v63 }
 0x53d   :  { %v1343_v52 = vpop.f32.mrb[12].mxu0 }
 0x53e   :  { %v1345_v39 = vpop.f32.mrb[13].mxu0  ;;  %v1344_v44 = vadd.f32 %v1343_v52, %v1254_v59 }
 0x53f   :  { %v1396_v15 = vpop.f32.mrb[12].mxu1  ;;  %v1347_v60 = vpop.f32.mrb[14].mxu0  ;;  %v1346_v27 = vadd.f32 %v1345_v39, %v1254_v59 }
 0x540   :  { %v1398_v40 = vpop.f32.mrb[13].mxu1  ;;  %v1397_v17 = vadd.f32 %v1396_v15, %v1254_v59  ;;  %v1348_v62 = vadd.f32 %v1347_v60, %v1259_v28  ;;  %v1349_v45 = vpop.f32.mrb[15].mxu0 }
 0x541   :  { %v1400_v12 = vpop.f32.mrb[14].mxu1  ;;  %v1399_v16 = vadd.f32 %v1398_v40, %v1254_v59  ;;  %v1350_v43 = vadd.f32 %v1349_v45, %v1259_v28 }
 0x542   :  { %v1401_v13 = vadd.f32 %v1400_v12, %v1259_v28  ;;  %v1402_v20 = vpop.f32.mrb[15].mxu1  ;;  %v1415_v61 = vpack.c.bf16 %v1348_v62, %v1344_v44 }
 0x543   :  { %v1403_v35 = vadd.f32 %v1402_v20, %v1259_v28  ;;  %v1416_v30 = vpack.c.bf16 %v1350_v43, %v1346_v27 }
 0x544   :  { %v1417_v63 = vpack.c.bf16 %v1401_v13, %v1397_v17 }
 0x545   :  { %v1418_v23 = vpack.c.bf16 %v1403_v35, %v1399_v16  ;;  %v1353_v58 = vpop.f32.mrb[16].mxu0  ;;  %1711 = vmatprep.mubr.bf16.mxu0 %v1416_v30 }
 0x546   :  { %v1355_v52 = vpop.f32.mrb[17].mxu0  ;;  %1712 = vmatmul.mubr.bf16.vlgmr.msra.gmra.mrb[20].mxu0 %v1415_v61  ;;  %v1354_v39 = vadd.f32 %v1353_v58, %v1264_v57 }
 0x547   :  { %v1406_v32 = vpop.f32.mrb[16].mxu1  ;;  %1760 = vmatprep.mubr.bf16.mxu1 %v1418_v23  ;;  %v1357_v60 = vpop.f32.mrb[18].mxu0  ;;  %v1356_v27 = vadd.f32 %v1355_v52, %v1264_v57 }
 0x548   :  { %v1408_v15 = vpop.f32.mrb[17].mxu1  ;;  %1761 = vmatmul.mubr.bf16.vlgmr.msra.gmra.mrb[20].mxu1 %v1417_v63  ;;  %v1407_v59 = vadd.f32 %v1406_v32, %v1264_v57  ;;  %v1358_v45 = vadd.f32 %v1357_v60, %v1269_v6  ;;  %v1359_v28 = vpop.f32.mrb[19].mxu0 }
 0x549   :  { %v1410_v12 = vpop.f32.mrb[18].mxu1  ;;  %v1409_v16 = vadd.f32 %v1408_v15, %v1264_v57  ;;  %v1360_v44 = vadd.f32 %v1359_v28, %v1269_v6 }
 0x54a   :  { %v1411_v20 = vadd.f32 %v1410_v12, %v1269_v6  ;;  %v1412_v40 = vpop.f32.mrb[19].mxu1  ;;  %v1419_v62 = vpack.c.bf16 %v1358_v45, %v1354_v39 }
 0x54b   :  { %v1413_v17 = vadd.f32 %v1412_v40, %v1269_v6  ;;  %v1420_v30 = vpack.c.bf16 %v1360_v44, %v1356_v27 }
 0x54c   :  { %v1421_v13 = vpack.c.bf16 %v1411_v20, %v1407_v59 }
 0x54d   :  { %v1422_v23 = vpack.c.bf16 %v1413_v17, %v1409_v16  ;;  %1719 = vmatprep.mubr.bf16.mxu0 %v1420_v30 }
 0x54e   :  { %1720 = vmatmul.mubr.bf16.gmra.mrb[24].mxu0 %v1419_v62 }
 0x54f   :  { %1768 = vmatprep.mubr.bf16.mxu1 %v1422_v23 }
 0x550   :  { %1769 = vmatmul.mubr.bf16.gmra.mrb[24].mxu1 %v1421_v13 }
 0x619   :  { %v5298_v43 = vpop.f32.mrb[20].mxu0 }
 0x61a   :  { %v5299_v58 = vpop.f32.mrb[21].mxu0 }
 0x61b   :  { %v5326_v35 = vpop.f32.mrb[20].mxu1  ;;  %v5300_v61 = vadd.f32 %v5299_v58, %v5298_v43  ;;  %v5301_v60 = vpop.f32.mrb[22].mxu0 }
 0x61c   :  { %v5327_v32 = vpop.f32.mrb[21].mxu1  ;;  %v5302_v52 = vpop.f32.mrb[23].mxu0 }
 0x61d   :  { %v5328_v63 = vadd.f32 %v5327_v32, %v5326_v35  ;;  %v5329_v12 = vpop.f32.mrb[22].mxu1  ;;  %v5303_v6 = vadd.f32 %v5302_v52, %v5301_v60 }
 0x61e   :  { %v5330_v57 = vpop.f32.mrb[23].mxu1 }
 0x61f   :  { %v8416_v15 = vadd.f32 %v5328_v63, %v5300_v61  ;;  %v5331_v39 = vadd.f32 %v5330_v57, %v5329_v12 }
 0x621   :  { %v8418_v59 = vadd.f32 %v5331_v39, %v5303_v6  ;;  %1785 = vadd.xlane.f32.xlu0 %v8416_v15  ;;  %v5304_v45 = vpop.f32.mrb[24].mxu0  ;;  %v1797_v35 = vmul.f32 %v8416_v15, %v8416_v15 }
 0x622   :  { %v5305_v28 = vpop.f32.mrb[25].mxu0 }
 0x623   :  { %v5332_v20 = vpop.f32.mrb[24].mxu1  ;;  %v5306_v27 = vadd.f32 %v5305_v28, %v5304_v45  ;;  %v5307_v44 = vpop.f32.mrb[26].mxu0  ;;  %v1798_v61 = vmul.f32 %v8418_v59, %v8418_v59 }
 0x624   :  { %v5333_v40 = vpop.f32.mrb[25].mxu1  ;;  %v5308_v62 = vpop.f32.mrb[27].mxu0 }
 0x625   :  { %v5334_v16 = vadd.f32 %v5333_v40, %v5332_v20  ;;  %v5335_v17 = vpop.f32.mrb[26].mxu1  ;;  %1787 = vadd.xlane.f32.xlu0 %v8418_v59  ;;  %v5309_v23 = vadd.f32 %v5308_v62, %v5307_v44 }
 0x626   :  { %v5336_v13 = vpop.f32.mrb[27].mxu1 }
 0x627   :  { %v8422_v30 = vadd.f32 %v5334_v16, %v5306_v27  ;;  %v5337_v43 = vadd.f32 %v5336_v13, %v5335_v17 }
 0x629   :  { %v8426_v58 = vadd.f32 %v5337_v43, %v5309_v23  ;;  %1789 = vadd.xlane.f32.xlu1 %v8422_v30  ;;  %1801 = vadd.xlane.f32.xlu0 %v1797_v35  ;;  %v1799_v32 = vmul.f32 %v8422_v30, %v8422_v30 }
 0x62b   :  { %v1800_v63 = vmul.f32 %v8426_v58, %v8426_v58 }
 0x62d   :  { %1805 = vadd.xlane.f32.xlu1 %v1799_v32  ;;  %1803 = vadd.xlane.f32.xlu0 %v1798_v61 }
 0x631   :  { %1791 = vadd.xlane.f32.xlu1 %v8426_v58  ;;  %1807 = vadd.xlane.f32.xlu0 %v1800_v63 }
 0x6ae   :  { %v1786_v60 = vpop.xlane.xlu0 %1785 }
 0x6af   :  { %v1793_v52 = vmul.f32 0.0078125, %v1786_v60 }
 0x6b1   :  { %v1813_v45 = vmul.f32 %v1793_v52, %v1793_v52 }
 0x6b2   :  { %v1788_v12 = vpop.xlane.xlu0 %1787 }
 0x6b3   :  { %v1794_v57 = vmul.f32 0.0078125, %v1788_v12 }
 0x6b5   :  { %v1814_v27 = vmul.f32 %v1794_v57, %v1794_v57 }
 0x6b6   :  { %v1790_v6 = vpop.xlane.xlu1 %1789  ;;  %v1802_v39 = vpop.xlane.xlu0 %1801 }
 0x6b7   :  { %v1795_v20 = vmul.f32 0.0078125, %v1790_v6  ;;  %v1809_v28 = vmul.f32 0.0078125, %v1802_v39 }
 0x6b9   :  { %v1817_v40 = vsub.f32 %v1809_v28, %v1813_v45  ;;  %v1815_v17 = vmul.f32 %v1795_v20, %v1795_v20  ;;  %v1777_v28 = vld [vmem:[%s10053_s14 + $0x10] sm:$0xff] }
 0x6ba   :  { %v1806_v16 = vpop.xlane.xlu1 %1805  ;;  %v1804_v44 = vpop.xlane.xlu0 %1803 }
 0x6bb   :  { %v1821_v62 = vadd.f32 1e-05, %v1817_v40  ;;  %v1811_v13 = vmul.f32 0.0078125, %v1806_v16  ;;  %v1810_v23 = vmul.f32 0.0078125, %v1804_v44  ;;  %v1778_v44 = vld [vmem:[%s10053_s14 + $0x18] sm:$0xff] }
 0x6bd   :  { %6531 = vrsqrt.f32 %v1821_v62  ;;  %v1819_v43 = vsub.f32 %v1811_v13, %v1815_v17  ;;  %v1818_v35 = vsub.f32 %v1810_v23, %v1814_v27  ;;  %v1779_v27 = vld [vmem:[%s10053_s14 + $0x20] sm:$0xff] }
 0x6be   :  { %v1792_v32 = vpop.xlane.xlu1 %1791  ;;  %v1808_v61 = vpop.xlane.xlu0 %1807  ;;  %v1783_v23 = vld [vmem:[%s10054_s15 + $0x20] sm:$0xff] }
 0x6bf   :  { %v1823_v63 = vadd.f32 1e-05, %v1819_v43  ;;  %v1822_v60 = vadd.f32 1e-05, %v1818_v35  ;;  %v1796_v12 = vmul.f32 0.0078125, %v1792_v32  ;;  %v1812_v6 = vmul.f32 0.0078125, %v1808_v61 }
 0x6c0   :  { %v1781_v32 = vld [vmem:[%s10054_s15 + $0x10] sm:$0xff]  ;;  %v1780_v61 = vld [vmem:[%s10053_s14 + $0x28] sm:$0xff] }
 0x6c1   :  { %6533 = vrsqrt.f32 %v1823_v63  ;;  %v1816_v22 = vmul.f32 %v1796_v12, %v1796_v12 }
 0x6c2   :  { %6535 = vrsqrt.f32 %v1822_v60 }
 0x6c3   :  { %v1820_v39 = vsub.f32 %v1812_v6, %v1816_v22 }
 0x6c5   :  { %v1824_v45 = vadd.f32 1e-05, %v1820_v39 }
 0x6c7   :  { %v6532_v40 = vpop.eup %6531  ;;  %6537 = vrsqrt.f32 %v1824_v45 }
 0x6c8   :  { %v1829_v16 = vmul.f32 %v6532_v40, %v1777_v28  ;;  %v1784_v40 = vld [vmem:[%s10054_s15 + $0x28] sm:$0xff] }
 0x6ca   :  { %1843 = vperm.xlu1 %5659, %v1829_v16   ;;  %v1833_v43 = vmul.f32 %v1829_v16, %v1793_v52  ;;  %v1782_v52 = vld [vmem:[%s10054_s15 + $0x18] sm:$0xff] }
 0x6cb   :  { %v6534_v17 = vpop.eup %6533 }
 0x6cc   :  { %v6536_v62 = vpop.eup %6535  ;;  %v1831_v22 = vmul.f32 %v6534_v17, %v1779_v27  ;;  %v1837_v39 = vsub.f32 %v1781_v32, %v1833_v43 }
 0x6cd   :  { %v1830_v13 = vmul.f32 %v6536_v62, %v1778_v44 }
 0x6ce   :  { %1853 = vperm.xlu0 %5660, %v1831_v22   ;;  %v1835_v35 = vmul.f32 %v1831_v22, %v1795_v20 }
 0x6cf   :  { %1848 = vperm.xlu1 %5659, %v1830_v13   ;;  %v1834_v6 = vmul.f32 %v1830_v13, %v1794_v57 }
 0x6d0   :  { %v1839_v63 = vsub.f32 %v1783_v23, %v1835_v35 }
 0x6d1   :  { %v6538_v60 = vpop.eup %6537  ;;  %v1838_v20 = vsub.f32 %v1782_v52, %v1834_v6  ;;  %v95_v6 = vshra.s32 %v6823_v4, 6 }
 0x6d2   :  { %1877 = vperm.xlu0 %5660, %v1839_v63   ;;  %v1832_v45 = vmul.f32 %v6538_v60, %v1780_v61 }
 0x6d3   :  { %1867 = vperm.xlu1 %5659, %v1837_v39   ;;  %vm96_vm4 = vcmp.eq.s32.totalorder %v95_v6, 1  ;;  %v2104_v6 = vld [vmem:[%s10059_s7 + $0x48] sm:$0xff] }
 0x6d4   :  { %v1836_v28 = vmul.f32 %v1832_v45, %v1796_v12 }
 0x6d6   :  { %1858 = vperm.xlu0 %5660, %v1832_v45   ;;  %v1840_v16 = vsub.f32 %v1784_v40, %v1836_v28 }
 0x6d7   :  { %1872 = vperm.xlu1 %5659, %v1838_v20  }
 0x6db   :  { %1882 = vperm.xlu1 %5659, %v1840_v16  }
 0x749   :  { %v1844_v27 = vpop.permute.xlu1 %1843 }
 0x74a   :  { %v1861_v17 = vmul.f32 %v1844_v27, %v8416_v15  ;;  %v10874_v27 = vld [vmem:[#allocation2_spill] sm:$0xff] }
 0x74d   :  { %v1854_v57 = vpop.permute.xlu0 %1853 }
 0x74e   :  { %v1849_v44 = vpop.permute.xlu1 %1848  ;;  %v1863_v62 = vmul.f32 %v1854_v57, %v8422_v30  ;;  %v10875_v57 = vld [vmem:[#allocation3_spill] sm:$0xff] }
 0x74f   :  { %v1862_v12 = vmul.f32 %v1849_v44, %v8418_v59  ;;  %v8481_v44 = vsel %vm96_vm4, %v10875_v57, %v10874_v27 }
 0x751   :  { %v1878_v22 = vpop.permute.xlu0 %1877 }
 0x752   :  { %v1868_v13 = vpop.permute.xlu1 %1867  ;;  %v1887_v43 = vadd.f32 %v1878_v22, %v1863_v62 }
 0x753   :  { %v1885_v23 = vadd.f32 %v1868_v13, %v1861_v17 }
 0x754   :  { %v1895_v63 = vmul.f32 0.2, %v1887_v43  ;;  %vm1891_vm12 = vcmp.ge.f32.partialorder %v1887_v43, 0.0 }
 0x755   :  { %v1859_v32 = vpop.permute.xlu0 %1858  ;;  %v1893_v61 = vmul.f32 0.2, %v1885_v23  ;;  %vm1889_vm7 = vcmp.ge.f32.partialorder %v1885_v23, 0.0 }
 0x756   :  { %v1873_v35 = vpop.permute.xlu1 %1872  ;;  %v1864_v15 = vmul.f32 %v1859_v32, %v8426_v58  ;;  %v8467_v45 = vsel %vm1891_vm12, %v1887_v43, %v1895_v63  ;;  %v2097_v43 = vld [vmem:[%s10059_s7 + $0x10] sm:$0xff]  ;;  %v2098_v32 = vld [vmem:[%s10059_s7 + $0x18] sm:$0xff] }
 0x757   :  { %v1886_v60 = vadd.f32 %v1873_v35, %v1862_v12  ;;  %v8465_v52 = vsel %vm1889_vm7, %v1885_v23, %v1893_v61  ;;  %v6345_v23 = vld [vmem:[%s10058_s6 + $0x4] ss:$12 sps:$4 sm:$0xff]   ;;  %v2096_v12 = vld [vmem:[%s10059_s7 + $0x8] sm:$0xff] }
 0x758   :  { %2311 = vmatprep.mubr.bf16.mxu0 %v6345_v23  ;;  %v6355_v35 = vld [vmem:[%s10058_s6 + $0x8] ss:$12 sps:$4 sm:$0xff]   ;;  %v2095_v61 = vld [vmem:[%s10059_s7] sm:$0xff] }
 0x759   :  { %vm1890_vm2 = vcmp.ge.f32.partialorder %v1886_v60, 0.0  ;;  %v1894_v39 = vmul.f32 0.2, %v1886_v60  ;;  %v2101_v63 = vld [vmem:[%s10059_s7 + $0x30] sm:$0xff] }
 0x75a   :  { %v1883_v30 = vpop.permute.xlu1 %1882 }
 0x75b   :  { %v8469_v20 = vsel %vm1890_vm2, %v1886_v60, %v1894_v39  ;;  %v1888_v59 = vadd.f32 %v1883_v30, %v1864_v15  ;;  %v2100_v60 = vld [vmem:[%s10059_s7 + $0x28] sm:$0xff]  ;;  %v2099_v39 = vld [vmem:[%s10059_s7 + $0x20] sm:$0xff]  ;;  %v2105_v30 = vld [vmem:[%s10059_s7 + $0x50] sm:$0xff] }
 0x75c   :  { %v5821_v28 = vpack.i.bf16 %v8469_v20, %v8465_v52  ;;  %v5826_v40 = vpack.i.bf16 %v8467_v45, %v8469_v20  ;;  %v2058_v58 = vpack.c.bf16 %v8469_v20, %v8465_v52  ;;  %v2103_v15 = vld [vmem:[%s10059_s7 + $0x40] sm:$0xff] }
 0x75d   :  { %vm1892_vm0 = vcmp.ge.f32.partialorder %v1888_v59, 0.0  ;;  %v1896_v16 = vmul.f32 0.2, %v1888_v59 }
 0x75e   :  { %5822 = vrot.lane.b32.xlu1 %v5821_v28, %s6714_s5  ;;  %5827 = vrot.lane.b32.xlu0 %v5826_v40, %s6708_s27 }
 0x75f   :  { %v8483_v17 = vsel %vm1892_vm0, %v1888_v59, %v1896_v16  ;;  %vm10347_vm0 = vcmask 850944   ;;  %v2106_v59 = vld [vmem:[%s10059_s7 + $0x58] sm:$0xff]  ;;  %v1901_v16 = vand.u32 7, %v6823_v4 }
 0x760   :  { %v5836_v62 = vpack.i.bf16 %v8483_v17, %v8467_v45  ;;  %v5831_v22 = vpack.i.bf16 %v8481_v44, %v8483_v17  ;;  %v2059_v13 = vpack.c.bf16 %v8483_v17, %v8467_v45  ;;  %5447 = vmatprep.mubr.msk.bf16.mxu1 %vm10347_vm0, %v6355_v35 }
 0x761   :  { %vm8568_vm2 = vcmp.gt.s32.totalorder %v1901_v16, 0  ;;  %vm8623_vm10 = vcmp.lt.s32.totalorder %v1901_v16, 7 }
 0x762   :  { %5837 = vrot.lane.b32.xlu1 %v5836_v62, %s6714_s5  ;;  %5832 = vrot.lane.b32.xlu0 %v5831_v22, %s6708_s27  ;;  %vm8584_vm12 = vmpackc.low %vm8568_vm2, %vm8568_vm2 }
 0x763   :  { %vm8644_vm11 = vmpackc.low %vm8623_vm10, %vm10890_vm13 }
 0x766   :  { %5842 = vrot.lane.b32.xlu1 %v5821_v28, %s6715_s26  ;;  %1916 = vrot.lane.b32.xlu0 %v8481_v44, %s6714_s5 }
 0x76a   :  { %5847 = vrot.lane.b32.xlu1 %v5821_v28, %s10661_s24  ;;  %5852 = vrot.lane.b32.xlu0 %v5836_v62, %s6715_s26 }
 0x76e   :  { %5862 = vrot.lane.b32.xlu1 %v5836_v62, %s10661_s24  ;;  %1934 = vrot.lane.b32.xlu0 %v8481_v44, %s6715_s26 }
 0x772   :  { %1986 = vrot.lane.b32.xlu1 %v8481_v44, %s10661_s24  ;;  %5857 = vrot.lane.b32.xlu0 %v5821_v28, %s10345_s3 }
 0x776   :  { %5867 = vrot.lane.b32.xlu1 %v5821_v28, %s6717_s4  ;;  %5872 = vrot.lane.b32.xlu0 %v5836_v62, %s10345_s3 }
 0x77a   :  { %1961 = vrot.lane.b32.xlu1 %v8465_v52, %s6708_s27  ;;  %1951 = vrot.lane.b32.xlu0 %v8481_v44, %s10345_s3 }
 0x77e   :  { %2003 = vrot.lane.b32.xlu1 %v8481_v44, %s6717_s4  ;;  %5877 = vrot.lane.b32.xlu0 %v5836_v62, %s6717_s4 }
 0x782   :  { %5882 = vrot.lane.b32.xlu1 %v5826_v40, %s6718_s30  ;;  %2013 = vrot.lane.b32.xlu0 %v8465_v52, %s6718_s30  ;;  %v1902_v40 = vshra.s32 %v6823_v4, 3 }
 0x784   :  { %v8566_v27 = vand.u32 7, %v1902_v40 }
 0x786   :  { %5892 = vrot.lane.b32.xlu1 %v5821_v28, %s10343_s1  ;;  %5887 = vrot.lane.b32.xlu0 %v5831_v22, %s6718_s30  ;;  %v2102_v28 = vld [vmem:[%s10059_s7 + $0x38] sm:$0xff]  ;;  %vm10348_vm4 = vcmp.gt.s32.totalorder %v8566_v27, 0  ;;  %vm10895_vm13 = vcmp.gt.s32.totalorder %v8566_v27, 0  ;;  %vm10352_vm1 = vcmp.lt.s32.totalorder %v8566_v27, 7  ;;  %vm10904_vm14 = vcmp.lt.s32.totalorder %v8566_v27, 7 }
 0x787   :  { %vm8577_vm7 = vmand %vm10348_vm4, %vm8568_vm2  ;;  %v6352_v27 = vld [vmem:[%s10058_s6 + $0x4c] ss:$12 sps:$4 sm:$0xff]  }
 0x788   :  { %vm8591_vm0 = vmpackc.low %vm8577_vm7, %vm8577_vm7 }
 0x789   :  { %vm8619_vm3 = vmpackc.low %vm10348_vm4, %vm8577_vm7 }
 0x78a   :  { %2038 = vrot.lane.b32.xlu1 %v8481_v44, %s10343_s1  ;;  %5897 = vrot.lane.b32.xlu0 %v5836_v62, %s10343_s1  ;;  %vm8635_vm7 = vmpackc.low %vm10348_vm4, %vm10348_vm4  ;;  %s10917_s1 = smov 7  }
 0x78b   :  { %vm8656_vm4 = vmpackc.low %vm8623_vm10, %vm8623_vm10 }
 0x78c   :  { %vm8667_vm5 = vmand %vm10895_vm13, %vm8623_vm10 }
 0x78d   :  { %vm8679_vm13 = vmpackc.low %vm8667_vm5, %vm8667_vm5 }
 0x78e   :  { %2119 = vperm.xlu1 %5659, %v2097_v43   ;;  %2114 = vperm.xlu0 %5660, %v2096_v12   ;;  %vm8688_vm9 = vmand %vm10352_vm1, %vm8568_vm2 }
 0x78f   :  { %vm8701_vm8 = vmpackc.low %vm8688_vm9, %vm8688_vm9 }
 0x790   :  { %vm10357_vm1 = vmpackc.low %vm8568_vm2, %vm8667_vm5 }
 0x791   :  { %vm8731_vm15 = vmpackc.low %vm10904_vm14, %vm8688_vm9 }
 0x792   :  { %2124 = vperm.xlu1 %5659, %v2098_v32   ;;  %2109 = vperm.xlu0 %5660, %v2095_v61   ;;  %vm8747_vm9 = vmpackc.low %vm10904_vm14, %vm10904_vm14 }
 0x796   :  { %2139 = vperm.xlu1 %5659, %v2101_v63   ;;  %2134 = vperm.xlu0 %5660, %v2100_v60  }
 0x79a   :  { %2154 = vperm.xlu1 %5659, %v2104_v6   ;;  %2129 = vperm.xlu0 %5660, %v2099_v39  }
 0x79e   :  { %2149 = vperm.xlu1 %5659, %v2103_v15   ;;  %2159 = vperm.xlu0 %5660, %v2105_v30  }
 0x7a2   :  { %2164 = vperm.xlu1 %5659, %v2106_v59   ;;  %2144 = vperm.xlu0 %5660, %v2102_v28  }
 0x7d0   :  { %v5823_v62 = vpop.permute.xlu1 %5822  ;;  %v5828_v22 = vpop.permute.xlu0 %5827 }
 0x7d1   :  { %v5825_v43 = vunpack.i.h.bf16 %v5823_v62  ;;  %v5824_v12 = vunpack.i.l.bf16 %v5823_v62  ;;  %v5830_v35 = vunpack.i.h.bf16 %v5828_v22  ;;  %v5829_v32 = vunpack.i.l.bf16 %v5828_v22 }
 0x7d3   :  { %v4789_v63 = vpack.c.bf16 %v5825_v43, %v5824_v12  ;;  %v4813_v60 = vpack.c.bf16 %v5830_v35, %v5829_v32 }
 0x7d4   :  { %v5838_v39 = vpop.permute.xlu1 %5837  ;;  %v8595_v15 = vpop.permute.xlu0 %5832 }
 0x7d5   :  { %v5840_v30 = vunpack.i.h.bf16 %v5838_v39  ;;  %v5839_v59 = vunpack.i.l.bf16 %v5838_v39  ;;  %v10351_v28 = vunpack.i.h.bf16 %v8595_v15  ;;  %v5834_v40 = vunpack.i.l.bf16 %v8595_v15  ;;  %5338 = vmatprep.subr.msk.bf16.mxu0 %vm8584_vm12, %v4813_v60 }
 0x7d6   :  { %5339 = vmatpush3.bf16.msk.msra.mxu0 %vm8591_vm0, %v4789_v63 }
 0x7d7   :  { %v4792_v62 = vpack.c.bf16 %v5840_v30, %v5839_v59  ;;  %v4816_v22 = vpack.c.bf16 %v10351_v28, %v5834_v40 }
 0x7d8   :  { %v5843_v43 = vpop.permute.xlu1 %5842  ;;  %v8605_v12 = vpop.permute.xlu0 %1916 }
 0x7d9   :  { %v5844_v35 = vunpack.i.l.bf16 %v5843_v43  ;;  %5340 = vmatprep.subr.msk.bf16.mxu0 %vm8584_vm12, %v4816_v22  ;;  %v5845_v30 = vunpack.i.h.bf16 %v5843_v43  ;;  %v6367_v43 = vld [vmem:[%s10060_s8] ss:$12 sps:$4 sm:$0xff]  }
 0x7da   :  { %5341 = vmatpush3.bf16.msk.msra.mxu0 %vm8591_vm0, %v4792_v62 }
 0x7db   :  { %v4795_v32 = vpack.c.bf16 %v5844_v35, %v8605_v12  ;;  %5342 = vmatprep.subr.bf16.mxu0 %v2058_v58 }
 0x7dc   :  { %v5848_v60 = vpop.permute.xlu1 %5847  ;;  %v5853_v39 = vpop.permute.xlu0 %5852 }
 0x7dd   :  { %v5849_v59 = vunpack.i.l.bf16 %v5848_v60  ;;  %v5854_v40 = vunpack.i.l.bf16 %v5853_v39  ;;  %v5850_v22 = vunpack.i.h.bf16 %v5848_v60 }
 0x7de   :  { %5343 = vmatpush3.bf16.msk.msra.mxu0 %vm8619_vm3, %v4795_v32 }
 0x7df   :  { %v4798_v52 = vpack.c.bf16 %v5854_v40, %v5845_v30  ;;  %5344 = vmatprep.subr.bf16.mxu0 %v2059_v13  ;;  %v4819_v45 = vpack.c.bf16 %v5849_v59, %v8481_v44  ;;  %v5855_v13 = vunpack.i.h.bf16 %v5853_v39 }
 0x7e0   :  { %v5863_v58 = vpop.permute.xlu1 %5862  ;;  %v8639_v16 = vpop.permute.xlu0 %1934 }
 0x7e1   :  { %v5864_v17 = vunpack.i.l.bf16 %v5863_v58  ;;  %v4801_v35 = vpack.c.bf16 %v8639_v16, %v5855_v13 }
 0x7e2   :  { %5345 = vmatpush3.bf16.msk.msra.mxu0 %vm8635_vm7, %v4798_v52  ;;  %v5865_v52 = vunpack.i.h.bf16 %v5863_v58 }
 0x7e3   :  { %5346 = vmatprep.subr.msk.bf16.mxu0 %vm8644_vm11, %v4819_v45  ;;  %v4822_v39 = vpack.c.bf16 %v5864_v17, %v5850_v22 }
 0x7e4   :  { %v8661_v32 = vpop.permute.xlu1 %1986  ;;  %v5858_v30 = vpop.permute.xlu0 %5857 }
 0x7e5   :  { %v5860_v59 = vunpack.i.h.bf16 %v5858_v30  ;;  %v5859_v40 = vunpack.i.l.bf16 %v5858_v30  ;;  %v4825_v17 = vpack.c.bf16 %v8661_v32, %v5865_v52 }
 0x7e6   :  { %5347 = vmatpush3.bf16.msk.msra.mxu0 %vm8635_vm7, %v4801_v35 }
 0x7e7   :  { %v4804_v45 = vpack.c.bf16 %v5860_v59, %v5859_v40  ;;  %5348 = vmatprep.subr.msk.bf16.mxu0 %vm8656_vm4, %v4822_v39 }
 0x7e8   :  { %v5868_v22 = vpop.permute.xlu1 %5867  ;;  %v5873_v58 = vpop.permute.xlu0 %5872 }
 0x7e9   :  { %v5870_v30 = vunpack.i.h.bf16 %v5868_v22  ;;  %v5869_v28 = vunpack.i.l.bf16 %v5868_v22  ;;  %v5875_v35 = vunpack.i.h.bf16 %v5873_v58  ;;  %v5874_v49 = vunpack.i.l.bf16 %v5873_v58  ;;  %v6370_v22 = vld [vmem:[%s10060_s8 + $0x8] ss:$12 sps:$4 sm:$0xff]  }
 0x7ea   :  { %5349 = vmatpush3.bf16.msk.msra.mxu0 %vm8679_vm13, %v4804_v45 }
 0x7eb   :  { %v4807_v59 = vpack.c.bf16 %v5875_v35, %v5874_v49  ;;  %5350 = vmatprep.subr.msk.bf16.mxu0 %vm8656_vm4, %v4825_v17  ;;  %v4828_v58 = vpack.c.bf16 %v5870_v30, %v5869_v28  ;;  %v6343_v28 = vld [vmem:[%s10058_s6] ss:$12 sps:$4 sm:$0xff]   ;;  %v6346_v30 = vld [vmem:[%s10058_s6 + $0x1c] ss:$12 sps:$4 sm:$0xff]  }
 0x7ec   :  { %v1962_v40 = vpop.permute.xlu1 %1961  ;;  %v8696_v52 = vpop.permute.xlu0 %1951 }
 0x7ed   :  { %v4810_v49 = vpack.c.bf16 %v1962_v40, %v8696_v52 }
 0x7ee   :  { %5351 = vmatpush3.bf16.msk.msra.mxu0 %vm8679_vm13, %v4807_v59 }
 0x7ef   :  { %5352 = vmatprep.subr.msk.bf16.mxu0 %vm8701_vm8, %v4828_v58 }
 0x7f0   :  { %v8714_v45 = vpop.permute.xlu1 %2003  ;;  %v5878_v17 = vpop.permute.xlu0 %5877 }
 0x7f1   :  { %v5880_v35 = vunpack.i.h.bf16 %v5878_v17  ;;  %v5879_v0 = vunpack.i.l.bf16 %v5878_v17 }
 0x7f2   :  { %5353 = vmatpush3.bf16.msk.msra.mxu0 %vm10357_vm1, %v4810_v49  ;;  %vm2040_vm1 = vmand %vm10904_vm14, %vm8623_vm10  ;;  %vm10913_vm14 = vcmask 850944  }
 0x7f3   :  { %v4831_v59 = vpack.c.bf16 %v5880_v35, %v5879_v0  ;;  %vm8773_vm6 = vmpackc.low %vm2040_vm1, %vm2040_vm1 }
 0x7f4   :  { %v5883_v40 = vpop.permute.xlu1 %5882  ;;  %v2014_v58 = vpop.permute.xlu0 %2013 }
 0x7f5   :  { %v5885_v9 = vunpack.i.h.bf16 %v5883_v40  ;;  %v5884_v11 = vunpack.i.l.bf16 %v5883_v40  ;;  %v4834_v29 = vpack.c.bf16 %v2014_v58, %v8714_v45  ;;  %2312 = vmatmul.mubr.bf16.vlgmr.msra.gmra.mrb[28].mxu0 %v6343_v28  ;;  %5433 = vmatprep.subr.msk.bf16.mxu1 %vm8701_vm8, %v4831_v59  ;;  %v6349_v40 = vld [vmem:[%s10058_s6 + $0x34] ss:$12 sps:$4 sm:$0xff]  }
 0x7f6   :  { %5434 = vmatpush3.bf16.msk.msra.mxu1 %vm8701_vm8, %v4831_v59  ;;  %2319 = vmatprep.mubr.bf16.mxu0 %v6346_v30  ;;  %v6348_v30 = vld [vmem:[%s10058_s6 + $0x18] ss:$12 sps:$4 sm:$0xff]  }
 0x7f7   :  { %5435 = vmatprep.subr.msk.bf16.mxu1 %vm8731_vm15, %v4834_v29  ;;  %v4837_v49 = vpack.c.bf16 %v5885_v9, %v5884_v11 }
 0x7f8   :  { %v8742_v0 = vpop.permute.xlu0 %5887  ;;  %v5893_v59 = vpop.permute.xlu1 %5892 }
 0x7f9   :  { %v10358_v35 = vunpack.i.h.bf16 %v8742_v0  ;;  %v5889_v28 = vunpack.i.l.bf16 %v8742_v0  ;;  %v5895_v9 = vunpack.i.h.bf16 %v5893_v59  ;;  %v5894_v11 = vunpack.i.l.bf16 %v5893_v59 }
 0x7fa   :  { %5436 = vmatpush3.bf16.msk.msra.mxu1 %vm8731_vm15, %v4834_v29 }
 0x7fb   :  { %5437 = vmatprep.subr.msk.bf16.mxu1 %vm8747_vm9, %v4837_v49  ;;  %v4840_v58 = vpack.c.bf16 %v10358_v35, %v5889_v28  ;;  %v4843_v59 = vpack.c.bf16 %v5895_v9, %v5894_v11  ;;  %v6354_v11 = vld [vmem:[%s10058_s6 + $0x48] ss:$12 sps:$4 sm:$0xff]  }
 0x7fc   :  { %v5898_v42 = vpop.permute.xlu0 %5897  ;;  %v2039_v62 = vpop.permute.xlu1 %2038 }
 0x7fd   :  { %2320 = vmatmul.mubr.bf16.gmra.mrb[32].mxu0 %v6348_v30  ;;  %v5900_v28 = vunpack.i.h.bf16 %v5898_v42  ;;  %v5899_v30 = vunpack.i.l.bf16 %v5898_v42  ;;  %v2047_v9 = vsel %vm2040_vm1, %v2039_v62, 0.0  ;;  %vm10911_vm1 = vcmask 1043456   ;;  %v6361_v62 = vld [vmem:[%s10058_s6 + $0x50] ss:$12 sps:$4 sm:$0xff]  }
 0x7fe   :  { %5438 = vmatpush3.bf16.msk.msra.mxu1 %vm8747_vm9, %v4837_v49  ;;  %2327 = vmatprep.mubr.bf16.mxu0 %v6349_v40  ;;  %v6351_v49 = vld [vmem:[%s10058_s6 + $0x30] ss:$12 sps:$4 sm:$0xff]   ;;  %v2070_v42 = vpack.c.bf16 %v2047_v9, %v2047_v9  ;;  %vm10912_vm10 = vmmov %vm10911_vm1  ;;  %v6364_v9 = vld [vmem:[%s10058_s6 + $0x78] ss:$12 sps:$4 sm:$0xff]  }
 0x7ff   :  { %5439 = vmatprep.subr.msk.bf16.mxu1 %vm8747_vm9, %v4840_v58  ;;  %v4846_v40 = vpack.c.bf16 %v5900_v28, %v5899_v30  ;;  %v6356_v28 = vld [vmem:[%s10058_s6 + $0x20] ss:$12 sps:$4 sm:$0xff]   ;;  %v6360_v30 = vld [vmem:[%s10058_s6 + $0x38] ss:$12 sps:$4 sm:$0xff]  }
 0x802   :  { %5440 = vmatpush3.bf16.msk.msra.mxu1 %vm8747_vm9, %v4840_v58  ;;  %v6357_v58 = vld [vmem:[%s10058_s6 + $0x64] ss:$12 sps:$4 sm:$0xff]  }
 0x803   :  { %5441 = vmatprep.subr.msk.bf16.mxu1 %vm8773_vm6, %v4843_v59 }
 0x805   :  { %2328 = vmatmul.mubr.bf16.gmra.mrb[36].mxu0 %v6351_v49  ;;  %v6359_v49 = vld [vmem:[%s10058_s6 + $0x60] ss:$12 sps:$4 sm:$0xff]  }
 0x806   :  { %5442 = vmatpush3.bf16.msk.msra.mxu1 %vm8773_vm6, %v4843_v59  ;;  %2335 = vmatprep.mubr.bf16.mxu0 %v6352_v27  ;;  %v8801_v59 = vsel %vm10912_vm10, %v2070_v42, 0  ;;  %v6362_v27 = vld [vmem:[%s10058_s6 + $0x7c] ss:$12 sps:$4 sm:$0xff]  }
 0x807   :  { %5443 = vmatprep.subr.msk.bf16.mxu1 %vm8773_vm6, %v4846_v40 }
 0x80a   :  { %5444 = vmatpush3.bf16.msk.msra.mxu1 %vm8773_vm6, %v4846_v40  ;;  %v6365_v40 = vld [vmem:[%s10058_s6 + $0x68] ss:$12 sps:$4 sm:$0xff]  }
 0x80b   :  { %5477 = vmatprep.subr.msk.bf16.mxu1 %vm10911_vm1, %v2070_v42  ;;  %vm10914_vm1 = vmmov %vm10913_vm14  ;;  %v6366_v42 = vld [vmem:[%s10058_s6 + $0x80] ss:$12 sps:$4 sm:$0xff]  }
 0x80c   :  { %vm10915_vm10 = vmmov %vm10914_vm1 }
 0x80d   :  { %2336 = vmatmul.mubr.bf16.gmra.mrb[40].mxu0 %v6354_v11  ;;  %v2120_v41 = vpop.permute.xlu1 %2119 }
 0x80e   :  { %5446 = vmatpush3.bf16.msra.mxu1 %v8801_v59  ;;  %2343 = vmatprep.mubr.bf16.mxu0 %v6357_v58 }
 0x811   :  { %5448 = vmatmul.mubr.msk.bf16.vlgmr.msra.gmra.mrb[28].mxu1 %vm10913_vm14, %v6356_v28  ;;  %vm10916_vm14 = vmmov %vm10914_vm1 }
 0x812   :  { %5451 = vmatprep.mubr.msk.bf16.mxu1 %vm10914_vm1, %v6360_v30 }
 0x815   :  { %2344 = vmatmul.mubr.bf16.gmra.mrb[44].mxu0 %v6359_v49 }
 0x816   :  { %2351 = vmatprep.mubr.bf16.mxu0 %v6362_v27 }
 0x819   :  { %5452 = vmatmul.mubr.msk.bf16.gmra.mrb[32].mxu1 %vm10915_vm10, %v6361_v62  ;;  %v2115_v62 = vpop.permute.xlu0 %2114  ;;  %vm6721_vm10 = vmmov 0  }
 0x81a   :  { %5455 = vmatprep.mubr.msk.bf16.mxu1 %vm10916_vm14, %v6365_v40 }
 0x81d   :  { %2352 = vmatmul.mubr.bf16.gmra.mrb[48].mxu0 %v6364_v9  ;;  %v2110_v40 = vpop.permute.xlu0 %2109 }
 0x821   :  { %5456 = vmatmul.mubr.msk.bf16.gmra.mrb[36].mxu1 %vm10914_vm1, %v6366_v42  ;;  %v2135_v47 = vpop.permute.xlu0 %2134 }
 0x8c8   :  { %v5354_v11 = vpop.f32.mrb[28].mxu0 }
 0x8c9   :  { %v5355_v58 = vpop.f32.mrb[29].mxu0 }
 0x8ca   :  { %v5356_v28 = vadd.f32 %v5355_v58, %v5354_v11  ;;  %v5357_v30 = vpop.f32.mrb[30].mxu0  ;;  %v2125_v11 = vpop.permute.xlu1 %2124 }
 0x8cb   :  { %v5358_v49 = vpop.f32.mrb[31].mxu0  ;;  %v2130_v58 = vpop.permute.xlu0 %2129 }
 0x8cc   :  { %v5359_v27 = vadd.f32 %v5358_v49, %v5357_v30 }
 0x8ce   :  { %v2317_v55 = vadd.f32 %v5359_v27, %v2115_v62 }
 0x8cf   :  { %v2160_v34 = vpop.permute.xlu0 %2159 }
 0x8d0   :  { %v5360_v35 = vpop.f32.mrb[32].mxu0 }
 0x8d1   :  { %v5361_v19 = vpop.f32.mrb[33].mxu0 }
 0x8d2   :  { %v5362_v50 = vadd.f32 %v5361_v19, %v5360_v35  ;;  %v5363_v26 = vpop.f32.mrb[34].mxu0  ;;  %v2140_v35 = vpop.permute.xlu1 %2139 }
 0x8d3   :  { %v5364_v46 = vpop.f32.mrb[35].mxu0 }
 0x8d4   :  { %v5365_v9 = vadd.f32 %v5364_v46, %v5363_v26  ;;  %v2322_v19 = vadd.f32 %v5362_v50, %v2120_v41  ;;  %v2314_v26 = vadd.f32 %v5356_v28, %v2110_v40 }
 0x8d6   :  { %v2325_v56 = vadd.f32 %v5365_v9, %v2125_v11  ;;  %v2155_v50 = vpop.permute.xlu1 %2154 }
 0x8d8   :  { %v5366_v2 = vpop.f32.mrb[36].mxu0 }
 0x8d9   :  { %v5367_v5 = vpop.f32.mrb[37].mxu0 }
 0x8da   :  { %v5368_v36 = vadd.f32 %v5367_v5, %v5366_v2  ;;  %v5369_v42 = vpop.f32.mrb[38].mxu0 }
 0x8db   :  { %v5370_v38 = vpop.f32.mrb[39].mxu0 }
 0x8dc   :  { %v5371_v3 = vadd.f32 %v5370_v38, %v5369_v42 }
 0x8e0   :  { %v5372_v10 = vpop.f32.mrb[40].mxu0 }
 0x8e1   :  { %v5373_v30 = vpop.f32.mrb[41].mxu0 }
 0x8e2   :  { %v5374_v49 = vadd.f32 %v5373_v30, %v5372_v10  ;;  %v5375_v7 = vpop.f32.mrb[42].mxu0 }
 0x8e3   :  { %v5376_v37 = vpop.f32.mrb[43].mxu0 }
 0x8e4   :  { %v5377_v51 = vadd.f32 %v5376_v37, %v5375_v7  ;;  %v5449_v48 = vpop.f32.mrb[28].mxu1  ;;  %v2338_v40 = vadd.f32 %v5374_v49, %v2140_v35 }
 0x8e5   :  { %v2403_v46 = vadd.f32 %v5449_v48, %v2322_v19  ;;  %v2394_v31 = vpop.f32.mrb[29].mxu1 }
 0x8e6   :  { %v2395_v5 = vadd.f32 %v2394_v31, %v2314_v26  ;;  %v5450_v2 = vpop.f32.mrb[30].mxu1  ;;  %v2145_v31 = vpop.permute.xlu0 %2144  ;;  %v2333_v26 = vadd.f32 %v5371_v3, %v2135_v47 }
 0x8e7   :  { %v4856_v38 = vmul.f32 -1.442695, %v2403_v46  ;;  %v2406_v42 = vadd.f32 %v5450_v2, %v2325_v56  ;;  %v2397_v21 = vpop.f32.mrb[31].mxu1  ;;  %v2330_v56 = vadd.f32 %v5368_v36, %v2130_v58 }
 0x8e8   :  { %v4854_v25 = vmul.f32 -1.442695, %v2395_v5  ;;  %v2398_v1 = vadd.f32 %v2397_v21, %v2317_v55  ;;  %v5378_v10 = vpop.f32.mrb[44].mxu0  ;;  %v2341_v55 = vadd.f32 %v5377_v51, %v2145_v31 }
 0x8e9   :  { %6539 = vpow2.f32 %v4856_v38  ;;  %v4857_v30 = vmul.f32 -1.442695, %v2406_v42  ;;  %v5379_v41 = vpop.f32.mrb[45].mxu0 }
 0x8ea   :  { %6541 = vpow2.f32 %v4854_v25  ;;  %v4855_v37 = vmul.f32 -1.442695, %v2398_v1  ;;  %v5380_v7 = vadd.f32 %v5379_v41, %v5378_v10  ;;  %v5381_v48 = vpop.f32.mrb[46].mxu0  ;;  %v2150_v1 = vpop.permute.xlu1 %2149 }
 0x8eb   :  { %6543 = vpow2.f32 %v4857_v30  ;;  %v5382_v28 = vpop.f32.mrb[47].mxu0 }
 0x8ec   :  { %6545 = vpow2.f32 %v4855_v37  ;;  %v5383_v27 = vadd.f32 %v5382_v28, %v5381_v48  ;;  %v5453_v62 = vpop.f32.mrb[32].mxu1  ;;  %v2346_v51 = vadd.f32 %v5380_v7, %v2150_v1 }
 0x8ed   :  { %v2419_v9 = vadd.f32 %v5453_v62, %v2338_v40  ;;  %v2410_v11 = vpop.f32.mrb[33].mxu1 }
 0x8ee   :  { %v2411_v21 = vadd.f32 %v2410_v11, %v2330_v56  ;;  %v5454_v19 = vpop.f32.mrb[34].mxu1  ;;  %v2349_v56 = vadd.f32 %v5383_v27, %v2155_v50  ;;  %v2165_v11 = vpop.permute.xlu1 %2164 }
 0x8ef   :  { %v4860_v46 = vmul.f32 -1.442695, %v2419_v9  ;;  %v2422_v5 = vadd.f32 %v5454_v19, %v2341_v55  ;;  %v2413_v25 = vpop.f32.mrb[35].mxu1 }
 0x8f0   :  { %v4858_v2 = vmul.f32 -1.442695, %v2411_v21  ;;  %v2414_v38 = vadd.f32 %v2413_v25, %v2333_v26  ;;  %v5384_v42 = vpop.f32.mrb[48].mxu0 }
 0x8f1   :  { %v4861_v10 = vmul.f32 -1.442695, %v2422_v5  ;;  %v5385_v49 = vpop.f32.mrb[49].mxu0  ;;  %6547 = vpow2.f32 %v4860_v46 }
 0x8f2   :  { %v4859_v35 = vmul.f32 -1.442695, %v2414_v38  ;;  %v5386_v30 = vadd.f32 %v5385_v49, %v5384_v42  ;;  %v5387_v41 = vpop.f32.mrb[50].mxu0  ;;  %6549 = vpow2.f32 %v4858_v2 }
 0x8f3   :  { %v6540_v36 = vpop.eup %6539  ;;  %v5388_v58 = vpop.f32.mrb[51].mxu0  ;;  %6551 = vpow2.f32 %v4861_v10 }
 0x8f4   :  { %v6542_v37 = vpop.eup %6541  ;;  %v2455_v48 = vadd.f32 1.0, %v6540_v36  ;;  %v5389_v47 = vadd.f32 %v5388_v58, %v5387_v41  ;;  %v2354_v3 = vadd.f32 %v5386_v30, %v2160_v34  ;;  %v5457_v28 = vpop.f32.mrb[36].mxu1  ;;  %6553 = vpow2.f32 %v4859_v35 }
 0x8f5   :  { %v6544_v40 = vpop.eup %6543  ;;  %v2453_v31 = vadd.f32 1.0, %v6542_v37  ;;  %v2426_v62 = vpop.f32.mrb[37].mxu1 }
 0x8f6   :  { %v6546_v9 = vpop.eup %6545  ;;  %6555 = vrcp.f32 %v2455_v48  ;;  %v2456_v55 = vadd.f32 1.0, %v6544_v40  ;;  %v2435_v21 = vadd.f32 %v5457_v28, %v2354_v3  ;;  %v2427_v19 = vadd.f32 %v2426_v62, %v2346_v51  ;;  %v5458_v26 = vpop.f32.mrb[38].mxu1 }
 0x8f7   :  { %6557 = vrcp.f32 %v2453_v31  ;;  %v2454_v7 = vadd.f32 1.0, %v6546_v9  ;;  %v2357_v46 = vadd.f32 %v5389_v47, %v2165_v11  ;;  %v2429_v5 = vpop.f32.mrb[39].mxu1 }
 0x8f8   :  { %6559 = vrcp.f32 %v2456_v55  ;;  %v2430_v25 = vadd.f32 %v2429_v5, %v2349_v56 }
 0x8f9   :  { %6561 = vrcp.f32 %v2454_v7  ;;  %v2438_v34 = vadd.f32 %v5458_v26, %v2357_v46 }
 0x8fa   :  { %6563 = vtanh.f32 %v2435_v21 }
 0x8fb   :  { %6565 = vtanh.f32 %v2427_v19  ;;  %v6548_v1 = vpop.eup %6547 }
 0x8fc   :  { %6567 = vtanh.f32 %v2438_v34  ;;  %v6550_v50 = vpop.eup %6549  ;;  %v2479_v38 = vadd.f32 1.0, %v6548_v1 }
 0x8fd   :  { %6569 = vtanh.f32 %v2430_v25  ;;  %v6552_v27 = vpop.eup %6551  ;;  %v2477_v10 = vadd.f32 1.0, %v6550_v50 }
 0x8fe   :  { %v6554_v2 = vpop.eup %6553  ;;  %v2480_v35 = vadd.f32 1.0, %v6552_v27  ;;  %6571 = vrcp.f32 %v2479_v38 }
 0x8ff   :  { %v2478_v41 = vadd.f32 1.0, %v6554_v2  ;;  %6573 = vrcp.f32 %v2477_v10 }
 0x900   :  { %v6556_v42 = vpop.eup %6555  ;;  %6575 = vrcp.f32 %v2480_v35 }
 0x901   :  { %v6558_v49 = vpop.eup %6557  ;;  %6577 = vrcp.f32 %v2478_v41 }
 0x902   :  { %v6560_v30 = vpop.eup %6559 }
 0x903   :  { %v6562_v36 = vpop.eup %6561 }
 0x904   :  { %v6564_v58 = vpop.eup %6563 }
 0x905   :  { %v6566_v51 = vpop.eup %6565  ;;  %v2495_v37 = vmul.f32 %v6564_v58, %v6556_v42 }
 0x906   :  { %v6568_v48 = vpop.eup %6567  ;;  %v2493_v47 = vmul.f32 %v6566_v51, %v6558_v49 }
 0x907   :  { %v6570_v3 = vpop.eup %6569  ;;  %6579 = vtanh.f32 %v2495_v37  ;;  %v2496_v28 = vmul.f32 %v6568_v48, %v6560_v30 }
 0x908   :  { %6581 = vtanh.f32 %v2493_v47  ;;  %v2494_v40 = vmul.f32 %v6570_v3, %v6562_v36  ;;  %v6572_v31 = vpop.eup %6571 }
 0x909   :  { %6583 = vtanh.f32 %v2496_v28  ;;  %v6574_v62 = vpop.eup %6573 }
 0x90a   :  { %6585 = vtanh.f32 %v2494_v40  ;;  %v6576_v56 = vpop.eup %6575 }
 0x90b   :  { %v6578_v9 = vpop.eup %6577 }
 0x911   :  { %v6580_v11 = vpop.eup %6579 }
 0x912   :  { %v6582_v55 = vpop.eup %6581  ;;  %v8833_v21 = vmul.f32 %v6580_v11, %v6572_v31 }
 0x913   :  { %v6584_v19 = vpop.eup %6583  ;;  %v8835_v26 = vmul.f32 %v6582_v55, %v6574_v62 }
 0x914   :  { %v6586_v7 = vpop.eup %6585  ;;  %2517 = vadd.xlane.f32.xlu1 %v8833_v21  ;;  %v8838_v46 = vmul.f32 %v6584_v19, %v6576_v56  ;;  %v2527_v25 = vmul.f32 %v8833_v21, %v8833_v21 }
 0x915   :  { %2513 = vadd.xlane.f32.xlu0 %v8835_v26  ;;  %v8841_v5 = vmul.f32 %v6586_v7, %v6578_v9  ;;  %v2525_v34 = vmul.f32 %v8835_v26, %v8835_v26 }
 0x916   :  { %v2528_v50 = vmul.f32 %v8838_v46, %v8838_v46 }
 0x917   :  { %v2526_v1 = vmul.f32 %v8841_v5, %v8841_v5 }
 0x918   :  { %2533 = vadd.xlane.f32.xlu1 %v2527_v25  ;;  %v2507_v25 = vld [vmem:[%s10053_s14 + $0x40] sm:$0xff] }
 0x919   :  { %2515 = vadd.xlane.f32.xlu0 %v8841_v5 }
 0x91c   :  { %2519 = vadd.xlane.f32.xlu1 %v8838_v46 }
 0x91d   :  { %2529 = vadd.xlane.f32.xlu0 %v2525_v34 }
 0x921   :  { %2531 = vadd.xlane.f32.xlu0 %v2526_v1 }
 0x925   :  { %2535 = vadd.xlane.f32.xlu0 %v2528_v50 }
 0x9a1   :  { %v2518_v27 = vpop.xlane.xlu1 %2517 }
 0x9a2   :  { %v2523_v2 = vmul.f32 0.0078125, %v2518_v27  ;;  %v2514_v38 = vpop.xlane.xlu0 %2513 }
 0x9a3   :  { %v2521_v30 = vmul.f32 0.0078125, %v2514_v38  ;;  %v2511_v38 = vld [vmem:[%s10054_s15 + $0x40] sm:$0xff] }
 0x9a4   :  { %v2543_v10 = vmul.f32 %v2523_v2, %v2523_v2 }
 0x9a5   :  { %v2534_v42 = vpop.xlane.xlu1 %2533  ;;  %v2541_v51 = vmul.f32 %v2521_v30, %v2521_v30 }
 0x9a6   :  { %v2539_v49 = vmul.f32 0.0078125, %v2534_v42  ;;  %v2516_v35 = vpop.xlane.xlu0 %2515 }
 0x9a7   :  { %v2522_v37 = vmul.f32 0.0078125, %v2516_v35 }
 0x9a8   :  { %v2547_v41 = vsub.f32 %v2539_v49, %v2543_v10  ;;  %v2505_v10 = vld [vmem:[%s10053_s14 + $0x30] sm:$0xff] }
 0x9a9   :  { %v2520_v47 = vpop.xlane.xlu1 %2519  ;;  %v2542_v40 = vmul.f32 %v2522_v37, %v2522_v37 }
 0x9aa   :  { %v2551_v36 = vadd.f32 1e-05, %v2547_v41  ;;  %v2530_v58 = vpop.xlane.xlu0 %2529  ;;  %v2524_v31 = vmul.f32 0.0078125, %v2520_v47  ;;  %v2508_v47 = vld [vmem:[%s10053_s14 + $0x48] sm:$0xff] }
 0x9ab   :  { %v2537_v48 = vmul.f32 0.0078125, %v2530_v58 }
 0x9ac   :  { %6587 = vrsqrt.f32 %v2551_v36  ;;  %v2544_v55 = vmul.f32 %v2524_v31, %v2524_v31  ;;  %v2506_v36 = vld [vmem:[%s10053_s14 + $0x38] sm:$0xff] }
 0x9ad   :  { %v2545_v3 = vsub.f32 %v2537_v48, %v2541_v51 }
 0x9ae   :  { %v2532_v28 = vpop.xlane.xlu0 %2531 }
 0x9af   :  { %v2549_v62 = vadd.f32 1e-05, %v2545_v3  ;;  %v2538_v56 = vmul.f32 0.0078125, %v2532_v28 }
 0x9b1   :  { %6589 = vrsqrt.f32 %v2549_v62  ;;  %v2546_v9 = vsub.f32 %v2538_v56, %v2542_v40  ;;  %v2510_v56 = vld [vmem:[%s10054_s15 + $0x38] sm:$0xff] }
 0x9b2   :  { %v2536_v11 = vpop.xlane.xlu0 %2535 }
 0x9b3   :  { %v2550_v19 = vadd.f32 1e-05, %v2546_v9  ;;  %v2540_v7 = vmul.f32 0.0078125, %v2536_v11  ;;  %v2512_v11 = vld [vmem:[%s10054_s15 + $0x48] sm:$0xff] }
 0x9b5   :  { %6591 = vrsqrt.f32 %v2550_v19  ;;  %v2548_v34 = vsub.f32 %v2540_v7, %v2544_v55 }
 0x9b6   :  { %v6588_v1 = vpop.eup %6587 }
 0x9b7   :  { %v2552_v50 = vadd.f32 1e-05, %v2548_v34  ;;  %v2559_v27 = vmul.f32 %v6588_v1, %v2507_v25 }
 0x9b9   :  { %6593 = vrsqrt.f32 %v2552_v50  ;;  %2581 = vperm.xlu0 %5660, %v2559_v27   ;;  %v2563_v42 = vmul.f32 %v2559_v27, %v2523_v2  ;;  %v2509_v2 = vld [vmem:[%s10054_s15 + $0x30] sm:$0xff] }
 0x9bb   :  { %v6590_v49 = vpop.eup %6589  ;;  %v2567_v35 = vsub.f32 %v2511_v38, %v2563_v42 }
 0x9bc   :  { %v2557_v41 = vmul.f32 %v6590_v49, %v2505_v10 }
 0x9bd   :  { %2605 = vperm.xlu0 %5660, %v2567_v35  }
 0x9be   :  { %2571 = vperm.xlu1 %5659, %v2557_v41   ;;  %v2561_v48 = vmul.f32 %v2557_v41, %v2521_v30 }
 0x9bf   :  { %v6592_v58 = vpop.eup %6591 }
 0x9c0   :  { %v2558_v51 = vmul.f32 %v6592_v58, %v2506_v36  ;;  %v2565_v28 = vsub.f32 %v2509_v2, %v2561_v48  ;;  %v6720_v36 = vmov 0.0   ;;  %v6369_v48 = vld [vmem:[%s10060_s8 + $0x4] ss:$12 sps:$4 sm:$0xff]   ;;  %s10925_s8 = smov 17  }
 0x9c1   :  { %5459 = vmatprep.subr.bf16.mxu0 %v6720_v36  ;;  %2801 = vmatprep.mubr.bf16.mxu1 %v6369_v48  ;;  %v2739_v2 = vld [vmem:[%s10061_s9] sm:$0xff] }
 0x9c2   :  { %2576 = vperm.xlu1 %5659, %v2558_v51   ;;  %v2562_v62 = vmul.f32 %v2558_v51, %v2522_v37  ;;  %5473 = vmatprep.mubr.msk.bf16.mxu0 %vm6721_vm10, %v6720_v36 }
 0x9c3   :  { %v6594_v3 = vpop.eup %6593 }
 0x9c4   :  { %v2560_v40 = vmul.f32 %v6594_v3, %v2508_v47  ;;  %v2566_v30 = vsub.f32 %v2510_v56, %v2562_v62  ;;  %v2740_v47 = vld [vmem:[%s10061_s9 + $0x8] sm:$0xff] }
 0x9c6   :  { %2595 = vperm.xlu1 %5659, %v2565_v28   ;;  %2586 = vperm.xlu0 %5660, %v2560_v40   ;;  %v2564_v9 = vmul.f32 %v2560_v40, %v2524_v31 }
 0x9c8   :  { %v2568_v55 = vsub.f32 %v2512_v11, %v2564_v9 }
 0x9ca   :  { %2600 = vperm.xlu1 %5659, %v2566_v30  }
 0x9ce   :  { %2610 = vperm.xlu1 %5659, %v2568_v55  }
 0xa38   :  { %v2582_v7 = vpop.permute.xlu0 %2581 }
 0xa39   :  { %v2591_v1 = vmul.f32 %v2582_v7, %v8833_v21 }
 0xa3c   :  { %v2606_v34 = vpop.permute.xlu0 %2605 }
 0xa3d   :  { %v2572_v19 = vpop.permute.xlu1 %2571  ;;  %v8880_v42 = vadd.f32 %v2606_v34, %v2591_v1  ;;  %v10919_v34 = vunpack.i.h.bf16 %v8595_v15 }
 0xa3e   :  { %v2589_v50 = vmul.f32 %v2572_v19, %v8835_v26 }
 0xa41   :  { %v2577_v25 = vpop.permute.xlu1 %2576 }
 0xa42   :  { %v2590_v27 = vmul.f32 %v2577_v25, %v8841_v5 }
 0xa45   :  { %v2596_v37 = vpop.permute.xlu1 %2595  ;;  %v2587_v38 = vpop.permute.xlu0 %2586 }
 0xa46   :  { %v8882_v10 = vadd.f32 %v2596_v37, %v2589_v50  ;;  %v2592_v35 = vmul.f32 %v2587_v38, %v8838_v46 }
 0xa49   :  { %v2601_v31 = vpop.permute.xlu1 %2600 }
 0xa4a   :  { %v8884_v49 = vadd.f32 %v2601_v31, %v2590_v27 }
 0xa4c   :  { %v5901_v41 = vpack.i.bf16 %v8884_v49, %v8882_v10  ;;  %v5906_v21 = vpack.i.bf16 %v8880_v42, %v8884_v49  ;;  %v2723_v58 = vpack.c.bf16 %v8884_v49, %v8882_v10 }
 0xa4d   :  { %v2611_v26 = vpop.permute.xlu1 %2610 }
 0xa4e   :  { %v8892_v5 = vadd.f32 %v2611_v26, %v2592_v35  ;;  %5902 = vrot.lane.b32.xlu1 %v5901_v41, %s6714_s5  ;;  %5907 = vrot.lane.b32.xlu0 %v5906_v21, %s6708_s27 }
 0xa50   :  { %v5916_v46 = vpack.i.bf16 %v8892_v5, %v8880_v42  ;;  %v2724_v51 = vpack.c.bf16 %v8892_v5, %v8880_v42 }
 0xa52   :  { %5917 = vrot.lane.b32.xlu1 %v5916_v46, %s6714_s5  ;;  %2659 = vrot.lane.b32.xlu0 %v8892_v5, %s6708_s27 }
 0xa56   :  { %5922 = vrot.lane.b32.xlu1 %v5916_v46, %s6717_s4  ;;  %5912 = vrot.lane.b32.xlu0 %v5901_v41, %s6715_s26 }
 0xa5a   :  { %5927 = vrot.lane.b32.xlu1 %v5901_v41, %s6718_s30  ;;  %5932 = vrot.lane.b32.xlu0 %v5916_v46, %s6715_s26 }
 0xa5e   :  { %5942 = vrot.lane.b32.xlu1 %v5916_v46, %s6718_s30  ;;  %5937 = vrot.lane.b32.xlu0 %v5901_v41, %s10661_s24 }
 0xa62   :  { %5947 = vrot.lane.b32.xlu1 %v5901_v41, %s10917_s1  ;;  %5957 = vrot.lane.b32.xlu0 %v5916_v46, %s10661_s24 }
 0xa66   :  { %5952 = vrot.lane.b32.xlu1 %v5901_v41, %s10918_s29  ;;  %5962 = vrot.lane.b32.xlu0 %v5916_v46, %s10917_s1 }
 0xa6a   :  { %2653 = vrot.lane.b32.xlu1 %v8882_v10, %s6708_s27  ;;  %5967 = vrot.lane.b32.xlu0 %v5901_v41, %s6717_s4 }
 0xa6e   :  { %2743 = vperm.xlu1 %5659, %v2739_v2   ;;  %5972 = vrot.lane.b32.xlu0 %v5916_v46, %s10918_s29 }
 0xa72   :  { %2748 = vperm.xlu0 %5660, %v2740_v47  }
 0xac0   :  { %v5903_v3 = vpop.permute.xlu1 %5902  ;;  %v5908_v28 = vpop.permute.xlu0 %5907 }
 0xac1   :  { %v5905_v40 = vunpack.i.h.bf16 %v5903_v3  ;;  %v5904_v62 = vunpack.i.l.bf16 %v5903_v3  ;;  %v5910_v56 = vunpack.i.h.bf16 %v5908_v28  ;;  %v5909_v30 = vunpack.i.l.bf16 %v5908_v28 }
 0xac3   :  { %v4866_v9 = vpack.c.bf16 %v5905_v40, %v5904_v62  ;;  %v4890_v11 = vpack.c.bf16 %v5910_v56, %v5909_v30 }
 0xac4   :  { %v5918_v55 = vpop.permute.xlu1 %5917  ;;  %v2660_v19 = vpop.permute.xlu0 %2659 }
 0xac5   :  { %v5920_v7 = vunpack.i.h.bf16 %v5918_v55  ;;  %v5919_v25 = vunpack.i.l.bf16 %v5918_v55  ;;  %v4893_v37 = vpack.c.bf16 %v10919_v34, %v2660_v19  ;;  %5403 = vmatprep.subr.msk.bf16.mxu1 %vm8584_vm12, %v4890_v11 }
 0xac6   :  { %5404 = vmatpush3.bf16.msk.msra.mxu1 %vm8591_vm0, %v4866_v9 }
 0xac7   :  { %v4869_v1 = vpack.c.bf16 %v5920_v7, %v5919_v25  ;;  %5405 = vmatprep.subr.msk.bf16.mxu1 %vm8584_vm12, %v4893_v37 }
 0xac8   :  { %v5923_v50 = vpop.permute.xlu1 %5922  ;;  %v5913_v27 = vpop.permute.xlu0 %5912 }
 0xac9   :  { %v5925_v38 = vunpack.i.h.bf16 %v5923_v50  ;;  %v5924_v31 = vunpack.i.l.bf16 %v5923_v50  ;;  %v5914_v42 = vunpack.i.l.bf16 %v5913_v27  ;;  %v5915_v41 = vunpack.i.h.bf16 %v5913_v27 }
 0xaca   :  { %5406 = vmatpush3.bf16.msk.msra.mxu1 %vm8591_vm0, %v4869_v1  ;;  %vm10929_vm0 = vcmp.lt.s32.totalorder %v6823_v4, 17 }
 0xacb   :  { %v4908_v15 = vpack.c.bf16 %v5925_v38, %v5924_v31  ;;  %v4872_v10 = vpack.c.bf16 %v5914_v42, %v8605_v12  ;;  %5407 = vmatprep.subr.bf16.mxu1 %v2723_v58  ;;  %vm10936_vm14 = vmmov %vm10929_vm0 }
 0xacc   :  { %v5928_v49 = vpop.permute.xlu1 %5927  ;;  %v5933_v35 = vpop.permute.xlu0 %5932  ;;  %vm10938_vm10 = vmmov %vm10929_vm0 }
 0xacd   :  { %v5929_v21 = vunpack.i.l.bf16 %v5928_v49  ;;  %v5934_v26 = vunpack.i.l.bf16 %v5933_v35  ;;  %5460 = vmatpush3.bf16.msk.msra.mxu0 %vm8701_vm8, %v4908_v15  ;;  %v5935_v5 = vunpack.i.h.bf16 %v5933_v35  ;;  %v5930_v46 = vunpack.i.h.bf16 %v5928_v49 }
 0xace   :  { %5408 = vmatpush3.bf16.msk.msra.mxu1 %vm8619_vm3, %v4872_v10  ;;  %5461 = vmatprep.subr.bf16.mxu0 %v6720_v36 }
 0xacf   :  { %v4911_v61 = vpack.c.bf16 %v5929_v21, %v8714_v45  ;;  %v4875_v6 = vpack.c.bf16 %v5934_v26, %v5915_v41  ;;  %5409 = vmatprep.subr.bf16.mxu1 %v2724_v51  ;;  %v4878_v51 = vpack.c.bf16 %v8639_v16, %v5935_v5 }
 0xad0   :  { %v5943_v12 = vpop.permute.xlu1 %5942  ;;  %v5938_v58 = vpop.permute.xlu0 %5937 }
 0xad1   :  { %v5944_v48 = vunpack.i.l.bf16 %v5943_v12  ;;  %v5939_v2 = vunpack.i.l.bf16 %v5938_v58  ;;  %5462 = vmatpush3.bf16.msk.msra.mxu0 %vm8731_vm15, %v4911_v61  ;;  %v5945_v63 = vunpack.i.h.bf16 %v5943_v12  ;;  %v5940_v3 = vunpack.i.h.bf16 %v5938_v58  ;;  %vm10921_vm15 = vmpackc.low %vm8568_vm2, %vm8667_vm5 }
 0xad2   :  { %5410 = vmatpush3.bf16.msk.msra.mxu1 %vm8635_vm7, %v4875_v6  ;;  %5463 = vmatprep.subr.bf16.mxu0 %v6720_v36  ;;  %vm10927_vm5 = vcmask 719872   ;;  %vm10930_vm2 = vmmov %vm10929_vm0 }
 0xad3   :  { %v4914_v47 = vpack.c.bf16 %v5944_v48, %v5930_v46  ;;  %v4896_v45 = vpack.c.bf16 %v5939_v2, %v8481_v44  ;;  %v10920_v44 = vunpack.i.h.bf16 %v8742_v0  ;;  %v6371_v2 = vld [vmem:[%s10062_s17] ss:$16 sps:$4 sm:$0xff]   ;;  %vm10928_vm3 = vmmov %vm10927_vm5 }
 0xad4   :  { %v5948_v28 = vpop.permute.xlu1 %5947  ;;  %v5958_v40 = vpop.permute.xlu0 %5957 }
 0xad5   :  { %v5950_v62 = vunpack.i.h.bf16 %v5948_v28  ;;  %v5949_v56 = vunpack.i.l.bf16 %v5948_v28  ;;  %v5960_v30 = vunpack.i.h.bf16 %v5958_v40  ;;  %v5959_v9 = vunpack.i.l.bf16 %v5958_v40  ;;  %5411 = vmatprep.subr.msk.bf16.mxu1 %vm8644_vm11, %v4896_v45  ;;  %5464 = vmatpush3.bf16.msk.msra.mxu0 %vm8747_vm9, %v4914_v47  ;;  %v6374_v47 = vld [vmem:[%s10062_s17 + $0x8] ss:$16 sps:$4 sm:$0xff]   ;;  %v6376_v45 = vld [vmem:[%s10062_s17 + $0xc] ss:$16 sps:$4 sm:$0xff]  }
 0xad6   :  { %5412 = vmatpush3.bf16.msk.msra.mxu1 %vm8635_vm7, %v4878_v51  ;;  %5465 = vmatprep.subr.bf16.mxu0 %v6720_v36  ;;  %v4917_v16 = vpack.c.bf16 %v10920_v44, %v5945_v63  ;;  %v6373_v63 = vld [vmem:[%s10062_s17 + $0x4] ss:$16 sps:$4 sm:$0xff]   ;;  %v6377_v51 = vld [vmem:[%s10062_s17 + $0x20] ss:$16 sps:$4 sm:$0xff]   ;;  %v6380_v28 = vld [vmem:[%s10062_s17 + $0x28] ss:$16 sps:$4 sm:$0xff]  }
 0xad7   :  { %v4881_v17 = vpack.c.bf16 %v5950_v62, %v5949_v56  ;;  %v4899_v11 = vpack.c.bf16 %v5959_v9, %v5940_v3  ;;  %v4902_v55 = vpack.c.bf16 %v8661_v32, %v5960_v30  ;;  %v6379_v3 = vld [vmem:[%s10062_s17 + $0x24] ss:$16 sps:$4 sm:$0xff]   ;;  %v6382_v40 = vld [vmem:[%s10062_s17 + $0x2c] ss:$16 sps:$4 sm:$0xff]   ;;  %v6383_v56 = vld [vmem:[%s10062_s17 + $0x40] ss:$16 sps:$4 sm:$0xff]  }
 0xad8   :  { %v5953_v19 = vpop.permute.xlu1 %5952  ;;  %v5963_v7 = vpop.permute.xlu0 %5962  ;;  %v6385_v62 = vld [vmem:[%s10062_s17 + $0x44] ss:$16 sps:$4 sm:$0xff]   ;;  %v6388_v30 = vld [vmem:[%s10062_s17 + $0x4c] ss:$16 sps:$4 sm:$0xff]   ;;  %v6386_v9 = vld [vmem:[%s10062_s17 + $0x48] ss:$16 sps:$4 sm:$0xff]  }
 0xad9   :  { %v5955_v25 = vunpack.i.h.bf16 %v5953_v19  ;;  %v5954_v23 = vunpack.i.l.bf16 %v5953_v19  ;;  %v5965_v34 = vunpack.i.h.bf16 %v5963_v7  ;;  %v5964_v37 = vunpack.i.l.bf16 %v5963_v7  ;;  %5413 = vmatprep.subr.msk.bf16.mxu1 %vm8656_vm4, %v4899_v11  ;;  %5466 = vmatpush3.bf16.msk.msra.mxu0 %vm8747_vm9, %v4917_v16  ;;  %v6391_v44 = vld [vmem:[%s10062_s17 + $0x64] ss:$16 sps:$4 sm:$0xff]   ;;  %v6394_v16 = vld [vmem:[%s10062_s17 + $0x6c] ss:$16 sps:$4 sm:$0xff]   ;;  %v6392_v11 = vld [vmem:[%s10062_s17 + $0x68] ss:$16 sps:$4 sm:$0xff]  }
 0xada   :  { %5414 = vmatpush3.bf16.msk.msra.mxu1 %vm8679_vm13, %v4881_v17  ;;  %5467 = vmatprep.subr.bf16.mxu0 %v6720_v36  ;;  %v6389_v17 = vld [vmem:[%s10062_s17 + $0x60] ss:$16 sps:$4 sm:$0xff]   ;;  %v6400_v19 = vld [vmem:[%s10062_s17 + $0x8c] ss:$16 sps:$4 sm:$0xff]   ;;  %vm10933_vm7 = vmmov %vm10929_vm0  ;;  %vm10935_vm9 = vnez %v10451_v18 }
 0xadb   :  { %v4920_v20 = vpack.c.bf16 %v5955_v25, %v5954_v23  ;;  %v4884_v0 = vpack.c.bf16 %v5965_v34, %v5964_v37  ;;  %5415 = vmatprep.subr.msk.bf16.mxu1 %vm8656_vm4, %v4902_v55  ;;  %v6397_v55 = vld [vmem:[%s10062_s17 + $0x84] ss:$16 sps:$4 sm:$0xff]   ;;  %v6395_v7 = vld [vmem:[%s10062_s17 + $0x80] ss:$16 sps:$4 sm:$0xff]   ;;  %v6398_v25 = vld [vmem:[%s10062_s17 + $0x88] ss:$16 sps:$4 sm:$0xff]  }
 0xadc   :  { %v5968_v32 = vpop.permute.xlu0 %5967  ;;  %v2654_v1 = vpop.permute.xlu1 %2653  ;;  %vm10931_vm4 = vcmp.lt.s32.totalorder %v6823_v4, 16 }
 0xadd   :  { %v5970_v50 = vunpack.i.h.bf16 %v5968_v32  ;;  %v5969_v27 = vunpack.i.l.bf16 %v5968_v32  ;;  %5468 = vmatpush3.bf16.msk.msra.mxu0 %vm8773_vm6, %v4920_v20  ;;  %v4887_v38 = vpack.c.bf16 %v2654_v1, %v8696_v52  ;;  %v10922_v52 = vmov 0   ;;  %vm10932_vm12 = vmmov %vm10931_vm4 }
 0xade   :  { %5416 = vmatpush3.bf16.msk.msra.mxu1 %vm8679_vm13, %v4884_v0  ;;  %5469 = vmatprep.subr.bf16.mxu0 %v6720_v36  ;;  %vm10934_vm13 = vmmov %vm10929_vm0 }
 0xadf   :  { %v4905_v39 = vpack.c.bf16 %v5970_v50, %v5969_v27 }
 0xae0   :  { %v5973_v31 = vpop.permute.xlu0 %5972 }
 0xae1   :  { %v5975_v42 = vunpack.i.h.bf16 %v5973_v31  ;;  %v5974_v15 = vunpack.i.l.bf16 %v5973_v31  ;;  %5417 = vmatprep.subr.msk.bf16.mxu1 %vm8701_vm8, %v4905_v39  ;;  %vm10923_vm8 = vmmov %vm10914_vm1 }
 0xae2   :  { %5418 = vmatpush3.bf16.msk.msra.mxu1 %vm10921_vm15, %v4887_v38  ;;  %vm10937_vm1 = vmmov %vm10929_vm0 }
 0xae3   :  { %v4923_v13 = vpack.c.bf16 %v5975_v42, %v5974_v15  ;;  %3106 = vmatprep.subr.bf16.mxu1 %v6373_v63  ;;  %v6418_v63 = vld [vmem:[%s10062_s17 + $0xec] ss:$16 sps:$4 sm:$0xff]   ;;  %vm10939_vm15 = vmmov %vm10929_vm0 }
 0xae5   :  { %2802 = vmatmul.mubr.bf16.vlgmr.msra.gmra.mrb[40].mxu1 %v6367_v43  ;;  %5470 = vmatpush3.bf16.msk.msra.mxu0 %vm8773_vm6, %v4923_v13  ;;  %v2852_v43 = vld [vmem:[%s10053_s14 + $0x58] sm:$0xff] }
 0xae6   :  { %5471 = vmatprep.subr.bf16.mxu0 %v6720_v36  ;;  %3138 = vmatprep.mubr.bf16.mxu1 %v10922_v52 }
 0xae7   :  { %3107 = vmatpush1.bf16.msra.mxu1 %v6371_v2  ;;  %v6415_v2 = vld [vmem:[%s10062_s17 + $0xe4] ss:$16 sps:$4 sm:$0xff]  }
 0xae8   :  { %3108 = vmatprep.subr.bf16.mxu1 %v6379_v3 }
 0xae9   :  { %5472 = vmatpush3.bf16.msra.mxu0 %v8801_v59 }
 0xaea   :  { %3149 = vmatprep.subr.bf16.mxu0 %v6376_v45  ;;  %v6416_v45 = vld [vmem:[%s10062_s17 + $0xe8] ss:$16 sps:$4 sm:$0xff]  }
 0xaeb   :  { %3109 = vmatpush1.bf16.msra.mxu1 %v6377_v51 }
 0xaec   :  { %5474 = vmatmul.mubr.msk.bf16.vlgmr.msra.gmra.mrb[52].mxu0 %vm10923_vm8, %v6370_v22  ;;  %3110 = vmatprep.subr.bf16.mxu1 %v6385_v62  ;;  %vm10940_vm8 = vmmov %vm10931_vm4 }
 0xaed   :  { %3181 = vmatprep.mubr.bf16.mxu0 %v10922_v52  ;;  %v2744_v41 = vpop.permute.xlu1 %2743  ;;  %3150 = vmatpush1.bf16.msra.mxu0 %v6374_v47  ;;  %v2851_v52 = vld [vmem:[%s10053_s14 + $0x50] sm:$0xff] }
 0xaee   :  { %3151 = vmatprep.subr.bf16.mxu0 %v6382_v40  ;;  %v6413_v47 = vld [vmem:[%s10062_s17 + $0xe0] ss:$16 sps:$4 sm:$0xff]  }
 0xaef   :  { %3111 = vmatpush1.bf16.msra.mxu1 %v6383_v56 }
 0xaf0   :  { %3112 = vmatprep.subr.bf16.mxu1 %v6391_v44 }
 0xaf1   :  { %v2749_v21 = vpop.permute.xlu0 %2748  ;;  %3152 = vmatpush1.bf16.msra.mxu0 %v6380_v28 }
 0xaf2   :  { %3153 = vmatprep.subr.bf16.mxu0 %v6388_v30 }
 0xaf3   :  { %3113 = vmatpush1.bf16.msra.mxu1 %v6389_v17 }
 0xaf4   :  { %3114 = vmatprep.subr.bf16.mxu1 %v6397_v55 }
 0xaf5   :  { %3154 = vmatpush1.bf16.msra.mxu0 %v6386_v9 }
 0xaf6   :  { %3155 = vmatprep.subr.bf16.mxu0 %v6394_v16 }
 0xaf7   :  { %3115 = vmatpush1.bf16.msra.mxu1 %v6395_v7 }
 0xaf9   :  { %3156 = vmatpush1.bf16.msra.mxu0 %v6392_v11 }
 0xafa   :  { %3157 = vmatprep.subr.bf16.mxu0 %v6400_v19 }
 0xafd   :  { %3158 = vmatpush1.bf16.msra.mxu0 %v6398_v25 }
 0xbb8   :  { %v5419_v57 = vpop.f32.mrb[40].mxu1 }
 0xbb9   :  { %v5420_v60 = vpop.f32.mrb[41].mxu1 }
 0xbba   :  { %v5421_v10 = vadd.f32 %v5420_v60, %v5419_v57  ;;  %v5422_v49 = vpop.f32.mrb[42].mxu1 }
 0xbbb   :  { %v5423_v29 = vpop.f32.mrb[43].mxu1 }
 0xbbc   :  { %v5424_v35 = vadd.f32 %v5423_v29, %v5422_v49  ;;  %v2804_v36 = vadd.f32 %v5421_v10, %v2744_v41  ;;  %v6401_v49 = vld [vmem:[%s10062_s17 + $0xa0] ss:$16 sps:$4 sm:$0xff]   ;;  %v6403_v29 = vld [vmem:[%s10062_s17 + $0xa4] ss:$16 sps:$4 sm:$0xff]   ;;  %v2854_v41 = vld [vmem:[%s10054_s15 + $0x58] sm:$0xff] }
 0xbbd   :  { %3116 = vmatprep.subr.bf16.mxu1 %v6403_v29  ;;  %v3508_v29 = vld [vmem:[%s10063_s11 + $0x10] sm:$0xff] }
 0xbbe   :  { %v2807_v5 = vadd.f32 %v5424_v35, %v2749_v21  ;;  %v6404_v35 = vld [vmem:[%s10062_s17 + $0xa8] ss:$16 sps:$4 sm:$0xff]   ;;  %v6406_v21 = vld [vmem:[%s10062_s17 + $0xac] ss:$16 sps:$4 sm:$0xff]   ;;  %3117 = vmatpush1.bf16.msra.mxu1 %v6401_v49 }
 0xbbf   :  { %v2844_v26 = vpop.f32.mrb[52].mxu0  ;;  %3159 = vmatprep.subr.bf16.mxu0 %v6406_v21  ;;  %v6419_v49 = vld [vmem:[%s10064_s10 + $0x4] ss:$8 sps:$4 sm:$0xff]  }
 0xbc0   :  { %v8998_v61 = vadd.f32 %v2844_v26, %v2804_v36  ;;  %v5475_v6 = vpop.f32.mrb[53].mxu0  ;;  %v2853_v36 = vld [vmem:[%s10054_s15 + $0x50] sm:$0xff]  ;;  %3160 = vmatpush1.bf16.msra.mxu0 %v6404_v35  ;;  %v3509_v35 = vld [vmem:[%s10063_s11 + $0x18] sm:$0xff] }
 0xbc1   :  { %v2847_v12 = vpop.f32.mrb[54].mxu0  ;;  %v6409_v6 = vld [vmem:[%s10062_s17 + $0xc4] ss:$16 sps:$4 sm:$0xff]  }
 0xbc2   :  { %v9000_v59 = vadd.f32 %v2847_v12, %v2807_v5  ;;  %2855 = vadd.xlane.f32.xlu1 %v8998_v61  ;;  %v5476_v58 = vpop.f32.mrb[55].mxu0  ;;  %v2861_v48 = vmul.f32 %v8998_v61, %v8998_v61  ;;  %v6407_v5 = vld [vmem:[%s10062_s17 + $0xc0] ss:$16 sps:$4 sm:$0xff]   ;;  %v6412_v12 = vld [vmem:[%s10062_s17 + $0xcc] ss:$16 sps:$4 sm:$0xff]   ;;  %3118 = vmatprep.subr.bf16.mxu1 %v6409_v6 }
 0xbc3   :  { %3161 = vmatprep.subr.bf16.mxu0 %v6412_v12  ;;  %3119 = vmatpush1.bf16.msra.mxu1 %v6407_v5 }
 0xbc4   :  { %2857 = vadd.xlane.f32.xlu0 %v9000_v59  ;;  %v2862_v46 = vmul.f32 %v9000_v59, %v9000_v59  ;;  %3120 = vmatprep.subr.bf16.mxu1 %v6415_v2 }
 0xbc6   :  { %2865 = vadd.xlane.f32.xlu1 %v2862_v46 }
 0xbc7   :  { %3121 = vmatpush1.bf16.msra.mxu1 %v6413_v47 }
 0xbc8   :  { %2863 = vadd.xlane.f32.xlu0 %v2861_v48  ;;  %v6410_v48 = vld [vmem:[%s10062_s17 + $0xc8] ss:$16 sps:$4 sm:$0xff]   ;;  %s10924_s17 = smov 16  }
 0xbc9   :  { %3162 = vmatpush1.bf16.msra.mxu0 %v6410_v48 }
 0xbca   :  { %3163 = vmatprep.subr.bf16.mxu0 %v6418_v63 }
 0xbcd   :  { %3164 = vmatpush1.bf16.msra.mxu0 %v6416_v45 }
 0xc4f   :  { %v2856_v23 = vpop.xlane.xlu1 %2855 }
 0xc50   :  { %v2859_v37 = vmul.f32 0.0078125, %v2856_v23 }
 0xc51   :  { %v2858_v34 = vpop.xlane.xlu0 %2857 }
 0xc52   :  { %v2860_v20 = vmul.f32 0.0078125, %v2858_v34  ;;  %v2869_v27 = vmul.f32 %v2859_v37, %v2859_v37 }
 0xc53   :  { %v2866_v0 = vpop.xlane.xlu1 %2865 }
 0xc54   :  { %v2870_v32 = vmul.f32 %v2860_v20, %v2860_v20  ;;  %v2868_v1 = vmul.f32 0.0078125, %v2866_v0 }
 0xc55   :  { %v2864_v50 = vpop.xlane.xlu0 %2863 }
 0xc56   :  { %v2872_v39 = vsub.f32 %v2868_v1, %v2870_v32  ;;  %v2867_v38 = vmul.f32 0.0078125, %v2864_v50 }
 0xc58   :  { %v2874_v31 = vadd.f32 1e-05, %v2872_v39  ;;  %v2871_v42 = vsub.f32 %v2867_v38, %v2869_v27 }
 0xc5a   :  { %6595 = vrsqrt.f32 %v2874_v31  ;;  %v2873_v15 = vadd.f32 1e-05, %v2871_v42 }
 0xc5c   :  { %6597 = vrsqrt.f32 %v2873_v15 }
 0xc64   :  { %v6596_v13 = vpop.eup %6595 }
 0xc65   :  { %v2878_v22 = vmul.f32 %v6596_v13, %v2852_v43 }
 0xc66   :  { %v6598_v57 = vpop.eup %6597 }
 0xc67   :  { %2890 = vperm.xlu1 %5659, %v2878_v22   ;;  %v2877_v60 = vmul.f32 %v6598_v57, %v2851_v52  ;;  %v2880_v10 = vmul.f32 %v2878_v22, %v2860_v20  ;;  %v11004_v57 = vld [vmem:[#allocation37_spill] sm:$0xff] }
 0xc69   :  { %2885 = vperm.xlu0 %5660, %v2877_v60   ;;  %v2879_v26 = vmul.f32 %v2877_v60, %v2859_v37  ;;  %v2882_v58 = vsub.f32 %v2854_v41, %v2880_v10  ;;  %v3506_v60 = vld [vmem:[%s10063_s11] sm:$0xff]  ;;  %v3507_v10 = vld [vmem:[%s10063_s11 + $0x8] sm:$0xff] }
 0xc6a   :  { %v3510_v41 = vld [vmem:[%s10063_s11 + $0x20] sm:$0xff] }
 0xc6b   :  { %v2881_v46 = vsub.f32 %v2853_v36, %v2879_v26  ;;  %v3511_v36 = vld [vmem:[%s10063_s11 + $0x28] sm:$0xff] }
 0xc6d   :  { %2902 = vperm.xlu0 %5660, %v2882_v58   ;;  %2897 = vperm.xlu1 %5659, %v2881_v46  }
 0xce6   :  { %v2891_v51 = vpop.permute.xlu1 %2890 }
 0xce7   :  { %v2894_v28 = vmul.f32 %v2891_v51, %v9000_v59 }
 0xce8   :  { %v2886_v3 = vpop.permute.xlu0 %2885 }
 0xce9   :  { %v2893_v40 = vmul.f32 %v2886_v3, %v8998_v61 }
 0xcec   :  { %v2903_v62 = vpop.permute.xlu0 %2902  ;;  %v2898_v56 = vpop.permute.xlu1 %2897 }
 0xced   :  { %v2906_v30 = vadd.f32 %v2903_v62, %v2894_v28  ;;  %v2905_v9 = vadd.f32 %v2898_v56, %v2893_v40 }
 0xcef   :  { %vm2908_vm6 = vcmp.ge.f32.partialorder %v2906_v30, 0.0  ;;  %v2910_v44 = vmul.f32 0.2, %v2906_v30  ;;  %vm2907_vm11 = vcmp.ge.f32.partialorder %v2905_v9, 0.0  ;;  %v2909_v16 = vmul.f32 0.2, %v2905_v9 }
 0xcf1   :  { %v2912_v17 = vsel %vm2908_vm6, %v2906_v30, %v2910_v44  ;;  %v2911_v11 = vsel %vm2907_vm11, %v2905_v9, %v2909_v16  ;;  %vm10941_vm6 = vnez %v10460_v54  ;;  %vm10942_vm11 = vnez %v10465_v8 }
 0xcf2   :  { %v2913_v55 = vpack.c.bf16 %v2912_v17, %v2911_v11 }
 0xcf4   :  { %3139 = vmatmul.mubr.bf16.vlgmr.msra.gmra.mrb[44].mxu1 %v2913_v55  ;;  %3182 = vmatmul.mubr.bf16.vlgmr.msra.gmra.mrb[56].mxu0 %v2913_v55 }
 0xcf5   :  { %5037 = vmatprep.mubr.msk.bf16.mxu1 %vm10927_vm5, %v6419_v49  ;;  %5113 = vmatprep.mubr.msk.bf16.mxu0 %vm10928_vm3, %v6419_v49  ;;  %vm10943_vm5 = vmmov %vm10931_vm4 }
 0xcf6   :  { %vm10944_vm3 = vmmov %vm10931_vm4 }
 0xdc7   :  { %v9118_v19 = vpop.f32.mrb[44].mxu1  ;;  %v9120_v7 = vpop.f32.mrb[56].mxu0 }
 0xdc8   :  { %v9122_v59 = vpop.f32.mrb[45].mxu1  ;;  %v9124_v61 = vpop.f32.mrb[57].mxu0 }
 0xdc9   :  { %v9126_v25 = vpop.f32.mrb[46].mxu1  ;;  %v9128_v23 = vpop.f32.mrb[58].mxu0  ;;  %v5981_v34 = vpack.i.bf16 %v9120_v7, %v9124_v61  ;;  %v5976_v37 = vpack.i.bf16 %v9122_v59, %v9118_v19  ;;  %v6051_v31 = vpack.i.bf16 %v9120_v7, %v9122_v59  ;;  %v6061_v42 = vpack.i.bf16 %v9124_v61, %v9118_v19 }
 0xdca   :  { %v9134_v20 = vpop.f32.mrb[47].mxu1  ;;  %v9136_v0 = vpop.f32.mrb[59].mxu0  ;;  %v5991_v32 = vpack.i.bf16 %v9128_v23, %v9120_v7  ;;  %v5986_v1 = vpack.i.bf16 %v9126_v25, %v9118_v19 }
 0xdcb   :  { %5982 = vrot.lane.b32.xlu0 %v5981_v34, %s10924_s17  ;;  %5977 = vrot.lane.b32.xlu1 %v5976_v37, %s10924_s17  ;;  %v6001_v50 = vpack.i.bf16 %v9134_v20, %v9122_v59  ;;  %v6011_v27 = vpack.i.bf16 %v9136_v0, %v9124_v61  ;;  %v6016_v39 = vpack.i.bf16 %v9134_v20, %v9126_v25 }
 0xdcc   :  { %v6026_v38 = vpack.i.bf16 %v9128_v23, %v9136_v0  ;;  %v6076_v15 = vpack.i.bf16 %v9128_v23, %v9134_v20  ;;  %v6081_v43 = vpack.i.bf16 %v9136_v0, %v9126_v25  ;;  %v3473_v13 = vpack.c.bf16 %v9134_v20, %v9122_v59 }
 0xdcf   :  { %5992 = vrot.lane.b32.xlu0 %v5991_v32, %s10925_s8  ;;  %5987 = vrot.lane.b32.xlu1 %v5986_v1, %s10925_s8 }
 0xdd3   :  { %5997 = vrot.lane.b32.xlu1 %v5986_v1, %s10926_s2  ;;  %6002 = vrot.lane.b32.xlu0 %v6001_v50, %s10925_s8 }
 0xdd7   :  { %6012 = vrot.lane.b32.xlu1 %v6011_v27, %s10925_s8  ;;  %6007 = vrot.lane.b32.xlu0 %v5991_v32, %s10926_s2 }
 0xddb   :  { %6017 = vrot.lane.b32.xlu1 %v6016_v39, %s10924_s17  ;;  %6027 = vrot.lane.b32.xlu0 %v6026_v38, %s10924_s17 }
 0xddf   :  { %6022 = vrot.lane.b32.xlu1 %v5976_v37, %s6708_s27  ;;  %6032 = vrot.lane.b32.xlu0 %v6001_v50, %s10926_s2 }
 0xde3   :  { %6042 = vrot.lane.b32.xlu1 %v6011_v27, %s10926_s2  ;;  %6037 = vrot.lane.b32.xlu0 %v5981_v34, %s6708_s27 }
 0xde7   :  { %6047 = vrot.lane.b32.xlu1 %v6016_v39, %s6708_s27  ;;  %6057 = vrot.lane.b32.xlu0 %v6026_v38, %s6708_s27 }
 0xdeb   :  { %6052 = vrot.lane.b32.xlu1 %v6051_v31, %s10661_s24  ;;  %6062 = vrot.lane.b32.xlu0 %v6061_v42, %s10661_s24 }
 0xdef   :  { %6072 = vrot.lane.b32.xlu1 %v5986_v1, %s10663_s0  ;;  %6067 = vrot.lane.b32.xlu0 %v5991_v32, %s10663_s0 }
 0xdf3   :  { %6077 = vrot.lane.b32.xlu1 %v6076_v15, %s10661_s24  ;;  %6082 = vrot.lane.b32.xlu0 %v6081_v43, %s10661_s24 }
 0xdf7   :  { %6087 = vrot.lane.b32.xlu1 %v6001_v50, %s10663_s0  ;;  %6097 = vrot.lane.b32.xlu0 %v6061_v42, %s10662_s19 }
 0xdfb   :  { %6092 = vrot.lane.b32.xlu1 %v6051_v31, %s10662_s19  ;;  %6102 = vrot.lane.b32.xlu0 %v6011_v27, %s10663_s0 }
 0xdff   :  { %6107 = vrot.lane.b32.xlu1 %v6076_v15, %s10662_s19  ;;  %6112 = vrot.lane.b32.xlu0 %v6081_v43, %s10662_s19 }
 0xe03   :  { %6122 = vrot.lane.b32.xlu1 %v6001_v50, %s10664_s21  ;;  %6117 = vrot.lane.b32.xlu0 %v5991_v32, %s10664_s21 }
 0xe07   :  { %6127 = vrot.lane.b32.xlu1 %v5986_v1, %s10664_s21  ;;  %6132 = vrot.lane.b32.xlu0 %v6011_v27, %s10664_s21 }
 0xe0b   :  { %3514 = vperm.xlu1 %5659, %v3506_v60   ;;  %3519 = vperm.xlu0 %5660, %v3507_v10  }
 0xe0f   :  { %3524 = vperm.xlu1 %5659, %v3508_v29   ;;  %3529 = vperm.xlu0 %5660, %v3509_v35  }
 0xe13   :  { %3534 = vperm.xlu1 %5659, %v3510_v41   ;;  %3539 = vperm.xlu0 %5660, %v3511_v36  }
 0xe3d   :  { %v5983_v21 = vpop.permute.xlu0 %5982  ;;  %v5978_v26 = vpop.permute.xlu1 %5977 }
 0xe3e   :  { %v5980_v12 = vunpack.i.h.bf16 %v5978_v26  ;;  %v5979_v58 = vunpack.i.l.bf16 %v5978_v26  ;;  %v5985_v51 = vunpack.i.h.bf16 %v5983_v21  ;;  %v5984_v3 = vunpack.i.l.bf16 %v5983_v21 }
 0xe40   :  { %v3244_v16 = vsel %vm10931_vm4, %v5979_v58, %v5980_v12  ;;  %v3240_v55 = vsel %vm10932_vm12, %v5985_v51, %v5984_v3  ;;  %v3246_v39 = vsel %vm10940_vm8, %v5984_v3, %v5979_v58  ;;  %v3242_v36 = vsel %vm10943_vm5, %v5980_v12, %v5985_v51 }
 0xe41   :  { %v5993_v6 = vpop.permute.xlu0 %5992  ;;  %v5988_v5 = vpop.permute.xlu1 %5987  ;;  %v4971_v38 = vpack.c.bf16 %v3244_v16, %v7123_v14  ;;  %v5047_v41 = vpack.c.bf16 %v3240_v55, %v7173_v33  ;;  %v4974_v26 = vpack.c.bf16 %v3246_v39, %v7155_v53  ;;  %v10955_v16 = vld [vmem:[#allocation8_spill] sm:$0xff] }
 0xe42   :  { %v5990_v2 = vunpack.i.h.bf16 %v5988_v5  ;;  %v5989_v63 = vunpack.i.l.bf16 %v5988_v5  ;;  %v5995_v62 = vunpack.i.h.bf16 %v5993_v6  ;;  %v5994_v56 = vunpack.i.l.bf16 %v5993_v6  ;;  %v10946_v5 = vld [vmem:[#allocation18_spill] sm:$0xff] }
 0xe45   :  { %v9221_v46 = vpop.permute.xlu1 %5997  ;;  %v6003_v48 = vpop.permute.xlu0 %6002 }
 0xe46   :  { %v6005_v47 = vunpack.i.h.bf16 %v6003_v48  ;;  %v6004_v45 = vunpack.i.l.bf16 %v6003_v48  ;;  %v6000_v6 = vunpack.i.h.bf16 %v9221_v46 }
 0xe48   :  { %v3213_v28 = vsel %vm10929_vm0, %v5990_v2, %v6005_v47  ;;  %v3212_v40 = vsel %vm10930_vm2, %v5989_v63, %v6004_v45  ;;  %v3211_v34 = vsel %vm10933_vm7, %v6005_v47, %v5995_v62  ;;  %v3210_v37 = vsel %vm10934_vm13, %v6004_v45, %v5994_v56  ;;  %vm10947_vm2 = vmmov %vm10944_vm3 }
 0xe49   :  { %v4965_v30 = vpack.c.bf16 %v3213_v28, %v3212_v40  ;;  %v6013_v9 = vpop.permute.xlu1 %6012  ;;  %v9227_v44 = vpop.permute.xlu0 %6007  ;;  %v5044_v35 = vpack.c.bf16 %v3211_v34, %v3210_v37  ;;  %vm10945_vm0 = vnez %v10679_v24  ;;  %vm10950_vm12 = vmmov %vm10947_vm2  ;;  %v10952_v28 = vld [vmem:[#allocation85_spill] sm:$0xff]  ;;  %v10954_v40 = vld [vmem:[#allocation16_spill] sm:$0xff] }
 0xe4a   :  { %v6015_v17 = vunpack.i.h.bf16 %v6013_v9  ;;  %v6014_v11 = vunpack.i.l.bf16 %v6013_v9  ;;  %vm10951_vm7 = vmmov %vm10947_vm2  ;;  %vm10953_vm13 = vnez %v10952_v28  ;;  %v10959_v37 = vld [vmem:[#allocation19_spill] sm:$0xff] }
 0xe4b   :  { %4966 = vmatprep.subr.msk.bf16.mxu1 %vm10935_vm9, %v4965_v30 }
 0xe4c   :  { %v3209_v32 = vsel %vm10936_vm14, %v5995_v62, %v6015_v17  ;;  %v3208_v1 = vsel %vm10937_vm1, %v5994_v56, %v6014_v11  ;;  %v3214_v50 = vsel %vm10938_vm10, %v6014_v11, %v5989_v63  ;;  %v3215_v27 = vsel %vm10939_vm15, %v6015_v17, %v5990_v2  ;;  %v10948_v2 = vld [vmem:[#allocation17_spill] sm:$0xff]  ;;  %v10957_v11 = vld [vmem:[#allocation22_spill] sm:$0xff] }
 0xe4d   :  { %v4968_v31 = vpack.c.bf16 %v3215_v27, %v3214_v50  ;;  %v5041_v42 = vpack.c.bf16 %v3209_v32, %v3208_v1  ;;  %v6018_v15 = vpop.permute.xlu1 %6017  ;;  %v6028_v43 = vpop.permute.xlu0 %6027  ;;  %vm10949_vm4 = vnez %v10948_v2  ;;  %v5050_v62 = vpack.c.bf16 %v3242_v36, %v10954_v40  ;;  %v10961_v1 = vld [vmem:[#allocation20_spill] sm:$0xff]  ;;  %v10971_v36 = vld [vmem:[#allocation26_spill] sm:$0xff] }
 0xe4e   :  { %v6020_v60 = vunpack.i.h.bf16 %v6018_v15  ;;  %v6019_v10 = vunpack.i.l.bf16 %v6018_v15  ;;  %v6030_v49 = vunpack.i.h.bf16 %v6028_v43  ;;  %v6029_v29 = vunpack.i.l.bf16 %v6028_v43 }
 0xe4f   :  { %4969 = vmatpush1.bf16.msk.msra.mxu1 %vm10941_vm6, %v4968_v31  ;;  %5042 = vmatprep.subr.msk.bf16.mxu0 %vm10942_vm11, %v5041_v42  ;;  %v5999_v56 = vunpack.i.l.bf16 %v9221_v46  ;;  %vm10956_vm14 = vnez %v10955_v16  ;;  %v6010_v17 = vunpack.i.h.bf16 %v9227_v44  ;;  %vm10958_vm1 = vcmp.lt.s32.totalorder %v6823_v4, 15  ;;  %v10962_v46 = vld [vmem:[#allocation24_spill] sm:$0xff] }
 0xe50   :  { %v3245_v21 = vsel %vm10944_vm3, %v6019_v10, %v6020_v60  ;;  %4972 = vmatprep.subr.msk.bf16.mxu1 %vm10945_vm0, %v4971_v38  ;;  %v3241_v48 = vsel %vm10947_vm2, %v6030_v49, %v6029_v29  ;;  %5045 = vmatpush1.bf16.msk.msra.mxu0 %vm10949_vm4, %v5044_v35  ;;  %v3243_v47 = vsel %vm10950_vm12, %v6020_v60, %v6030_v49  ;;  %v6009_v32 = vunpack.i.l.bf16 %v9227_v44  ;;  %vm10963_vm15 = vmmov %vm10958_vm1  ;;  %v10964_v38 = vld [vmem:[#allocation9_spill] sm:$0xff] }
 0xe51   :  { %v4977_v58 = vpack.c.bf16 %v10946_v5, %v3245_v21  ;;  %v6023_v63 = vpop.permute.xlu1 %6022  ;;  %v6033_v12 = vpop.permute.xlu0 %6032  ;;  %v3247_v45 = vsel %vm10951_vm7, %v6029_v29, %v6019_v10  ;;  %5048 = vmatprep.subr.msk.bf16.mxu0 %vm10953_vm13, %v5047_v41  ;;  %v5053_v55 = vpack.c.bf16 %v10957_v11, %v3241_v48  ;;  %vm10960_vm10 = vnez %v10959_v37  ;;  %v10966_v49 = vld [vmem:[#allocation21_spill] sm:$0xff]  ;;  %vm10969_vm2 = vmmov %vm10958_vm1 }
 0xe52   :  { %v6035_v51 = vunpack.i.h.bf16 %v6033_v12  ;;  %v6034_v3 = vunpack.i.l.bf16 %v6033_v12  ;;  %v6025_v30 = vunpack.i.h.bf16 %v6023_v63  ;;  %v6024_v9 = vunpack.i.l.bf16 %v6023_v63  ;;  %vm10970_vm12 = vmmov %vm10958_vm1  ;;  %v10976_v63 = vld [vmem:[#allocation28_spill] sm:$0xff] }
 0xe53   :  { %4975 = vmatpush1.bf16.msk.msra.mxu1 %vm10956_vm14, %v4974_v26  ;;  %v5056_v50 = vpack.c.bf16 %v10961_v1, %v3243_v47  ;;  %v4980_v27 = vpack.c.bf16 %v10962_v46, %v3247_v45  ;;  %vm10965_vm8 = vnez %v10964_v38  ;;  %vm10967_vm5 = vnez %v10966_v49 }
 0xe54   :  { %v3277_v34 = vsel %vm10958_vm1, %v6000_v6, %v6035_v51  ;;  %4978 = vmatprep.subr.msk.bf16.mxu1 %vm10960_vm10, %v4977_v58  ;;  %v3276_v39 = vsel %vm10963_vm15, %v5999_v56, %v6034_v3  ;;  %5051 = vmatpush1.bf16.msk.msra.mxu0 %vm10965_vm8, %v5050_v62  ;;  %vm10968_vm3 = vcmp.lt.s32.totalorder %v6823_v4, 1  ;;  %v3274_v29 = vsel %vm10969_vm2, %v6034_v3, %v6009_v32  ;;  %vm10973_vm15 = vmmov %vm10958_vm1  ;;  %v10981_v62 = vld [vmem:[#allocation27_spill] sm:$0xff] }
 0xe55   :  { %v6043_v31 = vpop.permute.xlu1 %6042  ;;  %v6038_v42 = vpop.permute.xlu0 %6037  ;;  %v4983_v15 = vpack.c.bf16 %v3277_v34, %v3276_v39  ;;  %5054 = vmatprep.subr.msk.bf16.mxu0 %vm10967_vm5, %v5053_v55  ;;  %v3308_v44 = vsel %vm10968_vm3, %v6024_v9, %v6025_v30  ;;  %v3275_v35 = vsel %vm10970_vm12, %v6035_v51, %v6010_v17  ;;  %vm10972_vm7 = vnez %v10971_v36  ;;  %vm10974_vm5 = vmmov %vm10958_vm1  ;;  %v10979_v51 = vld [vmem:[#allocation23_spill] sm:$0xff] }
 0xe56   :  { %v6045_v43 = vunpack.i.h.bf16 %v6043_v31  ;;  %v6044_v60 = vunpack.i.l.bf16 %v6043_v31  ;;  %v6040_v10 = vunpack.i.h.bf16 %v6038_v42  ;;  %v6039_v41 = vunpack.i.l.bf16 %v6038_v42  ;;  %vm10975_vm3 = vmmov %vm10958_vm1  ;;  %v10983_v31 = vld [vmem:[#allocation35_spill] sm:$0xff]  ;;  %v10985_v42 = vld [vmem:[#allocation32_spill] sm:$0xff] }
 0xe57   :  { %4981 = vmatpush1.bf16.msk.msra.mxu1 %vm10972_vm7, %v4980_v27  ;;  %vm10977_vm2 = vnez %v10976_v63  ;;  %vm10978_vm12 = vcmp.lt.s32.totalorder %v6823_v4, 1  ;;  %vm10980_vm7 = vnez %v10979_v51  ;;  %v4989_v55 = vpack.c.bf16 %v3308_v44, %v10981_v62 }
 0xe58   :  { %v3279_v21 = vsel %vm10958_vm1, %v6045_v43, %v6000_v6  ;;  %v3272_v26 = vsel %vm10973_vm15, %v6009_v32, %v6044_v60  ;;  %v3273_v58 = vsel %vm10974_vm5, %v6010_v17, %v6045_v43  ;;  %v3278_v48 = vsel %vm10975_vm3, %v6044_v60, %v5999_v56  ;;  %4984 = vmatprep.subr.msk.bf16.mxu1 %vm10977_vm2, %v4983_v15  ;;  %vm10982_vm5 = vmmov %vm10978_vm12  ;;  %v10988_v15 = vld [vmem:[#allocation31_spill] sm:$0xff]  ;;  %v10989_v60 = vld [vmem:[#allocation25_spill] sm:$0xff] }
 0xe59   :  { %v4986_v12 = vpack.c.bf16 %v3279_v21, %v3278_v48  ;;  %v5059_v47 = vpack.c.bf16 %v3273_v58, %v3272_v26  ;;  %v3304_v45 = vsel %vm10978_vm12, %v6040_v10, %v6039_v41  ;;  %5057 = vmatpush1.bf16.msk.msra.mxu0 %vm10980_vm7, %v5056_v50  ;;  %v6048_v6 = vpop.permute.xlu1 %6047  ;;  %v6058_v3 = vpop.permute.xlu0 %6057  ;;  %v3310_v17 = vsel %vm10982_vm5, %v6039_v41, %v6024_v9  ;;  %vm10987_vm3 = vmmov %vm10982_vm5  ;;  %v10991_v9 = vld [vmem:[#allocation33_spill] sm:$0xff]  ;;  %v10994_v41 = vld [vmem:[#allocation34_spill] sm:$0xff] }
 0xe5a   :  { %v6050_v34 = vunpack.i.h.bf16 %v6048_v6  ;;  %v5062_v56 = vpack.c.bf16 %v3275_v35, %v3274_v29  ;;  %v6049_v32 = vunpack.i.l.bf16 %v6048_v6  ;;  %v6060_v27 = vunpack.i.h.bf16 %v6058_v3  ;;  %vm10992_vm5 = vmmov %vm10987_vm3  ;;  %v10996_v58 = vld [vmem:[#allocation36_spill] sm:$0xff]  ;;  %v10997_v48 = vld [vmem:[#allocation30_spill] sm:$0xff] }
 0xe5b   :  { %v6059_v39 = vunpack.i.l.bf16 %v6058_v3  ;;  %vm10984_vm1 = vnez %v10983_v31  ;;  %vm10986_vm15 = vnez %v10985_v42  ;;  %v3306_v50 = vsel %vm10987_vm3, %v6025_v30, %v6040_v10  ;;  %vm10993_vm7 = vmmov %vm10987_vm3  ;;  %v11000_v3 = vld [vmem:[#allocation11_spill] sm:$0xff] }
 0xe5c   :  { %4987 = vmatpush1.bf16.msk.msra.mxu1 %vm10984_vm1, %v4986_v12  ;;  %5060 = vmatprep.subr.msk.bf16.mxu0 %vm10986_vm15, %v5059_v47  ;;  %v5065_v43 = vpack.c.bf16 %v3304_v45, %v10988_v15  ;;  %vm10990_vm12 = vnez %v10989_v60  ;;  %v4992_v44 = vpack.c.bf16 %v3310_v17, %v10991_v9  ;;  %v3309_v29 = vsel %vm10992_vm5, %v6049_v32, %v6050_v34  ;;  %v10999_v12 = vld [vmem:[#allocation29_spill] sm:$0xff]  ;;  %v11003_v17 = vld [vmem:[#allocation39_spill] sm:$0xff] }
 0xe5d   :  { %4990 = vmatprep.subr.msk.bf16.mxu1 %vm10990_vm12, %v4989_v55  ;;  %v3305_v35 = vsel %vm10993_vm7, %v6060_v27, %v6059_v39  ;;  %vm10995_vm1 = vnez %v10994_v41  ;;  %v6053_v21 = vpop.permute.xlu1 %6052  ;;  %v6063_v26 = vpop.permute.xlu0 %6062  ;;  %v4995_v30 = vpack.c.bf16 %v10996_v58, %v3309_v29  ;;  %v3311_v10 = vsel %vm10987_vm3, %v6059_v39, %v6049_v32  ;;  %vm11002_vm7 = vmmov %vm10987_vm3  ;;  %v11006_v29 = vld [vmem:[#allocation41_spill] sm:$0xff] }
 0xe5e   :  { %5063 = vmatpush1.bf16.msk.msra.mxu0 %vm10995_vm1, %v5062_v56  ;;  %vm10998_vm12 = vnez %v10997_v48  ;;  %v5068_v47 = vpack.c.bf16 %v3306_v50, %v10999_v12  ;;  %v6055_v45 = vunpack.i.h.bf16 %v6053_v21  ;;  %v6054_v6 = vunpack.i.l.bf16 %v6053_v21 }
 0xe5f   :  { %5066 = vmatprep.subr.msk.bf16.mxu0 %vm10998_vm12, %v5065_v43  ;;  %vm11001_vm5 = vnez %v11000_v3  ;;  %v3307_v55 = vsel %vm11002_vm7, %v6050_v34, %v6060_v27  ;;  %v5071_v56 = vpack.c.bf16 %v11003_v17, %v3305_v35  ;;  %vm11005_vm1 = vnez %v11004_v57  ;;  %v11007_v43 = vld [vmem:[#allocation13_spill] sm:$0xff]  ;;  %v11010_v34 = vld [vmem:[#allocation40_spill] sm:$0xff]  ;;  %v11012_v27 = vld [vmem:[#allocation38_spill] sm:$0xff] }
 0xe60   :  { %4993 = vmatpush1.bf16.msk.msra.mxu1 %vm11001_vm5, %v4992_v44  ;;  %v4998_v32 = vpack.c.bf16 %v11006_v29, %v3311_v10  ;;  %v6065_v39 = vunpack.i.h.bf16 %v6063_v26  ;;  %v6064_v22 = vunpack.i.l.bf16 %v6063_v26  ;;  %vm11008_vm3 = vnez %v11007_v43  ;;  %v11015_v26 = vld [vmem:[#allocation6_spill] sm:$0xff] }
 0xe61   :  { %4996 = vmatprep.subr.msk.bf16.mxu1 %vm11005_vm1, %v4995_v30  ;;  %v9350_v50 = vpop.permute.xlu1 %6072  ;;  %v9352_v21 = vpop.permute.xlu0 %6067  ;;  %vm11009_vm5 = vcmp.lt.s32.totalorder %v6823_v4, 127  ;;  %vm11011_vm7 = vnez %v11010_v34  ;;  %v5074_v35 = vpack.c.bf16 %v11012_v27, %v3307_v55  ;;  %v11013_v30 = vld [vmem:[#allocation43_spill] sm:$0xff]  ;;  %v11019_v34 = vld [vmem:[#allocation42_spill] sm:$0xff] }
 0xe62   :  { %5069 = vmatpush1.bf16.msk.msra.mxu0 %vm11008_vm3, %v5068_v47  ;;  %v3338_v44 = vsel %vm11009_vm5, %v6054_v6, %v6055_v45  ;;  %vm11014_vm1 = vnez %v11013_v30  ;;  %vm11016_vm3 = vmmov %vm11009_vm5 }
 0xe63   :  { %5072 = vmatprep.subr.msk.bf16.mxu0 %vm11011_vm7, %v5071_v56  ;;  %v5001_v10 = vpack.c.bf16 %v3338_v44, %v11015_v26  ;;  %v3336_v47 = vsel %vm11016_vm3, %v6055_v45, %v6065_v39  ;;  %vm11017_vm12 = vmmov %vm11016_vm3  ;;  %vm11020_vm7 = vnez %v11019_v34  ;;  %v11022_v45 = vpack.c.bf16 %v9126_v25, %v9118_v19  ;;  %v11028_v26 = vld [vmem:[#allocation4_spill] sm:$0xff]  ;;  %v11047_v34 = vld [vmem:[#allocation51_spill] sm:$0xff] }
 0xe64   :  { %4999 = vmatpush1.bf16.msk.msra.mxu1 %vm11014_vm1, %v4998_v32  ;;  %v3340_v52 = vsel %vm11017_vm12, %v6064_v22, %v6054_v6  ;;  %vm11018_vm5 = vmmov %vm11016_vm3  ;;  %v11023_v6 = vld [vmem:[#allocation7_spill] sm:$0xff]  ;;  %v11031_v25 = vpack.c.bf16 %v9128_v23, %v9120_v7  ;;  %v11035_v7 = vld [vmem:[#allocation49_spill] sm:$0xff] }
 0xe65   :  { %3590 = vmatprep.subr.bf16.mxu1 %v3473_v13  ;;  %v3342_v56 = vsel %vm11018_vm5, %v6065_v39, %v6064_v22  ;;  %v6078_v55 = vpop.permute.xlu1 %6077  ;;  %v6083_v32 = vpop.permute.xlu0 %6082  ;;  %v11021_v13 = vpack.c.bf16 %v9136_v0, %v9124_v61  ;;  %vm11024_vm12 = vmmov %vm11016_vm3  ;;  %v5004_v61 = vpack.c.bf16 %v3340_v52, %v11028_v26  ;;  %v11029_v0 = vld [vmem:[#allocation44_spill] sm:$0xff]  ;;  %v6075_v52 = vunpack.i.h.bf16 %v9350_v50 }
 0xe66   :  { %5075 = vmatpush1.bf16.msk.msra.mxu0 %vm11020_vm7, %v5074_v35  ;;  %v6080_v30 = vunpack.i.h.bf16 %v6078_v55  ;;  %v6079_v27 = vunpack.i.l.bf16 %v6078_v55  ;;  %v6085_v59 = vunpack.i.h.bf16 %v6083_v32  ;;  %v6084_v20 = vunpack.i.l.bf16 %v6083_v32  ;;  %v11025_v35 = vld [vmem:[#allocation86_spill] sm:$0xff]  ;;  %v11027_v55 = vld [vmem:[#allocation5_spill] sm:$0xff]  ;;  %vm11030_vm7 = vmmov %vm11016_vm3 }
 0xe67   :  { %3653 = vmatprep.subr.bf16.mxu0 %v11021_v13  ;;  %v5077_v44 = vpack.c.bf16 %v3342_v56, %v11023_v6  ;;  %vm11026_vm5 = vnez %v11025_v35  ;;  %v5080_v32 = vpack.c.bf16 %v3336_v47, %v11027_v55  ;;  %v6069_v35 = vunpack.i.l.bf16 %v9352_v21  ;;  %v11032_v47 = vld [vmem:[#allocation87_spill] sm:$0xff] }
 0xe68   :  { %3591 = vmatpush1.bf16.msra.mxu1 %v11022_v45  ;;  %v3339_v22 = vsel %vm11024_vm12, %v6079_v27, %v6080_v30  ;;  %v3341_v39 = vsel %vm11016_vm3, %v6084_v20, %v6079_v27  ;;  %v3343_v19 = vsel %vm11030_vm7, %v6085_v59, %v6084_v20  ;;  %v6070_v27 = vunpack.i.h.bf16 %v9352_v21  ;;  %vm11034_vm7 = vmmov %vm11016_vm3 }
 0xe69   :  { %5002 = vmatprep.subr.msk.bf16.mxu1 %vm11026_vm5, %v5001_v10  ;;  %v5007_v13 = vpack.c.bf16 %v11029_v0, %v3339_v22  ;;  %v6088_v56 = vpop.permute.xlu1 %6087  ;;  %v6098_v45 = vpop.permute.xlu0 %6097  ;;  %vm11033_vm12 = vnez %v11032_v47  ;;  %v6074_v22 = vunpack.i.l.bf16 %v9350_v50  ;;  %v3337_v20 = vsel %vm11034_vm7, %v6080_v30, %v6085_v59  ;;  %v11038_v0 = vld [vmem:[#allocation46_spill] sm:$0xff]  ;;  %v11041_v47 = vld [vmem:[#allocation45_spill] sm:$0xff] }
 0xe6a   :  { %3654 = vmatpush1.bf16.msra.mxu0 %v11031_v25  ;;  %v6090_v10 = vunpack.i.h.bf16 %v6088_v56  ;;  %v6089_v6 = vunpack.i.l.bf16 %v6088_v56  ;;  %v5010_v23 = vpack.c.bf16 %v11035_v7, %v3341_v39  ;;  %v11036_v25 = vld [vmem:[#allocation82_spill] sm:$0xff]  ;;  %v5083_v26 = vpack.c.bf16 %v11038_v0, %v3343_v19 }
 0xe6b   :  { %5078 = vmatprep.subr.msk.bf16.mxu0 %vm11033_vm12, %v5077_v44  ;;  %vm11037_vm3 = vnez %v11036_v25  ;;  %vm11039_vm5 = vcmp.lt.s32.totalorder %v6823_v4, 113  ;;  %v6100_v56 = vunpack.i.h.bf16 %v6098_v45  ;;  %vm11042_vm12 = vnez %v11041_v47 }
 0xe6c   :  { %5005 = vmatpush1.bf16.msk.msra.mxu1 %vm11037_vm3, %v5004_v61  ;;  %v3370_v21 = vsel %vm11039_vm5, %v6089_v6, %v6069_v35  ;;  %vm11040_vm1 = vmmov %vm11039_vm5  ;;  %v6099_v39 = vunpack.i.l.bf16 %v6098_v45  ;;  %v11045_v61 = vld [vmem:[#allocation84_spill] sm:$0xff]  ;;  %vm11052_vm5 = vcmp.lt.s32.totalorder %v6823_v4, 112 }
 0xe6d   :  { %v3371_v44 = vsel %vm11040_vm1, %v6090_v10, %v6070_v27  ;;  %5008 = vmatprep.subr.msk.bf16.mxu1 %vm11042_vm12, %v5007_v13  ;;  %vm11043_vm15 = vmmov %vm11040_vm1  ;;  %vm11046_vm3 = vnez %v11045_v61  ;;  %v6093_v19 = vpop.permute.xlu1 %6092  ;;  %v6103_v7 = vpop.permute.xlu0 %6102  ;;  %v11049_v13 = vld [vmem:[#allocation48_spill] sm:$0xff] }
 0xe6e   :  { %v3372_v50 = vsel %vm11043_vm15, %v6074_v22, %v6089_v6  ;;  %vm11044_vm7 = vmmov %vm11040_vm1  ;;  %v5013_v59 = vpack.c.bf16 %v3371_v44, %v3370_v21  ;;  %5081 = vmatpush1.bf16.msk.msra.mxu0 %vm11046_vm3, %v5080_v32  ;;  %v6095_v0 = vunpack.i.h.bf16 %v6093_v19  ;;  %v6094_v25 = vunpack.i.l.bf16 %v6093_v19  ;;  %v11050_v6 = vld [vmem:[#allocation47_spill] sm:$0xff]  ;;  %v11053_v21 = vld [vmem:[#allocation54_spill] sm:$0xff] }
 0xe6f   :  { %v3373_v30 = vsel %vm11044_vm7, %v6075_v52, %v6090_v10  ;;  %v6105_v55 = vunpack.i.h.bf16 %v6103_v7  ;;  %vm11048_vm1 = vnez %v11047_v34  ;;  %v5086_v47 = vpack.c.bf16 %v11049_v13, %v3337_v20  ;;  %vm11055_vm12 = vmmov %vm11052_vm5  ;;  %v11057_v20 = vld [vmem:[#allocation53_spill] sm:$0xff] }
 0xe70   :  { %5084 = vmatprep.subr.msk.bf16.mxu0 %vm11048_vm1, %v5083_v26  ;;  %v6104_v43 = vunpack.i.l.bf16 %v6103_v7  ;;  %vm11051_vm15 = vnez %v11050_v6  ;;  %v5016_v10 = vpack.c.bf16 %v3373_v30, %v3372_v50  ;;  %v3402_v45 = vsel %vm11052_vm5, %v6094_v25, %v6095_v0  ;;  %vm11056_vm1 = vmmov %vm11052_vm5  ;;  %v11059_v50 = vld [vmem:[#allocation52_spill] sm:$0xff] }
 0xe71   :  { %5011 = vmatpush1.bf16.msk.msra.mxu1 %vm11051_vm15, %v5010_v23  ;;  %v3375_v32 = vsel %vm11044_vm7, %v6105_v55, %v6075_v52  ;;  %vm11054_vm3 = vnez %v11053_v21  ;;  %v3406_v44 = vsel %vm11055_vm12, %v6100_v56, %v6099_v39  ;;  %v3404_v26 = vsel %vm11056_vm1, %v6099_v39, %v6094_v25  ;;  %vm11058_vm15 = vmmov %vm11044_vm7  ;;  %v6108_v30 = vpop.permute.xlu1 %6107  ;;  %v6113_v19 = vpop.permute.xlu0 %6112 }
 0xe72   :  { %5014 = vmatprep.subr.msk.bf16.mxu1 %vm11054_vm3, %v5013_v59  ;;  %v5019_v7 = vpack.c.bf16 %v3402_v45, %v11057_v20  ;;  %v3368_v23 = vsel %vm11058_vm15, %v6069_v35, %v6104_v43  ;;  %vm11060_vm2 = vnez %v11059_v50  ;;  %vm11061_vm5 = vmmov %vm11044_vm7  ;;  %v6110_v21 = vunpack.i.h.bf16 %v6108_v30  ;;  %v11063_v20 = vld [vmem:[#allocation59_spill] sm:$0xff]  ;;  %v11067_v50 = vld [vmem:[#allocation56_spill] sm:$0xff] }
 0xe73   :  { %5087 = vmatpush1.bf16.msk.msra.mxu0 %vm11060_vm2, %v5086_v47  ;;  %v3369_v52 = vsel %vm11061_vm5, %v6070_v27, %v6105_v55  ;;  %vm11062_vm7 = vmmov %vm11061_vm5  ;;  %v6109_v6 = vunpack.i.l.bf16 %v6108_v30  ;;  %v6115_v39 = vunpack.i.h.bf16 %v6113_v19  ;;  %v6114_v45 = vunpack.i.l.bf16 %v6113_v19  ;;  %v11065_v47 = vld [vmem:[#allocation83_spill] sm:$0xff]  ;;  %v11069_v27 = vld [vmem:[#allocation58_spill] sm:$0xff] }
 0xe74   :  { %v3374_v59 = vsel %vm11062_vm7, %v6104_v43, %v6074_v22  ;;  %v5092_v25 = vpack.c.bf16 %v3369_v52, %v3368_v23  ;;  %vm11064_vm12 = vnez %v11063_v20  ;;  %vm11066_vm15 = vnez %v11065_v47  ;;  %vm11068_vm5 = vmmov %vm11056_vm1  ;;  %v11071_v30 = vld [vmem:[#allocation60_spill] sm:$0xff]  ;;  %v11082_v47 = vld [vmem:[#allocation63_spill] sm:$0xff] }
 0xe75   :  { %v5089_v13 = vpack.c.bf16 %v3375_v32, %v3374_v59  ;;  %5017 = vmatpush1.bf16.msk.msra.mxu1 %vm11064_vm12, %v5016_v10  ;;  %v3403_v35 = vsel %vm11056_vm1, %v6109_v6, %v6110_v21  ;;  %v5095_v55 = vpack.c.bf16 %v3406_v44, %v11067_v50  ;;  %v3400_v43 = vsel %vm11068_vm5, %v6095_v0, %v6100_v56  ;;  %v11070_v32 = vld [vmem:[#allocation62_spill] sm:$0xff]  ;;  %v6123_v19 = vpop.permute.xlu1 %6122  ;;  %v6118_v10 = vpop.permute.xlu0 %6117  ;;  %vm11073_vm12 = vmmov %vm11056_vm1  ;;  %v11074_v59 = vld [vmem:[#allocation61_spill] sm:$0xff] }
 0xe76   :  { %5020 = vmatprep.subr.msk.bf16.mxu1 %vm11066_vm15, %v5019_v7  ;;  %v5022_v22 = vpack.c.bf16 %v3404_v26, %v11069_v27  ;;  %v5025_v23 = vpack.c.bf16 %v11070_v32, %v3403_v35  ;;  %vm11072_vm7 = vnez %v11071_v30  ;;  %v3405_v52 = vsel %vm11073_vm12, %v6114_v45, %v6109_v6  ;;  %v11076_v27 = vld [vmem:[#allocation10_spill] sm:$0xff]  ;;  %vm11081_vm12 = vmmov %vm11056_vm1 }
 0xe77   :  { %5090 = vmatprep.subr.msk.bf16.mxu0 %vm11072_vm7, %v5089_v13  ;;  %v3407_v7 = vsel %vm11056_vm1, %v6115_v39, %v6114_v45  ;;  %vm11075_vm15 = vnez %v11074_v59  ;;  %v6125_v44 = vunpack.i.h.bf16 %v6123_v19  ;;  %v6124_v0 = vunpack.i.l.bf16 %v6123_v19  ;;  %v11078_v35 = vld [vmem:[#allocation14_spill] sm:$0xff]  ;;  %v11080_v13 = vld [vmem:[#allocation57_spill] sm:$0xff]  ;;  %v11084_v45 = vld [vmem:[#allocation68_spill] sm:$0xff] }
 0xe78   :  { %5093 = vmatpush1.bf16.msk.msra.mxu0 %vm11075_vm15, %v5092_v25  ;;  %v6120_v56 = vunpack.i.h.bf16 %v6118_v10  ;;  %v6119_v26 = vunpack.i.l.bf16 %v6118_v10  ;;  %vm11077_vm5 = vnez %v11076_v27  ;;  %vm11079_vm7 = vnez %v11078_v35  ;;  %v11085_v59 = vld [vmem:[#allocation67_spill] sm:$0xff] }
 0xe79   :  { %5096 = vmatprep.subr.msk.bf16.mxu0 %vm11077_vm5, %v5095_v55  ;;  %5023 = vmatpush1.bf16.msk.msra.mxu1 %vm11079_vm7, %v5022_v22  ;;  %v5098_v32 = vpack.c.bf16 %v3400_v43, %v11080_v13  ;;  %v3401_v6 = vsel %vm11081_vm12, %v6110_v21, %v6115_v39  ;;  %vm11083_vm1 = vnez %v11082_v47  ;;  %v5028_v25 = vpack.c.bf16 %v11084_v45, %v3405_v52  ;;  %v6128_v35 = vpop.permute.xlu1 %6127  ;;  %v6133_v22 = vpop.permute.xlu0 %6132  ;;  %v11088_v43 = vld [vmem:[#allocation15_spill] sm:$0xff]  ;;  %v11091_v45 = vld [vmem:[#allocation69_spill] sm:$0xff] }
 0xe7a   :  { %5026 = vmatprep.subr.msk.bf16.mxu1 %vm11083_vm1, %v5025_v23  ;;  %v5101_v19 = vpack.c.bf16 %v11085_v59, %v3407_v7  ;;  %vm11086_vm15 = vcmp.lt.s32.totalorder %v6823_v4, 111  ;;  %vm11089_vm7 = vnez %v11088_v43  ;;  %v6130_v21 = vunpack.i.h.bf16 %v6128_v35  ;;  %v11090_v23 = vld [vmem:[#allocation66_spill] sm:$0xff]  ;;  %v11093_v7 = vld [vmem:[#allocation64_spill] sm:$0xff] }
 0xe7b   :  { %v3435_v10 = vsel %vm11086_vm15, %v6125_v44, %v6120_v56  ;;  %vm11087_vm5 = vmmov %vm11086_vm15  ;;  %v6129_v39 = vunpack.i.l.bf16 %v6128_v35  ;;  %v6135_v47 = vunpack.i.h.bf16 %v6133_v22  ;;  %v5104_v13 = vpack.c.bf16 %v11090_v23, %v3401_v6  ;;  %v11098_v6 = vld [vmem:[#allocation71_spill] sm:$0xff] }
 0xe7c   :  { %v3434_v55 = vsel %vm11087_vm5, %v6124_v0, %v6119_v26  ;;  %5099 = vmatpush1.bf16.msk.msra.mxu0 %vm11089_vm7, %v5098_v32  ;;  %v6134_v52 = vunpack.i.l.bf16 %v6133_v22  ;;  %vm11092_vm12 = vnez %v11091_v45  ;;  %vm11094_vm15 = vnez %v11093_v7  ;;  %vm11095_vm1 = vmmov %vm11087_vm5  ;;  %v11102_v7 = vld [vmem:[#allocation70_spill] sm:$0xff] }
 0xe7d   :  { %v5031_v27 = vpack.c.bf16 %v3435_v10, %v3434_v55  ;;  %5102 = vmatprep.subr.msk.bf16.mxu0 %vm11092_vm12, %v5101_v19  ;;  %5029 = vmatpush1.bf16.msk.msra.mxu1 %vm11094_vm15, %v5028_v25  ;;  %v3436_v59 = vsel %vm11087_vm5, %v6129_v39, %v6124_v0  ;;  %v3437_v10 = vsel %vm11095_vm1, %v6130_v21, %v6125_v44  ;;  %vm11096_vm7 = vmmov %vm11095_vm1  ;;  %v11104_v44 = vld [vmem:[#allocation75_spill] sm:$0xff]  ;;  %vm11109_vm5 = vcmask 1043456  }
 0xe7e   :  { %v3439_v32 = vsel %vm11096_vm7, %v6135_v47, %v6130_v21  ;;  %vm11097_vm2 = vmmov %vm11095_vm1  ;;  %vm11099_vm3 = vnez %v11098_v6  ;;  %v5034_v55 = vpack.c.bf16 %v3437_v10, %v3436_v59  ;;  %vm11105_vm7 = vnez %v11104_v44  ;;  %v11106_v21 = vld [vmem:[#allocation76_spill] sm:$0xff]  ;;  %v6421_v59 = vld [vmem:[%s10064_s10] ss:$8 sps:$4 sm:$0xff]  }
 0xe7f   :  { %v3433_v35 = vsel %vm11097_vm2, %v6120_v56, %v6135_v47  ;;  %5032 = vmatprep.subr.msk.bf16.mxu1 %vm11099_vm3, %v5031_v27  ;;  %vm11100_vm12 = vmmov %vm11095_vm1  ;;  %vm11107_vm2 = vnez %v11106_v21  ;;  %v11108_v47 = vld [vmem:[#allocation12_spill] sm:$0xff]  ;;  %v11110_v27 = vld [vmem:[#allocation81_spill] sm:$0xff] }
 0xe80   :  { %v3432_v19 = vsel %vm11100_vm12, %v6119_v26, %v6134_v52  ;;  %vm11101_vm15 = vmmov %vm11095_vm1  ;;  %vm11103_vm1 = vnez %v11102_v7  ;;  %vm11111_vm3 = vnez %v11110_v27  ;;  %v11112_v56 = vld [vmem:[#allocation50_spill] sm:$0xff]  ;;  %v11114_v26 = vld [vmem:[#allocation55_spill] sm:$0xff] }
 0xe81   :  { %v3438_v25 = vsel %vm11101_vm15, %v6134_v52, %v6129_v39  ;;  %v5110_v22 = vpack.c.bf16 %v3433_v35, %v3432_v19  ;;  %5105 = vmatpush1.bf16.msk.msra.mxu0 %vm11103_vm1, %v5104_v13  ;;  %5035 = vmatpush1.bf16.msk.msra.mxu1 %vm11105_vm7, %v5034_v55  ;;  %vm11113_vm12 = vmmov %vm11109_vm5  ;;  %v6422_v13 = vld [vmem:[%s10064_s10 + $0x14] ss:$8 sps:$4 sm:$0xff]   ;;  %vm11116_vm15 = vcmask 719872   ;;  %v6424_v52 = vld [vmem:[%s10064_s10 + $0x10] ss:$8 sps:$4 sm:$0xff]  }
 0xe82   :  { %v5107_v0 = vpack.c.bf16 %v3439_v32, %v3438_v25  ;;  %5036 = vmatprep.subr.msk.bf16.mxu1 %vm11109_vm5, %v11108_v47  ;;  %v11115_v39 = vld [vmem:[#allocation77_spill] sm:$0xff]  ;;  %vm11117_vm5 = vmmov %vm11116_vm15  ;;  %v6425_v10 = vld [vmem:[%s10064_s10 + $0x24] ss:$8 sps:$4 sm:$0xff]  }
 0xe83   :  { %v6427_v32 = vld [vmem:[%s10064_s10 + $0x20] ss:$8 sps:$4 sm:$0xff]  }
 0xe84   :  { %5108 = vmatprep.subr.msk.bf16.mxu0 %vm11107_vm2, %v5107_v0 }
 0xe85   :  { %5111 = vmatpush1.bf16.msk.msra.mxu0 %vm11111_vm3, %v5110_v22  ;;  %3605 = vmatpush1.bf16.msra.mxu1 %v11114_v26 }
 0xe86   :  { %5112 = vmatprep.subr.msk.bf16.mxu0 %vm11113_vm12, %v11112_v56  ;;  %vm11118_vm12 = vmmov %vm11117_vm5 }
 0xe88   :  { %3611 = vmatmul.mubr.bf16.vlgmr.msra.gmra.mrb[48].mxu1 %v6421_v59 }
 0xe89   :  { %3668 = vmatpush1.bf16.msra.mxu0 %v11115_v39  ;;  %5038 = vmatprep.mubr.msk.bf16.mxu1 %vm11116_vm15, %v6422_v13  ;;  %vm11119_vm15 = vmmov %vm11117_vm5 }
 0xe8a   :  { %v3515_v35 = vpop.permute.xlu1 %3514  ;;  %v3520_v0 = vpop.permute.xlu0 %3519 }
 0xe8c   :  { %3674 = vmatmul.mubr.bf16.vlgmr.msra.gmra.mrb[60].mxu0 %v6421_v59 }
 0xe8d   :  { %5114 = vmatprep.mubr.msk.bf16.mxu0 %vm11117_vm5, %v6422_v13 }
 0xe90   :  { %3621 = vmatmul.mubr.bf16.gmra.mrb[52].mxu1 %v6424_v52 }
 0xe91   :  { %5039 = vmatprep.mubr.msk.bf16.mxu1 %vm11118_vm12, %v6425_v10  ;;  %vm11121_vm12 = vmmov %vm11117_vm5 }
 0xe94   :  { %3684 = vmatmul.mubr.bf16.gmra.mrb[64].mxu0 %v6424_v52 }
 0xe95   :  { %5115 = vmatprep.mubr.msk.bf16.mxu0 %vm11119_vm15, %v6425_v10  ;;  %vm11122_vm15 = vcmp.lt.s32.totalorder %v6823_v4, 16 }
 0xe96   :  { %vm11125_vm3 = vmmov %vm11122_vm15 }
 0xe98   :  { %3631 = vmatmul.mubr.bf16.gmra.mrb[56].mxu1 %v6427_v32 }
 0xe9c   :  { %3694 = vmatmul.mubr.bf16.gmra.mrb[68].mxu0 %v6427_v32 }
 0xf5b   :  { %v3612_v55 = vpop.f32.mrb[48].mxu1 }
 0xf5c   :  { %v3613_v19 = vadd.f32 %v3612_v55, %v3515_v35  ;;  %v3614_v25 = vpop.f32.mrb[49].mxu1 }
 0xf5d   :  { %v3615_v22 = vadd.f32 %v3614_v25, %v3515_v35  ;;  %v3616_v59 = vpop.f32.mrb[50].mxu1 }
 0xf5e   :  { %v5116_v13 = vmul.f32 -1.442695, %v3613_v19  ;;  %v3617_v26 = vadd.f32 %v3616_v59, %v3520_v0  ;;  %v3618_v56 = vpop.f32.mrb[51].mxu1  ;;  %v3525_v19 = vpop.permute.xlu1 %3524 }
 0xf5f   :  { %v3675_v39 = vpop.f32.mrb[60].mxu0  ;;  %v5117_v52 = vmul.f32 -1.442695, %v3615_v22  ;;  %v3619_v21 = vadd.f32 %v3618_v56, %v3520_v0 }
 0xf60   :  { %v3676_v27 = vadd.f32 %v3675_v39, %v3515_v35  ;;  %v3677_v47 = vpop.f32.mrb[61].mxu0  ;;  %6599 = vpow2.f32 %v5116_v13  ;;  %v5120_v44 = vmul.f32 -1.442695, %v3617_v26  ;;  %v3530_v13 = vpop.permute.xlu0 %3529 }
 0xf61   :  { %v3678_v10 = vadd.f32 %v3677_v47, %v3515_v35  ;;  %v3679_v7 = vpop.f32.mrb[62].mxu0  ;;  %6601 = vpow2.f32 %v5117_v52  ;;  %v5121_v6 = vmul.f32 -1.442695, %v3619_v21 }
 0xf62   :  { %v5118_v32 = vmul.f32 -1.442695, %v3676_v27  ;;  %v3680_v55 = vadd.f32 %v3679_v7, %v3520_v0  ;;  %v3681_v23 = vpop.f32.mrb[63].mxu0  ;;  %6603 = vpow2.f32 %v5120_v44  ;;  %v3535_v3 = vpop.permute.xlu1 %3534 }
 0xf63   :  { %v5119_v25 = vmul.f32 -1.442695, %v3678_v10  ;;  %v3682_v45 = vadd.f32 %v3681_v23, %v3520_v0  ;;  %v3622_v43 = vpop.f32.mrb[52].mxu1 }
 0xf64   :  { %6605 = vpow2.f32 %v5118_v32  ;;  %v5122_v59 = vmul.f32 -1.442695, %v3680_v55  ;;  %v3623_v22 = vadd.f32 %v3622_v43, %v3525_v19  ;;  %v3624_v56 = vpop.f32.mrb[53].mxu1 }
 0xf65   :  { %6607 = vpow2.f32 %v5119_v25  ;;  %v5123_v39 = vmul.f32 -1.442695, %v3682_v45  ;;  %v3625_v47 = vadd.f32 %v3624_v56, %v3525_v19  ;;  %v3626_v26 = vpop.f32.mrb[54].mxu1 }
 0xf66   :  { %6609 = vpow2.f32 %v5121_v6  ;;  %v5124_v27 = vmul.f32 -1.442695, %v3623_v22  ;;  %v3627_v7 = vadd.f32 %v3626_v26, %v3530_v13  ;;  %v3628_v35 = vpop.f32.mrb[55].mxu1 }
 0xf67   :  { %6611 = vpow2.f32 %v5122_v59  ;;  %v3685_v21 = vpop.f32.mrb[64].mxu0  ;;  %v5125_v44 = vmul.f32 -1.442695, %v3625_v47  ;;  %v3629_v61 = vadd.f32 %v3628_v35, %v3530_v13 }
 0xf68   :  { %6613 = vpow2.f32 %v5123_v39  ;;  %v3686_v23 = vadd.f32 %v3685_v21, %v3525_v19  ;;  %v3687_v0 = vpop.f32.mrb[65].mxu0  ;;  %v5128_v52 = vmul.f32 -1.442695, %v3627_v7 }
 0xf69   :  { %6615 = vpow2.f32 %v5124_v27  ;;  %v3688_v10 = vadd.f32 %v3687_v0, %v3525_v19  ;;  %v3689_v32 = vpop.f32.mrb[66].mxu0 }
 0xf6a   :  { %6617 = vpow2.f32 %v5125_v44  ;;  %v5126_v45 = vmul.f32 -1.442695, %v3686_v23  ;;  %v3691_v43 = vpop.f32.mrb[67].mxu0  ;;  %v6600_v55 = vpop.eup %6599  ;;  %v3690_v29 = vadd.f32 %v3689_v32, %v3530_v13 }
 0xf6b   :  { %6619 = vpow2.f32 %v5128_v52  ;;  %v5127_v6 = vmul.f32 -1.442695, %v3688_v10  ;;  %v6602_v25 = vpop.eup %6601  ;;  %v3728_v59 = vadd.f32 1.0, %v6600_v55  ;;  %v3632_v22 = vpop.f32.mrb[56].mxu1 }
 0xf6c   :  { %v6604_v56 = vpop.eup %6603  ;;  %v3729_v26 = vadd.f32 1.0, %v6602_v25  ;;  %v3634_v30 = vpop.f32.mrb[57].mxu1  ;;  %6621 = vpow2.f32 %v5126_v45 }
 0xf6d   :  { %v3732_v47 = vadd.f32 1.0, %v6604_v56  ;;  %v3636_v21 = vpop.f32.mrb[58].mxu1  ;;  %6623 = vpow2.f32 %v5127_v6  ;;  %v3635_v32 = vadd.f32 %v3634_v30, %v3535_v3 }
 0xf6e   :  { %v6606_v39 = vpop.eup %6605  ;;  %v3638_v44 = vpop.f32.mrb[59].mxu1  ;;  %6625 = vrcp.f32 %v3728_v59 }
 0xf6f   :  { %v6608_v27 = vpop.eup %6607  ;;  %v3730_v7 = vadd.f32 1.0, %v6606_v39  ;;  %v3695_v19 = vpop.f32.mrb[68].mxu0  ;;  %6627 = vrcp.f32 %v3729_v26 }
 0xf70   :  { %v6610_v23 = vpop.eup %6609  ;;  %v3731_v0 = vadd.f32 1.0, %v6608_v27  ;;  %v3697_v52 = vpop.f32.mrb[69].mxu0  ;;  %6629 = vrcp.f32 %v3732_v47  ;;  %v3692_v27 = vadd.f32 %v3691_v43, %v3530_v13  ;;  %v5130_v47 = vmul.f32 -1.442695, %v3690_v29 }
 0xf71   :  { %v6612_v10 = vpop.eup %6611  ;;  %v3733_v55 = vadd.f32 1.0, %v6610_v23  ;;  %v3699_v50 = vpop.f32.mrb[70].mxu0  ;;  %6631 = vrcp.f32 %v3730_v7  ;;  %v5129_v23 = vmul.f32 -1.442695, %v3629_v61  ;;  %v3633_v7 = vadd.f32 %v3632_v22, %v3535_v3 }
 0xf72   :  { %v6614_v20 = vpop.eup %6613  ;;  %v3734_v25 = vadd.f32 1.0, %v6612_v10  ;;  %v3701_v34 = vpop.f32.mrb[71].mxu0  ;;  %6633 = vrcp.f32 %v3731_v0  ;;  %v3696_v13 = vadd.f32 %v3695_v19, %v3535_v3  ;;  %v3698_v29 = vadd.f32 %v3697_v52, %v3535_v3 }
 0xf73   :  { %v6616_v56 = vpop.eup %6615  ;;  %v3735_v45 = vadd.f32 1.0, %v6614_v20  ;;  %6635 = vrcp.f32 %v3733_v55  ;;  %v5131_v20 = vmul.f32 -1.442695, %v3692_v27 }
 0xf74   :  { %v6618_v39 = vpop.eup %6617  ;;  %v3776_v6 = vadd.f32 1.0, %v6616_v56  ;;  %6637 = vrcp.f32 %v3734_v25  ;;  %v3540_v56 = vpop.permute.xlu0 %3539 }
 0xf75   :  { %v6620_v57 = vpop.eup %6619  ;;  %v3777_v59 = vadd.f32 1.0, %v6618_v39  ;;  %6639 = vrcp.f32 %v3735_v45  ;;  %v3637_v61 = vadd.f32 %v3636_v21, %v3540_v56  ;;  %v3639_v45 = vadd.f32 %v3638_v44, %v3540_v56 }
 0xf76   :  { %v3780_v26 = vadd.f32 1.0, %v6620_v57  ;;  %v6622_v17 = vpop.eup %6621  ;;  %6641 = vrcp.f32 %v3776_v6  ;;  %v3700_v6 = vadd.f32 %v3699_v50, %v3540_v56 }
 0xf77   :  { %v6624_v10 = vpop.eup %6623  ;;  %6643 = vrcp.f32 %v3777_v59  ;;  %v3702_v59 = vadd.f32 %v3701_v34, %v3540_v56  ;;  %v3778_v27 = vadd.f32 1.0, %v6622_v17 }
 0xf78   :  { %v6626_v35 = vpop.eup %6625  ;;  %6645 = vrcp.f32 %v3780_v26  ;;  %v3779_v19 = vadd.f32 1.0, %v6624_v10 }
 0xf79   :  { %v6628_v0 = vpop.eup %6627  ;;  %6647 = vpow2.f32 %v5129_v23 }
 0xf7a   :  { %v6630_v55 = vpop.eup %6629  ;;  %6649 = vpow2.f32 %v5130_v47 }
 0xf7b   :  { %v6632_v57 = vpop.eup %6631  ;;  %6651 = vpow2.f32 %v5131_v20 }
 0xf7c   :  { %v6634_v43 = vpop.eup %6633  ;;  %6653 = vtanh.f32 %v3633_v7 }
 0xf7d   :  { %v6636_v25 = vpop.eup %6635  ;;  %6655 = vtanh.f32 %v3635_v32 }
 0xf7e   :  { %v6638_v39 = vpop.eup %6637  ;;  %6657 = vtanh.f32 %v3696_v13 }
 0xf7f   :  { %v6640_v22 = vpop.eup %6639  ;;  %6659 = vtanh.f32 %v3637_v61 }
 0xf80   :  { %v6642_v30 = vpop.eup %6641  ;;  %6661 = vtanh.f32 %v3698_v29 }
 0xf81   :  { %v6644_v26 = vpop.eup %6643  ;;  %6663 = vtanh.f32 %v3639_v45 }
 0xf82   :  { %v6646_v23 = vpop.eup %6645  ;;  %6665 = vtanh.f32 %v3700_v6 }
 0xf83   :  { %v6648_v21 = vpop.eup %6647  ;;  %6667 = vtanh.f32 %v3702_v59 }
 0xf84   :  { %v6650_v3 = vpop.eup %6649  ;;  %6669 = vrcp.f32 %v3778_v27  ;;  %v3781_v52 = vadd.f32 1.0, %v6648_v21 }
 0xf85   :  { %v6652_v44 = vpop.eup %6651  ;;  %6671 = vrcp.f32 %v3779_v19  ;;  %v3782_v47 = vadd.f32 1.0, %v6650_v3 }
 0xf86   :  { %v6654_v50 = vpop.eup %6653  ;;  %6673 = vrcp.f32 %v3781_v52  ;;  %v3783_v20 = vadd.f32 1.0, %v6652_v44 }
 0xf87   :  { %v6656_v34 = vpop.eup %6655  ;;  %6675 = vrcp.f32 %v3782_v47  ;;  %v3808_v17 = vmul.f32 %v6654_v50, %v6626_v35 }
 0xf88   :  { %v6658_v7 = vpop.eup %6657  ;;  %6677 = vrcp.f32 %v3783_v20  ;;  %v3809_v10 = vmul.f32 %v6656_v34, %v6628_v0 }
 0xf89   :  { %v6660_v32 = vpop.eup %6659  ;;  %6679 = vtanh.f32 %v3808_v17  ;;  %v3810_v56 = vmul.f32 %v6658_v7, %v6632_v57 }
 0xf8a   :  { %v6662_v13 = vpop.eup %6661  ;;  %6681 = vtanh.f32 %v3809_v10  ;;  %v3812_v61 = vmul.f32 %v6660_v32, %v6630_v55 }
 0xf8b   :  { %v6664_v29 = vpop.eup %6663  ;;  %6683 = vtanh.f32 %v3810_v56  ;;  %v3811_v45 = vmul.f32 %v6662_v13, %v6634_v43 }
 0xf8c   :  { %v6666_v6 = vpop.eup %6665  ;;  %6685 = vtanh.f32 %v3812_v61  ;;  %v3813_v59 = vmul.f32 %v6664_v29, %v6636_v25 }
 0xf8d   :  { %v6668_v27 = vpop.eup %6667  ;;  %6687 = vtanh.f32 %v3811_v45  ;;  %v3814_v19 = vmul.f32 %v6666_v6, %v6638_v39 }
 0xf8e   :  { %v6670_v21 = vpop.eup %6669  ;;  %6689 = vtanh.f32 %v3813_v59  ;;  %v3815_v35 = vmul.f32 %v6668_v27, %v6640_v22 }
 0xf8f   :  { %v6672_v3 = vpop.eup %6671  ;;  %6691 = vtanh.f32 %v3814_v19 }
 0xf90   :  { %v6674_v0 = vpop.eup %6673  ;;  %6693 = vtanh.f32 %v3815_v35 }
 0xf91   :  { %v6676_v57 = vpop.eup %6675 }
 0xf92   :  { %v6678_v52 = vpop.eup %6677 }
 0xf93   :  { %v6680_v44 = vpop.eup %6679 }
 0xf94   :  { %v6682_v55 = vpop.eup %6681  ;;  %v9530_v47 = vmul.f32 %v6680_v44, %v6642_v30 }
 0xf95   :  { %v6684_v43 = vpop.eup %6683  ;;  %v9532_v50 = vmul.f32 %v6682_v55, %v6644_v26 }
 0xf96   :  { %v6686_v25 = vpop.eup %6685  ;;  %v9534_v20 = vmul.f32 %v6684_v43, %v6670_v21  ;;  %v3848_v39 = vmul.f32 %v9530_v47, %v9530_v47 }
 0xf97   :  { %v6688_v22 = vpop.eup %6687  ;;  %v3836_v34 = vadd.f32 %v9532_v50, %v9530_v47  ;;  %v9540_v17 = vmul.f32 %v6686_v25, %v6646_v23  ;;  %v3849_v7 = vmul.f32 %v9532_v50, %v9532_v50 }
 0xf98   :  { %v6690_v30 = vpop.eup %6689  ;;  %v9544_v10 = vmul.f32 %v6688_v22, %v6672_v3  ;;  %v3850_v3 = vmul.f32 %v9534_v20, %v9534_v20 }
 0xf99   :  { %v6692_v26 = vpop.eup %6691  ;;  %v3837_v32 = vadd.f32 %v3836_v34, %v9534_v20  ;;  %v9547_v56 = vmul.f32 %v6690_v30, %v6674_v0  ;;  %v3852_v13 = vmul.f32 %v9540_v17, %v9540_v17  ;;  %v3856_v45 = vadd.f32 %v3849_v7, %v3848_v39 }
 0xf9a   :  { %v6694_v61 = vpop.eup %6693  ;;  %v9551_v29 = vmul.f32 %v6692_v26, %v6676_v57  ;;  %v3851_v43 = vmul.f32 %v9544_v10, %v9544_v10 }
 0xf9b   :  { %v3838_v23 = vadd.f32 %v3837_v32, %v9544_v10  ;;  %v9554_v6 = vmul.f32 %v6694_v61, %v6678_v52  ;;  %v3841_v59 = vadd.f32 %v9547_v56, %v9540_v17  ;;  %v3853_v27 = vmul.f32 %v9547_v56, %v9547_v56 }
 0xf9c   :  { %v3854_v21 = vmul.f32 %v9551_v29, %v9551_v29  ;;  %v3857_v44 = vadd.f32 %v3856_v45, %v3850_v3  ;;  %v3832_v3 = vld [vmem:[%s10053_s14 + $0x60] sm:$0xff] }
 0xf9d   :  { %3839 = vadd.xlane.f32.xlu1 %v3838_v23  ;;  %v3842_v19 = vadd.f32 %v3841_v59, %v9551_v29  ;;  %v3861_v35 = vadd.f32 %v3853_v27, %v3852_v13  ;;  %v3855_v57 = vmul.f32 %v9554_v6, %v9554_v6 }
 0xf9e   :  { %v3858_v25 = vadd.f32 %v3857_v44, %v3851_v43  ;;  %v3835_v43 = vld [vmem:[%s10054_s15 + $0x68] sm:$0xff] }
 0xf9f   :  { %v3843_v0 = vadd.f32 %v3842_v19, %v9554_v6  ;;  %v3862_v52 = vadd.f32 %v3861_v35, %v3854_v21  ;;  %v3833_v21 = vld [vmem:[%s10053_s14 + $0x68] sm:$0xff] }
 0xfa1   :  { %3844 = vadd.xlane.f32.xlu0 %v3843_v0  ;;  %v3863_v55 = vadd.f32 %v3862_v52, %v3855_v57 }
 0xfa3   :  { %3864 = vadd.xlane.f32.xlu1 %v3863_v55  ;;  %v3834_v55 = vld [vmem:[%s10054_s15 + $0x60] sm:$0xff] }
 0xfa5   :  { %3859 = vadd.xlane.f32.xlu0 %v3858_v25 }
0x102a   :  { %v3840_v39 = vpop.xlane.xlu1 %3839 }
0x102b   :  { %v3846_v34 = vmul.f32 0.001953125, %v3840_v39 }
0x102d   :  { %v3868_v61 = vmul.f32 %v3846_v34, %v3846_v34 }
0x102e   :  { %v3845_v22 = vpop.xlane.xlu0 %3844 }
0x102f   :  { %v3847_v7 = vmul.f32 0.001953125, %v3845_v22 }
0x1030   :  { %v3865_v30 = vpop.xlane.xlu1 %3864 }
0x1031   :  { %v3869_v26 = vmul.f32 %v3847_v7, %v3847_v7  ;;  %v3867_v32 = vmul.f32 0.001953125, %v3865_v30 }
0x1032   :  { %v3860_v13 = vpop.xlane.xlu0 %3859 }
0x1033   :  { %v3871_v23 = vsub.f32 %v3867_v32, %v3869_v26  ;;  %v3866_v59 = vmul.f32 0.001953125, %v3860_v13 }
0x1035   :  { %v3873_v45 = vadd.f32 1e-05, %v3871_v23  ;;  %v3870_v27 = vsub.f32 %v3866_v59, %v3868_v61 }
0x1037   :  { %6695 = vrsqrt.f32 %v3873_v45  ;;  %v3872_v19 = vadd.f32 1e-05, %v3870_v27 }
0x1039   :  { %6697 = vrsqrt.f32 %v3872_v19 }
0x1041   :  { %v6696_v35 = vpop.eup %6695 }
0x1042   :  { %v3877_v0 = vmul.f32 %v6696_v35, %v3833_v21 }
0x1043   :  { %v6698_v57 = vpop.eup %6697 }
0x1044   :  { %3889 = vperm.xlu1 %5659, %v3877_v0   ;;  %v3876_v52 = vmul.f32 %v6698_v57, %v3832_v3  ;;  %v3879_v44 = vmul.f32 %v3877_v0, %v3847_v7 }
0x1046   :  { %3884 = vperm.xlu0 %5660, %v3876_v52   ;;  %v3878_v25 = vmul.f32 %v3876_v52, %v3846_v34  ;;  %v3881_v22 = vsub.f32 %v3835_v43, %v3879_v44 }
0x1048   :  { %v3880_v39 = vsub.f32 %v3834_v55, %v3878_v25 }
0x104a   :  { %3902 = vperm.xlu1 %5659, %v3880_v39   ;;  %3907 = vperm.xlu0 %5660, %v3881_v22  }
0x10c3   :  { %v3890_v30 = vpop.permute.xlu1 %3889 }
0x10c4   :  { %v3898_v35 = vmul.f32 %v3890_v30, %v9551_v29 }
0x10c5   :  { %v3885_v26 = vpop.permute.xlu0 %3884 }
0x10c6   :  { %v3892_v32 = vmul.f32 %v3885_v26, %v9530_v47  ;;  %v3893_v7 = vmul.f32 %v3885_v26, %v9532_v50  ;;  %v3894_v13 = vmul.f32 %v3885_v26, %v9534_v20  ;;  %v3895_v61 = vmul.f32 %v3885_v26, %v9544_v10 }
0x10c7   :  { %v3896_v50 = vmul.f32 %v3890_v30, %v9540_v17  ;;  %v3897_v20 = vmul.f32 %v3890_v30, %v9547_v56  ;;  %v3899_v10 = vmul.f32 %v3890_v30, %v9554_v6 }
0x10c9   :  { %v3903_v23 = vpop.permute.xlu1 %3902  ;;  %v3908_v19 = vpop.permute.xlu0 %3907 }
0x10ca   :  { %v9586_v59 = vadd.f32 %v3903_v23, %v3892_v32  ;;  %v9588_v45 = vadd.f32 %v3903_v23, %v3893_v7  ;;  %v9590_v34 = vadd.f32 %v3903_v23, %v3894_v13  ;;  %v9592_v27 = vadd.f32 %v3903_v23, %v3895_v61  ;;  %v6430_v13 = vld [vmem:[%s10066_s12 + $0x4] ss:$8 sps:$4 sm:$0xff]  }
0x10cb   :  { %v9604_v3 = vadd.f32 %v3908_v19, %v3896_v50  ;;  %v9606_v0 = vadd.f32 %v3908_v19, %v3897_v20  ;;  %v9608_v57 = vadd.f32 %v3908_v19, %v3899_v10  ;;  %v9610_v52 = vadd.f32 %v3908_v19, %v3898_v35  ;;  %v4229_v61 = vld [vmem:[%s10065_s13 + $0x8] sm:$0xff]  ;;  %v4228_v23 = vld [vmem:[%s10065_s13] sm:$0xff]  ;;  %5207 = vmatprep.mubr.msk.bf16.mxu1 %vm11117_vm5, %v6430_v13 }
0x10cc   :  { %11120 = vst [vmem:[#allocation80_spill] sm:$0xff] %v9590_v34  ;;  %v6136_v21 = vpack.i.bf16 %v9588_v45, %v9586_v59  ;;  %v6141_v47 = vpack.i.bf16 %v9590_v34, %v9592_v27  ;;  %v6221_v30 = vpack.i.bf16 %v9592_v27, %v9586_v59  ;;  %v6211_v26 = vpack.i.bf16 %v9590_v34, %v9588_v45 }
0x10cd   :  { %v6161_v17 = vpack.i.bf16 %v9606_v0, %v9588_v45  ;;  %v6156_v56 = vpack.i.bf16 %v9604_v3, %v9586_v59  ;;  %v6171_v43 = vpack.i.bf16 %v9610_v52, %v9590_v34  ;;  %v6166_v25 = vpack.i.bf16 %v9608_v57, %v9592_v27  ;;  %5281 = vmatprep.mubr.msk.bf16.mxu0 %vm11121_vm12, %v6430_v13 }
0x10ce   :  { %6137 = vrot.lane.b32.xlu1 %v6136_v21, %s10924_s17  ;;  %6142 = vrot.lane.b32.xlu0 %v6141_v47, %s10924_s17  ;;  %v6181_v39 = vpack.i.bf16 %v9610_v52, %v9608_v57  ;;  %v6176_v22 = vpack.i.bf16 %v9606_v0, %v9604_v3  ;;  %v6241_v32 = vpack.i.bf16 %v9608_v57, %v9604_v3  ;;  %vm11123_vm5 = vcmp.lt.s32.totalorder %v6823_v4, 17 }
0x10cf   :  { %v6236_v7 = vpack.i.bf16 %v9610_v52, %v9606_v0  ;;  %vm11124_vm12 = vmmov %vm11123_vm5 }
0x10d0   :  { %vm11128_vm2 = vmmov %vm11124_vm12 }
0x10d1   :  { %vm11129_vm7 = vmmov %vm11128_vm2 }
0x10d2   :  { %6147 = vrot.lane.b32.xlu1 %v6136_v21, %s6708_s27  ;;  %6152 = vrot.lane.b32.xlu0 %v6141_v47, %s6708_s27 }
0x10d6   :  { %6162 = vrot.lane.b32.xlu0 %v6161_v17, %s10925_s8  ;;  %6157 = vrot.lane.b32.xlu1 %v6156_v56, %s10925_s8 }
0x10da   :  { %6172 = vrot.lane.b32.xlu0 %v6171_v43, %s10925_s8  ;;  %6167 = vrot.lane.b32.xlu1 %v6166_v25, %s10925_s8 }
0x10de   :  { %6182 = vrot.lane.b32.xlu0 %v6181_v39, %s10924_s17  ;;  %6177 = vrot.lane.b32.xlu1 %v6176_v22, %s10924_s17 }
0x10e2   :  { %6192 = vrot.lane.b32.xlu0 %v6161_v17, %s10926_s2  ;;  %6187 = vrot.lane.b32.xlu1 %v6156_v56, %s10926_s2 }
0x10e6   :  { %6202 = vrot.lane.b32.xlu0 %v6171_v43, %s10926_s2  ;;  %6197 = vrot.lane.b32.xlu1 %v6166_v25, %s10926_s2 }
0x10ea   :  { %6217 = vrot.lane.b32.xlu0 %v6181_v39, %s6708_s27  ;;  %6207 = vrot.lane.b32.xlu1 %v6176_v22, %s6708_s27 }
0x10ee   :  { %6222 = vrot.lane.b32.xlu0 %v6221_v30, %s10661_s24  ;;  %6212 = vrot.lane.b32.xlu1 %v6211_v26, %s10661_s24 }
0x10f2   :  { %6232 = vrot.lane.b32.xlu0 %v6221_v30, %s10662_s19  ;;  %6227 = vrot.lane.b32.xlu1 %v6211_v26, %s10662_s19 }
0x10f6   :  { %6242 = vrot.lane.b32.xlu0 %v6241_v32, %s10661_s24  ;;  %6237 = vrot.lane.b32.xlu1 %v6236_v7, %s10661_s24 }
0x10fa   :  { %6252 = vrot.lane.b32.xlu0 %v6171_v43, %s10663_s0  ;;  %6247 = vrot.lane.b32.xlu1 %v6161_v17, %s10663_s0 }
0x10fe   :  { %6262 = vrot.lane.b32.xlu0 %v6166_v25, %s10663_s0  ;;  %6257 = vrot.lane.b32.xlu1 %v6156_v56, %s10663_s0 }
0x1102   :  { %6272 = vrot.lane.b32.xlu0 %v6241_v32, %s10662_s19  ;;  %6267 = vrot.lane.b32.xlu1 %v6236_v7, %s10662_s19 }
0x1106   :  { %6282 = vrot.lane.b32.xlu0 %v6171_v43, %s10664_s21  ;;  %6277 = vrot.lane.b32.xlu1 %v6161_v17, %s10664_s21 }
0x110a   :  { %6292 = vrot.lane.b32.xlu0 %v6166_v25, %s10664_s21  ;;  %6287 = vrot.lane.b32.xlu1 %v6156_v56, %s10664_s21 }
0x110e   :  { %4237 = vperm.xlu0 %5660, %v4229_v61   ;;  %4232 = vperm.xlu1 %5659, %v4228_v23  }
0x1140   :  { %v6138_v19 = vpop.permute.xlu1 %6137  ;;  %v6143_v21 = vpop.permute.xlu0 %6142 }
0x1141   :  { %v6140_v20 = vunpack.i.h.bf16 %v6138_v19  ;;  %v6139_v10 = vunpack.i.l.bf16 %v6138_v19  ;;  %v6145_v22 = vunpack.i.h.bf16 %v6143_v21  ;;  %v6144_v30 = vunpack.i.l.bf16 %v6143_v21 }
0x1143   :  { %v3970_v26 = vsel %vm11122_vm15, %v6139_v10, %v6140_v20  ;;  %v3968_v21 = vsel %vm11125_vm3, %v6140_v20, %v6145_v22  ;;  %vm11126_vm15 = vmmov %vm11125_vm3 }
0x1144   :  { %v9681_v47 = vpop.permute.xlu1 %6147  ;;  %v9683_v50 = vpop.permute.xlu0 %6152  ;;  %v3966_v6 = vsel %vm11126_vm15, %v6145_v22, %v6144_v30  ;;  %vm11131_vm15 = vmmov %vm11128_vm2 }
0x1145   :  { %v5215_v34 = vpack.c.bf16 %v3966_v6, %v7173_v33  ;;  %v6150_v33 = vunpack.i.h.bf16 %v9681_v47  ;;  %v6149_v54 = vunpack.i.l.bf16 %v9681_v47  ;;  %v6155_v24 = vunpack.i.h.bf16 %v9683_v50 }
0x1148   :  { %v6158_v35 = vpop.permute.xlu1 %6157  ;;  %v6163_v17 = vpop.permute.xlu0 %6162 }
0x1149   :  { %v6160_v56 = vunpack.i.h.bf16 %v6158_v35  ;;  %v6159_v43 = vunpack.i.l.bf16 %v6158_v35  ;;  %v6165_v25 = vunpack.i.h.bf16 %v6163_v17  ;;  %v6164_v39 = vunpack.i.l.bf16 %v6163_v17 }
0x114a   :  { %v5141_v17 = vpack.c.bf16 %v3970_v26, %v7123_v14 }
0x114b   :  { %v3939_v32 = vsel %vm11123_vm5, %v6160_v56, %v6165_v25  ;;  %v3938_v7 = vsel %vm11124_vm12, %v6159_v43, %v6164_v39  ;;  %vm11127_vm5 = vmmov %vm11125_vm3 }
0x114c   :  { %v5135_v13 = vpack.c.bf16 %v3939_v32, %v3938_v7  ;;  %v6168_v61 = vpop.permute.xlu1 %6167  ;;  %v6173_v23 = vpop.permute.xlu0 %6172  ;;  %v3972_v29 = vsel %vm11127_vm5, %v6144_v30, %v6139_v10  ;;  %vm11130_vm3 = vmmov %vm11128_vm2 }
0x114d   :  { %v6170_v19 = vunpack.i.h.bf16 %v6168_v61  ;;  %v6169_v55 = vunpack.i.l.bf16 %v6168_v61  ;;  %v6175_v44 = vunpack.i.h.bf16 %v6173_v23  ;;  %v6174_v35 = vunpack.i.l.bf16 %v6173_v23  ;;  %vm11132_vm5 = vmmov %vm11128_vm2 }
0x114e   :  { %5136 = vmatprep.subr.msk.bf16.mxu1 %vm10935_vm9, %v5135_v13  ;;  %vm11133_vm9 = vcmp.lt.s32.totalorder %v6823_v4, 16 }
0x114f   :  { %v3940_v32 = vsel %vm11124_vm12, %v6169_v55, %v6159_v43  ;;  %v3941_v7 = vsel %vm11128_vm2, %v6170_v19, %v6160_v56  ;;  %v3935_v14 = vsel %vm11129_vm7, %v6175_v44, %v6170_v19  ;;  %v3934_v20 = vsel %vm11130_vm3, %v6174_v35, %v6169_v55 }
0x1150   :  { %v5138_v26 = vpack.c.bf16 %v3941_v7, %v3940_v32  ;;  %v3936_v22 = vsel %vm11131_vm15, %v6164_v39, %v6174_v35  ;;  %v3937_v18 = vsel %vm11132_vm5, %v6165_v25, %v6175_v44  ;;  %v5209_v10 = vpack.c.bf16 %v3935_v14, %v3934_v20  ;;  %v6178_v30 = vpop.permute.xlu1 %6177  ;;  %v6183_v13 = vpop.permute.xlu0 %6182 }
0x1151   :  { %v5212_v43 = vpack.c.bf16 %v3937_v18, %v3936_v22  ;;  %v6180_v61 = vunpack.i.h.bf16 %v6178_v30  ;;  %v6179_v23 = vunpack.i.l.bf16 %v6178_v30  ;;  %v6185_v56 = vunpack.i.h.bf16 %v6183_v13 }
0x1152   :  { %v6184_v19 = vunpack.i.l.bf16 %v6183_v13  ;;  %5139 = vmatpush1.bf16.msk.msra.mxu1 %vm10941_vm6, %v5138_v26  ;;  %5210 = vmatprep.subr.msk.bf16.mxu0 %vm10942_vm11, %v5209_v10  ;;  %v5218_v55 = vpack.c.bf16 %v3968_v21, %v10954_v40  ;;  %v5144_v44 = vpack.c.bf16 %v3972_v29, %v7155_v53  ;;  %vm11134_vm6 = vmmov %vm11133_vm9  ;;  %v6154_v35 = vunpack.i.l.bf16 %v9683_v50 }
0x1153   :  { %v3971_v25 = vsel %vm11133_vm9, %v6179_v23, %v6180_v61  ;;  %5142 = vmatprep.subr.msk.bf16.mxu1 %vm10945_vm0, %v5141_v17  ;;  %5213 = vmatpush1.bf16.msk.msra.mxu0 %vm10949_vm4, %v5212_v43  ;;  %vm11135_vm11 = vmmov %vm11134_vm6  ;;  %vm11137_vm4 = vcmp.lt.s32.totalorder %v6823_v4, 1  ;;  %vm11143_vm2 = vnez %v10971_v36  ;;  %vm11148_vm9 = vnez %v10976_v63 }
0x1154   :  { %v5147_v8 = vpack.c.bf16 %v10946_v5, %v3971_v25  ;;  %v3967_v40 = vsel %vm11134_vm6, %v6185_v56, %v6184_v19  ;;  %v6188_v6 = vpop.permute.xlu1 %6187  ;;  %v6193_v53 = vpop.permute.xlu0 %6192  ;;  %5216 = vmatprep.subr.msk.bf16.mxu0 %vm10953_vm13, %v5215_v34  ;;  %v3973_v2 = vsel %vm11135_vm11, %v6184_v19, %v6179_v23  ;;  %vm11136_vm0 = vmmov %vm11134_vm6  ;;  %v4034_v34 = vsel %vm11137_vm4, %v6149_v54, %v6150_v33 }
0x1155   :  { %v6190_v29 = vunpack.i.h.bf16 %v6188_v6  ;;  %v6189_v39 = vunpack.i.l.bf16 %v6188_v6  ;;  %v5221_v47 = vpack.c.bf16 %v10957_v11, %v3967_v40  ;;  %v6195_v5 = vunpack.i.h.bf16 %v6193_v53 }
0x1156   :  { %v6194_v17 = vunpack.i.l.bf16 %v6193_v53  ;;  %5145 = vmatpush1.bf16.msk.msra.mxu1 %vm10956_vm14, %v5144_v44  ;;  %v3969_v28 = vsel %vm11136_vm0, %v6180_v61, %v6185_v56  ;;  %v5150_v50 = vpack.c.bf16 %v10962_v46, %v3973_v2  ;;  %vm11138_vm13 = vcmp.lt.s32.totalorder %v6823_v4, 15  ;;  %v11161_v53 = vld [vmem:[#allocation11_spill] sm:$0xff]  ;;  %v11165_v2 = vld [vmem:[#allocation37_spill] sm:$0xff] }
0x1157   :  { %5148 = vmatprep.subr.msk.bf16.mxu1 %vm10960_vm10, %v5147_v8  ;;  %5219 = vmatpush1.bf16.msk.msra.mxu0 %vm10965_vm8, %v5218_v55  ;;  %v4003_v11 = vsel %vm11138_vm13, %v6190_v29, %v6195_v5  ;;  %vm11139_vm7 = vmmov %vm11138_vm13  ;;  %vm11140_vm14 = vnez %v10966_v49  ;;  %v5224_v26 = vpack.c.bf16 %v10961_v1, %v3969_v28  ;;  %v5159_v1 = vpack.c.bf16 %v4034_v34, %v10981_v62  ;;  %v11172_v28 = vld [vmem:[#allocation38_spill] sm:$0xff] }
0x1158   :  { %v4002_v16 = vsel %vm11139_vm7, %v6189_v39, %v6194_v17  ;;  %v6198_v21 = vpop.permute.xlu1 %6197  ;;  %v6203_v32 = vpop.permute.xlu0 %6202  ;;  %5222 = vmatprep.subr.msk.bf16.mxu0 %vm11140_vm14, %v5221_v47  ;;  %vm11141_vm10 = vmmov %vm11137_vm4  ;;  %vm11151_vm0 = vnez %v10979_v51  ;;  %vm11155_vm14 = vnez %v10985_v42  ;;  %v11168_v47 = vld [vmem:[#allocation13_spill] sm:$0xff] }
0x1159   :  { %v5153_v37 = vpack.c.bf16 %v4003_v11, %v4002_v16  ;;  %v6200_v7 = vunpack.i.h.bf16 %v6198_v21  ;;  %v6199_v38 = vunpack.i.l.bf16 %v6198_v21  ;;  %v6205_v14 = vunpack.i.h.bf16 %v6203_v32  ;;  %vm11142_vm8 = vmmov %vm11137_vm4  ;;  %v11174_v11 = vld [vmem:[#allocation43_spill] sm:$0xff] }
0x115a   :  { %v4030_v20 = vsel %vm11141_vm10, %v6155_v24, %v6154_v35  ;;  %v4036_v46 = vsel %vm11142_vm8, %v6154_v35, %v6149_v54  ;;  %v6204_v22 = vunpack.i.l.bf16 %v6203_v32  ;;  %5151 = vmatpush1.bf16.msk.msra.mxu1 %vm11143_vm2, %v5150_v50  ;;  %vm11144_vm12 = vmmov %vm11139_vm7  ;;  %vm11152_vm4 = vnez %v10983_v31 }
0x115b   :  { %v4004_v49 = vsel %vm11144_vm12, %v6199_v38, %v6189_v39  ;;  %vm11145_vm3 = vmmov %vm11139_vm7  ;;  %5154 = vmatprep.subr.msk.bf16.mxu1 %vm11148_vm9, %v5153_v37  ;;  %5225 = vmatpush1.bf16.msk.msra.mxu0 %vm11151_vm0, %v5224_v26  ;;  %v5233_v54 = vpack.c.bf16 %v4030_v20, %v10988_v15  ;;  %vm11156_vm10 = vnez %v10989_v60  ;;  %v5162_v8 = vpack.c.bf16 %v4036_v46, %v10991_v9  ;;  %v11182_v20 = vld [vmem:[#allocation6_spill] sm:$0xff] }
0x115c   :  { %v4005_v18 = vsel %vm11145_vm3, %v6200_v7, %v6190_v29  ;;  %vm11146_vm15 = vmmov %vm11145_vm3  ;;  %v6208_v61 = vpop.permute.xlu1 %6207  ;;  %v6218_v23 = vpop.permute.xlu0 %6217  ;;  %vm11158_vm2 = vnez %v10994_v41  ;;  %v11164_v41 = vld [vmem:[#allocation39_spill] sm:$0xff]  ;;  %vm11166_vm9 = vnez %v11165_v2  ;;  %v11167_v29 = vld [vmem:[#allocation41_spill] sm:$0xff]  ;;  %vm11173_vm0 = vcmp.lt.s32.totalorder %v6823_v4, 127 }
0x115d   :  { %v3999_v10 = vsel %vm11146_vm15, %v6205_v14, %v6200_v7  ;;  %vm11147_vm5 = vmmov %vm11145_vm3  ;;  %v5156_v13 = vpack.c.bf16 %v4005_v18, %v4004_v49  ;;  %v6210_v55 = vunpack.i.h.bf16 %v6208_v61  ;;  %v6209_v44 = vunpack.i.l.bf16 %v6208_v61  ;;  %v11180_v7 = vld [vmem:[#allocation42_spill] sm:$0xff]  ;;  %v11208_v2 = vld [vmem:[#allocation84_spill] sm:$0xff] }
0x115e   :  { %v4001_v30 = vsel %vm11147_vm5, %v6195_v5, %v6205_v14  ;;  %vm11149_vm6 = vmmov %vm11145_vm3  ;;  %v6220_v63 = vunpack.i.h.bf16 %v6218_v23  ;;  %v6219_v25 = vunpack.i.l.bf16 %v6218_v23  ;;  %vm11162_vm15 = vnez %v11161_v53  ;;  %v11188_v61 = vld [vmem:[#allocation86_spill] sm:$0xff]  ;;  %v11205_v53 = vld [vmem:[#allocation49_spill] sm:$0xff] }
0x115f   :  { %v3998_v36 = vsel %vm11149_vm6, %v6204_v22, %v6199_v38  ;;  %vm11150_vm11 = vmmov %vm11145_vm3  ;;  %5157 = vmatpush1.bf16.msk.msra.mxu1 %vm11152_vm4, %v5156_v13  ;;  %vm11160_vm3 = vnez %v10997_v48  ;;  %vm11169_vm6 = vnez %v11168_v47  ;;  %vm11175_vm4 = vnez %v11174_v11 }
0x1160   :  { %v4000_v43 = vsel %vm11150_vm11, %v6194_v17, %v6204_v22  ;;  %v5227_v56 = vpack.c.bf16 %v3999_v10, %v3998_v36  ;;  %vm11153_vm13 = vmmov %vm11142_vm8  ;;  %5160 = vmatprep.subr.msk.bf16.mxu1 %vm11156_vm10, %v5159_v1  ;;  %v6213_v15 = vpop.permute.xlu1 %6212  ;;  %v11170_v17 = vld [vmem:[#allocation40_spill] sm:$0xff]  ;;  %v11176_v16 = vpack.c.bf16 %v9606_v0, %v9588_v45  ;;  %vm11181_vm10 = vnez %v11180_v7  ;;  %v11185_v10 = vld [vmem:[#allocation5_spill] sm:$0xff] }
0x1161   :  { %v5230_v19 = vpack.c.bf16 %v4001_v30, %v4000_v43  ;;  %v4032_v62 = vsel %vm11153_vm13, %v6150_v33, %v6155_v24  ;;  %vm11154_vm7 = vmmov %vm11142_vm8  ;;  %v6223_v33 = vpop.permute.xlu0 %6222  ;;  %v6215_v60 = vunpack.i.h.bf16 %v6213_v15  ;;  %v6214_v9 = vunpack.i.l.bf16 %v6213_v15  ;;  %v11186_v1 = vld [vmem:[#allocation4_spill] sm:$0xff]  ;;  %v11187_v36 = vld [vmem:[#allocation7_spill] sm:$0xff] }
0x1162   :  { %v4035_v51 = vsel %vm11154_vm7, %v6209_v44, %v6210_v55  ;;  %5228 = vmatprep.subr.msk.bf16.mxu0 %vm11155_vm14, %v5227_v56  ;;  %vm11157_vm8 = vmmov %vm11154_vm7  ;;  %v5236_v42 = vpack.c.bf16 %v4032_v62, %v10999_v12  ;;  %v6225_v35 = vunpack.i.h.bf16 %v6223_v33  ;;  %v6224_v48 = vunpack.i.l.bf16 %v6223_v33 }
0x1163   :  { %v5165_v40 = vpack.c.bf16 %v10996_v58, %v4035_v51  ;;  %v4031_v31 = vsel %vm11157_vm8, %v6220_v63, %v6219_v25  ;;  %5231 = vmatpush1.bf16.msk.msra.mxu0 %vm11158_vm2, %v5230_v19  ;;  %vm11159_vm12 = vmmov %vm11154_vm7  ;;  %5163 = vmatpush1.bf16.msk.msra.mxu1 %vm11162_vm15, %v5162_v8  ;;  %vm11171_vm11 = vnez %v11170_v17  ;;  %v4064_v50 = vsel %vm11173_vm0, %v6214_v9, %v6215_v60  ;;  %v11196_v51 = vld [vmem:[#allocation87_spill] sm:$0xff] }
0x1164   :  { %v4037_v6 = vsel %vm11159_vm12, %v6219_v25, %v6209_v44  ;;  %5234 = vmatprep.subr.msk.bf16.mxu0 %vm11160_vm3, %v5233_v54  ;;  %vm11163_vm5 = vmmov %vm11154_vm7  ;;  %v5239_v24 = vpack.c.bf16 %v11164_v41, %v4031_v31  ;;  %v9810_v12 = vpop.permute.xlu1 %6227  ;;  %v5171_v46 = vpack.c.bf16 %v4064_v50, %v11182_v20  ;;  %v11183_v45 = vpack.c.bf16 %v9608_v57, %v9592_v27  ;;  %v11194_v25 = vld [vmem:[#allocation44_spill] sm:$0xff] }
0x1165   :  { %v4033_v58 = vsel %vm11163_vm5, %v6210_v55, %v6220_v63  ;;  %5166 = vmatprep.subr.msk.bf16.mxu1 %vm11166_vm9, %v5165_v40  ;;  %v5168_v39 = vpack.c.bf16 %v11167_v29, %v4037_v6  ;;  %v9812_v5 = vpop.permute.xlu0 %6232  ;;  %vm11177_vm13 = vmmov %vm11173_vm0  ;;  %v11184_v18 = vpack.c.bf16 %v9604_v3, %v9586_v59  ;;  %vm11189_vm8 = vnez %v11188_v61  ;;  %v11192_v3 = vld [vmem:[#allocation80_spill] sm:$0xff]  ;;  %v11201_v6 = vld [vmem:[#allocation46_spill] sm:$0xff] }
0x1166   :  { %v5242_v34 = vpack.c.bf16 %v11172_v28, %v4033_v58  ;;  %v4062_v21 = vsel %vm11177_vm13, %v6215_v60, %v6225_v35  ;;  %vm11178_vm7 = vmmov %vm11173_vm0  ;;  %v6230_v27 = vunpack.i.h.bf16 %v9810_v12  ;;  %v6229_v57 = vunpack.i.l.bf16 %v9810_v12  ;;  %v11202_v60 = vld [vmem:[#allocation45_spill] sm:$0xff] }
0x1167   :  { %5237 = vmatpush1.bf16.msk.msra.mxu0 %vm11169_vm6, %v5236_v42  ;;  %5169 = vmatpush1.bf16.msk.msra.mxu1 %vm11175_vm4, %v5168_v39  ;;  %v4066_v32 = vsel %vm11178_vm7, %v6224_v48, %v6214_v9  ;;  %vm11179_vm14 = vmmov %vm11173_vm0  ;;  %v5248_v30 = vpack.c.bf16 %v4062_v21, %v11185_v10  ;;  %v11193_v56 = vpack.c.bf16 %v9610_v52, %v11192_v3  ;;  %v6235_v44 = vunpack.i.h.bf16 %v9812_v5  ;;  %v11198_v52 = vld [vmem:[#allocation82_spill] sm:$0xff]  ;;  %v11233_v3 = vld [vmem:[#allocation60_spill] sm:$0xff] }
0x1168   :  { %5240 = vmatprep.subr.msk.bf16.mxu0 %vm11171_vm11, %v5239_v24  ;;  %4264 = vmatprep.subr.bf16.mxu1 %v11176_v16  ;;  %v4068_v37 = vsel %vm11179_vm14, %v6225_v35, %v6224_v48  ;;  %v6238_v38 = vpop.permute.xlu1 %6237  ;;  %v5174_v13 = vpack.c.bf16 %v4066_v32, %v11186_v1  ;;  %vm11190_vm2 = vmmov %vm11173_vm0  ;;  %v6234_v63 = vunpack.i.l.bf16 %v9812_v5  ;;  %vm11197_vm15 = vnez %v11196_v51  ;;  %v11210_v5 = vld [vmem:[#allocation51_spill] sm:$0xff] }
0x1169   :  { %v6243_v14 = vpop.permute.xlu0 %6242  ;;  %v6240_v0 = vunpack.i.h.bf16 %v6238_v38  ;;  %v6239_v26 = vunpack.i.l.bf16 %v6238_v38  ;;  %v5245_v43 = vpack.c.bf16 %v4068_v37, %v11187_v36  ;;  %vm11191_vm12 = vmmov %vm11173_vm0  ;;  %vm11199_vm5 = vnez %v11198_v52  ;;  %v11215_v16 = vld [vmem:[#allocation47_spill] sm:$0xff]  ;;  %v11221_v38 = vld [vmem:[#allocation54_spill] sm:$0xff] }
0x116a   :  { %v6245_v22 = vunpack.i.h.bf16 %v6243_v14  ;;  %v6244_v49 = vunpack.i.l.bf16 %v6243_v14  ;;  %vm11195_vm3 = vmmov %vm11173_vm0  ;;  %vm11203_vm6 = vnez %v11202_v60  ;;  %vm11204_vm11 = vcmp.lt.s32.totalorder %v6823_v4, 112  ;;  %v11223_v14 = vld [vmem:[#allocation53_spill] sm:$0xff] }
0x116b   :  { %5243 = vmatpush1.bf16.msk.msra.mxu0 %vm11181_vm10, %v5242_v34  ;;  %4265 = vmatpush1.bf16.msra.mxu1 %v11184_v18  ;;  %v4065_v23 = vsel %vm11190_vm2, %v6239_v26, %v6240_v0  ;;  %vm11200_vm9 = vmmov %vm11173_vm0  ;;  %v4128_v9 = vsel %vm11204_vm11, %v6229_v57, %v6230_v27  ;;  %vm11206_vm0 = vcmp.lt.s32.totalorder %v6823_v4, 113  ;;  %vm11209_vm13 = vnez %v11208_v2  ;;  %v11214_v34 = vld [vmem:[#allocation48_spill] sm:$0xff] }
0x116c   :  { %4307 = vmatprep.subr.bf16.mxu0 %v11183_v45  ;;  %5172 = vmatprep.subr.msk.bf16.mxu1 %vm11189_vm8, %v5171_v46  ;;  %v4069_v59 = vsel %vm11191_vm12, %v6245_v22, %v6244_v49  ;;  %v6248_v19 = vpop.permute.xlu1 %6247  ;;  %v5177_v62 = vpack.c.bf16 %v11194_v25, %v4065_v23  ;;  %v4067_v54 = vsel %vm11195_vm3, %v6244_v49, %v6239_v26  ;;  %vm11207_vm4 = vmmov %vm11206_vm0  ;;  %v11226_v26 = vld [vmem:[#allocation52_spill] sm:$0xff] }
0x116d   :  { %v6253_v55 = vpop.permute.xlu0 %6252  ;;  %v6250_v8 = vunpack.i.h.bf16 %v6248_v19  ;;  %v6249_v40 = vunpack.i.l.bf16 %v6248_v19  ;;  %v4063_v33 = vsel %vm11200_vm9, %v6240_v0, %v6245_v22  ;;  %v5251_v42 = vpack.c.bf16 %v11201_v6, %v4069_v59  ;;  %vm11212_vm14 = vmmov %vm11204_vm11  ;;  %v11237_v19 = vld [vmem:[#allocation58_spill] sm:$0xff] }
0x116e   :  { %v6255_v31 = vunpack.i.h.bf16 %v6253_v55  ;;  %v6254_v15 = vunpack.i.l.bf16 %v6253_v55  ;;  %v5180_v58 = vpack.c.bf16 %v11205_v53, %v4067_v54  ;;  %vm11211_vm7 = vnez %v11210_v5  ;;  %vm11213_vm10 = vmmov %vm11204_vm11  ;;  %v11240_v54 = vld [vmem:[#allocation61_spill] sm:$0xff] }
0x116f   :  { %4308 = vmatpush1.bf16.msra.mxu0 %v11193_v56  ;;  %5175 = vmatpush1.bf16.msk.msra.mxu1 %vm11199_vm5, %v5174_v13  ;;  %v4130_v17 = vsel %vm11212_vm14, %v6234_v63, %v6229_v57  ;;  %v4132_v28 = vsel %vm11213_vm10, %v6235_v44, %v6234_v63  ;;  %v5254_v50 = vpack.c.bf16 %v11214_v34, %v4063_v33  ;;  %vm11217_vm2 = vmmov %vm11206_vm0  ;;  %v11231_v57 = vld [vmem:[#allocation56_spill] sm:$0xff]  ;;  %v11235_v56 = vld [vmem:[#allocation83_spill] sm:$0xff] }
0x1170   :  { %5246 = vmatprep.subr.msk.bf16.mxu0 %vm11197_vm15, %v5245_v43  ;;  %5178 = vmatprep.subr.msk.bf16.mxu1 %vm11203_vm6, %v5177_v62  ;;  %v4097_v41 = vsel %vm11206_vm0, %v6250_v8, %v6255_v31  ;;  %v4096_v24 = vsel %vm11207_vm4, %v6249_v40, %v6254_v15  ;;  %v6258_v29 = vpop.permute.xlu1 %6257  ;;  %vm11216_vm8 = vnez %v11215_v16  ;;  %vm11218_vm12 = vmmov %vm11206_vm0  ;;  %vm11222_vm5 = vnez %v11221_v38  ;;  %v11228_v43 = vld [vmem:[#allocation59_spill] sm:$0xff]  ;;  %v11238_v63 = vld [vmem:[#allocation62_spill] sm:$0xff] }
0x1171   :  { %v6263_v39 = vpop.permute.xlu0 %6262  ;;  %v5183_v35 = vpack.c.bf16 %v4097_v41, %v4096_v24  ;;  %v6260_v48 = vunpack.i.h.bf16 %v6258_v29  ;;  %v6259_v47 = vunpack.i.l.bf16 %v6258_v29  ;;  %vm11219_vm3 = vmmov %vm11206_vm0  ;;  %v5189_v20 = vpack.c.bf16 %v4128_v9, %v11223_v14  ;;  %v11249_v9 = vld [vmem:[#allocation67_spill] sm:$0xff]  ;;  %v11252_v41 = vld [vmem:[#allocation68_spill] sm:$0xff] }
0x1172   :  { %v6265_v12 = vunpack.i.h.bf16 %v6263_v39  ;;  %v6264_v11 = vunpack.i.l.bf16 %v6263_v39  ;;  %vm11220_vm15 = vmmov %vm11206_vm0  ;;  %vm11227_vm11 = vnez %v11226_v26  ;;  %v5263_v23 = vpack.c.bf16 %v4132_v28, %v11231_v57  ;;  %v11255_v39 = vld [vmem:[#allocation15_spill] sm:$0xff]  ;;  %v11257_v28 = vld [vmem:[#allocation69_spill] sm:$0xff] }
0x1173   :  { %5249 = vmatpush1.bf16.msk.msra.mxu0 %vm11209_vm13, %v5248_v30  ;;  %5181 = vmatpush1.bf16.msk.msra.mxu1 %vm11216_vm8, %v5180_v58  ;;  %v4098_v21 = vsel %vm11217_vm2, %v6259_v47, %v6249_v40  ;;  %v4099_v32 = vsel %vm11218_vm12, %v6260_v48, %v6250_v8  ;;  %vm11224_vm9 = vmmov %vm11206_vm0  ;;  %vm11236_vm14 = vnez %v11235_v56  ;;  %v5192_v55 = vpack.c.bf16 %v4130_v17, %v11237_v19  ;;  %v11243_v40 = vld [vmem:[#allocation10_spill] sm:$0xff]  ;;  %v11250_v58 = vld [vmem:[#allocation63_spill] sm:$0xff] }
0x1174   :  { %5252 = vmatprep.subr.msk.bf16.mxu0 %vm11211_vm7, %v5251_v42  ;;  %v4101_v37 = vsel %vm11219_vm3, %v6265_v12, %v6260_v48  ;;  %v4095_v7 = vsel %vm11220_vm15, %v6255_v31, %v6265_v12  ;;  %5184 = vmatprep.subr.msk.bf16.mxu1 %vm11222_vm5, %v5183_v35  ;;  %v5186_v46 = vpack.c.bf16 %v4099_v32, %v4098_v21  ;;  %vm11225_vm6 = vmmov %vm11206_vm0  ;;  %v6268_v22 = vpop.permute.xlu1 %6267  ;;  %v11245_v31 = vld [vmem:[#allocation57_spill] sm:$0xff]  ;;  %v11246_v42 = vld [vmem:[#allocation14_spill] sm:$0xff] }
0x1175   :  { %v4094_v45 = vsel %vm11224_vm9, %v6254_v15, %v6264_v11  ;;  %v4100_v0 = vsel %vm11225_vm6, %v6264_v11, %v6259_v47  ;;  %v6273_v49 = vpop.permute.xlu0 %6272  ;;  %v6270_v30 = vunpack.i.h.bf16 %v6268_v22  ;;  %v6269_v1 = vunpack.i.l.bf16 %v6268_v22  ;;  %vm11230_vm4 = vmmov %vm11213_vm10  ;;  %v11259_v34 = vld [vmem:[#allocation66_spill] sm:$0xff]  ;;  %v11260_v16 = vld [vmem:[#allocation64_spill] sm:$0xff] }
0x1176   :  { %v5257_v18 = vpack.c.bf16 %v4101_v37, %v4100_v0  ;;  %v5260_v10 = vpack.c.bf16 %v4095_v7, %v4094_v45  ;;  %v6275_v13 = vunpack.i.h.bf16 %v6273_v49  ;;  %v6274_v36 = vunpack.i.l.bf16 %v6273_v49  ;;  %vm11232_vm13 = vmmov %vm11230_vm4  ;;  %v11266_v38 = vld [vmem:[#allocation71_spill] sm:$0xff]  ;;  %v11273_v49 = vld [vmem:[#allocation76_spill] sm:$0xff] }
0x1177   :  { %5255 = vmatpush1.bf16.msk.msra.mxu0 %vm11227_vm11, %v5254_v50  ;;  %vm11229_vm0 = vnez %v11228_v43  ;;  %v4126_v61 = vsel %vm11230_vm4, %v6230_v27, %v6235_v44  ;;  %v4129_v59 = vsel %vm11232_vm13, %v6269_v1, %v6270_v30  ;;  %vm11234_vm7 = vnez %v11233_v3  ;;  %vm11239_vm10 = vmmov %vm11230_vm4  ;;  %v11271_v22 = vld [vmem:[#allocation75_spill] sm:$0xff]  ;;  %v4338_v45 = vld [vmem:[%s10053_s14 + $0x70] sm:$0xff] }
0x1178   :  { %5187 = vmatpush1.bf16.msk.msra.mxu1 %vm11229_vm0, %v5186_v46  ;;  %5258 = vmatprep.subr.msk.bf16.mxu0 %vm11234_vm7, %v5257_v18  ;;  %v5195_v25 = vpack.c.bf16 %v11238_v63, %v4129_v59  ;;  %v4133_v62 = vsel %vm11239_vm10, %v6275_v13, %v6274_v36  ;;  %vm11241_vm8 = vnez %v11240_v54  ;;  %v6278_v27 = vpop.permute.xlu1 %6277  ;;  %vm11242_vm2 = vmmov %vm11230_vm4  ;;  %vm11244_vm12 = vnez %v11243_v40  ;;  %v11275_v18 = vld [vmem:[#allocation12_spill] sm:$0xff] }
0x1179   :  { %5190 = vmatprep.subr.msk.bf16.mxu1 %vm11236_vm14, %v5189_v20  ;;  %v6283_v44 = vpop.permute.xlu0 %6282  ;;  %v4131_v51 = vsel %vm11242_vm2, %v6274_v36, %v6269_v1  ;;  %v6280_v8 = vunpack.i.h.bf16 %v6278_v27  ;;  %v5266_v15 = vpack.c.bf16 %v4126_v61, %v11245_v31  ;;  %v6279_v52 = vunpack.i.l.bf16 %v6278_v27  ;;  %vm11248_vm15 = vmmov %vm11242_vm2  ;;  %v11281_v1 = vld [vmem:[#allocation55_spill] sm:$0xff] }
0x117a   :  { %v6285_v33 = vunpack.i.h.bf16 %v6283_v44  ;;  %v6284_v6 = vunpack.i.l.bf16 %v6283_v44  ;;  %vm11247_vm3 = vnez %v11246_v42  ;;  %v4127_v60 = vsel %vm11248_vm15, %v6270_v30, %v6275_v13  ;;  %v11279_v30 = vld [vmem:[#allocation50_spill] sm:$0xff]  ;;  %v11282_v13 = vld [vmem:[#allocation77_spill] sm:$0xff] }
0x117b   :  { %5261 = vmatpush1.bf16.msk.msra.mxu0 %vm11241_vm8, %v5260_v10  ;;  %v5269_v53 = vpack.c.bf16 %v11249_v9, %v4133_v62  ;;  %vm11251_vm5 = vnez %v11250_v58  ;;  %v5198_v24 = vpack.c.bf16 %v11252_v41, %v4131_v51  ;;  %vm11253_vm9 = vcmp.lt.s32.totalorder %v6823_v4, 111  ;;  %v11277_v10 = vld [vmem:[#allocation81_spill] sm:$0xff]  ;;  %v6428_v4 = vld [vmem:[%s10066_s12] ss:$8 sps:$4 sm:$0xff]  }
0x117c   :  { %5264 = vmatprep.subr.msk.bf16.mxu0 %vm11244_vm12, %v5263_v23  ;;  %5193 = vmatpush1.bf16.msk.msra.mxu1 %vm11247_vm3, %v5192_v55  ;;  %v4161_v2 = vsel %vm11253_vm9, %v6280_v8, %v6285_v33  ;;  %vm11254_vm6 = vmmov %vm11253_vm9  ;;  %vm11256_vm11 = vnez %v11255_v39  ;;  %v6288_v35 = vpop.permute.xlu1 %6287  ;;  %vm11258_vm0 = vnez %v11257_v28  ;;  %v5272_v50 = vpack.c.bf16 %v11259_v34, %v4127_v60 }
0x117d   :  { %5196 = vmatprep.subr.msk.bf16.mxu1 %vm11251_vm5, %v5195_v25  ;;  %v4160_v29 = vsel %vm11254_vm6, %v6279_v52, %v6284_v6  ;;  %v6293_v48 = vpop.permute.xlu0 %6292  ;;  %v6290_v12 = vunpack.i.h.bf16 %v6288_v35  ;;  %v6289_v5 = vunpack.i.l.bf16 %v6288_v35  ;;  %vm11261_vm4 = vnez %v11260_v16  ;;  %vm11262_vm13 = vmmov %vm11254_vm6 }
0x117e   :  { %v5201_v47 = vpack.c.bf16 %v4161_v2, %v4160_v29  ;;  %v6295_v17 = vunpack.i.h.bf16 %v6293_v48  ;;  %v6294_v11 = vunpack.i.l.bf16 %v6293_v48  ;;  %vm11263_vm7 = vmmov %vm11254_vm6  ;;  %vm11267_vm8 = vnez %v11266_v38 }
0x117f   :  { %5267 = vmatpush1.bf16.msk.msra.mxu0 %vm11256_vm11, %v5266_v15  ;;  %v4162_v21 = vsel %vm11262_vm13, %v6289_v5, %v6279_v52  ;;  %v4163_v32 = vsel %vm11263_vm7, %v6290_v12, %v6280_v8  ;;  %vm11264_vm14 = vmmov %vm11254_vm6  ;;  %vm11272_vm3 = vnez %v11271_v22  ;;  %vm11274_vm15 = vnez %v11273_v49 }
0x1180   :  { %5270 = vmatprep.subr.msk.bf16.mxu0 %vm11258_vm0, %v5269_v53  ;;  %5199 = vmatpush1.bf16.msk.msra.mxu1 %vm11261_vm4, %v5198_v24  ;;  %v4165_v37 = vsel %vm11264_vm14, %v6295_v17, %v6290_v12  ;;  %vm11265_vm10 = vmmov %vm11254_vm6  ;;  %v5204_v14 = vpack.c.bf16 %v4163_v32, %v4162_v21  ;;  %vm11276_vm5 = vcmask 1043456   ;;  %vm11278_vm9 = vnez %v11277_v10  ;;  %v4341_v10 = vld [vmem:[%s10054_s15 + $0x78] sm:$0xff] }
0x1181   :  { %v4159_v7 = vsel %vm11265_vm10, %v6285_v33, %v6295_v17  ;;  %5202 = vmatprep.subr.msk.bf16.mxu1 %vm11267_vm8, %v5201_v47  ;;  %vm11268_vm2 = vmmov %vm11254_vm6 }
0x1182   :  { %v4158_v20 = vsel %vm11268_vm2, %v6284_v6, %v6294_v11  ;;  %vm11269_vm12 = vmmov %vm11268_vm2 }
0x1183   :  { %v4164_v46 = vsel %vm11269_vm12, %v6294_v11, %v6289_v5  ;;  %5273 = vmatpush1.bf16.msk.msra.mxu0 %vm11103_vm1, %v5272_v50  ;;  %v5278_v26 = vpack.c.bf16 %v4159_v7, %v4158_v20  ;;  %vm11280_vm6 = vmmov %vm11276_vm5 }
0x1184   :  { %v5275_v0 = vpack.c.bf16 %v4165_v37, %v4164_v46  ;;  %5205 = vmatpush1.bf16.msk.msra.mxu1 %vm11272_vm3, %v5204_v14  ;;  %v4339_v46 = vld [vmem:[%s10053_s14 + $0x78] sm:$0xff] }
0x1185   :  { %5206 = vmatprep.subr.msk.bf16.mxu1 %vm11276_vm5, %v11275_v18  ;;  %v4340_v18 = vld [vmem:[%s10054_s15 + $0x70] sm:$0xff] }
0x1186   :  { %5276 = vmatprep.subr.msk.bf16.mxu0 %vm11274_vm15, %v5275_v0 }
0x1187   :  { %5279 = vmatpush1.bf16.msk.msra.mxu0 %vm11278_vm9, %v5278_v26 }
0x1188   :  { %5280 = vmatprep.subr.msk.bf16.mxu0 %vm11280_vm6, %v11279_v30  ;;  %4279 = vmatpush1.bf16.msra.mxu1 %v11281_v1 }
0x118b   :  { %4322 = vmatpush1.bf16.msra.mxu0 %v11282_v13  ;;  %4285 = vmatmul.mubr.bf16.vlgmr.msra.gmra.mrb[60].mxu1 %v6428_v4 }
0x118d   :  { %v4233_v36 = vpop.permute.xlu1 %4232  ;;  %v4238_v61 = vpop.permute.xlu0 %4237 }
0x118e   :  { %4328 = vmatmul.mubr.bf16.vlgmr.msra.gmra.mrb[72].mxu0 %v6428_v4 }
0x125e   :  { %v4286_v43 = vpop.f32.mrb[60].mxu1 }
0x125f   :  { %v9974_v57 = vadd.f32 %v4286_v43, %v4233_v36  ;;  %v4288_v23 = vpop.f32.mrb[61].mxu1 }
0x1260   :  { %v9976_v59 = vadd.f32 %v4288_v23, %v4233_v36  ;;  %v4290_v56 = vpop.f32.mrb[62].mxu1 }
0x1261   :  { %v4329_v3 = vpop.f32.mrb[72].mxu0  ;;  %v4354_v19 = vmul.f32 %v9974_v57, %v9974_v57  ;;  %v9980_v55 = vadd.f32 %v4290_v56, %v4238_v61  ;;  %v4292_v25 = vpop.f32.mrb[63].mxu1 }
0x1262   :  { %v4331_v63 = vpop.f32.mrb[73].mxu0  ;;  %v4342_v62 = vadd.f32 %v9976_v59, %v9974_v57  ;;  %v4355_v54 = vmul.f32 %v9976_v59, %v9976_v59  ;;  %v9986_v27 = vadd.f32 %v4329_v3, %v4233_v36  ;;  %v9988_v44 = vadd.f32 %v4292_v25, %v4238_v61 }
0x1263   :  { %v4333_v51 = vpop.f32.mrb[74].mxu0  ;;  %v4358_v8 = vmul.f32 %v9980_v55, %v9980_v55  ;;  %v4332_v33 = vadd.f32 %v4331_v63, %v4233_v36 }
0x1264   :  { %v9992_v40 = vadd.f32 %v4333_v51, %v4238_v61  ;;  %v4335_v31 = vpop.f32.mrb[75].mxu0  ;;  %v4362_v15 = vadd.f32 %v4355_v54, %v4354_v19  ;;  %v4343_v52 = vadd.f32 %v4342_v62, %v9986_v27  ;;  %v4347_v6 = vadd.f32 %v9988_v44, %v9980_v55 }
0x1265   :  { %v4359_v42 = vmul.f32 %v9988_v44, %v9988_v44  ;;  %v4336_v60 = vadd.f32 %v4335_v31, %v4238_v61  ;;  %v4356_v9 = vmul.f32 %v9986_v27, %v9986_v27  ;;  %v4357_v48 = vmul.f32 %v4332_v33, %v4332_v33 }
0x1266   :  { %v4348_v53 = vadd.f32 %v4347_v6, %v9992_v40  ;;  %v4344_v58 = vadd.f32 %v4343_v52, %v4332_v33  ;;  %v4360_v24 = vmul.f32 %v9992_v40, %v9992_v40 }
0x1267   :  { %v4367_v41 = vadd.f32 %v4359_v42, %v4358_v8  ;;  %v4363_v29 = vadd.f32 %v4362_v15, %v4356_v9  ;;  %v4361_v39 = vmul.f32 %v4336_v60, %v4336_v60 }
0x1268   :  { %4345 = vadd.xlane.f32.xlu1 %v4344_v58  ;;  %v4349_v2 = vadd.f32 %v4348_v53, %v4336_v60 }
0x1269   :  { %v4368_v35 = vadd.f32 %v4367_v41, %v4360_v24  ;;  %v4364_v12 = vadd.f32 %v4363_v29, %v4357_v48 }
0x126a   :  { %4350 = vadd.xlane.f32.xlu0 %v4349_v2 }
0x126b   :  { %v4369_v47 = vadd.f32 %v4368_v35, %v4361_v39 }
0x126d   :  { %4370 = vadd.xlane.f32.xlu1 %v4369_v47 }
0x126e   :  { %4365 = vadd.xlane.f32.xlu0 %v4364_v12 }
0x12f5   :  { %v4346_v5 = vpop.xlane.xlu1 %4345 }
0x12f6   :  { %v4352_v28 = vmul.f32 0.001953125, %v4346_v5 }
0x12f7   :  { %v4351_v17 = vpop.xlane.xlu0 %4350 }
0x12f8   :  { %v4353_v34 = vmul.f32 0.001953125, %v4351_v17  ;;  %v4374_v32 = vmul.f32 %v4352_v28, %v4352_v28 }
0x12fa   :  { %v4375_v50 = vmul.f32 %v4353_v34, %v4353_v34  ;;  %v4371_v11 = vpop.xlane.xlu1 %4370 }
0x12fb   :  { %v4373_v16 = vmul.f32 0.001953125, %v4371_v11  ;;  %v4366_v21 = vpop.xlane.xlu0 %4365 }
0x12fc   :  { %v4372_v37 = vmul.f32 0.001953125, %v4366_v21 }
0x12fd   :  { %v4377_v7 = vsub.f32 %v4373_v16, %v4375_v50 }
0x12fe   :  { %v4376_v38 = vsub.f32 %v4372_v37, %v4374_v32 }
0x12ff   :  { %v4379_v14 = vadd.f32 1e-05, %v4377_v7 }
0x1300   :  { %v4378_v20 = vadd.f32 1e-05, %v4376_v38 }
0x1301   :  { %6699 = vrsqrt.f32 %v4379_v14 }
0x1302   :  { %6701 = vrsqrt.f32 %v4378_v20 }
0x130b   :  { %v6700_v0 = vpop.eup %6699 }
0x130c   :  { %v6702_v26 = vpop.eup %6701  ;;  %v4383_v22 = vmul.f32 %v6700_v0, %v4339_v46 }
0x130d   :  { %v4382_v49 = vmul.f32 %v6702_v26, %v4338_v45 }
0x130e   :  { %4395 = vperm.xlu1 %5659, %v4383_v22   ;;  %v4385_v30 = vmul.f32 %v4383_v22, %v4353_v34 }
0x130f   :  { %4390 = vperm.xlu0 %5660, %v4382_v49   ;;  %v4384_v4 = vmul.f32 %v4382_v49, %v4352_v28 }
0x1310   :  { %v4387_v13 = vsub.f32 %v4341_v10, %v4385_v30 }
0x1311   :  { %v4386_v1 = vsub.f32 %v4340_v18, %v4384_v4 }
0x1313   :  { %4408 = vperm.xlu1 %5659, %v4386_v1   ;;  %4413 = vperm.xlu0 %5660, %v4387_v13  }
0x138d   :  { %v4396_v36 = vpop.permute.xlu1 %4395 }
0x138e   :  { %v4391_v43 = vpop.permute.xlu0 %4390  ;;  %v4402_v63 = vmul.f32 %v4396_v36, %v9980_v55  ;;  %v4403_v25 = vmul.f32 %v4396_v36, %v9988_v44  ;;  %v4404_v62 = vmul.f32 %v4396_v36, %v9992_v40  ;;  %v4405_v54 = vmul.f32 %v4396_v36, %v4336_v60 }
0x138f   :  { %v4398_v61 = vmul.f32 %v4391_v43, %v9974_v57  ;;  %v4399_v23 = vmul.f32 %v4391_v43, %v9976_v59  ;;  %v4400_v3 = vmul.f32 %v4391_v43, %v9986_v27  ;;  %v4401_v56 = vmul.f32 %v4391_v43, %v4332_v33 }
0x1392   :  { %v4409_v19 = vpop.permute.xlu1 %4408  ;;  %v4414_v51 = vpop.permute.xlu0 %4413 }
0x1393   :  { %v4416_v8 = vadd.f32 %v4409_v19, %v4398_v61  ;;  %v4417_v31 = vadd.f32 %v4409_v19, %v4399_v23  ;;  %v4418_v15 = vadd.f32 %v4409_v19, %v4400_v3  ;;  %v4419_v52 = vadd.f32 %v4409_v19, %v4401_v56 }
0x1394   :  { %v4420_v6 = vadd.f32 %v4414_v51, %v4402_v63  ;;  %v4421_v57 = vadd.f32 %v4414_v51, %v4403_v25  ;;  %v4422_v42 = vadd.f32 %v4414_v51, %v4404_v62  ;;  %v4423_v59 = vadd.f32 %v4414_v51, %v4405_v54 }
0x1395   :  { %vm4424_vm1 = vcmp.ge.f32.partialorder %v4416_v8, 0.0  ;;  %vm4425_vm11 = vcmp.ge.f32.partialorder %v4417_v31, 0.0  ;;  %vm4426_vm0 = vcmp.ge.f32.partialorder %v4418_v15, 0.0  ;;  %vm4427_vm4 = vcmp.ge.f32.partialorder %v4419_v52, 0.0 }
0x1396   :  { %v4432_v27 = vmul.f32 0.2, %v4416_v8  ;;  %v4433_v55 = vmul.f32 0.2, %v4417_v31  ;;  %v4434_v33 = vmul.f32 0.2, %v4418_v15 }
0x1397   :  { %v4435_v44 = vmul.f32 0.2, %v4419_v52  ;;  %vm4428_vm13 = vcmp.ge.f32.partialorder %v4420_v6, 0.0  ;;  %vm4429_vm7 = vcmp.ge.f32.partialorder %v4421_v57, 0.0  ;;  %vm4430_vm14 = vcmp.ge.f32.partialorder %v4422_v42, 0.0 }
0x1398   :  { %v4440_v40 = vsel %vm4424_vm1, %v4416_v8, %v4432_v27  ;;  %v4441_v60 = vsel %vm4425_vm11, %v4417_v31, %v4433_v55  ;;  %v4442_v9 = vsel %vm4426_vm0, %v4418_v15, %v4434_v33  ;;  %vm4431_vm10 = vcmp.ge.f32.partialorder %v4423_v59, 0.0 }
0x1399   :  { %v4443_v53 = vsel %vm4427_vm4, %v4419_v52, %v4435_v44  ;;  %4448 = vst [vmem:[%s10067_s18] sm:$0xff] %v4440_v40  ;;  %4449 = vst [vmem:[%s10067_s18 + $0x8] sm:$0xff] %v4441_v60  ;;  %v4436_v58 = vmul.f32 0.2, %v4420_v6  ;;  %v4437_v41 = vmul.f32 0.2, %v4421_v57 }
0x139a   :  { %4450 = vst [vmem:[%s10067_s18 + $0x10] sm:$0xff] %v4442_v9  ;;  %v4438_v24 = vmul.f32 0.2, %v4422_v42  ;;  %4451 = vst [vmem:[%s10067_s18 + $0x18] sm:$0xff] %v4443_v53  ;;  %v4439_v2 = vmul.f32 0.2, %v4423_v59 }
0x139b   :  { %v4444_v29 = vsel %vm4428_vm13, %v4420_v6, %v4436_v58  ;;  %v4445_v39 = vsel %vm4429_vm7, %v4421_v57, %v4437_v41 }
0x139c   :  { %v4446_v35 = vsel %vm4430_vm14, %v4422_v42, %v4438_v24  ;;  %v4447_v48 = vsel %vm4431_vm10, %v4423_v59, %v4439_v2  ;;  %4452 = vst [vmem:[%s10067_s18 + $0x20] sm:$0xff] %v4444_v29  ;;  %4453 = vst [vmem:[%s10067_s18 + $0x28] sm:$0xff] %v4445_v39 }
0x139d   :  { %4454 = vst [vmem:[%s10067_s18 + $0x30] sm:$0xff] %v4446_v35  ;;  %4455 = vst [vmem:[%s10067_s18 + $0x38] sm:$0xff] %v4447_v48 }

</bundles_post_ra>
